<compile_context>
chip_gen: v7x
topology: tpu7x:2x2x1
jax: 0.10.0
libtpu: 0.0.40
codegen_flags: <defaults>
</compile_context>

<pallas_src>
import functools
import math

import jax
import jax.numpy as jnp
from jax.experimental import pallas as pl
from jax.experimental.pallas import tpu as pltpu

D_MODEL = 128
N_HEADS = 4
HEAD_DIM = D_MODEL // N_HEADS
D_FF = 2048            # nn.TransformerEncoderLayer default dim_feedforward
LN_EPS = 1e-5          # default layer_norm_eps
NUM_LAYERS = 2         # num_encoder_layers


def _tpu_tuning():
    """Per-generation (rows per grid step, scoped vmem limit bytes, multi-TensorCore chip)."""
    try:
        kind = jax.devices()[0].device_kind.lower()
    except Exception:
        kind = ""
    if "v7" in kind:                       # 64 MiB VMEM per TC, 2 TCs/chip
        return 1024, 48 * 1024 * 1024, True
    if "v6" in kind:                       # 128 MiB VMEM, 256-wide MXU
        return 1024, 64 * 1024 * 1024, False
    if "v5" in kind:                       # small default scoped VMEM -> keep tiles modest
        return 512, 32 * 1024 * 1024, False
    return 512, None, False


def _layernorm(x, g, b):
    # one-pass form: var = E[x^2] - mean^2 (two independent reductions, one fewer VPU pass)
    mu = jnp.mean(x, axis=-1, keepdims=True)
    m2 = jnp.mean(x * x, axis=-1, keepdims=True)
    var = jnp.maximum(m2 - mu * mu, 0.0)
    return (x - mu) * jax.lax.rsqrt(var + LN_EPS) * g + b


def _mha(y, Bt, S, wqkv, bqkv, wo, bo):
    """Multi-head self attention on y: (R, D) f32. 1/sqrt(head_dim) already folded into wqkv/bqkv."""
    R = Bt * S
    qkv = (jnp.dot(y.astype(jnp.bfloat16), wqkv,
                   preferred_element_type=jnp.float32) + bqkv).astype(jnp.bfloat16)  # (R, 3D)

    def heads(col0):
        # gather the N_HEADS 32-lane slices into the (major) batch axis:
        # (N_HEADS*Bt, S, HEAD_DIM); batch entry index = h*Bt + b.
        parts = [qkv[:, col0 + h * HEAD_DIM: col0 + (h + 1) * HEAD_DIM]
                 .reshape(Bt, S, HEAD_DIM) for h in range(N_HEADS)]
        return jnp.concatenate(parts, axis=0)

    q = heads(0)
    k = heads(D_MODEL)
    v = heads(2 * D_MODEL)

    # ONE batched score matmul / softmax / PV matmul for all heads
    s = jnp.einsum("bqd,bkd->bqk", q, k, preferred_element_type=jnp.float32)   # (H*Bt, S, S)
    s = s - jnp.max(s, axis=-1, keepdims=True)
    p = jnp.exp(s)
    p = p * pl.reciprocal(jnp.sum(p, axis=-1, keepdims=True), approx=True)
    o = jnp.einsum("bqk,bkd->bqd", p.astype(jnp.bfloat16), v,
                   preferred_element_type=jnp.float32)                          # (H*Bt, S, hd)
    o = o.astype(jnp.bfloat16)

    # out-projection: accumulate each head through its 32-row slice of W_o (no lane concat)
    ctx = bo                                                                    # (1, D) f32
    for h in range(N_HEADS):
        o_h = o[h * Bt:(h + 1) * Bt].reshape(R, HEAD_DIM)
        ctx = ctx + jnp.dot(o_h, wo[h * HEAD_DIM:(h + 1) * HEAD_DIM, :],
                            preferred_element_type=jnp.float32)
    return ctx


def _encoder_layer(y, Bt, S, wqkv, bqkv, wo, bo, g1, be1, w1, b1, w2, b2, g2, be2):
    """One post-norm TransformerEncoderLayer on y: (Bt*S, D) f32."""
    attn = _mha(y, Bt, S, wqkv, bqkv, wo, bo)
    y = _layernorm(y + attn, g1, be1)
    # FFN: bias + ReLU + bf16 cast fused -> the f32 (R, D_FF) buffer dies before the 2nd matmul
    h1 = jnp.maximum(jnp.dot(y.astype(jnp.bfloat16), w1,
                             preferred_element_type=jnp.float32) + b1, 0.0
                     ).astype(jnp.bfloat16)
    z = jnp.dot(h1, w2, preferred_element_type=jnp.float32) + b2
    return _layernorm(y + z, g2, be2)


def _temporal_kernel(num_layers, x_ref, *refs):
    o_ref = refs[-1]
    cw_ref, cb_ref = refs[0], refs[1]
    layer_refs = refs[2:2 + 12 * num_layers]
    gf_ref, bf_ref = refs[2 + 12 * num_layers], refs[3 + 12 * num_layers]

    Bt, S, K = x_ref.shape
    R = Bt * S

    # Conv1d(k=3, padding=1) as a single im2col matmul + ReLU
    x = x_ref[...].reshape(R, K).astype(jnp.bfloat16)
    y = jnp.dot(x, cw_ref[...], preferred_element_type=jnp.float32) + cb_ref[...]
    y = jnp.maximum(y, 0.0)                                              # (R, D)

    for l in range(num_layers):
        p = layer_refs[12 * l:12 * (l + 1)]
        y = _encoder_layer(y, Bt, S,
                           p[0][...], p[1][...], p[2][...], p[3][...],
                           p[4][...], p[5][...], p[6][...], p[7][...],
                           p[8][...], p[9][...], p[10][...], p[11][...])

    # final encoder LayerNorm only on the last sequence position (== PyTorch `x[-1]`)
    last = y.reshape(Bt, S, D_MODEL)[:, S - 1, :]                        # (Bt, D)
    out = _layernorm(last, gf_ref[...], bf_ref[...])
    o_ref[0] = out.astype(o_ref.dtype)                                   # dense (Bt, 128) store


def _weight_spec(shape, single_buffer):
    n = len(shape)
    imap = lambda b, n=n: (0,) * n
    if single_buffer and hasattr(pl, "Buffered"):
        try:
            # constant index map -> resident weight; no need for double buffering
            return pl.BlockSpec(shape, imap, pipeline_mode=pl.Buffered(1))
        except TypeError:
            pass
    return pl.BlockSpec(shape, imap)


def temporal_layer_forward(x, params, *, single_buffer_weights=True):
    """x: (B, S, C_in) f32 -> (B, 128) f32 (== PyTorch `x[-1]`)."""
    B, S, Cin = x.shape
    K = 3 * Cin

    # host-side im2col slab for the k=3, pad=1 conv: (B, S, 3*Cin)
    xp = jnp.pad(x, ((0, 0), (1, 1), (0, 0)))
    x_col = jnp.concatenate([xp[:, t:t + S, :] for t in range(3)], axis=-1)

    rows_per_block, vmem_limit, multi_core = _tpu_tuning()
    Bt = B if B * S <= rows_per_block else max(1, rows_per_block // S)
    if multi_core and B >= 2:
        Bt = min(Bt, pl.cdiv(B, 2))   # guarantee >= 2 grid steps so both v7x TCs get work
    Bp = pl.cdiv(B, Bt) * Bt
    nb = Bp // Bt
    if Bp != B:
        x_col = jnp.pad(x_col, ((0, Bp - B), (0, 0), (0, 0)))

    # conv weight (Cout, Cin, 3) -> (3*Cin, Cout), tap-major to match im2col lanes
    cw = jnp.transpose(params["conv_w"], (2, 1, 0)).reshape(K, D_MODEL)

    scale = 1.0 / math.sqrt(HEAD_DIM)
    wargs = [cw.astype(jnp.bfloat16),
             params["conv_b"].reshape(1, D_MODEL).astype(jnp.float32)]
    for lp in params["layers"]:
        # fold 1/sqrt(head_dim) into the Q rows of the in-proj weight AND bias (free on host)
        wqkv = lp["wqkv"].astype(jnp.float32).at[:D_MODEL].multiply(scale)
        bqkv = lp["bqkv"].astype(jnp.float32).at[:D_MODEL].multiply(scale)
        wargs += [
            wqkv.T.astype(jnp.bfloat16),
            bqkv.reshape(1, 3 * D_MODEL),
            lp["wo"].T.astype(jnp.bfloat16),
            lp["bo"].reshape(1, D_MODEL).astype(jnp.float32),
            lp["ln1_g"].reshape(1, D_MODEL).astype(jnp.float32),
            lp["ln1_b"].reshape(1, D_MODEL).astype(jnp.float32),
            lp["w1"].T.astype(jnp.bfloat16),
            lp["b1"].reshape(1, D_FF).astype(jnp.float32),
            lp["w2"].T.astype(jnp.bfloat16),
            lp["b2"].reshape(1, D_MODEL).astype(jnp.float32),
            lp["ln2_g"].reshape(1, D_MODEL).astype(jnp.float32),
            lp["ln2_b"].reshape(1, D_MODEL).astype(jnp.float32),
        ]
    wargs += [params["enc_norm_g"].reshape(1, D_MODEL).astype(jnp.float32),
              params["enc_norm_b"].reshape(1, D_MODEL).astype(jnp.float32)]

    in_specs = [pl.BlockSpec((Bt, S, K), lambda b: (b, 0, 0))]
    in_specs += [_weight_spec(tuple(w.shape), single_buffer_weights) for w in wargs]

    out = pl.pallas_call(
        functools.partial(_temporal_kernel, len(params["layers"])),
        out_shape=jax.ShapeDtypeStruct((nb, Bt, D_MODEL), jnp.float32),
        grid=(nb,),
        in_specs=in_specs,
        out_specs=pl.BlockSpec((1, Bt, D_MODEL), lambda b: (b, 0, 0)),
        compiler_params=pltpu.CompilerParams(
            dimension_semantics=("parallel",),
            vmem_limit_bytes=vmem_limit),
    )(x_col, *wargs)
    return out.reshape(Bp, D_MODEL)[:B]


# ------------------------------- Parameters -------------------------------------
def init_params(key, in_channels):
    keys = jax.random.split(key, 16)

    def w(k, shape, scale=0.02):
        return (scale * jax.random.normal(k, shape)).astype(jnp.float32)

    params = {
        "conv_w": w(keys[0], (D_MODEL, in_channels, 3)),   # PyTorch Conv1d layout
        "conv_b": jnp.zeros((D_MODEL,), jnp.float32),
        "layers": [],
        "enc_norm_g": jnp.ones((D_MODEL,), jnp.float32),
        "enc_norm_b": jnp.zeros((D_MODEL,), jnp.float32),
    }
    idx = 1
    for _ in range(NUM_LAYERS):
        lp = {
            "wqkv": w(keys[idx + 0], (3 * D_MODEL, D_MODEL)),  # MHA in_proj_weight
            "bqkv": jnp.zeros((3 * D_MODEL,), jnp.float32),
            "wo": w(keys[idx + 1], (D_MODEL, D_MODEL)),        # MHA out_proj.weight
            "bo": jnp.zeros((D_MODEL,), jnp.float32),
            "ln1_g": jnp.ones((D_MODEL,), jnp.float32),
            "ln1_b": jnp.zeros((D_MODEL,), jnp.float32),
            "w1": w(keys[idx + 2], (D_FF, D_MODEL)),           # linear1.weight
            "b1": jnp.zeros((D_FF,), jnp.float32),
            "w2": w(keys[idx + 3], (D_MODEL, D_FF)),           # linear2.weight
            "b2": jnp.zeros((D_MODEL,), jnp.float32),
            "ln2_g": jnp.ones((D_MODEL,), jnp.float32),
            "ln2_b": jnp.zeros((D_MODEL,), jnp.float32),
        }
        params["layers"].append(lp)
        idx += 4
    return params


if __name__ == "__main__":
    B, S, C_IN = 2, 8, 4
    key = jax.random.PRNGKey(0)
    kx, kp = jax.random.split(key)
    x = jax.random.normal(kx, (B, S, C_IN), jnp.float32)
    params = init_params(kp, C_IN)

    def run(single_buffer):
        fn = jax.jit(functools.partial(temporal_layer_forward,
                                       single_buffer_weights=single_buffer))
        return jax.block_until_ready(fn(x, params))

    try:
        out = run(True)
    except Exception:
        # this jax build rejects BlockSpec(pipeline_mode=pl.Buffered(1)); retry double-buffered
        out = run(False)

    assert out.shape == (B, D_MODEL), out.shape
    assert bool(jnp.all(jnp.isfinite(out)))
    print("KERNEL_OK")
</pallas_src>

<mosaic_0001>
module attributes {stable_mosaic.version = 11 : i64} {
  func.func @_temporal_kernel(%arg0: i32, %arg1: memref<2x8x12xf32, #tpu.memory_space<vmem>>, %arg2: memref<12x128xbf16, #tpu.memory_space<vmem>>, %arg3: memref<1x128xf32, #tpu.memory_space<vmem>>, %arg4: memref<128x384xbf16, #tpu.memory_space<vmem>>, %arg5: memref<1x384xf32, #tpu.memory_space<vmem>>, %arg6: memref<128x128xbf16, #tpu.memory_space<vmem>>, %arg7: memref<1x128xf32, #tpu.memory_space<vmem>>, %arg8: memref<1x128xf32, #tpu.memory_space<vmem>>, %arg9: memref<1x128xf32, #tpu.memory_space<vmem>>, %arg10: memref<128x2048xbf16, #tpu.memory_space<vmem>>, %arg11: memref<1x2048xf32, #tpu.memory_space<vmem>>, %arg12: memref<2048x128xbf16, #tpu.memory_space<vmem>>, %arg13: memref<1x128xf32, #tpu.memory_space<vmem>>, %arg14: memref<1x128xf32, #tpu.memory_space<vmem>>, %arg15: memref<1x128xf32, #tpu.memory_space<vmem>>, %arg16: memref<128x384xbf16, #tpu.memory_space<vmem>>, %arg17: memref<1x384xf32, #tpu.memory_space<vmem>>, %arg18: memref<128x128xbf16, #tpu.memory_space<vmem>>, %arg19: memref<1x128xf32, #tpu.memory_space<vmem>>, %arg20: memref<1x128xf32, #tpu.memory_space<vmem>>, %arg21: memref<1x128xf32, #tpu.memory_space<vmem>>, %arg22: memref<128x2048xbf16, #tpu.memory_space<vmem>>, %arg23: memref<1x2048xf32, #tpu.memory_space<vmem>>, %arg24: memref<2048x128xbf16, #tpu.memory_space<vmem>>, %arg25: memref<1x128xf32, #tpu.memory_space<vmem>>, %arg26: memref<1x128xf32, #tpu.memory_space<vmem>>, %arg27: memref<1x128xf32, #tpu.memory_space<vmem>>, %arg28: memref<1x128xf32, #tpu.memory_space<vmem>>, %arg29: memref<1x128xf32, #tpu.memory_space<vmem>>, %arg30: memref<1x2x128xf32, #tpu.memory_space<vmem>>) attributes {dimension_semantics = [#tpu.dimension_semantics<parallel>], iteration_bounds = array<i64: 1>, scalar_prefetch = 0 : i64, scratch_operands = 0 : i64, tpu.core_type = #tpu.core_type<tc>, window_params = [{transform_indices = @transform_0, window_bounds = array<i64: 2, 8, 12>}, {pipeline_mode = #tpu.pipeline_mode<synchronous>, transform_indices = @transform_1, window_bounds = array<i64: 12, 128>}, {pipeline_mode = #tpu.pipeline_mode<synchronous>, transform_indices = @transform_2, window_bounds = array<i64: 1, 128>}, {pipeline_mode = #tpu.pipeline_mode<synchronous>, transform_indices = @transform_3, window_bounds = array<i64: 128, 384>}, {pipeline_mode = #tpu.pipeline_mode<synchronous>, transform_indices = @transform_4, window_bounds = array<i64: 1, 384>}, {pipeline_mode = #tpu.pipeline_mode<synchronous>, transform_indices = @transform_5, window_bounds = array<i64: 128, 128>}, {pipeline_mode = #tpu.pipeline_mode<synchronous>, transform_indices = @transform_6, window_bounds = array<i64: 1, 128>}, {pipeline_mode = #tpu.pipeline_mode<synchronous>, transform_indices = @transform_7, window_bounds = array<i64: 1, 128>}, {pipeline_mode = #tpu.pipeline_mode<synchronous>, transform_indices = @transform_8, window_bounds = array<i64: 1, 128>}, {pipeline_mode = #tpu.pipeline_mode<synchronous>, transform_indices = @transform_9, window_bounds = array<i64: 128, 2048>}, {pipeline_mode = #tpu.pipeline_mode<synchronous>, transform_indices = @transform_10, window_bounds = array<i64: 1, 2048>}, {pipeline_mode = #tpu.pipeline_mode<synchronous>, transform_indices = @transform_11, window_bounds = array<i64: 2048, 128>}, {pipeline_mode = #tpu.pipeline_mode<synchronous>, transform_indices = @transform_12, window_bounds = array<i64: 1, 128>}, {pipeline_mode = #tpu.pipeline_mode<synchronous>, transform_indices = @transform_13, window_bounds = array<i64: 1, 128>}, {pipeline_mode = #tpu.pipeline_mode<synchronous>, transform_indices = @transform_14, window_bounds = array<i64: 1, 128>}, {pipeline_mode = #tpu.pipeline_mode<synchronous>, transform_indices = @transform_15, window_bounds = array<i64: 128, 384>}, {pipeline_mode = #tpu.pipeline_mode<synchronous>, transform_indices = @transform_16, window_bounds = array<i64: 1, 384>}, {pipeline_mode = #tpu.pipeline_mode<synchronous>, transform_indices = @transform_17, window_bounds = array<i64: 128, 128>}, {pipeline_mode = #tpu.pipeline_mode<synchronous>, transform_indices = @transform_18, window_bounds = array<i64: 1, 128>}, {pipeline_mode = #tpu.pipeline_mode<synchronous>, transform_indices = @transform_19, window_bounds = array<i64: 1, 128>}, {pipeline_mode = #tpu.pipeline_mode<synchronous>, transform_indices = @transform_20, window_bounds = array<i64: 1, 128>}, {pipeline_mode = #tpu.pipeline_mode<synchronous>, transform_indices = @transform_21, window_bounds = array<i64: 128, 2048>}, {pipeline_mode = #tpu.pipeline_mode<synchronous>, transform_indices = @transform_22, window_bounds = array<i64: 1, 2048>}, {pipeline_mode = #tpu.pipeline_mode<synchronous>, transform_indices = @transform_23, window_bounds = array<i64: 2048, 128>}, {pipeline_mode = #tpu.pipeline_mode<synchronous>, transform_indices = @transform_24, window_bounds = array<i64: 1, 128>}, {pipeline_mode = #tpu.pipeline_mode<synchronous>, transform_indices = @transform_25, window_bounds = array<i64: 1, 128>}, {pipeline_mode = #tpu.pipeline_mode<synchronous>, transform_indices = @transform_26, window_bounds = array<i64: 1, 128>}, {pipeline_mode = #tpu.pipeline_mode<synchronous>, transform_indices = @transform_27, window_bounds = array<i64: 1, 128>}, {pipeline_mode = #tpu.pipeline_mode<synchronous>, transform_indices = @transform_28, window_bounds = array<i64: 1, 128>}, {transform_indices = @transform_29, window_bounds = array<i64: 1, 2, 128>}]} {
    %c0 = arith.constant 0 : index
    %c0_0 = arith.constant 0 : index
    %c0_1 = arith.constant 0 : index
    %0 = vector.load %arg1[%c0, %c0_0, %c0_1] : memref<2x8x12xf32, #tpu.memory_space<vmem>>, vector<2x8x12xf32>
    %1 = vector.shape_cast %0 : vector<2x8x12xf32> to vector<16x12xf32>
    %2 = arith.truncf %1 : vector<16x12xf32> to vector<16x12xbf16>
    %c0_2 = arith.constant 0 : index
    %c0_3 = arith.constant 0 : index
    %3 = vector.load %arg2[%c0_2, %c0_3] : memref<12x128xbf16, #tpu.memory_space<vmem>>, vector<12x128xbf16>
    %cst = arith.constant dense<0.000000e+00> : vector<16x128xf32>
    %4 = tpu.matmul %2, %3, %cst {dimension_numbers = #tpu.dot_dimension_numbers<[1], [0], [0], [1], [0, 0, 1, 1], [], []>} : vector<16x12xbf16>, vector<12x128xbf16>, vector<16x128xf32> -> vector<16x128xf32>
    %c0_4 = arith.constant 0 : index
    %c0_5 = arith.constant 0 : index
    %5 = vector.load %arg3[%c0_4, %c0_5] : memref<1x128xf32, #tpu.memory_space<vmem>>, vector<1x128xf32>
    %6 = vector.broadcast %5 : vector<1x128xf32> to vector<16x128xf32>
    %7 = arith.addf %4, %6 : vector<16x128xf32>
    %cst_6 = arith.constant 0.000000e+00 : f32
    %8 = vector.broadcast %cst_6 : f32 to vector<16x128xf32>
    %9 = arith.maximumf %7, %8 : vector<16x128xf32>
    %c0_7 = arith.constant 0 : index
    %c0_8 = arith.constant 0 : index
    %10 = vector.load %arg4[%c0_7, %c0_8] : memref<128x384xbf16, #tpu.memory_space<vmem>>, vector<128x384xbf16>
    %c0_9 = arith.constant 0 : index
    %c0_10 = arith.constant 0 : index
    %11 = vector.load %arg5[%c0_9, %c0_10] : memref<1x384xf32, #tpu.memory_space<vmem>>, vector<1x384xf32>
    %c0_11 = arith.constant 0 : index
    %c0_12 = arith.constant 0 : index
    %12 = vector.load %arg6[%c0_11, %c0_12] : memref<128x128xbf16, #tpu.memory_space<vmem>>, vector<128x128xbf16>
    %c0_13 = arith.constant 0 : index
    %c0_14 = arith.constant 0 : index
    %13 = vector.load %arg7[%c0_13, %c0_14] : memref<1x128xf32, #tpu.memory_space<vmem>>, vector<1x128xf32>
    %c0_15 = arith.constant 0 : index
    %c0_16 = arith.constant 0 : index
    %14 = vector.load %arg8[%c0_15, %c0_16] : memref<1x128xf32, #tpu.memory_space<vmem>>, vector<1x128xf32>
    %c0_17 = arith.constant 0 : index
    %c0_18 = arith.constant 0 : index
    %15 = vector.load %arg9[%c0_17, %c0_18] : memref<1x128xf32, #tpu.memory_space<vmem>>, vector<1x128xf32>
    %c0_19 = arith.constant 0 : index
    %c0_20 = arith.constant 0 : index
    %16 = vector.load %arg10[%c0_19, %c0_20] : memref<128x2048xbf16, #tpu.memory_space<vmem>>, vector<128x2048xbf16>
    %c0_21 = arith.constant 0 : index
    %c0_22 = arith.constant 0 : index
    %17 = vector.load %arg11[%c0_21, %c0_22] : memref<1x2048xf32, #tpu.memory_space<vmem>>, vector<1x2048xf32>
    %c0_23 = arith.constant 0 : index
    %c0_24 = arith.constant 0 : index
    %18 = vector.load %arg12[%c0_23, %c0_24] : memref<2048x128xbf16, #tpu.memory_space<vmem>>, vector<2048x128xbf16>
    %c0_25 = arith.constant 0 : index
    %c0_26 = arith.constant 0 : index
    %19 = vector.load %arg13[%c0_25, %c0_26] : memref<1x128xf32, #tpu.memory_space<vmem>>, vector<1x128xf32>
    %c0_27 = arith.constant 0 : index
    %c0_28 = arith.constant 0 : index
    %20 = vector.load %arg14[%c0_27, %c0_28] : memref<1x128xf32, #tpu.memory_space<vmem>>, vector<1x128xf32>
    %c0_29 = arith.constant 0 : index
    %c0_30 = arith.constant 0 : index
    %21 = vector.load %arg15[%c0_29, %c0_30] : memref<1x128xf32, #tpu.memory_space<vmem>>, vector<1x128xf32>
    %22 = arith.truncf %9 : vector<16x128xf32> to vector<16x128xbf16>
    %cst_31 = arith.constant dense<0.000000e+00> : vector<16x384xf32>
    %23 = tpu.matmul %22, %10, %cst_31 {dimension_numbers = #tpu.dot_dimension_numbers<[1], [0], [0], [1], [0, 0, 1, 1], [], []>} : vector<16x128xbf16>, vector<128x384xbf16>, vector<16x384xf32> -> vector<16x384xf32>
    %24 = vector.broadcast %11 : vector<1x384xf32> to vector<16x384xf32>
    %25 = arith.addf %23, %24 : vector<16x384xf32>
    %26 = arith.truncf %25 : vector<16x384xf32> to vector<16x384xbf16>
    %27 = vector.extract_strided_slice %26 {offsets = [0, 0], sizes = [16, 32], strides = [1, 1]} : vector<16x384xbf16> to vector<16x32xbf16>
    %28 = vector.shape_cast %27 : vector<16x32xbf16> to vector<2x8x32xbf16>
    %29 = vector.extract_strided_slice %26 {offsets = [0, 32], sizes = [16, 32], strides = [1, 1]} : vector<16x384xbf16> to vector<16x32xbf16>
    %30 = vector.shape_cast %29 : vector<16x32xbf16> to vector<2x8x32xbf16>
    %31 = vector.extract_strided_slice %26 {offsets = [0, 64], sizes = [16, 32], strides = [1, 1]} : vector<16x384xbf16> to vector<16x32xbf16>
    %32 = vector.shape_cast %31 : vector<16x32xbf16> to vector<2x8x32xbf16>
    %33 = vector.extract_strided_slice %26 {offsets = [0, 96], sizes = [16, 32], strides = [1, 1]} : vector<16x384xbf16> to vector<16x32xbf16>
    %34 = vector.shape_cast %33 : vector<16x32xbf16> to vector<2x8x32xbf16>
    %35 = tpu.concatenate %28, %30, %32, %34 in 0 : vector<2x8x32xbf16>, vector<2x8x32xbf16>, vector<2x8x32xbf16>, vector<2x8x32xbf16> -> vector<8x8x32xbf16>
    %36 = vector.extract_strided_slice %26 {offsets = [0, 128], sizes = [16, 32], strides = [1, 1]} : vector<16x384xbf16> to vector<16x32xbf16>
    %37 = vector.shape_cast %36 : vector<16x32xbf16> to vector<2x8x32xbf16>
    %38 = vector.extract_strided_slice %26 {offsets = [0, 160], sizes = [16, 32], strides = [1, 1]} : vector<16x384xbf16> to vector<16x32xbf16>
    %39 = vector.shape_cast %38 : vector<16x32xbf16> to vector<2x8x32xbf16>
    %40 = vector.extract_strided_slice %26 {offsets = [0, 192], sizes = [16, 32], strides = [1, 1]} : vector<16x384xbf16> to vector<16x32xbf16>
    %41 = vector.shape_cast %40 : vector<16x32xbf16> to vector<2x8x32xbf16>
    %42 = vector.extract_strided_slice %26 {offsets = [0, 224], sizes = [16, 32], strides = [1, 1]} : vector<16x384xbf16> to vector<16x32xbf16>
    %43 = vector.shape_cast %42 : vector<16x32xbf16> to vector<2x8x32xbf16>
    %44 = tpu.concatenate %37, %39, %41, %43 in 0 : vector<2x8x32xbf16>, vector<2x8x32xbf16>, vector<2x8x32xbf16>, vector<2x8x32xbf16> -> vector<8x8x32xbf16>
    %45 = vector.extract_strided_slice %26 {offsets = [0, 256], sizes = [16, 32], strides = [1, 1]} : vector<16x384xbf16> to vector<16x32xbf16>
    %46 = vector.shape_cast %45 : vector<16x32xbf16> to vector<2x8x32xbf16>
    %47 = vector.extract_strided_slice %26 {offsets = [0, 288], sizes = [16, 32], strides = [1, 1]} : vector<16x384xbf16> to vector<16x32xbf16>
    %48 = vector.shape_cast %47 : vector<16x32xbf16> to vector<2x8x32xbf16>
    %49 = vector.extract_strided_slice %26 {offsets = [0, 320], sizes = [16, 32], strides = [1, 1]} : vector<16x384xbf16> to vector<16x32xbf16>
    %50 = vector.shape_cast %49 : vector<16x32xbf16> to vector<2x8x32xbf16>
    %51 = vector.extract_strided_slice %26 {offsets = [0, 352], sizes = [16, 32], strides = [1, 1]} : vector<16x384xbf16> to vector<16x32xbf16>
    %52 = vector.shape_cast %51 : vector<16x32xbf16> to vector<2x8x32xbf16>
    %53 = tpu.concatenate %46, %48, %50, %52 in 0 : vector<2x8x32xbf16>, vector<2x8x32xbf16>, vector<2x8x32xbf16>, vector<2x8x32xbf16> -> vector<8x8x32xbf16>
    "tpu.trace_start"() <{level = 10 : i32, message = "bqd,bkd->bqk"}> : () -> ()
    %cst_32 = arith.constant dense<0.000000e+00> : vector<8x8x8xf32>
    %54 = tpu.matmul %35, %44, %cst_32 {dimension_numbers = #tpu.dot_dimension_numbers<[2], [2], [1], [1], [0, 0, 0, 1, 1, 1], [0], [0]>} : vector<8x8x32xbf16>, vector<8x8x32xbf16>, vector<8x8x8xf32> -> vector<8x8x8xf32>
    "tpu.trace_stop"() : () -> ()
    %cst_33 = arith.constant dense<0xFF800000> : vector<8x8xf32>
    %55 = vector.multi_reduction <maximumf>, %54, %cst_33 [2] : vector<8x8x8xf32> to vector<8x8xf32>
    %56 = vector.shape_cast %55 : vector<8x8xf32> to vector<8x8x1xf32>
    %57 = vector.broadcast %56 : vector<8x8x1xf32> to vector<8x8x8xf32>
    %58 = arith.subf %54, %57 : vector<8x8x8xf32>
    %59 = math.exp %58 : vector<8x8x8xf32>
    %cst_34 = arith.constant dense<0.000000e+00> : vector<8x8xf32>
    %60 = vector.multi_reduction <add>, %59, %cst_34 [2] : vector<8x8x8xf32> to vector<8x8xf32>
    %61 = vector.shape_cast %60 : vector<8x8xf32> to vector<8x8x1xf32>
    %62 = tpu.reciprocal %61 {approx = true} : vector<8x8x1xf32> -> vector<8x8x1xf32>
    %63 = vector.broadcast %62 : vector<8x8x1xf32> to vector<8x8x8xf32>
    %64 = arith.mulf %59, %63 : vector<8x8x8xf32>
    %65 = arith.truncf %64 : vector<8x8x8xf32> to vector<8x8x8xbf16>
    "tpu.trace_start"() <{level = 10 : i32, message = "bqk,bkd->bqd"}> : () -> ()
    %cst_35 = arith.constant dense<0.000000e+00> : vector<8x8x32xf32>
    %66 = tpu.matmul %65, %53, %cst_35 {dimension_numbers = #tpu.dot_dimension_numbers<[2], [1], [1], [2], [0, 0, 0, 1, 1, 2], [0], [0]>} : vector<8x8x8xbf16>, vector<8x8x32xbf16>, vector<8x8x32xf32> -> vector<8x8x32xf32>
    "tpu.trace_stop"() : () -> ()
    %67 = arith.truncf %66 : vector<8x8x32xf32> to vector<8x8x32xbf16>
    %68 = vector.extract_strided_slice %67 {offsets = [0, 0, 0], sizes = [2, 8, 32], strides = [1, 1, 1]} : vector<8x8x32xbf16> to vector<2x8x32xbf16>
    %69 = vector.shape_cast %68 : vector<2x8x32xbf16> to vector<16x32xbf16>
    %70 = vector.extract_strided_slice %12 {offsets = [0, 0], sizes = [32, 128], strides = [1, 1]} : vector<128x128xbf16> to vector<32x128xbf16>
    %cst_36 = arith.constant dense<0.000000e+00> : vector<16x128xf32>
    %71 = tpu.matmul %69, %70, %cst_36 {dimension_numbers = #tpu.dot_dimension_numbers<[1], [0], [0], [1], [0, 0, 1, 1], [], []>} : vector<16x32xbf16>, vector<32x128xbf16>, vector<16x128xf32> -> vector<16x128xf32>
    %72 = vector.broadcast %13 : vector<1x128xf32> to vector<16x128xf32>
    %73 = arith.addf %72, %71 : vector<16x128xf32>
    %74 = vector.extract_strided_slice %67 {offsets = [2, 0, 0], sizes = [2, 8, 32], strides = [1, 1, 1]} : vector<8x8x32xbf16> to vector<2x8x32xbf16>
    %75 = vector.shape_cast %74 : vector<2x8x32xbf16> to vector<16x32xbf16>
    %76 = vector.extract_strided_slice %12 {offsets = [32, 0], sizes = [32, 128], strides = [1, 1]} : vector<128x128xbf16> to vector<32x128xbf16>
    %cst_37 = arith.constant dense<0.000000e+00> : vector<16x128xf32>
    %77 = tpu.matmul %75, %76, %cst_37 {dimension_numbers = #tpu.dot_dimension_numbers<[1], [0], [0], [1], [0, 0, 1, 1], [], []>} : vector<16x32xbf16>, vector<32x128xbf16>, vector<16x128xf32> -> vector<16x128xf32>
    %78 = arith.addf %73, %77 : vector<16x128xf32>
    %79 = vector.extract_strided_slice %67 {offsets = [4, 0, 0], sizes = [2, 8, 32], strides = [1, 1, 1]} : vector<8x8x32xbf16> to vector<2x8x32xbf16>
    %80 = vector.shape_cast %79 : vector<2x8x32xbf16> to vector<16x32xbf16>
    %81 = vector.extract_strided_slice %12 {offsets = [64, 0], sizes = [32, 128], strides = [1, 1]} : vector<128x128xbf16> to vector<32x128xbf16>
    %cst_38 = arith.constant dense<0.000000e+00> : vector<16x128xf32>
    %82 = tpu.matmul %80, %81, %cst_38 {dimension_numbers = #tpu.dot_dimension_numbers<[1], [0], [0], [1], [0, 0, 1, 1], [], []>} : vector<16x32xbf16>, vector<32x128xbf16>, vector<16x128xf32> -> vector<16x128xf32>
    %83 = arith.addf %78, %82 : vector<16x128xf32>
    %84 = vector.extract_strided_slice %67 {offsets = [6, 0, 0], sizes = [2, 8, 32], strides = [1, 1, 1]} : vector<8x8x32xbf16> to vector<2x8x32xbf16>
    %85 = vector.shape_cast %84 : vector<2x8x32xbf16> to vector<16x32xbf16>
    %86 = vector.extract_strided_slice %12 {offsets = [96, 0], sizes = [32, 128], strides = [1, 1]} : vector<128x128xbf16> to vector<32x128xbf16>
    %cst_39 = arith.constant dense<0.000000e+00> : vector<16x128xf32>
    %87 = tpu.matmul %85, %86, %cst_39 {dimension_numbers = #tpu.dot_dimension_numbers<[1], [0], [0], [1], [0, 0, 1, 1], [], []>} : vector<16x32xbf16>, vector<32x128xbf16>, vector<16x128xf32> -> vector<16x128xf32>
    %88 = arith.addf %83, %87 : vector<16x128xf32>
    %89 = arith.addf %9, %88 : vector<16x128xf32>
    %cst_40 = arith.constant dense<0.000000e+00> : vector<16xf32>
    %90 = vector.multi_reduction <add>, %89, %cst_40 [1] : vector<16x128xf32> to vector<16xf32>
    %91 = vector.shape_cast %90 : vector<16xf32> to vector<16x1xf32>
    %cst_41 = arith.constant 1.280000e+02 : f32
    %92 = vector.broadcast %cst_41 : f32 to vector<16x1xf32>
    %93 = arith.divf %91, %92 : vector<16x1xf32>
    %94 = arith.mulf %89, %89 : vector<16x128xf32>
    %cst_42 = arith.constant dense<0.000000e+00> : vector<16xf32>
    %95 = vector.multi_reduction <add>, %94, %cst_42 [1] : vector<16x128xf32> to vector<16xf32>
    %96 = vector.shape_cast %95 : vector<16xf32> to vector<16x1xf32>
    %cst_43 = arith.constant 1.280000e+02 : f32
    %97 = vector.broadcast %cst_43 : f32 to vector<16x1xf32>
    %98 = arith.divf %96, %97 : vector<16x1xf32>
    %99 = arith.mulf %93, %93 : vector<16x1xf32>
    %100 = arith.subf %98, %99 : vector<16x1xf32>
    %cst_44 = arith.constant 0.000000e+00 : f32
    %101 = vector.broadcast %cst_44 : f32 to vector<16x1xf32>
    %102 = arith.maximumf %100, %101 : vector<16x1xf32>
    %103 = vector.broadcast %93 : vector<16x1xf32> to vector<16x128xf32>
    %104 = arith.subf %89, %103 : vector<16x128xf32>
    %cst_45 = arith.constant 9.99999974E-6 : f32
    %105 = vector.broadcast %cst_45 : f32 to vector<16x1xf32>
    %106 = arith.addf %102, %105 : vector<16x1xf32>
    %107 = math.rsqrt %106 : vector<16x1xf32>
    %108 = vector.broadcast %107 : vector<16x1xf32> to vector<16x128xf32>
    %109 = arith.mulf %104, %108 : vector<16x128xf32>
    %110 = vector.broadcast %14 : vector<1x128xf32> to vector<16x128xf32>
    %111 = arith.mulf %109, %110 : vector<16x128xf32>
    %112 = vector.broadcast %15 : vector<1x128xf32> to vector<16x128xf32>
    %113 = arith.addf %111, %112 : vector<16x128xf32>
    %114 = arith.truncf %113 : vector<16x128xf32> to vector<16x128xbf16>
    %cst_46 = arith.constant dense<0.000000e+00> : vector<16x2048xf32>
    %115 = tpu.matmul %114, %16, %cst_46 {dimension_numbers = #tpu.dot_dimension_numbers<[1], [0], [0], [1], [0, 0, 1, 1], [], []>} : vector<16x128xbf16>, vector<128x2048xbf16>, vector<16x2048xf32> -> vector<16x2048xf32>
    %116 = vector.broadcast %17 : vector<1x2048xf32> to vector<16x2048xf32>
    %117 = arith.addf %115, %116 : vector<16x2048xf32>
    %cst_47 = arith.constant 0.000000e+00 : f32
    %118 = vector.broadcast %cst_47 : f32 to vector<16x2048xf32>
    %119 = arith.maximumf %117, %118 : vector<16x2048xf32>
    %120 = arith.truncf %119 : vector<16x2048xf32> to vector<16x2048xbf16>
    %cst_48 = arith.constant dense<0.000000e+00> : vector<16x128xf32>
    %121 = tpu.matmul %120, %18, %cst_48 {dimension_numbers = #tpu.dot_dimension_numbers<[1], [0], [0], [1], [0, 0, 1, 1], [], []>} : vector<16x2048xbf16>, vector<2048x128xbf16>, vector<16x128xf32> -> vector<16x128xf32>
    %122 = vector.broadcast %19 : vector<1x128xf32> to vector<16x128xf32>
    %123 = arith.addf %121, %122 : vector<16x128xf32>
    %124 = arith.addf %113, %123 : vector<16x128xf32>
    %cst_49 = arith.constant dense<0.000000e+00> : vector<16xf32>
    %125 = vector.multi_reduction <add>, %124, %cst_49 [1] : vector<16x128xf32> to vector<16xf32>
    %126 = vector.shape_cast %125 : vector<16xf32> to vector<16x1xf32>
    %cst_50 = arith.constant 1.280000e+02 : f32
    %127 = vector.broadcast %cst_50 : f32 to vector<16x1xf32>
    %128 = arith.divf %126, %127 : vector<16x1xf32>
    %129 = arith.mulf %124, %124 : vector<16x128xf32>
    %cst_51 = arith.constant dense<0.000000e+00> : vector<16xf32>
    %130 = vector.multi_reduction <add>, %129, %cst_51 [1] : vector<16x128xf32> to vector<16xf32>
    %131 = vector.shape_cast %130 : vector<16xf32> to vector<16x1xf32>
    %cst_52 = arith.constant 1.280000e+02 : f32
    %132 = vector.broadcast %cst_52 : f32 to vector<16x1xf32>
    %133 = arith.divf %131, %132 : vector<16x1xf32>
    %134 = arith.mulf %128, %128 : vector<16x1xf32>
    %135 = arith.subf %133, %134 : vector<16x1xf32>
    %cst_53 = arith.constant 0.000000e+00 : f32
    %136 = vector.broadcast %cst_53 : f32 to vector<16x1xf32>
    %137 = arith.maximumf %135, %136 : vector<16x1xf32>
    %138 = vector.broadcast %128 : vector<16x1xf32> to vector<16x128xf32>
    %139 = arith.subf %124, %138 : vector<16x128xf32>
    %cst_54 = arith.constant 9.99999974E-6 : f32
    %140 = vector.broadcast %cst_54 : f32 to vector<16x1xf32>
    %141 = arith.addf %137, %140 : vector<16x1xf32>
    %142 = math.rsqrt %141 : vector<16x1xf32>
    %143 = vector.broadcast %142 : vector<16x1xf32> to vector<16x128xf32>
    %144 = arith.mulf %139, %143 : vector<16x128xf32>
    %145 = vector.broadcast %20 : vector<1x128xf32> to vector<16x128xf32>
    %146 = arith.mulf %144, %145 : vector<16x128xf32>
    %147 = vector.broadcast %21 : vector<1x128xf32> to vector<16x128xf32>
    %148 = arith.addf %146, %147 : vector<16x128xf32>
    %c0_55 = arith.constant 0 : index
    %c0_56 = arith.constant 0 : index
    %149 = vector.load %arg16[%c0_55, %c0_56] : memref<128x384xbf16, #tpu.memory_space<vmem>>, vector<128x384xbf16>
    %c0_57 = arith.constant 0 : index
    %c0_58 = arith.constant 0 : index
    %150 = vector.load %arg17[%c0_57, %c0_58] : memref<1x384xf32, #tpu.memory_space<vmem>>, vector<1x384xf32>
    %c0_59 = arith.constant 0 : index
    %c0_60 = arith.constant 0 : index
    %151 = vector.load %arg18[%c0_59, %c0_60] : memref<128x128xbf16, #tpu.memory_space<vmem>>, vector<128x128xbf16>
    %c0_61 = arith.constant 0 : index
    %c0_62 = arith.constant 0 : index
    %152 = vector.load %arg19[%c0_61, %c0_62] : memref<1x128xf32, #tpu.memory_space<vmem>>, vector<1x128xf32>
    %c0_63 = arith.constant 0 : index
    %c0_64 = arith.constant 0 : index
    %153 = vector.load %arg20[%c0_63, %c0_64] : memref<1x128xf32, #tpu.memory_space<vmem>>, vector<1x128xf32>
    %c0_65 = arith.constant 0 : index
    %c0_66 = arith.constant 0 : index
    %154 = vector.load %arg21[%c0_65, %c0_66] : memref<1x128xf32, #tpu.memory_space<vmem>>, vector<1x128xf32>
    %c0_67 = arith.constant 0 : index
    %c0_68 = arith.constant 0 : index
    %155 = vector.load %arg22[%c0_67, %c0_68] : memref<128x2048xbf16, #tpu.memory_space<vmem>>, vector<128x2048xbf16>
    %c0_69 = arith.constant 0 : index
    %c0_70 = arith.constant 0 : index
    %156 = vector.load %arg23[%c0_69, %c0_70] : memref<1x2048xf32, #tpu.memory_space<vmem>>, vector<1x2048xf32>
    %c0_71 = arith.constant 0 : index
    %c0_72 = arith.constant 0 : index
    %157 = vector.load %arg24[%c0_71, %c0_72] : memref<2048x128xbf16, #tpu.memory_space<vmem>>, vector<2048x128xbf16>
    %c0_73 = arith.constant 0 : index
    %c0_74 = arith.constant 0 : index
    %158 = vector.load %arg25[%c0_73, %c0_74] : memref<1x128xf32, #tpu.memory_space<vmem>>, vector<1x128xf32>
    %c0_75 = arith.constant 0 : index
    %c0_76 = arith.constant 0 : index
    %159 = vector.load %arg26[%c0_75, %c0_76] : memref<1x128xf32, #tpu.memory_space<vmem>>, vector<1x128xf32>
    %c0_77 = arith.constant 0 : index
    %c0_78 = arith.constant 0 : index
    %160 = vector.load %arg27[%c0_77, %c0_78] : memref<1x128xf32, #tpu.memory_space<vmem>>, vector<1x128xf32>
    %161 = arith.truncf %148 : vector<16x128xf32> to vector<16x128xbf16>
    %cst_79 = arith.constant dense<0.000000e+00> : vector<16x384xf32>
    %162 = tpu.matmul %161, %149, %cst_79 {dimension_numbers = #tpu.dot_dimension_numbers<[1], [0], [0], [1], [0, 0, 1, 1], [], []>} : vector<16x128xbf16>, vector<128x384xbf16>, vector<16x384xf32> -> vector<16x384xf32>
    %163 = vector.broadcast %150 : vector<1x384xf32> to vector<16x384xf32>
    %164 = arith.addf %162, %163 : vector<16x384xf32>
    %165 = arith.truncf %164 : vector<16x384xf32> to vector<16x384xbf16>
    %166 = vector.extract_strided_slice %165 {offsets = [0, 0], sizes = [16, 32], strides = [1, 1]} : vector<16x384xbf16> to vector<16x32xbf16>
    %167 = vector.shape_cast %166 : vector<16x32xbf16> to vector<2x8x32xbf16>
    %168 = vector.extract_strided_slice %165 {offsets = [0, 32], sizes = [16, 32], strides = [1, 1]} : vector<16x384xbf16> to vector<16x32xbf16>
    %169 = vector.shape_cast %168 : vector<16x32xbf16> to vector<2x8x32xbf16>
    %170 = vector.extract_strided_slice %165 {offsets = [0, 64], sizes = [16, 32], strides = [1, 1]} : vector<16x384xbf16> to vector<16x32xbf16>
    %171 = vector.shape_cast %170 : vector<16x32xbf16> to vector<2x8x32xbf16>
    %172 = vector.extract_strided_slice %165 {offsets = [0, 96], sizes = [16, 32], strides = [1, 1]} : vector<16x384xbf16> to vector<16x32xbf16>
    %173 = vector.shape_cast %172 : vector<16x32xbf16> to vector<2x8x32xbf16>
    %174 = tpu.concatenate %167, %169, %171, %173 in 0 : vector<2x8x32xbf16>, vector<2x8x32xbf16>, vector<2x8x32xbf16>, vector<2x8x32xbf16> -> vector<8x8x32xbf16>
    %175 = vector.extract_strided_slice %165 {offsets = [0, 128], sizes = [16, 32], strides = [1, 1]} : vector<16x384xbf16> to vector<16x32xbf16>
    %176 = vector.shape_cast %175 : vector<16x32xbf16> to vector<2x8x32xbf16>
    %177 = vector.extract_strided_slice %165 {offsets = [0, 160], sizes = [16, 32], strides = [1, 1]} : vector<16x384xbf16> to vector<16x32xbf16>
    %178 = vector.shape_cast %177 : vector<16x32xbf16> to vector<2x8x32xbf16>
    %179 = vector.extract_strided_slice %165 {offsets = [0, 192], sizes = [16, 32], strides = [1, 1]} : vector<16x384xbf16> to vector<16x32xbf16>
    %180 = vector.shape_cast %179 : vector<16x32xbf16> to vector<2x8x32xbf16>
    %181 = vector.extract_strided_slice %165 {offsets = [0, 224], sizes = [16, 32], strides = [1, 1]} : vector<16x384xbf16> to vector<16x32xbf16>
    %182 = vector.shape_cast %181 : vector<16x32xbf16> to vector<2x8x32xbf16>
    %183 = tpu.concatenate %176, %178, %180, %182 in 0 : vector<2x8x32xbf16>, vector<2x8x32xbf16>, vector<2x8x32xbf16>, vector<2x8x32xbf16> -> vector<8x8x32xbf16>
    %184 = vector.extract_strided_slice %165 {offsets = [0, 256], sizes = [16, 32], strides = [1, 1]} : vector<16x384xbf16> to vector<16x32xbf16>
    %185 = vector.shape_cast %184 : vector<16x32xbf16> to vector<2x8x32xbf16>
    %186 = vector.extract_strided_slice %165 {offsets = [0, 288], sizes = [16, 32], strides = [1, 1]} : vector<16x384xbf16> to vector<16x32xbf16>
    %187 = vector.shape_cast %186 : vector<16x32xbf16> to vector<2x8x32xbf16>
    %188 = vector.extract_strided_slice %165 {offsets = [0, 320], sizes = [16, 32], strides = [1, 1]} : vector<16x384xbf16> to vector<16x32xbf16>
    %189 = vector.shape_cast %188 : vector<16x32xbf16> to vector<2x8x32xbf16>
    %190 = vector.extract_strided_slice %165 {offsets = [0, 352], sizes = [16, 32], strides = [1, 1]} : vector<16x384xbf16> to vector<16x32xbf16>
    %191 = vector.shape_cast %190 : vector<16x32xbf16> to vector<2x8x32xbf16>
    %192 = tpu.concatenate %185, %187, %189, %191 in 0 : vector<2x8x32xbf16>, vector<2x8x32xbf16>, vector<2x8x32xbf16>, vector<2x8x32xbf16> -> vector<8x8x32xbf16>
    "tpu.trace_start"() <{level = 10 : i32, message = "bqd,bkd->bqk"}> : () -> ()
    %cst_80 = arith.constant dense<0.000000e+00> : vector<8x8x8xf32>
    %193 = tpu.matmul %174, %183, %cst_80 {dimension_numbers = #tpu.dot_dimension_numbers<[2], [2], [1], [1], [0, 0, 0, 1, 1, 1], [0], [0]>} : vector<8x8x32xbf16>, vector<8x8x32xbf16>, vector<8x8x8xf32> -> vector<8x8x8xf32>
    "tpu.trace_stop"() : () -> ()
    %cst_81 = arith.constant dense<0xFF800000> : vector<8x8xf32>
    %194 = vector.multi_reduction <maximumf>, %193, %cst_81 [2] : vector<8x8x8xf32> to vector<8x8xf32>
    %195 = vector.shape_cast %194 : vector<8x8xf32> to vector<8x8x1xf32>
    %196 = vector.broadcast %195 : vector<8x8x1xf32> to vector<8x8x8xf32>
    %197 = arith.subf %193, %196 : vector<8x8x8xf32>
    %198 = math.exp %197 : vector<8x8x8xf32>
    %cst_82 = arith.constant dense<0.000000e+00> : vector<8x8xf32>
    %199 = vector.multi_reduction <add>, %198, %cst_82 [2] : vector<8x8x8xf32> to vector<8x8xf32>
    %200 = vector.shape_cast %199 : vector<8x8xf32> to vector<8x8x1xf32>
    %201 = tpu.reciprocal %200 {approx = true} : vector<8x8x1xf32> -> vector<8x8x1xf32>
    %202 = vector.broadcast %201 : vector<8x8x1xf32> to vector<8x8x8xf32>
    %203 = arith.mulf %198, %202 : vector<8x8x8xf32>
    %204 = arith.truncf %203 : vector<8x8x8xf32> to vector<8x8x8xbf16>
    "tpu.trace_start"() <{level = 10 : i32, message = "bqk,bkd->bqd"}> : () -> ()
    %cst_83 = arith.constant dense<0.000000e+00> : vector<8x8x32xf32>
    %205 = tpu.matmul %204, %192, %cst_83 {dimension_numbers = #tpu.dot_dimension_numbers<[2], [1], [1], [2], [0, 0, 0, 1, 1, 2], [0], [0]>} : vector<8x8x8xbf16>, vector<8x8x32xbf16>, vector<8x8x32xf32> -> vector<8x8x32xf32>
    "tpu.trace_stop"() : () -> ()
    %206 = arith.truncf %205 : vector<8x8x32xf32> to vector<8x8x32xbf16>
    %207 = vector.extract_strided_slice %206 {offsets = [0, 0, 0], sizes = [2, 8, 32], strides = [1, 1, 1]} : vector<8x8x32xbf16> to vector<2x8x32xbf16>
    %208 = vector.shape_cast %207 : vector<2x8x32xbf16> to vector<16x32xbf16>
    %209 = vector.extract_strided_slice %151 {offsets = [0, 0], sizes = [32, 128], strides = [1, 1]} : vector<128x128xbf16> to vector<32x128xbf16>
    %cst_84 = arith.constant dense<0.000000e+00> : vector<16x128xf32>
    %210 = tpu.matmul %208, %209, %cst_84 {dimension_numbers = #tpu.dot_dimension_numbers<[1], [0], [0], [1], [0, 0, 1, 1], [], []>} : vector<16x32xbf16>, vector<32x128xbf16>, vector<16x128xf32> -> vector<16x128xf32>
    %211 = vector.broadcast %152 : vector<1x128xf32> to vector<16x128xf32>
    %212 = arith.addf %211, %210 : vector<16x128xf32>
    %213 = vector.extract_strided_slice %206 {offsets = [2, 0, 0], sizes = [2, 8, 32], strides = [1, 1, 1]} : vector<8x8x32xbf16> to vector<2x8x32xbf16>
    %214 = vector.shape_cast %213 : vector<2x8x32xbf16> to vector<16x32xbf16>
    %215 = vector.extract_strided_slice %151 {offsets = [32, 0], sizes = [32, 128], strides = [1, 1]} : vector<128x128xbf16> to vector<32x128xbf16>
    %cst_85 = arith.constant dense<0.000000e+00> : vector<16x128xf32>
    %216 = tpu.matmul %214, %215, %cst_85 {dimension_numbers = #tpu.dot_dimension_numbers<[1], [0], [0], [1], [0, 0, 1, 1], [], []>} : vector<16x32xbf16>, vector<32x128xbf16>, vector<16x128xf32> -> vector<16x128xf32>
    %217 = arith.addf %212, %216 : vector<16x128xf32>
    %218 = vector.extract_strided_slice %206 {offsets = [4, 0, 0], sizes = [2, 8, 32], strides = [1, 1, 1]} : vector<8x8x32xbf16> to vector<2x8x32xbf16>
    %219 = vector.shape_cast %218 : vector<2x8x32xbf16> to vector<16x32xbf16>
    %220 = vector.extract_strided_slice %151 {offsets = [64, 0], sizes = [32, 128], strides = [1, 1]} : vector<128x128xbf16> to vector<32x128xbf16>
    %cst_86 = arith.constant dense<0.000000e+00> : vector<16x128xf32>
    %221 = tpu.matmul %219, %220, %cst_86 {dimension_numbers = #tpu.dot_dimension_numbers<[1], [0], [0], [1], [0, 0, 1, 1], [], []>} : vector<16x32xbf16>, vector<32x128xbf16>, vector<16x128xf32> -> vector<16x128xf32>
    %222 = arith.addf %217, %221 : vector<16x128xf32>
    %223 = vector.extract_strided_slice %206 {offsets = [6, 0, 0], sizes = [2, 8, 32], strides = [1, 1, 1]} : vector<8x8x32xbf16> to vector<2x8x32xbf16>
    %224 = vector.shape_cast %223 : vector<2x8x32xbf16> to vector<16x32xbf16>
    %225 = vector.extract_strided_slice %151 {offsets = [96, 0], sizes = [32, 128], strides = [1, 1]} : vector<128x128xbf16> to vector<32x128xbf16>
    %cst_87 = arith.constant dense<0.000000e+00> : vector<16x128xf32>
    %226 = tpu.matmul %224, %225, %cst_87 {dimension_numbers = #tpu.dot_dimension_numbers<[1], [0], [0], [1], [0, 0, 1, 1], [], []>} : vector<16x32xbf16>, vector<32x128xbf16>, vector<16x128xf32> -> vector<16x128xf32>
    %227 = arith.addf %222, %226 : vector<16x128xf32>
    %228 = arith.addf %148, %227 : vector<16x128xf32>
    %cst_88 = arith.constant dense<0.000000e+00> : vector<16xf32>
    %229 = vector.multi_reduction <add>, %228, %cst_88 [1] : vector<16x128xf32> to vector<16xf32>
    %230 = vector.shape_cast %229 : vector<16xf32> to vector<16x1xf32>
    %cst_89 = arith.constant 1.280000e+02 : f32
    %231 = vector.broadcast %cst_89 : f32 to vector<16x1xf32>
    %232 = arith.divf %230, %231 : vector<16x1xf32>
    %233 = arith.mulf %228, %228 : vector<16x128xf32>
    %cst_90 = arith.constant dense<0.000000e+00> : vector<16xf32>
    %234 = vector.multi_reduction <add>, %233, %cst_90 [1] : vector<16x128xf32> to vector<16xf32>
    %235 = vector.shape_cast %234 : vector<16xf32> to vector<16x1xf32>
    %cst_91 = arith.constant 1.280000e+02 : f32
    %236 = vector.broadcast %cst_91 : f32 to vector<16x1xf32>
    %237 = arith.divf %235, %236 : vector<16x1xf32>
    %238 = arith.mulf %232, %232 : vector<16x1xf32>
    %239 = arith.subf %237, %238 : vector<16x1xf32>
    %cst_92 = arith.constant 0.000000e+00 : f32
    %240 = vector.broadcast %cst_92 : f32 to vector<16x1xf32>
    %241 = arith.maximumf %239, %240 : vector<16x1xf32>
    %242 = vector.broadcast %232 : vector<16x1xf32> to vector<16x128xf32>
    %243 = arith.subf %228, %242 : vector<16x128xf32>
    %cst_93 = arith.constant 9.99999974E-6 : f32
    %244 = vector.broadcast %cst_93 : f32 to vector<16x1xf32>
    %245 = arith.addf %241, %244 : vector<16x1xf32>
    %246 = math.rsqrt %245 : vector<16x1xf32>
    %247 = vector.broadcast %246 : vector<16x1xf32> to vector<16x128xf32>
    %248 = arith.mulf %243, %247 : vector<16x128xf32>
    %249 = vector.broadcast %153 : vector<1x128xf32> to vector<16x128xf32>
    %250 = arith.mulf %248, %249 : vector<16x128xf32>
    %251 = vector.broadcast %154 : vector<1x128xf32> to vector<16x128xf32>
    %252 = arith.addf %250, %251 : vector<16x128xf32>
    %253 = arith.truncf %252 : vector<16x128xf32> to vector<16x128xbf16>
    %cst_94 = arith.constant dense<0.000000e+00> : vector<16x2048xf32>
    %254 = tpu.matmul %253, %155, %cst_94 {dimension_numbers = #tpu.dot_dimension_numbers<[1], [0], [0], [1], [0, 0, 1, 1], [], []>} : vector<16x128xbf16>, vector<128x2048xbf16>, vector<16x2048xf32> -> vector<16x2048xf32>
    %255 = vector.broadcast %156 : vector<1x2048xf32> to vector<16x2048xf32>
    %256 = arith.addf %254, %255 : vector<16x2048xf32>
    %cst_95 = arith.constant 0.000000e+00 : f32
    %257 = vector.broadcast %cst_95 : f32 to vector<16x2048xf32>
    %258 = arith.maximumf %256, %257 : vector<16x2048xf32>
    %259 = arith.truncf %258 : vector<16x2048xf32> to vector<16x2048xbf16>
    %cst_96 = arith.constant dense<0.000000e+00> : vector<16x128xf32>
    %260 = tpu.matmul %259, %157, %cst_96 {dimension_numbers = #tpu.dot_dimension_numbers<[1], [0], [0], [1], [0, 0, 1, 1], [], []>} : vector<16x2048xbf16>, vector<2048x128xbf16>, vector<16x128xf32> -> vector<16x128xf32>
    %261 = vector.broadcast %158 : vector<1x128xf32> to vector<16x128xf32>
    %262 = arith.addf %260, %261 : vector<16x128xf32>
    %263 = arith.addf %252, %262 : vector<16x128xf32>
    %cst_97 = arith.constant dense<0.000000e+00> : vector<16xf32>
    %264 = vector.multi_reduction <add>, %263, %cst_97 [1] : vector<16x128xf32> to vector<16xf32>
    %265 = vector.shape_cast %264 : vector<16xf32> to vector<16x1xf32>
    %cst_98 = arith.constant 1.280000e+02 : f32
    %266 = vector.broadcast %cst_98 : f32 to vector<16x1xf32>
    %267 = arith.divf %265, %266 : vector<16x1xf32>
    %268 = arith.mulf %263, %263 : vector<16x128xf32>
    %cst_99 = arith.constant dense<0.000000e+00> : vector<16xf32>
    %269 = vector.multi_reduction <add>, %268, %cst_99 [1] : vector<16x128xf32> to vector<16xf32>
    %270 = vector.shape_cast %269 : vector<16xf32> to vector<16x1xf32>
    %cst_100 = arith.constant 1.280000e+02 : f32
    %271 = vector.broadcast %cst_100 : f32 to vector<16x1xf32>
    %272 = arith.divf %270, %271 : vector<16x1xf32>
    %273 = arith.mulf %267, %267 : vector<16x1xf32>
    %274 = arith.subf %272, %273 : vector<16x1xf32>
    %cst_101 = arith.constant 0.000000e+00 : f32
    %275 = vector.broadcast %cst_101 : f32 to vector<16x1xf32>
    %276 = arith.maximumf %274, %275 : vector<16x1xf32>
    %277 = vector.broadcast %267 : vector<16x1xf32> to vector<16x128xf32>
    %278 = arith.subf %263, %277 : vector<16x128xf32>
    %cst_102 = arith.constant 9.99999974E-6 : f32
    %279 = vector.broadcast %cst_102 : f32 to vector<16x1xf32>
    %280 = arith.addf %276, %279 : vector<16x1xf32>
    %281 = math.rsqrt %280 : vector<16x1xf32>
    %282 = vector.broadcast %281 : vector<16x1xf32> to vector<16x128xf32>
    %283 = arith.mulf %278, %282 : vector<16x128xf32>
    %284 = vector.broadcast %159 : vector<1x128xf32> to vector<16x128xf32>
    %285 = arith.mulf %283, %284 : vector<16x128xf32>
    %286 = vector.broadcast %160 : vector<1x128xf32> to vector<16x128xf32>
    %287 = arith.addf %285, %286 : vector<16x128xf32>
    %288 = vector.shape_cast %287 : vector<16x128xf32> to vector<2x8x128xf32>
    %289 = vector.extract_strided_slice %288 {offsets = [0, 7, 0], sizes = [2, 1, 128], strides = [1, 1, 1]} : vector<2x8x128xf32> to vector<2x1x128xf32>
    %290 = vector.shape_cast %289 : vector<2x1x128xf32> to vector<2x128xf32>
    %c0_103 = arith.constant 0 : index
    %c0_104 = arith.constant 0 : index
    %291 = vector.load %arg28[%c0_103, %c0_104] : memref<1x128xf32, #tpu.memory_space<vmem>>, vector<1x128xf32>
    %c0_105 = arith.constant 0 : index
    %c0_106 = arith.constant 0 : index
    %292 = vector.load %arg29[%c0_105, %c0_106] : memref<1x128xf32, #tpu.memory_space<vmem>>, vector<1x128xf32>
    %cst_107 = arith.constant dense<0.000000e+00> : vector<2xf32>
    %293 = vector.multi_reduction <add>, %290, %cst_107 [1] : vector<2x128xf32> to vector<2xf32>
    %294 = vector.shape_cast %293 : vector<2xf32> to vector<2x1xf32>
    %cst_108 = arith.constant 1.280000e+02 : f32
    %295 = vector.broadcast %cst_108 : f32 to vector<2x1xf32>
    %296 = arith.divf %294, %295 : vector<2x1xf32>
    %297 = arith.mulf %290, %290 : vector<2x128xf32>
    %cst_109 = arith.constant dense<0.000000e+00> : vector<2xf32>
    %298 = vector.multi_reduction <add>, %297, %cst_109 [1] : vector<2x128xf32> to vector<2xf32>
    %299 = vector.shape_cast %298 : vector<2xf32> to vector<2x1xf32>
    %cst_110 = arith.constant 1.280000e+02 : f32
    %300 = vector.broadcast %cst_110 : f32 to vector<2x1xf32>
    %301 = arith.divf %299, %300 : vector<2x1xf32>
    %302 = arith.mulf %296, %296 : vector<2x1xf32>
    %303 = arith.subf %301, %302 : vector<2x1xf32>
    %cst_111 = arith.constant 0.000000e+00 : f32
    %304 = vector.broadcast %cst_111 : f32 to vector<2x1xf32>
    %305 = arith.maximumf %303, %304 : vector<2x1xf32>
    %306 = vector.broadcast %296 : vector<2x1xf32> to vector<2x128xf32>
    %307 = arith.subf %290, %306 : vector<2x128xf32>
    %cst_112 = arith.constant 9.99999974E-6 : f32
    %308 = vector.broadcast %cst_112 : f32 to vector<2x1xf32>
    %309 = arith.addf %305, %308 : vector<2x1xf32>
    %310 = math.rsqrt %309 : vector<2x1xf32>
    %311 = vector.broadcast %310 : vector<2x1xf32> to vector<2x128xf32>
    %312 = arith.mulf %307, %311 : vector<2x128xf32>
    %313 = vector.broadcast %291 : vector<1x128xf32> to vector<2x128xf32>
    %314 = arith.mulf %312, %313 : vector<2x128xf32>
    %315 = vector.broadcast %292 : vector<1x128xf32> to vector<2x128xf32>
    %316 = arith.addf %314, %315 : vector<2x128xf32>
    %c0_113 = arith.constant 0 : index
    %c0_114 = arith.constant 0 : index
    %c0_115 = arith.constant 0 : index
    %317 = vector.load %arg30[%c0_113, %c0_114, %c0_115] : memref<1x2x128xf32, #tpu.memory_space<vmem>>, vector<1x2x128xf32>
    %318 = vector.shape_cast %317 : vector<1x2x128xf32> to vector<2x128xf32>
    %319 = vector.shape_cast %316 : vector<2x128xf32> to vector<1x2x128xf32>
    tpu.vector_store %arg30[%c0_113, %c0_114, %c0_115], %319 {strides = array<i32>} : memref<1x2x128xf32, #tpu.memory_space<vmem>>, vector<1x2x128xf32>,
    return
  }
  func.func @transform_0(%arg0: i32) -> (i32, i32, i32) {
    %c0_i32 = arith.constant 0 : i32
    %c0_i32_0 = arith.constant 0 : i32
    %c0_i32_1 = arith.constant 0 : i32
    return %arg0, %c0_i32, %c0_i32_0 : i32, i32, i32
  }
  func.func @transform_1(%arg0: i32) -> (i32, i32) {
    %c0_i32 = arith.constant 0 : i32
    %c0_i32_0 = arith.constant 0 : i32
    %c0_i32_1 = arith.constant 0 : i32
    return %c0_i32, %c0_i32_0 : i32, i32
  }
  func.func @transform_2(%arg0: i32) -> (i32, i32) {
    %c0_i32 = arith.constant 0 : i32
    %c0_i32_0 = arith.constant 0 : i32
    %c0_i32_1 = arith.constant 0 : i32
    return %c0_i32, %c0_i32_0 : i32, i32
  }
  func.func @transform_3(%arg0: i32) -> (i32, i32) {
    %c0_i32 = arith.constant 0 : i32
    %c0_i32_0 = arith.constant 0 : i32
    %c0_i32_1 = arith.constant 0 : i32
    return %c0_i32, %c0_i32_0 : i32, i32
  }
  func.func @transform_4(%arg0: i32) -> (i32, i32) {
    %c0_i32 = arith.constant 0 : i32
    %c0_i32_0 = arith.constant 0 : i32
    %c0_i32_1 = arith.constant 0 : i32
    return %c0_i32, %c0_i32_0 : i32, i32
  }
  func.func @transform_5(%arg0: i32) -> (i32, i32) {
    %c0_i32 = arith.constant 0 : i32
    %c0_i32_0 = arith.constant 0 : i32
    %c0_i32_1 = arith.constant 0 : i32
    return %c0_i32, %c0_i32_0 : i32, i32
  }
  func.func @transform_6(%arg0: i32) -> (i32, i32) {
    %c0_i32 = arith.constant 0 : i32
    %c0_i32_0 = arith.constant 0 : i32
    %c0_i32_1 = arith.constant 0 : i32
    return %c0_i32, %c0_i32_0 : i32, i32
  }
  func.func @transform_7(%arg0: i32) -> (i32, i32) {
    %c0_i32 = arith.constant 0 : i32
    %c0_i32_0 = arith.constant 0 : i32
    %c0_i32_1 = arith.constant 0 : i32
    return %c0_i32, %c0_i32_0 : i32, i32
  }
  func.func @transform_8(%arg0: i32) -> (i32, i32) {
    %c0_i32 = arith.constant 0 : i32
    %c0_i32_0 = arith.constant 0 : i32
    %c0_i32_1 = arith.constant 0 : i32
    return %c0_i32, %c0_i32_0 : i32, i32
  }
  func.func @transform_9(%arg0: i32) -> (i32, i32) {
    %c0_i32 = arith.constant 0 : i32
    %c0_i32_0 = arith.constant 0 : i32
    %c0_i32_1 = arith.constant 0 : i32
    return %c0_i32, %c0_i32_0 : i32, i32
  }
  func.func @transform_10(%arg0: i32) -> (i32, i32) {
    %c0_i32 = arith.constant 0 : i32
    %c0_i32_0 = arith.constant 0 : i32
    %c0_i32_1 = arith.constant 0 : i32
    return %c0_i32, %c0_i32_0 : i32, i32
  }
  func.func @transform_11(%arg0: i32) -> (i32, i32) {
    %c0_i32 = arith.constant 0 : i32
    %c0_i32_0 = arith.constant 0 : i32
    %c0_i32_1 = arith.constant 0 : i32
    return %c0_i32, %c0_i32_0 : i32, i32
  }
  func.func @transform_12(%arg0: i32) -> (i32, i32) {
    %c0_i32 = arith.constant 0 : i32
    %c0_i32_0 = arith.constant 0 : i32
    %c0_i32_1 = arith.constant 0 : i32
    return %c0_i32, %c0_i32_0 : i32, i32
  }
  func.func @transform_13(%arg0: i32) -> (i32, i32) {
    %c0_i32 = arith.constant 0 : i32
    %c0_i32_0 = arith.constant 0 : i32
    %c0_i32_1 = arith.constant 0 : i32
    return %c0_i32, %c0_i32_0 : i32, i32
  }
  func.func @transform_14(%arg0: i32) -> (i32, i32) {
    %c0_i32 = arith.constant 0 : i32
    %c0_i32_0 = arith.constant 0 : i32
    %c0_i32_1 = arith.constant 0 : i32
    return %c0_i32, %c0_i32_0 : i32, i32
  }
  func.func @transform_15(%arg0: i32) -> (i32, i32) {
    %c0_i32 = arith.constant 0 : i32
    %c0_i32_0 = arith.constant 0 : i32
    %c0_i32_1 = arith.constant 0 : i32
    return %c0_i32, %c0_i32_0 : i32, i32
  }
  func.func @transform_16(%arg0: i32) -> (i32, i32) {
    %c0_i32 = arith.constant 0 : i32
    %c0_i32_0 = arith.constant 0 : i32
    %c0_i32_1 = arith.constant 0 : i32
    return %c0_i32, %c0_i32_0 : i32, i32
  }
  func.func @transform_17(%arg0: i32) -> (i32, i32) {
    %c0_i32 = arith.constant 0 : i32
    %c0_i32_0 = arith.constant 0 : i32
    %c0_i32_1 = arith.constant 0 : i32
    return %c0_i32, %c0_i32_0 : i32, i32
  }
  func.func @transform_18(%arg0: i32) -> (i32, i32) {
    %c0_i32 = arith.constant 0 : i32
    %c0_i32_0 = arith.constant 0 : i32
    %c0_i32_1 = arith.constant 0 : i32
    return %c0_i32, %c0_i32_0 : i32, i32
  }
  func.func @transform_19(%arg0: i32) -> (i32, i32) {
    %c0_i32 = arith.constant 0 : i32
    %c0_i32_0 = arith.constant 0 : i32
    %c0_i32_1 = arith.constant 0 : i32
    return %c0_i32, %c0_i32_0 : i32, i32
  }
  func.func @transform_20(%arg0: i32) -> (i32, i32) {
    %c0_i32 = arith.constant 0 : i32
    %c0_i32_0 = arith.constant 0 : i32
    %c0_i32_1 = arith.constant 0 : i32
    return %c0_i32, %c0_i32_0 : i32, i32
  }
  func.func @transform_21(%arg0: i32) -> (i32, i32) {
    %c0_i32 = arith.constant 0 : i32
    %c0_i32_0 = arith.constant 0 : i32
    %c0_i32_1 = arith.constant 0 : i32
    return %c0_i32, %c0_i32_0 : i32, i32
  }
  func.func @transform_22(%arg0: i32) -> (i32, i32) {
    %c0_i32 = arith.constant 0 : i32
    %c0_i32_0 = arith.constant 0 : i32
    %c0_i32_1 = arith.constant 0 : i32
    return %c0_i32, %c0_i32_0 : i32, i32
  }
  func.func @transform_23(%arg0: i32) -> (i32, i32) {
    %c0_i32 = arith.constant 0 : i32
    %c0_i32_0 = arith.constant 0 : i32
    %c0_i32_1 = arith.constant 0 : i32
    return %c0_i32, %c0_i32_0 : i32, i32
  }
  func.func @transform_24(%arg0: i32) -> (i32, i32) {
    %c0_i32 = arith.constant 0 : i32
    %c0_i32_0 = arith.constant 0 : i32
    %c0_i32_1 = arith.constant 0 : i32
    return %c0_i32, %c0_i32_0 : i32, i32
  }
  func.func @transform_25(%arg0: i32) -> (i32, i32) {
    %c0_i32 = arith.constant 0 : i32
    %c0_i32_0 = arith.constant 0 : i32
    %c0_i32_1 = arith.constant 0 : i32
    return %c0_i32, %c0_i32_0 : i32, i32
  }
  func.func @transform_26(%arg0: i32) -> (i32, i32) {
    %c0_i32 = arith.constant 0 : i32
    %c0_i32_0 = arith.constant 0 : i32
    %c0_i32_1 = arith.constant 0 : i32
    return %c0_i32, %c0_i32_0 : i32, i32
  }
  func.func @transform_27(%arg0: i32) -> (i32, i32) {
    %c0_i32 = arith.constant 0 : i32
    %c0_i32_0 = arith.constant 0 : i32
    %c0_i32_1 = arith.constant 0 : i32
    return %c0_i32, %c0_i32_0 : i32, i32
  }
  func.func @transform_28(%arg0: i32) -> (i32, i32) {
    %c0_i32 = arith.constant 0 : i32
    %c0_i32_0 = arith.constant 0 : i32
    %c0_i32_1 = arith.constant 0 : i32
    return %c0_i32, %c0_i32_0 : i32, i32
  }
  func.func @transform_29(%arg0: i32) -> (i32, i32, i32) {
    %c0_i32 = arith.constant 0 : i32
    %c0_i32_0 = arith.constant 0 : i32
    %c0_i32_1 = arith.constant 0 : i32
    return %arg0, %c0_i32, %c0_i32_0 : i32, i32, i32
  }
}

module attributes {stable_mosaic.version = 11 : i64} {
  func.func @_temporal_kernel(%arg0: i32, %arg1: memref<2x8x12xf32, #tpu.memory_space<vmem>>, %arg2: memref<12x128xbf16, #tpu.memory_space<vmem>>, %arg3: memref<1x128xf32, #tpu.memory_space<vmem>>, %arg4: memref<128x384xbf16, #tpu.memory_space<vmem>>, %arg5: memref<1x384xf32, #tpu.memory_space<vmem>>, %arg6: memref<128x128xbf16, #tpu.memory_space<vmem>>, %arg7: memref<1x128xf32, #tpu.memory_space<vmem>>, %arg8: memref<1x128xf32, #tpu.memory_space<vmem>>, %arg9: memref<1x128xf32, #tpu.memory_space<vmem>>, %arg10: memref<128x2048xbf16, #tpu.memory_space<vmem>>, %arg11: memref<1x2048xf32, #tpu.memory_space<vmem>>, %arg12: memref<2048x128xbf16, #tpu.memory_space<vmem>>, %arg13: memref<1x128xf32, #tpu.memory_space<vmem>>, %arg14: memref<1x128xf32, #tpu.memory_space<vmem>>, %arg15: memref<1x128xf32, #tpu.memory_space<vmem>>, %arg16: memref<128x384xbf16, #tpu.memory_space<vmem>>, %arg17: memref<1x384xf32, #tpu.memory_space<vmem>>, %arg18: memref<128x128xbf16, #tpu.memory_space<vmem>>, %arg19: memref<1x128xf32, #tpu.memory_space<vmem>>, %arg20: memref<1x128xf32, #tpu.memory_space<vmem>>, %arg21: memref<1x128xf32, #tpu.memory_space<vmem>>, %arg22: memref<128x2048xbf16, #tpu.memory_space<vmem>>, %arg23: memref<1x2048xf32, #tpu.memory_space<vmem>>, %arg24: memref<2048x128xbf16, #tpu.memory_space<vmem>>, %arg25: memref<1x128xf32, #tpu.memory_space<vmem>>, %arg26: memref<1x128xf32, #tpu.memory_space<vmem>>, %arg27: memref<1x128xf32, #tpu.memory_space<vmem>>, %arg28: memref<1x128xf32, #tpu.memory_space<vmem>>, %arg29: memref<1x128xf32, #tpu.memory_space<vmem>>, %arg30: memref<1x2x128xf32, #tpu.memory_space<vmem>>) attributes {dimension_semantics = [#tpu.dimension_semantics<parallel>], iteration_bounds = array<i64: 1>, scalar_prefetch = 0 : i64, scratch_operands = 0 : i64, tpu.core_type = #tpu.core_type<tc>, window_params = [{transform_indices = @transform_0, window_bounds = array<i64: 2, 8, 12>}, {pipeline_mode = #tpu.pipeline_mode<synchronous>, transform_indices = @transform_1, window_bounds = array<i64: 12, 128>}, {pipeline_mode = #tpu.pipeline_mode<synchronous>, transform_indices = @transform_2, window_bounds = array<i64: 1, 128>}, {pipeline_mode = #tpu.pipeline_mode<synchronous>, transform_indices = @transform_3, window_bounds = array<i64: 128, 384>}, {pipeline_mode = #tpu.pipeline_mode<synchronous>, transform_indices = @transform_4, window_bounds = array<i64: 1, 384>}, {pipeline_mode = #tpu.pipeline_mode<synchronous>, transform_indices = @transform_5, window_bounds = array<i64: 128, 128>}, {pipeline_mode = #tpu.pipeline_mode<synchronous>, transform_indices = @transform_6, window_bounds = array<i64: 1, 128>}, {pipeline_mode = #tpu.pipeline_mode<synchronous>, transform_indices = @transform_7, window_bounds = array<i64: 1, 128>}, {pipeline_mode = #tpu.pipeline_mode<synchronous>, transform_indices = @transform_8, window_bounds = array<i64: 1, 128>}, {pipeline_mode = #tpu.pipeline_mode<synchronous>, transform_indices = @transform_9, window_bounds = array<i64: 128, 2048>}, {pipeline_mode = #tpu.pipeline_mode<synchronous>, transform_indices = @transform_10, window_bounds = array<i64: 1, 2048>}, {pipeline_mode = #tpu.pipeline_mode<synchronous>, transform_indices = @transform_11, window_bounds = array<i64: 2048, 128>}, {pipeline_mode = #tpu.pipeline_mode<synchronous>, transform_indices = @transform_12, window_bounds = array<i64: 1, 128>}, {pipeline_mode = #tpu.pipeline_mode<synchronous>, transform_indices = @transform_13, window_bounds = array<i64: 1, 128>}, {pipeline_mode = #tpu.pipeline_mode<synchronous>, transform_indices = @transform_14, window_bounds = array<i64: 1, 128>}, {pipeline_mode = #tpu.pipeline_mode<synchronous>, transform_indices = @transform_15, window_bounds = array<i64: 128, 384>}, {pipeline_mode = #tpu.pipeline_mode<synchronous>, transform_indices = @transform_16, window_bounds = array<i64: 1, 384>}, {pipeline_mode = #tpu.pipeline_mode<synchronous>, transform_indices = @transform_17, window_bounds = array<i64: 128, 128>}, {pipeline_mode = #tpu.pipeline_mode<synchronous>, transform_indices = @transform_18, window_bounds = array<i64: 1, 128>}, {pipeline_mode = #tpu.pipeline_mode<synchronous>, transform_indices = @transform_19, window_bounds = array<i64: 1, 128>}, {pipeline_mode = #tpu.pipeline_mode<synchronous>, transform_indices = @transform_20, window_bounds = array<i64: 1, 128>}, {pipeline_mode = #tpu.pipeline_mode<synchronous>, transform_indices = @transform_21, window_bounds = array<i64: 128, 2048>}, {pipeline_mode = #tpu.pipeline_mode<synchronous>, transform_indices = @transform_22, window_bounds = array<i64: 1, 2048>}, {pipeline_mode = #tpu.pipeline_mode<synchronous>, transform_indices = @transform_23, window_bounds = array<i64: 2048, 128>}, {pipeline_mode = #tpu.pipeline_mode<synchronous>, transform_indices = @transform_24, window_bounds = array<i64: 1, 128>}, {pipeline_mode = #tpu.pipeline_mode<synchronous>, transform_indices = @transform_25, window_bounds = array<i64: 1, 128>}, {pipeline_mode = #tpu.pipeline_mode<synchronous>, transform_indices = @transform_26, window_bounds = array<i64: 1, 128>}, {pipeline_mode = #tpu.pipeline_mode<synchronous>, transform_indices = @transform_27, window_bounds = array<i64: 1, 128>}, {pipeline_mode = #tpu.pipeline_mode<synchronous>, transform_indices = @transform_28, window_bounds = array<i64: 1, 128>}, {transform_indices = @transform_29, window_bounds = array<i64: 1, 2, 128>}]} {
    %c0 = arith.constant 0 : index
    %c0_0 = arith.constant 0 : index
    %c0_1 = arith.constant 0 : index
    %0 = vector.load %arg1[%c0, %c0_0, %c0_1] : memref<2x8x12xf32, #tpu.memory_space<vmem>>, vector<2x8x12xf32>
    %1 = vector.shape_cast %0 : vector<2x8x12xf32> to vector<16x12xf32>
    %2 = arith.truncf %1 : vector<16x12xf32> to vector<16x12xbf16>
    %c0_2 = arith.constant 0 : index
    %c0_3 = arith.constant 0 : index
    %3 = vector.load %arg2[%c0_2, %c0_3] : memref<12x128xbf16, #tpu.memory_space<vmem>>, vector<12x128xbf16>
    %cst = arith.constant dense<0.000000e+00> : vector<16x128xf32>
    %4 = tpu.matmul %2, %3, %cst {dimension_numbers = #tpu.dot_dimension_numbers<[1], [0], [0], [1], [0, 0, 1, 1], [], []>} : vector<16x12xbf16>, vector<12x128xbf16>, vector<16x128xf32> -> vector<16x128xf32>
    %c0_4 = arith.constant 0 : index
    %c0_5 = arith.constant 0 : index
    %5 = vector.load %arg3[%c0_4, %c0_5] : memref<1x128xf32, #tpu.memory_space<vmem>>, vector<1x128xf32>
    %6 = vector.broadcast %5 : vector<1x128xf32> to vector<16x128xf32>
    %7 = arith.addf %4, %6 : vector<16x128xf32>
    %cst_6 = arith.constant 0.000000e+00 : f32
    %8 = vector.broadcast %cst_6 : f32 to vector<16x128xf32>
    %9 = arith.maximumf %7, %8 : vector<16x128xf32>
    %c0_7 = arith.constant 0 : index
    %c0_8 = arith.constant 0 : index
    %10 = vector.load %arg4[%c0_7, %c0_8] : memref<128x384xbf16, #tpu.memory_space<vmem>>, vector<128x384xbf16>
    %c0_9 = arith.constant 0 : index
    %c0_10 = arith.constant 0 : index
    %11 = vector.load %arg5[%c0_9, %c0_10] : memref<1x384xf32, #tpu.memory_space<vmem>>, vector<1x384xf32>
    %c0_11 = arith.constant 0 : index
    %c0_12 = arith.constant 0 : index
    %12 = vector.load %arg6[%c0_11, %c0_12] : memref<128x128xbf16, #tpu.memory_space<vmem>>, vector<128x128xbf16>
    %c0_13 = arith.constant 0 : index
    %c0_14 = arith.constant 0 : index
    %13 = vector.load %arg7[%c0_13, %c0_14] : memref<1x128xf32, #tpu.memory_space<vmem>>, vector<1x128xf32>
    %c0_15 = arith.constant 0 : index
    %c0_16 = arith.constant 0 : index
    %14 = vector.load %arg8[%c0_15, %c0_16] : memref<1x128xf32, #tpu.memory_space<vmem>>, vector<1x128xf32>
    %c0_17 = arith.constant 0 : index
    %c0_18 = arith.constant 0 : index
    %15 = vector.load %arg9[%c0_17, %c0_18] : memref<1x128xf32, #tpu.memory_space<vmem>>, vector<1x128xf32>
    %c0_19 = arith.constant 0 : index
    %c0_20 = arith.constant 0 : index
    %16 = vector.load %arg10[%c0_19, %c0_20] : memref<128x2048xbf16, #tpu.memory_space<vmem>>, vector<128x2048xbf16>
    %c0_21 = arith.constant 0 : index
    %c0_22 = arith.constant 0 : index
    %17 = vector.load %arg11[%c0_21, %c0_22] : memref<1x2048xf32, #tpu.memory_space<vmem>>, vector<1x2048xf32>
    %c0_23 = arith.constant 0 : index
    %c0_24 = arith.constant 0 : index
    %18 = vector.load %arg12[%c0_23, %c0_24] : memref<2048x128xbf16, #tpu.memory_space<vmem>>, vector<2048x128xbf16>
    %c0_25 = arith.constant 0 : index
    %c0_26 = arith.constant 0 : index
    %19 = vector.load %arg13[%c0_25, %c0_26] : memref<1x128xf32, #tpu.memory_space<vmem>>, vector<1x128xf32>
    %c0_27 = arith.constant 0 : index
    %c0_28 = arith.constant 0 : index
    %20 = vector.load %arg14[%c0_27, %c0_28] : memref<1x128xf32, #tpu.memory_space<vmem>>, vector<1x128xf32>
    %c0_29 = arith.constant 0 : index
    %c0_30 = arith.constant 0 : index
    %21 = vector.load %arg15[%c0_29, %c0_30] : memref<1x128xf32, #tpu.memory_space<vmem>>, vector<1x128xf32>
    %22 = arith.truncf %9 : vector<16x128xf32> to vector<16x128xbf16>
    %cst_31 = arith.constant dense<0.000000e+00> : vector<16x384xf32>
    %23 = tpu.matmul %22, %10, %cst_31 {dimension_numbers = #tpu.dot_dimension_numbers<[1], [0], [0], [1], [0, 0, 1, 1], [], []>} : vector<16x128xbf16>, vector<128x384xbf16>, vector<16x384xf32> -> vector<16x384xf32>
    %24 = vector.broadcast %11 : vector<1x384xf32> to vector<16x384xf32>
    %25 = arith.addf %23, %24 : vector<16x384xf32>
    %26 = arith.truncf %25 : vector<16x384xf32> to vector<16x384xbf16>
    %27 = vector.extract_strided_slice %26 {offsets = [0, 0], sizes = [16, 32], strides = [1, 1]} : vector<16x384xbf16> to vector<16x32xbf16>
    %28 = vector.shape_cast %27 : vector<16x32xbf16> to vector<2x8x32xbf16>
    %29 = vector.extract_strided_slice %26 {offsets = [0, 32], sizes = [16, 32], strides = [1, 1]} : vector<16x384xbf16> to vector<16x32xbf16>
    %30 = vector.shape_cast %29 : vector<16x32xbf16> to vector<2x8x32xbf16>
    %31 = vector.extract_strided_slice %26 {offsets = [0, 64], sizes = [16, 32], strides = [1, 1]} : vector<16x384xbf16> to vector<16x32xbf16>
    %32 = vector.shape_cast %31 : vector<16x32xbf16> to vector<2x8x32xbf16>
    %33 = vector.extract_strided_slice %26 {offsets = [0, 96], sizes = [16, 32], strides = [1, 1]} : vector<16x384xbf16> to vector<16x32xbf16>
    %34 = vector.shape_cast %33 : vector<16x32xbf16> to vector<2x8x32xbf16>
    %35 = tpu.concatenate %28, %30, %32, %34 in 0 : vector<2x8x32xbf16>, vector<2x8x32xbf16>, vector<2x8x32xbf16>, vector<2x8x32xbf16> -> vector<8x8x32xbf16>
    %36 = vector.extract_strided_slice %26 {offsets = [0, 128], sizes = [16, 32], strides = [1, 1]} : vector<16x384xbf16> to vector<16x32xbf16>
    %37 = vector.shape_cast %36 : vector<16x32xbf16> to vector<2x8x32xbf16>
    %38 = vector.extract_strided_slice %26 {offsets = [0, 160], sizes = [16, 32], strides = [1, 1]} : vector<16x384xbf16> to vector<16x32xbf16>
    %39 = vector.shape_cast %38 : vector<16x32xbf16> to vector<2x8x32xbf16>
    %40 = vector.extract_strided_slice %26 {offsets = [0, 192], sizes = [16, 32], strides = [1, 1]} : vector<16x384xbf16> to vector<16x32xbf16>
    %41 = vector.shape_cast %40 : vector<16x32xbf16> to vector<2x8x32xbf16>
    %42 = vector.extract_strided_slice %26 {offsets = [0, 224], sizes = [16, 32], strides = [1, 1]} : vector<16x384xbf16> to vector<16x32xbf16>
    %43 = vector.shape_cast %42 : vector<16x32xbf16> to vector<2x8x32xbf16>
    %44 = tpu.concatenate %37, %39, %41, %43 in 0 : vector<2x8x32xbf16>, vector<2x8x32xbf16>, vector<2x8x32xbf16>, vector<2x8x32xbf16> -> vector<8x8x32xbf16>
    %45 = vector.extract_strided_slice %26 {offsets = [0, 256], sizes = [16, 32], strides = [1, 1]} : vector<16x384xbf16> to vector<16x32xbf16>
    %46 = vector.shape_cast %45 : vector<16x32xbf16> to vector<2x8x32xbf16>
    %47 = vector.extract_strided_slice %26 {offsets = [0, 288], sizes = [16, 32], strides = [1, 1]} : vector<16x384xbf16> to vector<16x32xbf16>
    %48 = vector.shape_cast %47 : vector<16x32xbf16> to vector<2x8x32xbf16>
    %49 = vector.extract_strided_slice %26 {offsets = [0, 320], sizes = [16, 32], strides = [1, 1]} : vector<16x384xbf16> to vector<16x32xbf16>
    %50 = vector.shape_cast %49 : vector<16x32xbf16> to vector<2x8x32xbf16>
    %51 = vector.extract_strided_slice %26 {offsets = [0, 352], sizes = [16, 32], strides = [1, 1]} : vector<16x384xbf16> to vector<16x32xbf16>
    %52 = vector.shape_cast %51 : vector<16x32xbf16> to vector<2x8x32xbf16>
    %53 = tpu.concatenate %46, %48, %50, %52 in 0 : vector<2x8x32xbf16>, vector<2x8x32xbf16>, vector<2x8x32xbf16>, vector<2x8x32xbf16> -> vector<8x8x32xbf16>
    "tpu.trace_start"() <{level = 10 : i32, message = "bqd,bkd->bqk"}> : () -> ()
    %cst_32 = arith.constant dense<0.000000e+00> : vector<8x8x8xf32>
    %54 = tpu.matmul %35, %44, %cst_32 {dimension_numbers = #tpu.dot_dimension_numbers<[2], [2], [1], [1], [0, 0, 0, 1, 1, 1], [0], [0]>} : vector<8x8x32xbf16>, vector<8x8x32xbf16>, vector<8x8x8xf32> -> vector<8x8x8xf32>
    "tpu.trace_stop"() : () -> ()
    %cst_33 = arith.constant dense<0xFF800000> : vector<8x8xf32>
    %55 = vector.multi_reduction <maximumf>, %54, %cst_33 [2] : vector<8x8x8xf32> to vector<8x8xf32>
    %56 = vector.shape_cast %55 : vector<8x8xf32> to vector<8x8x1xf32>
    %57 = vector.broadcast %56 : vector<8x8x1xf32> to vector<8x8x8xf32>
    %58 = arith.subf %54, %57 : vector<8x8x8xf32>
    %59 = math.exp %58 : vector<8x8x8xf32>
    %cst_34 = arith.constant dense<0.000000e+00> : vector<8x8xf32>
    %60 = vector.multi_reduction <add>, %59, %cst_34 [2] : vector<8x8x8xf32> to vector<8x8xf32>
    %61 = vector.shape_cast %60 : vector<8x8xf32> to vector<8x8x1xf32>
    %62 = tpu.reciprocal %61 {approx = true} : vector<8x8x1xf32> -> vector<8x8x1xf32>
    %63 = vector.broadcast %62 : vector<8x8x1xf32> to vector<8x8x8xf32>
    %64 = arith.mulf %59, %63 : vector<8x8x8xf32>
    %65 = arith.truncf %64 : vector<8x8x8xf32> to vector<8x8x8xbf16>
    "tpu.trace_start"() <{level = 10 : i32, message = "bqk,bkd->bqd"}> : () -> ()
    %cst_35 = arith.constant dense<0.000000e+00> : vector<8x8x32xf32>
    %66 = tpu.matmul %65, %53, %cst_35 {dimension_numbers = #tpu.dot_dimension_numbers<[2], [1], [1], [2], [0, 0, 0, 1, 1, 2], [0], [0]>} : vector<8x8x8xbf16>, vector<8x8x32xbf16>, vector<8x8x32xf32> -> vector<8x8x32xf32>
    "tpu.trace_stop"() : () -> ()
    %67 = arith.truncf %66 : vector<8x8x32xf32> to vector<8x8x32xbf16>
    %68 = vector.extract_strided_slice %67 {offsets = [0, 0, 0], sizes = [2, 8, 32], strides = [1, 1, 1]} : vector<8x8x32xbf16> to vector<2x8x32xbf16>
    %69 = vector.shape_cast %68 : vector<2x8x32xbf16> to vector<16x32xbf16>
    %70 = vector.extract_strided_slice %12 {offsets = [0, 0], sizes = [32, 128], strides = [1, 1]} : vector<128x128xbf16> to vector<32x128xbf16>
    %cst_36 = arith.constant dense<0.000000e+00> : vector<16x128xf32>
    %71 = tpu.matmul %69, %70, %cst_36 {dimension_numbers = #tpu.dot_dimension_numbers<[1], [0], [0], [1], [0, 0, 1, 1], [], []>} : vector<16x32xbf16>, vector<32x128xbf16>, vector<16x128xf32> -> vector<16x128xf32>
    %72 = vector.broadcast %13 : vector<1x128xf32> to vector<16x128xf32>
    %73 = arith.addf %72, %71 : vector<16x128xf32>
    %74 = vector.extract_strided_slice %67 {offsets = [2, 0, 0], sizes = [2, 8, 32], strides = [1, 1, 1]} : vector<8x8x32xbf16> to vector<2x8x32xbf16>
    %75 = vector.shape_cast %74 : vector<2x8x32xbf16> to vector<16x32xbf16>
    %76 = vector.extract_strided_slice %12 {offsets = [32, 0], sizes = [32, 128], strides = [1, 1]} : vector<128x128xbf16> to vector<32x128xbf16>
    %cst_37 = arith.constant dense<0.000000e+00> : vector<16x128xf32>
    %77 = tpu.matmul %75, %76, %cst_37 {dimension_numbers = #tpu.dot_dimension_numbers<[1], [0], [0], [1], [0, 0, 1, 1], [], []>} : vector<16x32xbf16>, vector<32x128xbf16>, vector<16x128xf32> -> vector<16x128xf32>
    %78 = arith.addf %73, %77 : vector<16x128xf32>
    %79 = vector.extract_strided_slice %67 {offsets = [4, 0, 0], sizes = [2, 8, 32], strides = [1, 1, 1]} : vector<8x8x32xbf16> to vector<2x8x32xbf16>
    %80 = vector.shape_cast %79 : vector<2x8x32xbf16> to vector<16x32xbf16>
    %81 = vector.extract_strided_slice %12 {offsets = [64, 0], sizes = [32, 128], strides = [1, 1]} : vector<128x128xbf16> to vector<32x128xbf16>
    %cst_38 = arith.constant dense<0.000000e+00> : vector<16x128xf32>
    %82 = tpu.matmul %80, %81, %cst_38 {dimension_numbers = #tpu.dot_dimension_numbers<[1], [0], [0], [1], [0, 0, 1, 1], [], []>} : vector<16x32xbf16>, vector<32x128xbf16>, vector<16x128xf32> -> vector<16x128xf32>
    %83 = arith.addf %78, %82 : vector<16x128xf32>
    %84 = vector.extract_strided_slice %67 {offsets = [6, 0, 0], sizes = [2, 8, 32], strides = [1, 1, 1]} : vector<8x8x32xbf16> to vector<2x8x32xbf16>
    %85 = vector.shape_cast %84 : vector<2x8x32xbf16> to vector<16x32xbf16>
    %86 = vector.extract_strided_slice %12 {offsets = [96, 0], sizes = [32, 128], strides = [1, 1]} : vector<128x128xbf16> to vector<32x128xbf16>
    %cst_39 = arith.constant dense<0.000000e+00> : vector<16x128xf32>
    %87 = tpu.matmul %85, %86, %cst_39 {dimension_numbers = #tpu.dot_dimension_numbers<[1], [0], [0], [1], [0, 0, 1, 1], [], []>} : vector<16x32xbf16>, vector<32x128xbf16>, vector<16x128xf32> -> vector<16x128xf32>
    %88 = arith.addf %83, %87 : vector<16x128xf32>
    %89 = arith.addf %9, %88 : vector<16x128xf32>
    %cst_40 = arith.constant dense<0.000000e+00> : vector<16xf32>
    %90 = vector.multi_reduction <add>, %89, %cst_40 [1] : vector<16x128xf32> to vector<16xf32>
    %91 = vector.shape_cast %90 : vector<16xf32> to vector<16x1xf32>
    %cst_41 = arith.constant 1.280000e+02 : f32
    %92 = vector.broadcast %cst_41 : f32 to vector<16x1xf32>
    %93 = arith.divf %91, %92 : vector<16x1xf32>
    %94 = arith.mulf %89, %89 : vector<16x128xf32>
    %cst_42 = arith.constant dense<0.000000e+00> : vector<16xf32>
    %95 = vector.multi_reduction <add>, %94, %cst_42 [1] : vector<16x128xf32> to vector<16xf32>
    %96 = vector.shape_cast %95 : vector<16xf32> to vector<16x1xf32>
    %cst_43 = arith.constant 1.280000e+02 : f32
    %97 = vector.broadcast %cst_43 : f32 to vector<16x1xf32>
    %98 = arith.divf %96, %97 : vector<16x1xf32>
    %99 = arith.mulf %93, %93 : vector<16x1xf32>
    %100 = arith.subf %98, %99 : vector<16x1xf32>
    %cst_44 = arith.constant 0.000000e+00 : f32
    %101 = vector.broadcast %cst_44 : f32 to vector<16x1xf32>
    %102 = arith.maximumf %100, %101 : vector<16x1xf32>
    %103 = vector.broadcast %93 : vector<16x1xf32> to vector<16x128xf32>
    %104 = arith.subf %89, %103 : vector<16x128xf32>
    %cst_45 = arith.constant 9.99999974E-6 : f32
    %105 = vector.broadcast %cst_45 : f32 to vector<16x1xf32>
    %106 = arith.addf %102, %105 : vector<16x1xf32>
    %107 = math.rsqrt %106 : vector<16x1xf32>
    %108 = vector.broadcast %107 : vector<16x1xf32> to vector<16x128xf32>
    %109 = arith.mulf %104, %108 : vector<16x128xf32>
    %110 = vector.broadcast %14 : vector<1x128xf32> to vector<16x128xf32>
    %111 = arith.mulf %109, %110 : vector<16x128xf32>
    %112 = vector.broadcast %15 : vector<1x128xf32> to vector<16x128xf32>
    %113 = arith.addf %111, %112 : vector<16x128xf32>
    %114 = arith.truncf %113 : vector<16x128xf32> to vector<16x128xbf16>
    %cst_46 = arith.constant dense<0.000000e+00> : vector<16x2048xf32>
    %115 = tpu.matmul %114, %16, %cst_46 {dimension_numbers = #tpu.dot_dimension_numbers<[1], [0], [0], [1], [0, 0, 1, 1], [], []>} : vector<16x128xbf16>, vector<128x2048xbf16>, vector<16x2048xf32> -> vector<16x2048xf32>
    %116 = vector.broadcast %17 : vector<1x2048xf32> to vector<16x2048xf32>
    %117 = arith.addf %115, %116 : vector<16x2048xf32>
    %cst_47 = arith.constant 0.000000e+00 : f32
    %118 = vector.broadcast %cst_47 : f32 to vector<16x2048xf32>
    %119 = arith.maximumf %117, %118 : vector<16x2048xf32>
    %120 = arith.truncf %119 : vector<16x2048xf32> to vector<16x2048xbf16>
    %cst_48 = arith.constant dense<0.000000e+00> : vector<16x128xf32>
    %121 = tpu.matmul %120, %18, %cst_48 {dimension_numbers = #tpu.dot_dimension_numbers<[1], [0], [0], [1], [0, 0, 1, 1], [], []>} : vector<16x2048xbf16>, vector<2048x128xbf16>, vector<16x128xf32> -> vector<16x128xf32>
    %122 = vector.broadcast %19 : vector<1x128xf32> to vector<16x128xf32>
    %123 = arith.addf %121, %122 : vector<16x128xf32>
    %124 = arith.addf %113, %123 : vector<16x128xf32>
    %cst_49 = arith.constant dense<0.000000e+00> : vector<16xf32>
    %125 = vector.multi_reduction <add>, %124, %cst_49 [1] : vector<16x128xf32> to vector<16xf32>
    %126 = vector.shape_cast %125 : vector<16xf32> to vector<16x1xf32>
    %cst_50 = arith.constant 1.280000e+02 : f32
    %127 = vector.broadcast %cst_50 : f32 to vector<16x1xf32>
    %128 = arith.divf %126, %127 : vector<16x1xf32>
    %129 = arith.mulf %124, %124 : vector<16x128xf32>
    %cst_51 = arith.constant dense<0.000000e+00> : vector<16xf32>
    %130 = vector.multi_reduction <add>, %129, %cst_51 [1] : vector<16x128xf32> to vector<16xf32>
    %131 = vector.shape_cast %130 : vector<16xf32> to vector<16x1xf32>
    %cst_52 = arith.constant 1.280000e+02 : f32
    %132 = vector.broadcast %cst_52 : f32 to vector<16x1xf32>
    %133 = arith.divf %131, %132 : vector<16x1xf32>
    %134 = arith.mulf %128, %128 : vector<16x1xf32>
    %135 = arith.subf %133, %134 : vector<16x1xf32>
    %cst_53 = arith.constant 0.000000e+00 : f32
    %136 = vector.broadcast %cst_53 : f32 to vector<16x1xf32>
    %137 = arith.maximumf %135, %136 : vector<16x1xf32>
    %138 = vector.broadcast %128 : vector<16x1xf32> to vector<16x128xf32>
    %139 = arith.subf %124, %138 : vector<16x128xf32>
    %cst_54 = arith.constant 9.99999974E-6 : f32
    %140 = vector.broadcast %cst_54 : f32 to vector<16x1xf32>
    %141 = arith.addf %137, %140 : vector<16x1xf32>
    %142 = math.rsqrt %141 : vector<16x1xf32>
    %143 = vector.broadcast %142 : vector<16x1xf32> to vector<16x128xf32>
    %144 = arith.mulf %139, %143 : vector<16x128xf32>
    %145 = vector.broadcast %20 : vector<1x128xf32> to vector<16x128xf32>
    %146 = arith.mulf %144, %145 : vector<16x128xf32>
    %147 = vector.broadcast %21 : vector<1x128xf32> to vector<16x128xf32>
    %148 = arith.addf %146, %147 : vector<16x128xf32>
    %c0_55 = arith.constant 0 : index
    %c0_56 = arith.constant 0 : index
    %149 = vector.load %arg16[%c0_55, %c0_56] : memref<128x384xbf16, #tpu.memory_space<vmem>>, vector<128x384xbf16>
    %c0_57 = arith.constant 0 : index
    %c0_58 = arith.constant 0 : index
    %150 = vector.load %arg17[%c0_57, %c0_58] : memref<1x384xf32, #tpu.memory_space<vmem>>, vector<1x384xf32>
    %c0_59 = arith.constant 0 : index
    %c0_60 = arith.constant 0 : index
    %151 = vector.load %arg18[%c0_59, %c0_60] : memref<128x128xbf16, #tpu.memory_space<vmem>>, vector<128x128xbf16>
    %c0_61 = arith.constant 0 : index
    %c0_62 = arith.constant 0 : index
    %152 = vector.load %arg19[%c0_61, %c0_62] : memref<1x128xf32, #tpu.memory_space<vmem>>, vector<1x128xf32>
    %c0_63 = arith.constant 0 : index
    %c0_64 = arith.constant 0 : index
    %153 = vector.load %arg20[%c0_63, %c0_64] : memref<1x128xf32, #tpu.memory_space<vmem>>, vector<1x128xf32>
    %c0_65 = arith.constant 0 : index
    %c0_66 = arith.constant 0 : index
    %154 = vector.load %arg21[%c0_65, %c0_66] : memref<1x128xf32, #tpu.memory_space<vmem>>, vector<1x128xf32>
    %c0_67 = arith.constant 0 : index
    %c0_68 = arith.constant 0 : index
    %155 = vector.load %arg22[%c0_67, %c0_68] : memref<128x2048xbf16, #tpu.memory_space<vmem>>, vector<128x2048xbf16>
    %c0_69 = arith.constant 0 : index
    %c0_70 = arith.constant 0 : index
    %156 = vector.load %arg23[%c0_69, %c0_70] : memref<1x2048xf32, #tpu.memory_space<vmem>>, vector<1x2048xf32>
    %c0_71 = arith.constant 0 : index
    %c0_72 = arith.constant 0 : index
    %157 = vector.load %arg24[%c0_71, %c0_72] : memref<2048x128xbf16, #tpu.memory_space<vmem>>, vector<2048x128xbf16>
    %c0_73 = arith.constant 0 : index
    %c0_74 = arith.constant 0 : index
    %158 = vector.load %arg25[%c0_73, %c0_74] : memref<1x128xf32, #tpu.memory_space<vmem>>, vector<1x128xf32>
    %c0_75 = arith.constant 0 : index
    %c0_76 = arith.constant 0 : index
    %159 = vector.load %arg26[%c0_75, %c0_76] : memref<1x128xf32, #tpu.memory_space<vmem>>, vector<1x128xf32>
    %c0_77 = arith.constant 0 : index
    %c0_78 = arith.constant 0 : index
    %160 = vector.load %arg27[%c0_77, %c0_78] : memref<1x128xf32, #tpu.memory_space<vmem>>, vector<1x128xf32>
    %161 = arith.truncf %148 : vector<16x128xf32> to vector<16x128xbf16>
    %cst_79 = arith.constant dense<0.000000e+00> : vector<16x384xf32>
    %162 = tpu.matmul %161, %149, %cst_79 {dimension_numbers = #tpu.dot_dimension_numbers<[1], [0], [0], [1], [0, 0, 1, 1], [], []>} : vector<16x128xbf16>, vector<128x384xbf16>, vector<16x384xf32> -> vector<16x384xf32>
    %163 = vector.broadcast %150 : vector<1x384xf32> to vector<16x384xf32>
    %164 = arith.addf %162, %163 : vector<16x384xf32>
    %165 = arith.truncf %164 : vector<16x384xf32> to vector<16x384xbf16>
    %166 = vector.extract_strided_slice %165 {offsets = [0, 0], sizes = [16, 32], strides = [1, 1]} : vector<16x384xbf16> to vector<16x32xbf16>
    %167 = vector.shape_cast %166 : vector<16x32xbf16> to vector<2x8x32xbf16>
    %168 = vector.extract_strided_slice %165 {offsets = [0, 32], sizes = [16, 32], strides = [1, 1]} : vector<16x384xbf16> to vector<16x32xbf16>
    %169 = vector.shape_cast %168 : vector<16x32xbf16> to vector<2x8x32xbf16>
    %170 = vector.extract_strided_slice %165 {offsets = [0, 64], sizes = [16, 32], strides = [1, 1]} : vector<16x384xbf16> to vector<16x32xbf16>
    %171 = vector.shape_cast %170 : vector<16x32xbf16> to vector<2x8x32xbf16>
    %172 = vector.extract_strided_slice %165 {offsets = [0, 96], sizes = [16, 32], strides = [1, 1]} : vector<16x384xbf16> to vector<16x32xbf16>
    %173 = vector.shape_cast %172 : vector<16x32xbf16> to vector<2x8x32xbf16>
    %174 = tpu.concatenate %167, %169, %171, %173 in 0 : vector<2x8x32xbf16>, vector<2x8x32xbf16>, vector<2x8x32xbf16>, vector<2x8x32xbf16> -> vector<8x8x32xbf16>
    %175 = vector.extract_strided_slice %165 {offsets = [0, 128], sizes = [16, 32], strides = [1, 1]} : vector<16x384xbf16> to vector<16x32xbf16>
    %176 = vector.shape_cast %175 : vector<16x32xbf16> to vector<2x8x32xbf16>
    %177 = vector.extract_strided_slice %165 {offsets = [0, 160], sizes = [16, 32], strides = [1, 1]} : vector<16x384xbf16> to vector<16x32xbf16>
    %178 = vector.shape_cast %177 : vector<16x32xbf16> to vector<2x8x32xbf16>
    %179 = vector.extract_strided_slice %165 {offsets = [0, 192], sizes = [16, 32], strides = [1, 1]} : vector<16x384xbf16> to vector<16x32xbf16>
    %180 = vector.shape_cast %179 : vector<16x32xbf16> to vector<2x8x32xbf16>
    %181 = vector.extract_strided_slice %165 {offsets = [0, 224], sizes = [16, 32], strides = [1, 1]} : vector<16x384xbf16> to vector<16x32xbf16>
    %182 = vector.shape_cast %181 : vector<16x32xbf16> to vector<2x8x32xbf16>
    %183 = tpu.concatenate %176, %178, %180, %182 in 0 : vector<2x8x32xbf16>, vector<2x8x32xbf16>, vector<2x8x32xbf16>, vector<2x8x32xbf16> -> vector<8x8x32xbf16>
    %184 = vector.extract_strided_slice %165 {offsets = [0, 256], sizes = [16, 32], strides = [1, 1]} : vector<16x384xbf16> to vector<16x32xbf16>
    %185 = vector.shape_cast %184 : vector<16x32xbf16> to vector<2x8x32xbf16>
    %186 = vector.extract_strided_slice %165 {offsets = [0, 288], sizes = [16, 32], strides = [1, 1]} : vector<16x384xbf16> to vector<16x32xbf16>
    %187 = vector.shape_cast %186 : vector<16x32xbf16> to vector<2x8x32xbf16>
    %188 = vector.extract_strided_slice %165 {offsets = [0, 320], sizes = [16, 32], strides = [1, 1]} : vector<16x384xbf16> to vector<16x32xbf16>
    %189 = vector.shape_cast %188 : vector<16x32xbf16> to vector<2x8x32xbf16>
    %190 = vector.extract_strided_slice %165 {offsets = [0, 352], sizes = [16, 32], strides = [1, 1]} : vector<16x384xbf16> to vector<16x32xbf16>
    %191 = vector.shape_cast %190 : vector<16x32xbf16> to vector<2x8x32xbf16>
    %192 = tpu.concatenate %185, %187, %189, %191 in 0 : vector<2x8x32xbf16>, vector<2x8x32xbf16>, vector<2x8x32xbf16>, vector<2x8x32xbf16> -> vector<8x8x32xbf16>
    "tpu.trace_start"() <{level = 10 : i32, message = "bqd,bkd->bqk"}> : () -> ()
    %cst_80 = arith.constant dense<0.000000e+00> : vector<8x8x8xf32>
    %193 = tpu.matmul %174, %183, %cst_80 {dimension_numbers = #tpu.dot_dimension_numbers<[2], [2], [1], [1], [0, 0, 0, 1, 1, 1], [0], [0]>} : vector<8x8x32xbf16>, vector<8x8x32xbf16>, vector<8x8x8xf32> -> vector<8x8x8xf32>
    "tpu.trace_stop"() : () -> ()
    %cst_81 = arith.constant dense<0xFF800000> : vector<8x8xf32>
    %194 = vector.multi_reduction <maximumf>, %193, %cst_81 [2] : vector<8x8x8xf32> to vector<8x8xf32>
    %195 = vector.shape_cast %194 : vector<8x8xf32> to vector<8x8x1xf32>
    %196 = vector.broadcast %195 : vector<8x8x1xf32> to vector<8x8x8xf32>
    %197 = arith.subf %193, %196 : vector<8x8x8xf32>
    %198 = math.exp %197 : vector<8x8x8xf32>
    %cst_82 = arith.constant dense<0.000000e+00> : vector<8x8xf32>
    %199 = vector.multi_reduction <add>, %198, %cst_82 [2] : vector<8x8x8xf32> to vector<8x8xf32>
    %200 = vector.shape_cast %199 : vector<8x8xf32> to vector<8x8x1xf32>
    %201 = tpu.reciprocal %200 {approx = true} : vector<8x8x1xf32> -> vector<8x8x1xf32>
    %202 = vector.broadcast %201 : vector<8x8x1xf32> to vector<8x8x8xf32>
    %203 = arith.mulf %198, %202 : vector<8x8x8xf32>
    %204 = arith.truncf %203 : vector<8x8x8xf32> to vector<8x8x8xbf16>
    "tpu.trace_start"() <{level = 10 : i32, message = "bqk,bkd->bqd"}> : () -> ()
    %cst_83 = arith.constant dense<0.000000e+00> : vector<8x8x32xf32>
    %205 = tpu.matmul %204, %192, %cst_83 {dimension_numbers = #tpu.dot_dimension_numbers<[2], [1], [1], [2], [0, 0, 0, 1, 1, 2], [0], [0]>} : vector<8x8x8xbf16>, vector<8x8x32xbf16>, vector<8x8x32xf32> -> vector<8x8x32xf32>
    "tpu.trace_stop"() : () -> ()
    %206 = arith.truncf %205 : vector<8x8x32xf32> to vector<8x8x32xbf16>
    %207 = vector.extract_strided_slice %206 {offsets = [0, 0, 0], sizes = [2, 8, 32], strides = [1, 1, 1]} : vector<8x8x32xbf16> to vector<2x8x32xbf16>
    %208 = vector.shape_cast %207 : vector<2x8x32xbf16> to vector<16x32xbf16>
    %209 = vector.extract_strided_slice %151 {offsets = [0, 0], sizes = [32, 128], strides = [1, 1]} : vector<128x128xbf16> to vector<32x128xbf16>
    %cst_84 = arith.constant dense<0.000000e+00> : vector<16x128xf32>
    %210 = tpu.matmul %208, %209, %cst_84 {dimension_numbers = #tpu.dot_dimension_numbers<[1], [0], [0], [1], [0, 0, 1, 1], [], []>} : vector<16x32xbf16>, vector<32x128xbf16>, vector<16x128xf32> -> vector<16x128xf32>
    %211 = vector.broadcast %152 : vector<1x128xf32> to vector<16x128xf32>
    %212 = arith.addf %211, %210 : vector<16x128xf32>
    %213 = vector.extract_strided_slice %206 {offsets = [2, 0, 0], sizes = [2, 8, 32], strides = [1, 1, 1]} : vector<8x8x32xbf16> to vector<2x8x32xbf16>
    %214 = vector.shape_cast %213 : vector<2x8x32xbf16> to vector<16x32xbf16>
    %215 = vector.extract_strided_slice %151 {offsets = [32, 0], sizes = [32, 128], strides = [1, 1]} : vector<128x128xbf16> to vector<32x128xbf16>
    %cst_85 = arith.constant dense<0.000000e+00> : vector<16x128xf32>
    %216 = tpu.matmul %214, %215, %cst_85 {dimension_numbers = #tpu.dot_dimension_numbers<[1], [0], [0], [1], [0, 0, 1, 1], [], []>} : vector<16x32xbf16>, vector<32x128xbf16>, vector<16x128xf32> -> vector<16x128xf32>
    %217 = arith.addf %212, %216 : vector<16x128xf32>
    %218 = vector.extract_strided_slice %206 {offsets = [4, 0, 0], sizes = [2, 8, 32], strides = [1, 1, 1]} : vector<8x8x32xbf16> to vector<2x8x32xbf16>
    %219 = vector.shape_cast %218 : vector<2x8x32xbf16> to vector<16x32xbf16>
    %220 = vector.extract_strided_slice %151 {offsets = [64, 0], sizes = [32, 128], strides = [1, 1]} : vector<128x128xbf16> to vector<32x128xbf16>
    %cst_86 = arith.constant dense<0.000000e+00> : vector<16x128xf32>
    %221 = tpu.matmul %219, %220, %cst_86 {dimension_numbers = #tpu.dot_dimension_numbers<[1], [0], [0], [1], [0, 0, 1, 1], [], []>} : vector<16x32xbf16>, vector<32x128xbf16>, vector<16x128xf32> -> vector<16x128xf32>
    %222 = arith.addf %217, %221 : vector<16x128xf32>
    %223 = vector.extract_strided_slice %206 {offsets = [6, 0, 0], sizes = [2, 8, 32], strides = [1, 1, 1]} : vector<8x8x32xbf16> to vector<2x8x32xbf16>
    %224 = vector.shape_cast %223 : vector<2x8x32xbf16> to vector<16x32xbf16>
    %225 = vector.extract_strided_slice %151 {offsets = [96, 0], sizes = [32, 128], strides = [1, 1]} : vector<128x128xbf16> to vector<32x128xbf16>
    %cst_87 = arith.constant dense<0.000000e+00> : vector<16x128xf32>
    %226 = tpu.matmul %224, %225, %cst_87 {dimension_numbers = #tpu.dot_dimension_numbers<[1], [0], [0], [1], [0, 0, 1, 1], [], []>} : vector<16x32xbf16>, vector<32x128xbf16>, vector<16x128xf32> -> vector<16x128xf32>
    %227 = arith.addf %222, %226 : vector<16x128xf32>
    %228 = arith.addf %148, %227 : vector<16x128xf32>
    %cst_88 = arith.constant dense<0.000000e+00> : vector<16xf32>
    %229 = vector.multi_reduction <add>, %228, %cst_88 [1] : vector<16x128xf32> to vector<16xf32>
    %230 = vector.shape_cast %229 : vector<16xf32> to vector<16x1xf32>
    %cst_89 = arith.constant 1.280000e+02 : f32
    %231 = vector.broadcast %cst_89 : f32 to vector<16x1xf32>
    %232 = arith.divf %230, %231 : vector<16x1xf32>
    %233 = arith.mulf %228, %228 : vector<16x128xf32>
    %cst_90 = arith.constant dense<0.000000e+00> : vector<16xf32>
    %234 = vector.multi_reduction <add>, %233, %cst_90 [1] : vector<16x128xf32> to vector<16xf32>
    %235 = vector.shape_cast %234 : vector<16xf32> to vector<16x1xf32>
    %cst_91 = arith.constant 1.280000e+02 : f32
    %236 = vector.broadcast %cst_91 : f32 to vector<16x1xf32>
    %237 = arith.divf %235, %236 : vector<16x1xf32>
    %238 = arith.mulf %232, %232 : vector<16x1xf32>
    %239 = arith.subf %237, %238 : vector<16x1xf32>
    %cst_92 = arith.constant 0.000000e+00 : f32
    %240 = vector.broadcast %cst_92 : f32 to vector<16x1xf32>
    %241 = arith.maximumf %239, %240 : vector<16x1xf32>
    %242 = vector.broadcast %232 : vector<16x1xf32> to vector<16x128xf32>
    %243 = arith.subf %228, %242 : vector<16x128xf32>
    %cst_93 = arith.constant 9.99999974E-6 : f32
    %244 = vector.broadcast %cst_93 : f32 to vector<16x1xf32>
    %245 = arith.addf %241, %244 : vector<16x1xf32>
    %246 = math.rsqrt %245 : vector<16x1xf32>
    %247 = vector.broadcast %246 : vector<16x1xf32> to vector<16x128xf32>
    %248 = arith.mulf %243, %247 : vector<16x128xf32>
    %249 = vector.broadcast %153 : vector<1x128xf32> to vector<16x128xf32>
    %250 = arith.mulf %248, %249 : vector<16x128xf32>
    %251 = vector.broadcast %154 : vector<1x128xf32> to vector<16x128xf32>
    %252 = arith.addf %250, %251 : vector<16x128xf32>
    %253 = arith.truncf %252 : vector<16x128xf32> to vector<16x128xbf16>
    %cst_94 = arith.constant dense<0.000000e+00> : vector<16x2048xf32>
    %254 = tpu.matmul %253, %155, %cst_94 {dimension_numbers = #tpu.dot_dimension_numbers<[1], [0], [0], [1], [0, 0, 1, 1], [], []>} : vector<16x128xbf16>, vector<128x2048xbf16>, vector<16x2048xf32> -> vector<16x2048xf32>
    %255 = vector.broadcast %156 : vector<1x2048xf32> to vector<16x2048xf32>
    %256 = arith.addf %254, %255 : vector<16x2048xf32>
    %cst_95 = arith.constant 0.000000e+00 : f32
    %257 = vector.broadcast %cst_95 : f32 to vector<16x2048xf32>
    %258 = arith.maximumf %256, %257 : vector<16x2048xf32>
    %259 = arith.truncf %258 : vector<16x2048xf32> to vector<16x2048xbf16>
    %cst_96 = arith.constant dense<0.000000e+00> : vector<16x128xf32>
    %260 = tpu.matmul %259, %157, %cst_96 {dimension_numbers = #tpu.dot_dimension_numbers<[1], [0], [0], [1], [0, 0, 1, 1], [], []>} : vector<16x2048xbf16>, vector<2048x128xbf16>, vector<16x128xf32> -> vector<16x128xf32>
    %261 = vector.broadcast %158 : vector<1x128xf32> to vector<16x128xf32>
    %262 = arith.addf %260, %261 : vector<16x128xf32>
    %263 = arith.addf %252, %262 : vector<16x128xf32>
    %cst_97 = arith.constant dense<0.000000e+00> : vector<16xf32>
    %264 = vector.multi_reduction <add>, %263, %cst_97 [1] : vector<16x128xf32> to vector<16xf32>
    %265 = vector.shape_cast %264 : vector<16xf32> to vector<16x1xf32>
    %cst_98 = arith.constant 1.280000e+02 : f32
    %266 = vector.broadcast %cst_98 : f32 to vector<16x1xf32>
    %267 = arith.divf %265, %266 : vector<16x1xf32>
    %268 = arith.mulf %263, %263 : vector<16x128xf32>
    %cst_99 = arith.constant dense<0.000000e+00> : vector<16xf32>
    %269 = vector.multi_reduction <add>, %268, %cst_99 [1] : vector<16x128xf32> to vector<16xf32>
    %270 = vector.shape_cast %269 : vector<16xf32> to vector<16x1xf32>
    %cst_100 = arith.constant 1.280000e+02 : f32
    %271 = vector.broadcast %cst_100 : f32 to vector<16x1xf32>
    %272 = arith.divf %270, %271 : vector<16x1xf32>
    %273 = arith.mulf %267, %267 : vector<16x1xf32>
    %274 = arith.subf %272, %273 : vector<16x1xf32>
    %cst_101 = arith.constant 0.000000e+00 : f32
    %275 = vector.broadcast %cst_101 : f32 to vector<16x1xf32>
    %276 = arith.maximumf %274, %275 : vector<16x1xf32>
    %277 = vector.broadcast %267 : vector<16x1xf32> to vector<16x128xf32>
    %278 = arith.subf %263, %277 : vector<16x128xf32>
    %cst_102 = arith.constant 9.99999974E-6 : f32
    %279 = vector.broadcast %cst_102 : f32 to vector<16x1xf32>
    %280 = arith.addf %276, %279 : vector<16x1xf32>
    %281 = math.rsqrt %280 : vector<16x1xf32>
    %282 = vector.broadcast %281 : vector<16x1xf32> to vector<16x128xf32>
    %283 = arith.mulf %278, %282 : vector<16x128xf32>
    %284 = vector.broadcast %159 : vector<1x128xf32> to vector<16x128xf32>
    %285 = arith.mulf %283, %284 : vector<16x128xf32>
    %286 = vector.broadcast %160 : vector<1x128xf32> to vector<16x128xf32>
    %287 = arith.addf %285, %286 : vector<16x128xf32>
    %288 = vector.shape_cast %287 : vector<16x128xf32> to vector<2x8x128xf32>
    %289 = vector.extract_strided_slice %288 {offsets = [0, 7, 0], sizes = [2, 1, 128], strides = [1, 1, 1]} : vector<2x8x128xf32> to vector<2x1x128xf32>
    %290 = vector.shape_cast %289 : vector<2x1x128xf32> to vector<2x128xf32>
    %c0_103 = arith.constant 0 : index
    %c0_104 = arith.constant 0 : index
    %291 = vector.load %arg28[%c0_103, %c0_104] : memref<1x128xf32, #tpu.memory_space<vmem>>, vector<1x128xf32>
    %c0_105 = arith.constant 0 : index
    %c0_106 = arith.constant 0 : index
    %292 = vector.load %arg29[%c0_105, %c0_106] : memref<1x128xf32, #tpu.memory_space<vmem>>, vector<1x128xf32>
    %cst_107 = arith.constant dense<0.000000e+00> : vector<2xf32>
    %293 = vector.multi_reduction <add>, %290, %cst_107 [1] : vector<2x128xf32> to vector<2xf32>
    %294 = vector.shape_cast %293 : vector<2xf32> to vector<2x1xf32>
    %cst_108 = arith.constant 1.280000e+02 : f32
    %295 = vector.broadcast %cst_108 : f32 to vector<2x1xf32>
    %296 = arith.divf %294, %295 : vector<2x1xf32>
    %297 = arith.mulf %290, %290 : vector<2x128xf32>
    %cst_109 = arith.constant dense<0.000000e+00> : vector<2xf32>
    %298 = vector.multi_reduction <add>, %297, %cst_109 [1] : vector<2x128xf32> to vector<2xf32>
    %299 = vector.shape_cast %298 : vector<2xf32> to vector<2x1xf32>
    %cst_110 = arith.constant 1.280000e+02 : f32
    %300 = vector.broadcast %cst_110 : f32 to vector<2x1xf32>
    %301 = arith.divf %299, %300 : vector<2x1xf32>
    %302 = arith.mulf %296, %296 : vector<2x1xf32>
    %303 = arith.subf %301, %302 : vector<2x1xf32>
    %cst_111 = arith.constant 0.000000e+00 : f32
    %304 = vector.broadcast %cst_111 : f32 to vector<2x1xf32>
    %305 = arith.maximumf %303, %304 : vector<2x1xf32>
    %306 = vector.broadcast %296 : vector<2x1xf32> to vector<2x128xf32>
    %307 = arith.subf %290, %306 : vector<2x128xf32>
    %cst_112 = arith.constant 9.99999974E-6 : f32
    %308 = vector.broadcast %cst_112 : f32 to vector<2x1xf32>
    %309 = arith.addf %305, %308 : vector<2x1xf32>
    %310 = math.rsqrt %309 : vector<2x1xf32>
    %311 = vector.broadcast %310 : vector<2x1xf32> to vector<2x128xf32>
    %312 = arith.mulf %307, %311 : vector<2x128xf32>
    %313 = vector.broadcast %291 : vector<1x128xf32> to vector<2x128xf32>
    %314 = arith.mulf %312, %313 : vector<2x128xf32>
    %315 = vector.broadcast %292 : vector<1x128xf32> to vector<2x128xf32>
    %316 = arith.addf %314, %315 : vector<2x128xf32>
    %c0_113 = arith.constant 0 : index
    %c0_114 = arith.constant 0 : index
    %c0_115 = arith.constant 0 : index
    %317 = vector.load %arg30[%c0_113, %c0_114, %c0_115] : memref<1x2x128xf32, #tpu.memory_space<vmem>>, vector<1x2x128xf32>
    %318 = vector.shape_cast %317 : vector<1x2x128xf32> to vector<2x128xf32>
    %319 = vector.shape_cast %316 : vector<2x128xf32> to vector<1x2x128xf32>
    tpu.vector_store %arg30[%c0_113, %c0_114, %c0_115], %319 {strides = array<i32>} : memref<1x2x128xf32, #tpu.memory_space<vmem>>, vector<1x2x128xf32>,
    return
  }
  func.func @transform_0(%arg0: i32) -> (i32, i32, i32) {
    %c0_i32 = arith.constant 0 : i32
    %c0_i32_0 = arith.constant 0 : i32
    %c0_i32_1 = arith.constant 0 : i32
    return %arg0, %c0_i32, %c0_i32_0 : i32, i32, i32
  }
  func.func @transform_1(%arg0: i32) -> (i32, i32) {
    %c0_i32 = arith.constant 0 : i32
    %c0_i32_0 = arith.constant 0 : i32
    %c0_i32_1 = arith.constant 0 : i32
    return %c0_i32, %c0_i32_0 : i32, i32
  }
  func.func @transform_2(%arg0: i32) -> (i32, i32) {
    %c0_i32 = arith.constant 0 : i32
    %c0_i32_0 = arith.constant 0 : i32
    %c0_i32_1 = arith.constant 0 : i32
    return %c0_i32, %c0_i32_0 : i32, i32
  }
  func.func @transform_3(%arg0: i32) -> (i32, i32) {
    %c0_i32 = arith.constant 0 : i32
    %c0_i32_0 = arith.constant 0 : i32
    %c0_i32_1 = arith.constant 0 : i32
    return %c0_i32, %c0_i32_0 : i32, i32
  }
  func.func @transform_4(%arg0: i32) -> (i32, i32) {
    %c0_i32 = arith.constant 0 : i32
    %c0_i32_0 = arith.constant 0 : i32
    %c0_i32_1 = arith.constant 0 : i32
    return %c0_i32, %c0_i32_0 : i32, i32
  }
  func.func @transform_5(%arg0: i32) -> (i32, i32) {
    %c0_i32 = arith.constant 0 : i32
    %c0_i32_0 = arith.constant 0 : i32
    %c0_i32_1 = arith.constant 0 : i32
    return %c0_i32, %c0_i32_0 : i32, i32
  }
  func.func @transform_6(%arg0: i32) -> (i32, i32) {
    %c0_i32 = arith.constant 0 : i32
    %c0_i32_0 = arith.constant 0 : i32
    %c0_i32_1 = arith.constant 0 : i32
    return %c0_i32, %c0_i32_0 : i32, i32
  }
  func.func @transform_7(%arg0: i32) -> (i32, i32) {
    %c0_i32 = arith.constant 0 : i32
    %c0_i32_0 = arith.constant 0 : i32
    %c0_i32_1 = arith.constant 0 : i32
    return %c0_i32, %c0_i32_0 : i32, i32
  }
  func.func @transform_8(%arg0: i32) -> (i32, i32) {
    %c0_i32 = arith.constant 0 : i32
    %c0_i32_0 = arith.constant 0 : i32
    %c0_i32_1 = arith.constant 0 : i32
    return %c0_i32, %c0_i32_0 : i32, i32
  }
  func.func @transform_9(%arg0: i32) -> (i32, i32) {
    %c0_i32 = arith.constant 0 : i32
    %c0_i32_0 = arith.constant 0 : i32
    %c0_i32_1 = arith.constant 0 : i32
    return %c0_i32, %c0_i32_0 : i32, i32
  }
  func.func @transform_10(%arg0: i32) -> (i32, i32) {
    %c0_i32 = arith.constant 0 : i32
    %c0_i32_0 = arith.constant 0 : i32
    %c0_i32_1 = arith.constant 0 : i32
    return %c0_i32, %c0_i32_0 : i32, i32
  }
  func.func @transform_11(%arg0: i32) -> (i32, i32) {
    %c0_i32 = arith.constant 0 : i32
    %c0_i32_0 = arith.constant 0 : i32
    %c0_i32_1 = arith.constant 0 : i32
    return %c0_i32, %c0_i32_0 : i32, i32
  }
  func.func @transform_12(%arg0: i32) -> (i32, i32) {
    %c0_i32 = arith.constant 0 : i32
    %c0_i32_0 = arith.constant 0 : i32
    %c0_i32_1 = arith.constant 0 : i32
    return %c0_i32, %c0_i32_0 : i32, i32
  }
  func.func @transform_13(%arg0: i32) -> (i32, i32) {
    %c0_i32 = arith.constant 0 : i32
    %c0_i32_0 = arith.constant 0 : i32
    %c0_i32_1 = arith.constant 0 : i32
    return %c0_i32, %c0_i32_0 : i32, i32
  }
  func.func @transform_14(%arg0: i32) -> (i32, i32) {
    %c0_i32 = arith.constant 0 : i32
    %c0_i32_0 = arith.constant 0 : i32
    %c0_i32_1 = arith.constant 0 : i32
    return %c0_i32, %c0_i32_0 : i32, i32
  }
  func.func @transform_15(%arg0: i32) -> (i32, i32) {
    %c0_i32 = arith.constant 0 : i32
    %c0_i32_0 = arith.constant 0 : i32
    %c0_i32_1 = arith.constant 0 : i32
    return %c0_i32, %c0_i32_0 : i32, i32
  }
  func.func @transform_16(%arg0: i32) -> (i32, i32) {
    %c0_i32 = arith.constant 0 : i32
    %c0_i32_0 = arith.constant 0 : i32
    %c0_i32_1 = arith.constant 0 : i32
    return %c0_i32, %c0_i32_0 : i32, i32
  }
  func.func @transform_17(%arg0: i32) -> (i32, i32) {
    %c0_i32 = arith.constant 0 : i32
    %c0_i32_0 = arith.constant 0 : i32
    %c0_i32_1 = arith.constant 0 : i32
    return %c0_i32, %c0_i32_0 : i32, i32
  }
  func.func @transform_18(%arg0: i32) -> (i32, i32) {
    %c0_i32 = arith.constant 0 : i32
    %c0_i32_0 = arith.constant 0 : i32
    %c0_i32_1 = arith.constant 0 : i32
    return %c0_i32, %c0_i32_0 : i32, i32
  }
  func.func @transform_19(%arg0: i32) -> (i32, i32) {
    %c0_i32 = arith.constant 0 : i32
    %c0_i32_0 = arith.constant 0 : i32
    %c0_i32_1 = arith.constant 0 : i32
    return %c0_i32, %c0_i32_0 : i32, i32
  }
  func.func @transform_20(%arg0: i32) -> (i32, i32) {
    %c0_i32 = arith.constant 0 : i32
    %c0_i32_0 = arith.constant 0 : i32
    %c0_i32_1 = arith.constant 0 : i32
    return %c0_i32, %c0_i32_0 : i32, i32
  }
  func.func @transform_21(%arg0: i32) -> (i32, i32) {
    %c0_i32 = arith.constant 0 : i32
    %c0_i32_0 = arith.constant 0 : i32
    %c0_i32_1 = arith.constant 0 : i32
    return %c0_i32, %c0_i32_0 : i32, i32
  }
  func.func @transform_22(%arg0: i32) -> (i32, i32) {
    %c0_i32 = arith.constant 0 : i32
    %c0_i32_0 = arith.constant 0 : i32
    %c0_i32_1 = arith.constant 0 : i32
    return %c0_i32, %c0_i32_0 : i32, i32
  }
  func.func @transform_23(%arg0: i32) -> (i32, i32) {
    %c0_i32 = arith.constant 0 : i32
    %c0_i32_0 = arith.constant 0 : i32
    %c0_i32_1 = arith.constant 0 : i32
    return %c0_i32, %c0_i32_0 : i32, i32
  }
  func.func @transform_24(%arg0: i32) -> (i32, i32) {
    %c0_i32 = arith.constant 0 : i32
    %c0_i32_0 = arith.constant 0 : i32
    %c0_i32_1 = arith.constant 0 : i32
    return %c0_i32, %c0_i32_0 : i32, i32
  }
  func.func @transform_25(%arg0: i32) -> (i32, i32) {
    %c0_i32 = arith.constant 0 : i32
    %c0_i32_0 = arith.constant 0 : i32
    %c0_i32_1 = arith.constant 0 : i32
    return %c0_i32, %c0_i32_0 : i32, i32
  }
  func.func @transform_26(%arg0: i32) -> (i32, i32) {
    %c0_i32 = arith.constant 0 : i32
    %c0_i32_0 = arith.constant 0 : i32
    %c0_i32_1 = arith.constant 0 : i32
    return %c0_i32, %c0_i32_0 : i32, i32
  }
  func.func @transform_27(%arg0: i32) -> (i32, i32) {
    %c0_i32 = arith.constant 0 : i32
    %c0_i32_0 = arith.constant 0 : i32
    %c0_i32_1 = arith.constant 0 : i32
    return %c0_i32, %c0_i32_0 : i32, i32
  }
  func.func @transform_28(%arg0: i32) -> (i32, i32) {
    %c0_i32 = arith.constant 0 : i32
    %c0_i32_0 = arith.constant 0 : i32
    %c0_i32_1 = arith.constant 0 : i32
    return %c0_i32, %c0_i32_0 : i32, i32
  }
  func.func @transform_29(%arg0: i32) -> (i32, i32, i32) {
    %c0_i32 = arith.constant 0 : i32
    %c0_i32_0 = arith.constant 0 : i32
    %c0_i32_1 = arith.constant 0 : i32
    return %arg0, %c0_i32, %c0_i32_0 : i32, i32, i32
  }
}

</mosaic_0001>

<bundles_post_ra>
// kernel: temporal_layer_forward.1
= control target key start
LH: loop header
LB: loop body
LE: loop exit
PB: predicated region body
PF: predicated region fallthrough
CT: control target
= control target key end

     0   :  { %s10496_s6 = smov 1   ;;  %s10497_s10 = smov 2   ;;  %s11879_s0 = inlined_call_operand.smem [shape: u32[30], index: -1, kind: input, shape index: {}] }
   0x1   :  { %s10540_s5 = sld [smem:[%s11879_s0]]   ;;  %s10498_s14 = smov 3  }
   0x2   :  { %s10545_s9 = sld [smem:[%s11879_s0 + %s10496_s6]]   ;;  %s10499_s18 = smov 4  }
   0x3   :  { %s10550_s13 = sld [smem:[%s11879_s0 + %s10497_s10]]   ;;  %s10500_s22 = smov 5  }
   0x4   :  { %s10555_s17 = sld [smem:[%s11879_s0 + %s10498_s14]]   ;;  %s10501_s26 = smov 6  }
   0x5   :  { %s10560_s21 = sld [smem:[%s11879_s0 + %s10499_s18]]   ;;  %s10502_s30 = smov 7  }
   0x6   :  { %s10565_s25 = sld [smem:[%s11879_s0 + %s10500_s22]]   ;;  %s10503_s4 = smov 8  }
   0x7   :  { %s10570_s29 = sld [smem:[%s11879_s0 + %s10501_s26]]   ;;  %s10504_s10 = smov 9  }
   0x8   :  { %s10575_s3 = sld [smem:[%s11879_s0 + %s10502_s30]]   ;;  %s10505_s15 = smov 10  }
   0x9   :  { %s10580_s8 = sld [smem:[%s11879_s0 + %s10503_s4]]   ;;  %s10506_s20 = smov 11  }
   0xa   :  { %s10585_s14 = sld [smem:[%s11879_s0 + %s10504_s10]]   ;;  %s10507_s26 = smov 12  }
   0xb   :  { %s10590_s19 = sld [smem:[%s11879_s0 + %s10505_s15]]   ;;  %s10508_s1 = smov 13  }
   0xc   :  { %s10595_s24 = sld [smem:[%s11879_s0 + %s10506_s20]]   ;;  %s10509_s7 = smov 14  }
   0xd   :  { %s10600_s30 = sld [smem:[%s11879_s0 + %s10507_s26]]   ;;  %s10510_s15 = smov 15  }
   0xe   :  { %s10605_s6 = sld [smem:[%s11879_s0 + %s10508_s1]]   ;;  %s10511_s22 = smov 16  }
   0xf   :  { %s10610_s12 = sld [smem:[%s11879_s0 + %s10509_s7]]   ;;  %s10512_s28 = smov 17  }
  0x10   :  { %s10615_s20 = sld [smem:[%s11879_s0 + %s10510_s15]]   ;;  %s10513_s7 = smov 18  }
  0x11   :  { %s10620_s27 = sld [smem:[%s11879_s0 + %s10511_s22]]   ;;  %s10514_s15 = smov 19  }
  0x12   :  { %s10625_s4 = sld [smem:[%s11879_s0 + %s10512_s28]]   ;;  %s10515_s22 = smov 20  }
  0x13   :  { %s10516_s28 = smov 21  }
  0x14   :  { %11884 = sst [smem:[#allocation5_spill]] %s10605_s6 }
  0x15   :  { %11885 = sst [smem:[#allocation6_spill]] %s10610_s12 }
  0x16   :  { %s10630_s12 = sld [smem:[%s11879_s0 + %s10513_s7]]   ;;  %s10517_s7 = smov 22  }
  0x17   :  { %11886 = sst [smem:[#allocation7_spill]] %s10620_s27 }
  0x18   :  { %11887 = sst [smem:[#allocation8_spill]] %s10625_s4 }
  0x19   :  { %s10635_s6 = sld [smem:[%s11879_s0 + %s10514_s15]]   ;;  %s10518_s15 = smov 23  }
  0x1a   :  { %s10640_s27 = sld [smem:[%s11879_s0 + %s10515_s22]]   ;;  %s10519_s22 = smov 24  }
  0x1b   :  { %s10645_s4 = sld [smem:[%s11879_s0 + %s10516_s28]]   ;;  %s10520_s28 = smov 25  }
  0x1c   :  { %11888 = sst [smem:[#allocation9_spill]] %s10630_s12 }
  0x1d   :  { %s10650_s12 = sld [smem:[%s11879_s0 + %s10517_s7]]   ;;  %s10521_s7 = smov 26  }
  0x1f   :  { %11889 = sst [smem:[#allocation10_spill]] %s10635_s6 }
  0x20   :  { %11890 = sst [smem:[#allocation11_spill]] %s10640_s27 }
  0x21   :  { %11891 = sst [smem:[#allocation12_spill]] %s10645_s4 }
  0x22   :  { %s10655_s6 = sld [smem:[%s11879_s0 + %s10518_s15]]   ;;  %s10522_s15 = smov 27  }
  0x23   :  { %11892 = sst [smem:[#allocation13_spill]] %s10650_s12 }
  0x24   :  { %s10660_s27 = sld [smem:[%s11879_s0 + %s10519_s22]]   ;;  %s10523_s22 = smov 28  }
  0x25   :  { %s10665_s4 = sld [smem:[%s11879_s0 + %s10520_s28]]   ;;  %s10524_s28 = smov 29  }
  0x26   :  { %s10670_s12 = sld [smem:[%s11879_s0 + %s10521_s7]]  }
  0x28   :  { %11893 = sst [smem:[#allocation14_spill]] %s10655_s6 }
  0x29   :  { %s10675_s6 = sld [smem:[%s11879_s0 + %s10522_s15]]  }
  0x2a   :  { %11894 = sst [smem:[#allocation15_spill]] %s10660_s27 }
  0x2b   :  { %11895 = sst [smem:[#allocation16_spill]] %s10665_s4 }
  0x2c   :  { %s10680_s27 = sld [smem:[%s11879_s0 + %s10523_s22]]  }
  0x2d   :  { %s10685_s4 = sld [smem:[%s11879_s0 + %s10524_s28]]  }
  0x2e   :  { %vm145_vm0 = vcmask 1045504   ;;  %v10525_v0 = vmov 0.0   ;;  %v10051_v1 = vld [vmem:[%s10545_s9] sm:$0x3f]   ;;  %v125_v3 = vld [vmem:[%s10540_s5 + $0x8] sm:$0xff]  ;;  %vm10526_vm1 = vmmov 0  }
  0x2f   :  { %9713 = vmatprep.subr.bf16.mxu0 %v10525_v0  ;;  %v124_v2 = vld [vmem:[%s10540_s5] sm:$0xff]  ;;  %9715 = vmatprep.mubr.msk.bf16.mxu0 %vm10526_vm1, %v10525_v0  ;;  %v147_v5 = vsel %vm145_vm0, %v10051_v1, 0  ;;  %vm141_vm2 = vcmask 97280   ;;  %v10055_v8 = vld [vmem:[%s10555_s17 + $0x8] ss:$12 sps:$4 sm:$0xff]   ;;  %v10527_v30 = vmov 0  }
  0x30   :  { %v10052_v4 = vld [vmem:[%s10555_s17 + $0x4] ss:$12 sps:$4 sm:$0xff]   ;;  %v126_v6 = vpack.c.bf16 %v125_v3, %v124_v2  ;;  %v10054_v7 = vld [vmem:[%s10555_s17] ss:$12 sps:$4 sm:$0xff]   ;;  %9714 = vmatpush3.bf16.msra.mxu0 %v147_v5  ;;  %v10056_v9 = vld [vmem:[%s10555_s17 + $0x1c] ss:$12 sps:$4 sm:$0xff]   ;;  %810 = vmatprep.mubr.bf16.mxu1 %v10527_v30 }
  0x31   :  { %778 = vmatprep.subr.bf16.mxu1 %v10052_v4  ;;  %9719 = vmatprep.subr.bf16.mxu0 %v10525_v0  ;;  %v10058_v10 = vld [vmem:[%s10555_s17 + $0x18] ss:$12 sps:$4 sm:$0xff]   ;;  %v10060_v11 = vld [vmem:[%s10555_s17 + $0x34] ss:$12 sps:$4 sm:$0xff]   ;;  %v10062_v13 = vld [vmem:[%s10555_s17 + $0x30] ss:$12 sps:$4 sm:$0xff]  }
  0x32   :  { %779 = vmatpush1.bf16.msra.mxu1 %v10054_v7  ;;  %v10059_v12 = vld [vmem:[%s10555_s17 + $0x20] ss:$12 sps:$4 sm:$0xff]   ;;  %v10063_v15 = vld [vmem:[%s10555_s17 + $0x38] ss:$12 sps:$4 sm:$0xff]   ;;  %v10066_v16 = vld [vmem:[%s10555_s17 + $0x48] ss:$12 sps:$4 sm:$0xff]  }
  0x33   :  { %9716 = vmatmul.mubr.msk.bf16.vlgmr.msra.gmra.mrb[0].mxu0 %vm141_vm2, %v126_v6  ;;  %780 = vmatprep.subr.bf16.mxu1 %v10056_v9  ;;  %v10064_v14 = vld [vmem:[%s10555_s17 + $0x4c] ss:$12 sps:$4 sm:$0xff]   ;;  %v10067_v17 = vld [vmem:[%s10555_s17 + $0x50] ss:$12 sps:$4 sm:$0xff]   ;;  %v10071_v21 = vld [vmem:[%s10555_s17 + $0x68] ss:$12 sps:$4 sm:$0xff]  }
  0x34   :  { %9720 = vmatpush3.bf16.msra.mxu0 %v10055_v8  ;;  %9735 = vmatprep.mubr.msk.bf16.mxu0 %vm10526_vm1, %v10525_v0  ;;  %v10068_v18 = vld [vmem:[%s10555_s17 + $0x64] ss:$12 sps:$4 sm:$0xff]   ;;  %v10070_v19 = vld [vmem:[%s10555_s17 + $0x60] ss:$12 sps:$4 sm:$0xff]   ;;  %v10072_v20 = vld [vmem:[%s10555_s17 + $0x7c] ss:$12 sps:$4 sm:$0xff]  }
  0x35   :  { %9721 = vmatprep.subr.bf16.mxu0 %v10525_v0  ;;  %v10074_v22 = vld [vmem:[%s10555_s17 + $0x78] ss:$12 sps:$4 sm:$0xff]   ;;  %v10075_v23 = vld [vmem:[%s10555_s17 + $0x80] ss:$12 sps:$4 sm:$0xff]   ;;  %v10078_v25 = vld [vmem:[%s10555_s17 + $0x90] ss:$12 sps:$4 sm:$0xff]  }
  0x36   :  { %781 = vmatpush1.bf16.msra.mxu1 %v10058_v10  ;;  %v10076_v24 = vld [vmem:[%s10555_s17 + $0x94] ss:$12 sps:$4 sm:$0xff]   ;;  %v10079_v26 = vld [vmem:[%s10555_s17 + $0x98] ss:$12 sps:$4 sm:$0xff]   ;;  %v10083_v29 = vld [vmem:[%s10555_s17 + $0xb0] ss:$12 sps:$4 sm:$0xff]  }
  0x37   :  { %782 = vmatprep.subr.bf16.mxu1 %v10060_v11  ;;  %v10080_v27 = vld [vmem:[%s10555_s17 + $0xac] ss:$12 sps:$4 sm:$0xff]   ;;  %v10082_v28 = vld [vmem:[%s10555_s17 + $0xa8] ss:$12 sps:$4 sm:$0xff]  }
  0x38   :  { %9722 = vmatpush3.bf16.msra.mxu0 %v10059_v12 }
  0x39   :  { %9723 = vmatprep.subr.bf16.mxu0 %v10525_v0 }
  0x3a   :  { %783 = vmatpush1.bf16.msra.mxu1 %v10062_v13 }
  0x3b   :  { %784 = vmatprep.subr.bf16.mxu1 %v10064_v14 }
  0x3c   :  { %9724 = vmatpush3.bf16.msra.mxu0 %v10063_v15 }
  0x3d   :  { %9725 = vmatprep.subr.bf16.mxu0 %v10525_v0 }
  0x3e   :  { %785 = vmatpush1.bf16.msra.mxu1 %v10066_v16 }
  0x3f   :  { %786 = vmatprep.subr.bf16.mxu1 %v10068_v18 }
  0x40   :  { %9726 = vmatpush3.bf16.msra.mxu0 %v10067_v17 }
  0x41   :  { %9727 = vmatprep.subr.bf16.mxu0 %v10525_v0 }
  0x42   :  { %787 = vmatpush1.bf16.msra.mxu1 %v10070_v19 }
  0x43   :  { %788 = vmatprep.subr.bf16.mxu1 %v10072_v20 }
  0x44   :  { %9728 = vmatpush3.bf16.msra.mxu0 %v10071_v21 }
  0x45   :  { %9729 = vmatprep.subr.bf16.mxu0 %v10525_v0 }
  0x46   :  { %789 = vmatpush1.bf16.msra.mxu1 %v10074_v22 }
  0x47   :  { %790 = vmatprep.subr.bf16.mxu1 %v10076_v24 }
  0x48   :  { %9730 = vmatpush3.bf16.msra.mxu0 %v10075_v23 }
  0x49   :  { %9731 = vmatprep.subr.bf16.mxu0 %v10525_v0 }
  0x4a   :  { %791 = vmatpush1.bf16.msra.mxu1 %v10078_v25 }
  0x4b   :  { %792 = vmatprep.subr.bf16.mxu1 %v10080_v27 }
  0x4c   :  { %9732 = vmatpush3.bf16.msra.mxu0 %v10079_v26 }
  0x4d   :  { %9733 = vmatprep.subr.bf16.mxu0 %v10525_v0 }
  0x4e   :  { %793 = vmatpush1.bf16.msra.mxu1 %v10082_v28 }
  0x4f   :  { %9739 = vmatprep.subr.bf16.mxu1 %v10525_v0 }
  0x50   :  { %9734 = vmatpush3.bf16.msra.mxu0 %v10083_v29 }
  0x51   :  { %9745 = vmatprep.subr.bf16.mxu0 %v10525_v0 }
  0x52   :  { %64 = vsyncpa [#allocation3], 0  ;;  %v8580_v31 = vld [vmem:[%s10550_s13] ss:$0 sm:$0xff]  ;;  %v635_v41 = vlaneseq  ;;  %vm916_vm3 = vcmask 261120   ;;  %s10528_s0 = smov 96  }
  0x53   :  { %v10751_v44 = vld [vmem:[%s10560_s21] sm:$0x7]  ;;  %s10529_s5 = smov 64   ;;  %s10530_s9 = smov 32   ;;  %vm1385_vm4 = vcmask 1043456   ;;  %vm1285_vm5 = vcmask 64512  }
  0x54   :  { %v10745_v42 = vshrl.u32 %v635_v41, 7  ;;  %s11896_s13 = sld [smem:[#allocation5_spill]]  ;;  %s11897_s17 = sld [smem:[#allocation6_spill]]  ;;  %vm8469_vm6 = vcmask 1040384   ;;  %vm8465_vm7 = vcmask 1047559  }
  0x55   :  { %s11898_s21 = sld [smem:[#allocation7_spill]] }
  0x56   :  { %v10748_v43 = vsub.s32 0, %v10745_v42  ;;  %v10754_v45 = vsub.s32 1, %v10745_v42  ;;  %v10791_v11 = vsub.s32 2, %v10745_v42 }
  0x58   :  { %v638_v46 = vrot.slane %v10751_v44, %v10748_v43  ;;  %v642_v47 = vrot.slane %v10751_v44, %v10754_v45  ;;  %v646_v15 = vrot.slane %v10751_v44, %v10791_v11 }
 0x106   :  { %v183_v32 = vpop.f32.mrb[0].mxu0 }
 0x107   :  { %v10731_v33 = vadd.f32 %v8580_v31, %v183_v32  ;;  %v9717_v34 = vpop.f32.mrb[1].mxu0 }
 0x108   :  { %v186_v35 = vpop.f32.mrb[2].mxu0 }
 0x109   :  { %v10733_v36 = vadd.f32 %v8580_v31, %v186_v35  ;;  %v9718_v37 = vpop.f32.mrb[3].mxu0  ;;  %v190_v38 = vmax.f32 %v10731_v33, 0.0 }
 0x10b   :  { %v191_v39 = vmax.f32 %v10733_v36, 0.0  ;;  %v252_v36 = vld [vmem:[%s10585_s14 + $0x40] sm:$0xff] }
 0x10d   :  { %v633_v40 = vpack.c.bf16 %v191_v39, %v190_v38 }
 0x10f   :  { %811 = vmatmul.mubr.bf16.vlgmr.msra.gmra.mrb[0].mxu1 %v633_v40  ;;  %9736 = vmatmul.mubr.bf16.vlgmr.msra.gmra.mrb[4].mxu0 %v633_v40 }
 0x110   :  { %9741 = vmatprep.mubr.msk.bf16.mxu1 %vm10526_vm1, %v10525_v0  ;;  %9747 = vmatprep.mubr.msk.bf16.mxu0 %vm10526_vm1, %v10525_v0 }
 0x1e2   :  { %v812_v48 = vpop.f32.mrb[0].mxu1  ;;  %v10760_v49 = vpop.f32.mrb[4].mxu0 }
 0x1e3   :  { %v813_v50 = vadd.f32 %v812_v48, %v638_v46  ;;  %v814_v51 = vpop.f32.mrb[1].mxu1  ;;  %v9737_v52 = vpop.f32.mrb[5].mxu0  ;;  %v856_v18 = vadd.f32 %v10760_v49, %v646_v15 }
 0x1e4   :  { %v815_v53 = vadd.f32 %v814_v51, %v642_v47  ;;  %v816_v54 = vpop.f32.mrb[2].mxu1  ;;  %v10762_v55 = vpop.f32.mrb[6].mxu0 }
 0x1e5   :  { %v9233_v56 = vpack.c.bf16 %v813_v50, %v813_v50  ;;  %v817_v57 = vadd.f32 %v816_v54, %v638_v46  ;;  %v818_v58 = vpop.f32.mrb[3].mxu1  ;;  %v9738_v59 = vpop.f32.mrb[7].mxu0  ;;  %v10811_v21 = vpack.c.bf16 %v856_v18, %v856_v18  ;;  %v859_v22 = vadd.f32 %v10762_v55, %v646_v15 }
 0x1e6   :  { %v9235_v60 = vpack.c.bf16 %v815_v53, %v815_v53  ;;  %v819_v61 = vadd.f32 %v818_v58, %v642_v47 }
 0x1e7   :  { %870 = vrot.lane.b32.xlu1 %v9233_v56, %s10528_s0  ;;  %v9234_v1 = vpack.c.bf16 %v817_v57, %v817_v57  ;;  %v10819_v25 = vpack.c.bf16 %v859_v22, %v859_v22  ;;  %v1387_v26 = vsel %vm1385_vm4, %v10811_v21, 0 }
 0x1e8   :  { %v9236_v62 = vpack.c.bf16 %v819_v61, %v819_v61  ;;  %887 = vrot.lane.b32.xlu0 %v9235_v60, %s10528_s0  ;;  %v921_v63 = vsel %vm916_vm3, %v9235_v60, 0 }
 0x1e9   :  { %9740 = vmatpush3.bf16.xpose.msra.mxu1 %v921_v63  ;;  %v1433_v28 = vsel %vm1385_vm4, %v10819_v25, 0 }
 0x1ea   :  { %v967_v2 = vsel %vm916_vm3, %v9236_v62, 0  ;;  %9751 = vmatprep.subr.bf16.mxu1 %v10525_v0 }
 0x1eb   :  { %9746 = vmatpush3.bf16.xpose.msra.mxu0 %v967_v2  ;;  %872 = vrot.lane.b32.xlu1 %v9234_v1, %s10528_s0 }
 0x1ec   :  { %889 = vrot.lane.b32.xlu0 %v9236_v62, %s10528_s0  ;;  %9757 = vmatprep.subr.bf16.mxu0 %v10525_v0 }
 0x1ef   :  { %893 = vrot.lane.b32.xlu1 %v9236_v62, %s10529_s5 }
 0x1f0   :  { %891 = vrot.lane.b32.xlu0 %v9235_v60, %s10529_s5  ;;  %9742 = vmatmul.mubr.msk.bf16.vlgmr.msra.gmra.mrb[4].mxu1 %vm916_vm3, %v9233_v56 }
 0x1f1   :  { %9753 = vmatprep.mubr.msk.bf16.mxu1 %vm10526_vm1, %v10525_v0 }
 0x1f2   :  { %9748 = vmatmul.mubr.msk.bf16.vlgmr.msra.gmra.mrb[8].mxu0 %vm916_vm3, %v9234_v1 }
 0x1f3   :  { %876 = vrot.lane.b32.xlu1 %v9234_v1, %s10529_s5  ;;  %9759 = vmatprep.mubr.msk.bf16.mxu0 %vm10526_vm1, %v10525_v0 }
 0x1f4   :  { %874 = vrot.lane.b32.xlu0 %v9233_v56, %s10529_s5 }
 0x1f7   :  { %897 = vrot.lane.b32.xlu1 %v9236_v62, %s10530_s9 }
 0x1f8   :  { %895 = vrot.lane.b32.xlu0 %v9235_v60, %s10530_s9 }
 0x1fb   :  { %880 = vrot.lane.b32.xlu1 %v9234_v1, %s10530_s9 }
 0x1fc   :  { %878 = vrot.lane.b32.xlu0 %v9233_v56, %s10530_s9 }
 0x259   :  { %v871_v3 = vpop.permute.xlu1 %870 }
 0x25a   :  { %v888_v4 = vpop.permute.xlu0 %887 }
 0x25b   :  { %v1013_v5 = vsel %vm916_vm3, %v888_v4, 0 }
 0x25c   :  { %9752 = vmatpush3.bf16.xpose.msra.mxu1 %v1013_v5 }
 0x25d   :  { %v873_v6 = vpop.permute.xlu1 %872  ;;  %9763 = vmatprep.subr.bf16.mxu1 %v10525_v0 }
 0x25e   :  { %v890_v7 = vpop.permute.xlu0 %889 }
 0x25f   :  { %v1059_v8 = vsel %vm916_vm3, %v890_v7, 0 }
 0x260   :  { %9758 = vmatpush3.bf16.xpose.msra.mxu0 %v1059_v8 }
 0x261   :  { %v894_v9 = vpop.permute.xlu1 %893  ;;  %9769 = vmatprep.subr.bf16.mxu0 %v10525_v0 }
 0x262   :  { %v892_v10 = vpop.permute.xlu0 %891  ;;  %v1151_v16 = vsel %vm916_vm3, %v894_v9, 0 }
 0x263   :  { %v1105_v12 = vsel %vm916_vm3, %v892_v10, 0  ;;  %9754 = vmatmul.mubr.msk.bf16.vlgmr.msra.gmra.mrb[8].mxu1 %vm916_vm3, %v871_v3 }
 0x264   :  { %9764 = vmatpush3.bf16.xpose.msra.mxu1 %v1105_v12  ;;  %9765 = vmatprep.mubr.msk.bf16.mxu1 %vm10526_vm1, %v10525_v0 }
 0x265   :  { %9775 = vmatprep.subr.bf16.mxu1 %v10525_v0  ;;  %v877_v13 = vpop.permute.xlu1 %876 }
 0x266   :  { %v875_v14 = vpop.permute.xlu0 %874 }
 0x267   :  { %9760 = vmatmul.mubr.msk.bf16.vlgmr.msra.gmra.mrb[12].mxu0 %vm916_vm3, %v873_v6 }
 0x268   :  { %9770 = vmatpush3.bf16.xpose.msra.mxu0 %v1151_v16  ;;  %9771 = vmatprep.mubr.msk.bf16.mxu0 %vm10526_vm1, %v10525_v0 }
 0x269   :  { %9781 = vmatprep.subr.bf16.mxu0 %v10525_v0  ;;  %v898_v20 = vpop.permute.xlu1 %897 }
 0x26a   :  { %v896_v17 = vpop.permute.xlu0 %895  ;;  %v1243_v23 = vsel %vm916_vm3, %v898_v20, 0 }
 0x26b   :  { %v1197_v19 = vsel %vm916_vm3, %v896_v17, 0  ;;  %9766 = vmatmul.mubr.msk.bf16.vlgmr.msra.gmra.mrb[12].mxu1 %vm916_vm3, %v875_v14 }
 0x26c   :  { %9776 = vmatpush3.bf16.xpose.msra.mxu1 %v1197_v19  ;;  %9777 = vmatprep.mubr.msk.bf16.mxu1 %vm10526_vm1, %v10525_v0 }
 0x26d   :  { %9787 = vmatprep.subr.bf16.mxu1 %v10525_v0  ;;  %v881_v27 = vpop.permute.xlu1 %880 }
 0x26e   :  { %v879_v24 = vpop.permute.xlu0 %878 }
 0x26f   :  { %9772 = vmatmul.mubr.msk.bf16.vlgmr.msra.gmra.mrb[16].mxu0 %vm916_vm3, %v877_v13 }
 0x270   :  { %9782 = vmatpush3.bf16.xpose.msra.mxu0 %v1243_v23  ;;  %9783 = vmatprep.mubr.msk.bf16.mxu0 %vm10526_vm1, %v10525_v0 }
 0x271   :  { %9793 = vmatprep.subr.bf16.mxu0 %v10525_v0 }
 0x273   :  { %9778 = vmatmul.mubr.msk.bf16.vlgmr.msra.gmra.mrb[16].mxu1 %vm916_vm3, %v879_v24 }
 0x274   :  { %9788 = vmatpush3.bf16.msra.mxu1 %v1387_v26  ;;  %9789 = vmatprep.mubr.msk.bf16.mxu1 %vm10526_vm1, %v10525_v0 }
 0x275   :  { %9799 = vmatprep.subr.bf16.mxu1 %v10525_v0 }
 0x277   :  { %9784 = vmatmul.mubr.msk.bf16.vlgmr.msra.gmra.mrb[20].mxu0 %vm916_vm3, %v881_v27 }
 0x278   :  { %9794 = vmatpush3.bf16.msra.mxu0 %v1433_v28  ;;  %9795 = vmatprep.mubr.msk.bf16.mxu0 %vm10526_vm1, %v10525_v0 }
 0x279   :  { %9805 = vmatprep.subr.bf16.mxu0 %v10525_v0 }
 0x2c3   :  { %v957_v29 = vpop.f32.mrb[4].mxu1 }
 0x2c4   :  { %v9743_v31 = vpop.f32.mrb[5].mxu1  ;;  %v1286_v32 = vsel %vm1285_vm5, %v957_v29, -inf }
 0x2c5   :  { %1287 = vmax.xlane.f32.xlu0 %v1286_v32  ;;  %v960_v34 = vpop.f32.mrb[6].mxu1  ;;  %v1003_v35 = vpop.f32.mrb[8].mxu0 }
 0x2c6   :  { %v9744_v37 = vpop.f32.mrb[7].mxu1  ;;  %v9749_v40 = vpop.f32.mrb[9].mxu0  ;;  %v1289_v41 = vsel %vm1285_vm5, %v1003_v35, -inf }
 0x2c7   :  { %1290 = vmax.xlane.f32.xlu1 %v1289_v41  ;;  %v1006_v44 = vpop.f32.mrb[10].mxu0 }
 0x2c8   :  { %v9750_v46 = vpop.f32.mrb[11].mxu0 }
 0x336   :  { %v1049_v47 = vpop.f32.mrb[8].mxu1 }
 0x337   :  { %v9755_v48 = vpop.f32.mrb[9].mxu1  ;;  %v1292_v49 = vsel %vm1285_vm5, %v1049_v47, -inf }
 0x338   :  { %1293 = vmax.xlane.f32.xlu0 %v1292_v49  ;;  %v1052_v50 = vpop.f32.mrb[10].mxu1 }
 0x339   :  { %v9756_v51 = vpop.f32.mrb[11].mxu1 }
 0x33a   :  { %v1095_v52 = vpop.f32.mrb[12].mxu0 }
 0x33b   :  { %v9761_v53 = vpop.f32.mrb[13].mxu0  ;;  %v1295_v54 = vsel %vm1285_vm5, %v1095_v52, -inf }
 0x33c   :  { %1296 = vmax.xlane.f32.xlu0 %v1295_v54  ;;  %v1098_v55 = vpop.f32.mrb[14].mxu0 }
 0x33d   :  { %v9762_v56 = vpop.f32.mrb[15].mxu0 }
 0x33e   :  { %v10837_v57 = vpop.f32.mrb[12].mxu1 }
 0x33f   :  { %v9767_v58 = vpop.f32.mrb[13].mxu1  ;;  %v1298_v59 = vsel %vm1285_vm5, %v10837_v57, -inf }
 0x340   :  { %v1144_v60 = vpop.f32.mrb[14].mxu1  ;;  %1299 = vmax.xlane.f32.xlu1 %v1298_v59 }
 0x341   :  { %v9768_v61 = vpop.f32.mrb[15].mxu1 }
 0x342   :  { %v1187_v62 = vpop.f32.mrb[16].mxu0 }
 0x343   :  { %v9773_v63 = vpop.f32.mrb[17].mxu0  ;;  %v1301_v1 = vsel %vm1285_vm5, %v1187_v62, -inf }
 0x344   :  { %1302 = vmax.xlane.f32.xlu0 %v1301_v1  ;;  %v1190_v2 = vpop.f32.mrb[18].mxu0 }
 0x345   :  { %v9774_v3 = vpop.f32.mrb[19].mxu0 }
 0x346   :  { %v1233_v4 = vpop.f32.mrb[16].mxu1 }
 0x347   :  { %v9779_v5 = vpop.f32.mrb[17].mxu1  ;;  %v1304_v6 = vsel %vm1285_vm5, %v1233_v4, -inf }
 0x348   :  { %v1236_v7 = vpop.f32.mrb[18].mxu1  ;;  %1305 = vmax.xlane.f32.xlu1 %v1304_v6 }
 0x349   :  { %v9780_v8 = vpop.f32.mrb[19].mxu1 }
 0x34a   :  { %v1279_v9 = vpop.f32.mrb[20].mxu0 }
 0x34b   :  { %v9785_v10 = vpop.f32.mrb[21].mxu0  ;;  %v1307_v12 = vsel %vm1285_vm5, %v1279_v9, -inf }
 0x34c   :  { %1308 = vmax.xlane.f32.xlu0 %v1307_v12  ;;  %v1282_v13 = vpop.f32.mrb[22].mxu0 }
 0x34d   :  { %v9786_v14 = vpop.f32.mrb[23].mxu0 }
 0x352   :  { %v1288_v19 = vpop.xlane.xlu0 %1287 }
 0x353   :  { %v1310_v22 = vsub.f32 %v957_v29, %v1288_v19 }
 0x354   :  { %v1291_v15 = vpop.xlane.xlu1 %1290 }
 0x355   :  { %v1311_v16 = vsub.f32 %v1003_v35, %v1291_v15  ;;  %v1318_v23 = vmul.f32 1.442695, %v1310_v22 }
 0x357   :  { %v1320_v17 = vmul.f32 1.442695, %v1311_v16 }
 0x359   :  { %10388 = vpow2.f32 %v1320_v17  ;;  %904 = vrot.lane.b32.xlu1 %v10811_v21, %s10528_s0 }
 0x35a   :  { %10390 = vpow2.f32 %v1318_v23 }
 0x363   :  { %v10389_v18 = vpop.eup %10388 }
 0x364   :  { %v1337_v20 = vsel %vm1285_vm5, %v10389_v18, 0.0  ;;  %v10391_v24 = vpop.eup %10390 }
 0x365   :  { %1338 = vadd.xlane.f32.xlu0 %v1337_v20  ;;  %v1334_v26 = vsel %vm1285_vm5, %v10391_v24, 0.0 }
 0x37d   :  { %1335 = vadd.xlane.f32.xlu1 %v1334_v26 }
 0x3c5   :  { %v1294_v27 = vpop.xlane.xlu0 %1293 }
 0x3c6   :  { %v1312_v28 = vsub.f32 %v1049_v47, %v1294_v27 }
 0x3c8   :  { %v1322_v31 = vmul.f32 1.442695, %v1312_v28 }
 0x3c9   :  { %v1297_v32 = vpop.xlane.xlu0 %1296 }
 0x3ca   :  { %10392 = vpow2.f32 %v1322_v31  ;;  %v1313_v34 = vsub.f32 %v1095_v52, %v1297_v32 }
 0x3cc   :  { %v1324_v35 = vmul.f32 1.442695, %v1313_v34 }
 0x3cd   :  { %v1300_v48 = vpop.xlane.xlu1 %1299 }
 0x3ce   :  { %10394 = vpow2.f32 %v1324_v35  ;;  %v1314_v49 = vsub.f32 %v10837_v57, %v1300_v48 }
 0x3d0   :  { %v1326_v52 = vmul.f32 1.442695, %v1314_v49 }
 0x3d1   :  { %v1303_v44 = vpop.xlane.xlu0 %1302 }
 0x3d2   :  { %v1315_v50 = vsub.f32 %v1187_v62, %v1303_v44 }
 0x3d4   :  { %v10848_v37 = vpop.eup %10392  ;;  %v1328_v55 = vmul.f32 1.442695, %v1315_v50 }
 0x3d5   :  { %v1340_v40 = vsel %vm1285_vm5, %v10848_v37, 0.0  ;;  %v1306_v51 = vpop.xlane.xlu1 %1305 }
 0x3d6   :  { %1341 = vadd.xlane.f32.xlu1 %v1340_v40  ;;  %v1316_v53 = vsub.f32 %v1233_v4, %v1306_v51 }
 0x3d8   :  { %v10852_v29 = vpop.eup %10394  ;;  %v1330_v59 = vmul.f32 1.442695, %v1316_v53  ;;  %v10084_v53 = vld [vmem:[%s10565_s25] sm:$0xff]  }
 0x3d9   :  { %v1343_v41 = vsel %vm1285_vm5, %v10852_v29, 0.0  ;;  %v1309_v46 = vpop.xlane.xlu0 %1308  ;;  %v905_v57 = vpop.permute.xlu1 %904 }
 0x3da   :  { %1344 = vadd.xlane.f32.xlu0 %v1343_v41  ;;  %v1317_v56 = vsub.f32 %v1279_v9, %v1309_v46  ;;  %v1479_v12 = vsel %vm1385_vm4, %v905_v57, 0 }
 0x3dc   :  { %v1332_v61 = vmul.f32 1.442695, %v1317_v56  ;;  %v10085_v56 = vld [vmem:[%s10565_s25 + $0x8] sm:$0xff]  }
 0x3e7   :  { %908 = vrot.lane.b32.xlu1 %v10811_v21, %s10529_s5 }
 0x3eb   :  { %910 = vrot.lane.b32.xlu1 %v10819_v25, %s10529_s5 }
 0x3f0   :  { %906 = vrot.lane.b32.xlu0 %v10819_v25, %s10528_s0 }
 0x3f2   :  { %v1339_v47 = vpop.xlane.xlu0 %1338 }
 0x3f3   :  { %10396 = vrcp.f32 %v1339_v47 }
 0x3f4   :  { %10398 = vpow2.f32 %v1326_v52 }
 0x3f5   :  { %10400 = vpow2.f32 %v1328_v55 }
 0x3f6   :  { %10402 = vpow2.f32 %v1330_v59  ;;  %v10087_v59 = vld [vmem:[%s10565_s25 + $0x18] sm:$0xff]  }
 0x3f7   :  { %10404 = vpow2.f32 %v1332_v61 }
 0x3fd   :  { %v10397_v54 = vpop.eup %10396 }
 0x3fe   :  { %v1367_v58 = vmul.f32 %v10397_v54, %v10389_v18  ;;  %v10399_v62 = vpop.eup %10398 }
 0x3ff   :  { %v10401_v1 = vpop.eup %10400  ;;  %v1346_v3 = vsel %vm1285_vm5, %v10399_v62, 0.0 }
 0x400   :  { %v1375_v60 = vpack.c.bf16 %v1367_v58, %v1367_v58  ;;  %v10866_v2 = vpop.eup %10402  ;;  %v1349_v4 = vsel %vm1285_vm5, %v10401_v1, 0.0  ;;  %v10086_v58 = vld [vmem:[%s10565_s25 + $0x10] sm:$0xff]  }
 0x401   :  { %v10870_v5 = vpop.eup %10404  ;;  %v1352_v6 = vsel %vm1285_vm5, %v10866_v2, 0.0 }
 0x402   :  { %9796 = vmatmul.mubr.msk.bf16.vlgmr.msra.gmra.mrb[24].mxu0 %vm1285_vm5, %v1375_v60  ;;  %v1355_v7 = vsel %vm1285_vm5, %v10870_v5, 0.0 }
 0x403   :  { %9807 = vmatprep.mubr.msk.bf16.mxu0 %vm10526_vm1, %v10525_v0 }
 0x40a   :  { %v1336_v63 = vpop.xlane.xlu1 %1335 }
 0x40b   :  { %10406 = vrcp.f32 %v1336_v63 }
 0x40f   :  { %1347 = vadd.xlane.f32.xlu1 %v1346_v3  ;;  %1350 = vadd.xlane.f32.xlu0 %v1349_v4 }
 0x413   :  { %1353 = vadd.xlane.f32.xlu1 %v1352_v6  ;;  %1356 = vadd.xlane.f32.xlu0 %v1355_v7  ;;  %v10089_v6 = vld [vmem:[%s10565_s25 + $0x28] sm:$0xff]  }
 0x415   :  { %v10407_v8 = vpop.eup %10406 }
 0x416   :  { %v1366_v9 = vmul.f32 %v10407_v8, %v10391_v24 }
 0x418   :  { %v1374_v10 = vpack.c.bf16 %v1366_v9, %v1366_v9 }
 0x41a   :  { %9790 = vmatmul.mubr.msk.bf16.vlgmr.msra.gmra.mrb[20].mxu1 %vm1285_vm5, %v1374_v10 }
 0x41b   :  { %9800 = vmatpush3.bf16.msra.mxu1 %v1479_v12  ;;  %9801 = vmatprep.mubr.msk.bf16.mxu1 %vm10526_vm1, %v10525_v0 }
 0x41c   :  { %9811 = vmatprep.subr.bf16.mxu1 %v10525_v0 }
 0x424   :  { %914 = vrot.lane.b32.xlu1 %v10819_v25, %s10530_s9 }
 0x429   :  { %912 = vrot.lane.b32.xlu0 %v10811_v21, %s10530_s9 }
 0x463   :  { %v1342_v13 = vpop.xlane.xlu1 %1341 }
 0x464   :  { %10408 = vrcp.f32 %v1342_v13  ;;  %v10090_v13 = vld [vmem:[%s10565_s25 + $0x30] sm:$0xff]  }
 0x467   :  { %v1345_v14 = vpop.xlane.xlu0 %1344  ;;  %v909_v18 = vpop.permute.xlu1 %908 }
 0x468   :  { %10410 = vrcp.f32 %v1345_v14  ;;  %v1571_v25 = vsel %vm1385_vm4, %v909_v18, 0  ;;  %v10091_v18 = vld [vmem:[%s10565_s25 + $0x38] sm:$0xff]  }
 0x46b   :  { %v907_v15 = vpop.permute.xlu0 %906  ;;  %v911_v23 = vpop.permute.xlu1 %910 }
 0x46c   :  { %v1525_v16 = vsel %vm1385_vm4, %v907_v15, 0  ;;  %v1617_v26 = vsel %vm1385_vm4, %v911_v23, 0 }
 0x46d   :  { %9806 = vmatpush3.bf16.msra.mxu0 %v1525_v16 }
 0x46e   :  { %v10409_v17 = vpop.eup %10408  ;;  %9817 = vmatprep.subr.bf16.mxu0 %v10525_v0 }
 0x46f   :  { %v1368_v19 = vmul.f32 %v10409_v17, %v10848_v37 }
 0x471   :  { %v1376_v20 = vpack.c.bf16 %v1368_v19, %v1368_v19 }
 0x472   :  { %v10411_v22 = vpop.eup %10410 }
 0x473   :  { %v1369_v21 = vmul.f32 %v10411_v22, %v10852_v29  ;;  %9802 = vmatmul.mubr.msk.bf16.vlgmr.msra.gmra.mrb[24].mxu1 %vm1285_vm5, %v1376_v20 }
 0x474   :  { %9812 = vmatpush3.bf16.msra.mxu1 %v1571_v25  ;;  %9813 = vmatprep.mubr.msk.bf16.mxu1 %vm10526_vm1, %v10525_v0 }
 0x475   :  { %v1377_v24 = vpack.c.bf16 %v1369_v21, %v1369_v21  ;;  %9823 = vmatprep.subr.bf16.mxu1 %v10525_v0 }
 0x477   :  { %9808 = vmatmul.mubr.msk.bf16.vlgmr.msra.gmra.mrb[28].mxu0 %vm1285_vm5, %v1377_v24 }
 0x478   :  { %9818 = vmatpush3.bf16.msra.mxu0 %v1617_v26  ;;  %9819 = vmatprep.mubr.msk.bf16.mxu0 %vm10526_vm1, %v10525_v0 }
 0x479   :  { %9829 = vmatprep.subr.bf16.mxu0 %v10525_v0 }
 0x49c   :  { %v1348_v27 = vpop.xlane.xlu1 %1347  ;;  %v1351_v28 = vpop.xlane.xlu0 %1350 }
 0x49d   :  { %10412 = vrcp.f32 %v1348_v27 }
 0x49e   :  { %10414 = vrcp.f32 %v1351_v28 }
 0x4a0   :  { %v1354_v31 = vpop.xlane.xlu1 %1353  ;;  %v1357_v32 = vpop.xlane.xlu0 %1356 }
 0x4a1   :  { %10416 = vrcp.f32 %v1354_v31 }
 0x4a2   :  { %10418 = vrcp.f32 %v1357_v32 }
 0x4a4   :  { %v913_v29 = vpop.permute.xlu0 %912  ;;  %v915_v41 = vpop.permute.xlu1 %914 }
 0x4a5   :  { %v1663_v49 = vsel %vm1385_vm4, %v913_v29, 0  ;;  %v1709_v50 = vsel %vm1385_vm4, %v915_v41, 0 }
 0x4a7   :  { %v10413_v34 = vpop.eup %10412 }
 0x4a8   :  { %v10415_v35 = vpop.eup %10414  ;;  %v1370_v37 = vmul.f32 %v10413_v34, %v10399_v62 }
 0x4a9   :  { %v1371_v40 = vmul.f32 %v10415_v35, %v10401_v1  ;;  %v10088_v1 = vld [vmem:[%s10565_s25 + $0x20] sm:$0xff]   ;;  %s11899_s25 = sld [smem:[#allocation8_spill]] }
 0x4aa   :  { %v1378_v44 = vpack.c.bf16 %v1370_v37, %v1370_v37 }
 0x4ab   :  { %v10417_v46 = vpop.eup %10416  ;;  %v1379_v47 = vpack.c.bf16 %v1371_v40, %v1371_v40 }
 0x4ac   :  { %v10419_v48 = vpop.eup %10418  ;;  %9814 = vmatmul.mubr.msk.bf16.vlgmr.msra.gmra.mrb[28].mxu1 %vm1285_vm5, %v1378_v44  ;;  %v1372_v51 = vmul.f32 %v10417_v46, %v10866_v2 }
 0x4ad   :  { %9820 = vmatmul.mubr.msk.bf16.vlgmr.msra.gmra.mrb[32].mxu0 %vm1285_vm5, %v1379_v47  ;;  %9824 = vmatpush3.bf16.msra.mxu1 %v1663_v49  ;;  %v1373_v52 = vmul.f32 %v10419_v48, %v10870_v5  ;;  %v8633_v49 = vld [vmem:[%s10570_s29] ss:$0 sm:$0xff]  ;;  %s11900_s29 = sld [smem:[#allocation9_spill]] }
 0x4ae   :  { %9830 = vmatpush3.bf16.msra.mxu0 %v1709_v50  ;;  %9825 = vmatprep.mubr.msk.bf16.mxu1 %vm10526_vm1, %v10525_v0  ;;  %v1380_v54 = vpack.c.bf16 %v1372_v51, %v1372_v51 }
 0x4af   :  { %9831 = vmatprep.mubr.msk.bf16.mxu0 %vm10526_vm1, %v10525_v0  ;;  %9835 = vmatprep.subr.bf16.mxu1 %v10525_v0  ;;  %v1381_v55 = vpack.c.bf16 %v1373_v52, %v1373_v52 }
 0x4b0   :  { %9843 = vmatprep.subr.bf16.mxu0 %v10525_v0 }
 0x4b4   :  { %9826 = vmatmul.mubr.msk.bf16.vlgmr.msra.gmra.mrb[32].mxu1 %vm1285_vm5, %v1380_v54 }
 0x4b5   :  { %9832 = vmatmul.mubr.msk.bf16.vlgmr.msra.gmra.mrb[36].mxu0 %vm1285_vm5, %v1381_v55  ;;  %9836 = vmatpush3.bf16.msra.mxu1 %v10084_v53 }
 0x4b6   :  { %9837 = vmatprep.subr.bf16.mxu1 %v10525_v0  ;;  %9839 = vmatprep.mubr.msk.bf16.mxu1 %vm10526_vm1, %v10525_v0 }
 0x4b7   :  { %9847 = vmatprep.mubr.msk.bf16.mxu0 %vm10526_vm1, %v10525_v0  ;;  %9844 = vmatpush3.bf16.msra.mxu0 %v10086_v58 }
 0x4b8   :  { %9845 = vmatprep.subr.bf16.mxu0 %v10525_v0 }
 0x4b9   :  { %9838 = vmatpush3.bf16.msra.mxu1 %v10085_v56 }
 0x4ba   :  { %9851 = vmatprep.subr.bf16.mxu1 %v10525_v0 }
 0x4bb   :  { %9846 = vmatpush3.bf16.msra.mxu0 %v10087_v59 }
 0x4bc   :  { %9859 = vmatprep.subr.bf16.mxu0 %v10525_v0 }
 0x4d5   :  { %v1469_v60 = vpop.f32.mrb[24].mxu0 }
 0x4d6   :  { %v9797_v61 = vpop.f32.mrb[25].mxu0 }
 0x4d7   :  { %v1472_v57 = vpop.f32.mrb[26].mxu0 }
 0x4d8   :  { %v9798_v62 = vpop.f32.mrb[27].mxu0 }
 0x4ed   :  { %v1423_v63 = vpop.f32.mrb[20].mxu1 }
 0x4ee   :  { %v9239_v2 = vpack.c.bf16 %v1469_v60, %v1423_v63  ;;  %v9791_v3 = vpop.f32.mrb[21].mxu1 }
 0x4ef   :  { %v1426_v4 = vpop.f32.mrb[22].mxu1 }
 0x4f0   :  { %v9792_v5 = vpop.f32.mrb[23].mxu1  ;;  %9840 = vmatmul.mubr.msk.bf16.vlgmr.msra.gmra.mrb[36].mxu1 %vm916_vm3, %v9239_v2 }
 0x4f1   :  { %9852 = vmatpush3.bf16.msra.mxu1 %v10088_v1  ;;  %9855 = vmatprep.mubr.msk.bf16.mxu1 %vm10526_vm1, %v10525_v0 }
 0x4f2   :  { %9853 = vmatprep.subr.bf16.mxu1 %v10525_v0 }
 0x4f5   :  { %9854 = vmatpush3.bf16.msra.mxu1 %v10089_v6 }
 0x546   :  { %v1515_v7 = vpop.f32.mrb[24].mxu1 }
 0x547   :  { %v9803_v8 = vpop.f32.mrb[25].mxu1 }
 0x548   :  { %v1518_v9 = vpop.f32.mrb[26].mxu1 }
 0x549   :  { %v9804_v10 = vpop.f32.mrb[27].mxu1 }
 0x54a   :  { %v1561_v12 = vpop.f32.mrb[28].mxu0 }
 0x54b   :  { %v9240_v14 = vpack.c.bf16 %v1561_v12, %v1515_v7  ;;  %v9809_v15 = vpop.f32.mrb[29].mxu0  ;;  %v253_v12 = vld [vmem:[%s10585_s14 + $0x48] sm:$0xff] }
 0x54c   :  { %v1564_v16 = vpop.f32.mrb[30].mxu0 }
 0x54d   :  { %v9810_v17 = vpop.f32.mrb[31].mxu0  ;;  %9848 = vmatmul.mubr.msk.bf16.vlgmr.msra.gmra.mrb[40].mxu0 %vm916_vm3, %v9240_v14  ;;  %v260_v16 = vld [vmem:[%s10585_s14 + $0x80] sm:$0xff] }
 0x54e   :  { %9860 = vmatpush3.bf16.msra.mxu0 %v10090_v13  ;;  %9863 = vmatprep.mubr.msk.bf16.mxu0 %vm10526_vm1, %v10525_v0  ;;  %v268_v17 = vld [vmem:[%s10585_s14 + $0xc0] sm:$0xff] }
 0x54f   :  { %9861 = vmatprep.subr.bf16.mxu0 %v10525_v0 }
 0x552   :  { %9862 = vmatpush3.bf16.msra.mxu0 %v10091_v18  ;;  %v261_v18 = vld [vmem:[%s10585_s14 + $0x88] sm:$0xff] }
 0x57f   :  { %v1607_v19 = vpop.f32.mrb[28].mxu1 }
 0x580   :  { %v1653_v20 = vpop.f32.mrb[32].mxu0  ;;  %v9815_v22 = vpop.f32.mrb[29].mxu1 }
 0x581   :  { %v9241_v25 = vpack.c.bf16 %v1653_v20, %v1607_v19  ;;  %v9821_v21 = vpop.f32.mrb[33].mxu0  ;;  %v1610_v23 = vpop.f32.mrb[30].mxu1  ;;  %v269_v19 = vld [vmem:[%s10585_s14 + $0xc8] sm:$0xff]  ;;  %v8664_v20 = vcombine.low %v260_v16, %v268_v17  ;;  %v8665_v22 = vcombine.high %v260_v16, %v268_v17  ;;  %v246_v16 = vld [vmem:[%s10585_s14 + $0x10] sm:$0xff] }
 0x582   :  { %v1656_v24 = vpop.f32.mrb[34].mxu0  ;;  %v9816_v26 = vpop.f32.mrb[31].mxu1  ;;  %v8667_v21 = vcombine.high %v261_v18, %v269_v19  ;;  %v276_v23 = vld [vmem:[%s10585_s14 + $0x100] sm:$0xff]  ;;  %v254_v17 = vld [vmem:[%s10585_s14 + $0x50] sm:$0xff] }
 0x583   :  { %v9822_v27 = vpop.f32.mrb[35].mxu0  ;;  %9856 = vmatmul.mubr.msk.bf16.vlgmr.msra.gmra.mrb[40].mxu1 %vm916_vm3, %v9241_v25  ;;  %v8666_v25 = vcombine.low %v261_v18, %v269_v19  ;;  %v284_v24 = vld [vmem:[%s10585_s14 + $0x140] sm:$0xff]  ;;  %v277_v26 = vld [vmem:[%s10585_s14 + $0x108] sm:$0xff]  ;;  %v247_v18 = vld [vmem:[%s10585_s14 + $0x18] sm:$0xff]  ;;  %v8652_v19 = vcombine.low %v246_v16, %v254_v17 }
 0x584   :  { %2819 = vmatprep.mubr.bf16.mxu1 %v10527_v30  ;;  %v8681_v27 = vcombine.high %v276_v23, %v284_v24 }
 0x587   :  { %v1699_v28 = vpop.f32.mrb[32].mxu1 }
 0x588   :  { %v1745_v31 = vpop.f32.mrb[36].mxu0  ;;  %v9827_v32 = vpop.f32.mrb[33].mxu1 }
 0x589   :  { %v9242_v34 = vpack.c.bf16 %v1745_v31, %v1699_v28  ;;  %v9833_v35 = vpop.f32.mrb[37].mxu0  ;;  %v1702_v37 = vpop.f32.mrb[34].mxu1  ;;  %v285_v28 = vld [vmem:[%s10585_s14 + $0x148] sm:$0xff]  ;;  %v8680_v31 = vcombine.low %v276_v23, %v284_v24 }
 0x58a   :  { %v1748_v40 = vpop.f32.mrb[38].mxu0  ;;  %v9828_v29 = vpop.f32.mrb[35].mxu1  ;;  %v8682_v32 = vcombine.low %v277_v26, %v285_v28  ;;  %v292_v35 = vld [vmem:[%s10585_s14 + $0x180] sm:$0xff] }
 0x58b   :  { %v9834_v41 = vpop.f32.mrb[39].mxu0  ;;  %9864 = vmatmul.mubr.msk.bf16.vlgmr.msra.gmra.mrb[44].mxu0 %vm916_vm3, %v9242_v34  ;;  %v8683_v34 = vcombine.high %v277_v26, %v285_v28  ;;  %v300_v37 = vld [vmem:[%s10585_s14 + $0x1c0] sm:$0xff]  ;;  %v293_v40 = vld [vmem:[%s10585_s14 + $0x188] sm:$0xff] }
 0x58c   :  { %2862 = vmatprep.mubr.bf16.mxu0 %v10527_v30  ;;  %v8697_v29 = vcombine.high %v292_v35, %v300_v37  ;;  %v301_v41 = vld [vmem:[%s10585_s14 + $0x1c8] sm:$0xff] }
 0x5c3   :  { %v1813_v44 = vpop.f32.mrb[36].mxu1 }
 0x5c4   :  { %v9841_v46 = vpop.f32.mrb[37].mxu1  ;;  %v1826_v50 = vadd.f32 %v8633_v49, %v1813_v44  ;;  %v8696_v44 = vcombine.low %v292_v35, %v300_v37 }
 0x5c5   :  { %v1816_v47 = vpop.f32.mrb[38].mxu1  ;;  %v8698_v46 = vcombine.low %v293_v40, %v301_v41 }
 0x5c6   :  { %v9842_v48 = vpop.f32.mrb[39].mxu1  ;;  %v1827_v52 = vadd.f32 %v8633_v49, %v1816_v47  ;;  %v8699_v47 = vcombine.high %v293_v40, %v301_v41  ;;  %v316_v49 = vld [vmem:[%s10585_s14 + $0x240] sm:$0xff] }
 0x5c7   :  { %v308_v48 = vld [vmem:[%s10585_s14 + $0x200] sm:$0xff] }
 0x620   :  { %v1882_v51 = vpop.f32.mrb[40].mxu0 }
 0x621   :  { %v1889_v53 = vadd.f32 %v1882_v51, %v1826_v50  ;;  %v9849_v54 = vpop.f32.mrb[41].mxu0  ;;  %v309_v50 = vld [vmem:[%s10585_s14 + $0x208] sm:$0xff]  ;;  %v8713_v51 = vcombine.high %v308_v48, %v316_v49 }
 0x622   :  { %v1885_v55 = vpop.f32.mrb[42].mxu0 }
 0x623   :  { %v1890_v56 = vadd.f32 %v1885_v55, %v1827_v52  ;;  %v9850_v58 = vpop.f32.mrb[43].mxu0  ;;  %v317_v52 = vld [vmem:[%s10585_s14 + $0x248] sm:$0xff] }
 0x624   :  { %v8714_v54 = vcombine.low %v309_v50, %v317_v52  ;;  %v8715_v55 = vcombine.high %v309_v50, %v317_v52  ;;  %v332_v58 = vld [vmem:[%s10585_s14 + $0x2c0] sm:$0xff] }
 0x656   :  { %v1945_v59 = vpop.f32.mrb[40].mxu1 }
 0x657   :  { %v1952_v60 = vadd.f32 %v1945_v59, %v1889_v53  ;;  %v9857_v61 = vpop.f32.mrb[41].mxu1  ;;  %v8712_v53 = vcombine.low %v308_v48, %v316_v49  ;;  %v325_v59 = vld [vmem:[%s10585_s14 + $0x288] sm:$0xff] }
 0x658   :  { %v1948_v57 = vpop.f32.mrb[42].mxu1  ;;  %v333_v61 = vld [vmem:[%s10585_s14 + $0x2c8] sm:$0xff] }
 0x659   :  { %v1953_v62 = vadd.f32 %v1948_v57, %v1890_v56  ;;  %v9858_v63 = vpop.f32.mrb[43].mxu1  ;;  %v324_v56 = vld [vmem:[%s10585_s14 + $0x280] sm:$0xff] }
 0x65a   :  { %v8728_v57 = vcombine.low %v324_v56, %v332_v58  ;;  %v8731_v63 = vcombine.high %v325_v59, %v333_v61 }
 0x65e   :  { %v2008_v1 = vpop.f32.mrb[44].mxu0 }
 0x65f   :  { %v2015_v2 = vadd.f32 %v2008_v1, %v1952_v60  ;;  %v9865_v3 = vpop.f32.mrb[45].mxu0  ;;  %v8729_v60 = vcombine.high %v324_v56, %v332_v58  ;;  %v340_v1 = vld [vmem:[%s10585_s14 + $0x300] sm:$0xff] }
 0x660   :  { %v2011_v4 = vpop.f32.mrb[46].mxu0  ;;  %v341_v3 = vld [vmem:[%s10585_s14 + $0x308] sm:$0xff]  ;;  %v8647_v56 = vld [vmem:[%s10580_s8] ss:$0 sm:$0xff]  ;;  %s11902_s8 = sld [smem:[#allocation10_spill]] }
 0x661   :  { %v10944_v5 = vadd.f32 %v2015_v2, %v190_v38  ;;  %v2016_v6 = vadd.f32 %v2011_v4, %v1953_v62  ;;  %v9866_v7 = vpop.f32.mrb[47].mxu0  ;;  %v244_v38 = vld [vmem:[%s10585_s14] sm:$0xff]  ;;  %v8730_v62 = vcombine.low %v325_v59, %v333_v61  ;;  %v262_v59 = vld [vmem:[%s10585_s14 + $0x90] sm:$0xff]  ;;  %v263_v61 = vld [vmem:[%s10585_s14 + $0x98] sm:$0xff] }
 0x662   :  { %v8649_v10 = vcombine.high %v244_v38, %v252_v36  ;;  %v8648_v13 = vcombine.low %v244_v38, %v252_v36  ;;  %v348_v2 = vld [vmem:[%s10585_s14 + $0x340] sm:$0xff] }
 0x663   :  { %v10948_v8 = vadd.f32 %v2016_v6, %v191_v39  ;;  %2019 = vadd.xlane.f32.xlu0 %v10944_v5  ;;  %v2026_v9 = vmul.f32 %v10944_v5, %v10944_v5  ;;  %v245_v39 = vld [vmem:[%s10585_s14 + $0x8] sm:$0xff]  ;;  %v8745_v4 = vcombine.high %v340_v1, %v348_v2  ;;  %v8744_v7 = vcombine.low %v340_v1, %v348_v2  ;;  %v356_v38 = vld [vmem:[%s10585_s14 + $0x380] sm:$0xff]  ;;  %v278_v2 = vld [vmem:[%s10585_s14 + $0x110] sm:$0xff] }
 0x664   :  { %v8650_v14 = vcombine.low %v245_v39, %v253_v12  ;;  %v8651_v15 = vcombine.high %v245_v39, %v253_v12  ;;  %2787 = vmatprep.subr.bf16.mxu1 %v8649_v10  ;;  %v349_v6 = vld [vmem:[%s10585_s14 + $0x348] sm:$0xff]  ;;  %v364_v36 = vld [vmem:[%s10585_s14 + $0x3c0] sm:$0xff] }
 0x665   :  { %2021 = vadd.xlane.f32.xlu1 %v10948_v8  ;;  %v2027_v33 = vmul.f32 %v10948_v8, %v10948_v8  ;;  %2788 = vmatpush1.bf16.msra.mxu1 %v8648_v13  ;;  %v357_v39 = vld [vmem:[%s10585_s14 + $0x388] sm:$0xff]  ;;  %v8761_v10 = vcombine.high %v356_v38, %v364_v36  ;;  %v8760_v13 = vcombine.low %v356_v38, %v364_v36  ;;  %v294_v36 = vld [vmem:[%s10585_s14 + $0x190] sm:$0xff] }
 0x666   :  { %2830 = vmatprep.subr.bf16.mxu0 %v8651_v15  ;;  %2789 = vmatprep.subr.bf16.mxu1 %v8665_v22  ;;  %v365_v12 = vld [vmem:[%s10585_s14 + $0x3c8] sm:$0xff]  ;;  %v255_v22 = vld [vmem:[%s10585_s14 + $0x58] sm:$0xff] }
 0x667   :  { %2028 = vadd.xlane.f32.xlu0 %v2026_v9  ;;  %2831 = vmatpush1.bf16.msra.mxu0 %v8650_v14  ;;  %v8746_v9 = vcombine.low %v341_v3, %v349_v6  ;;  %v8762_v14 = vcombine.low %v357_v39, %v365_v12  ;;  %v8763_v15 = vcombine.high %v357_v39, %v365_v12  ;;  %v302_v39 = vld [vmem:[%s10585_s14 + $0x1d0] sm:$0xff]  ;;  %v303_v12 = vld [vmem:[%s10585_s14 + $0x1d8] sm:$0xff] }
 0x668   :  { %2832 = vmatprep.subr.bf16.mxu0 %v8667_v21  ;;  %v8655_v21 = vcombine.high %v247_v18, %v255_v22 }
 0x669   :  { %2790 = vmatpush1.bf16.msra.mxu1 %v8664_v20  ;;  %v8653_v20 = vcombine.high %v246_v16, %v254_v17  ;;  %v310_v17 = vld [vmem:[%s10585_s14 + $0x210] sm:$0xff] }
 0x66a   :  { %2791 = vmatprep.subr.bf16.mxu1 %v8681_v27 }
 0x66b   :  { %2030 = vadd.xlane.f32.xlu0 %v2027_v33  ;;  %2833 = vmatpush1.bf16.msra.mxu0 %v8666_v25  ;;  %v8747_v33 = vcombine.high %v341_v3, %v349_v6  ;;  %v8654_v25 = vcombine.low %v247_v18, %v255_v22  ;;  %v286_v3 = vld [vmem:[%s10585_s14 + $0x150] sm:$0xff]  ;;  %v287_v6 = vld [vmem:[%s10585_s14 + $0x158] sm:$0xff]  ;;  %v8700_v22 = vcombine.low %v294_v36, %v302_v39 }
 0x66c   :  { %2834 = vmatprep.subr.bf16.mxu0 %v8683_v34  ;;  %v318_v18 = vld [vmem:[%s10585_s14 + $0x250] sm:$0xff] }
 0x66d   :  { %2792 = vmatpush1.bf16.msra.mxu1 %v8680_v31 }
 0x66e   :  { %2793 = vmatprep.subr.bf16.mxu1 %v8697_v29 }
 0x66f   :  { %2835 = vmatpush1.bf16.msra.mxu0 %v8682_v32 }
 0x670   :  { %2836 = vmatprep.subr.bf16.mxu0 %v8699_v47 }
 0x671   :  { %2794 = vmatpush1.bf16.msra.mxu1 %v8696_v44 }
 0x672   :  { %2795 = vmatprep.subr.bf16.mxu1 %v8713_v51  ;;  %v8646_v51 = vld [vmem:[%s10575_s3] ss:$0 sm:$0xff]  ;;  %s11901_s3 = sld [smem:[#allocation12_spill]] }
 0x673   :  { %2837 = vmatpush1.bf16.msra.mxu0 %v8698_v46 }
 0x674   :  { %2838 = vmatprep.subr.bf16.mxu0 %v8715_v55 }
 0x675   :  { %2796 = vmatpush1.bf16.msra.mxu1 %v8712_v53 }
 0x676   :  { %2797 = vmatprep.subr.bf16.mxu1 %v8729_v60  ;;  %v270_v60 = vld [vmem:[%s10585_s14 + $0xd0] sm:$0xff] }
 0x677   :  { %2839 = vmatpush1.bf16.msra.mxu0 %v8714_v54 }
 0x678   :  { %2840 = vmatprep.subr.bf16.mxu0 %v8731_v63 }
 0x679   :  { %2798 = vmatpush1.bf16.msra.mxu1 %v8728_v57  ;;  %v271_v57 = vld [vmem:[%s10585_s14 + $0xd8] sm:$0xff] }
 0x67a   :  { %2799 = vmatprep.subr.bf16.mxu1 %v8745_v4  ;;  %v8671_v1 = vcombine.high %v263_v61, %v271_v57  ;;  %v279_v4 = vld [vmem:[%s10585_s14 + $0x118] sm:$0xff] }
 0x67b   :  { %2841 = vmatpush1.bf16.msra.mxu0 %v8730_v62  ;;  %v8687_v38 = vcombine.high %v279_v4, %v287_v6 }
 0x67c   :  { %2842 = vmatprep.subr.bf16.mxu0 %v8747_v33  ;;  %v8685_v33 = vcombine.high %v278_v2, %v286_v3 }
 0x67d   :  { %2800 = vmatpush1.bf16.msra.mxu1 %v8744_v7  ;;  %v8668_v7 = vcombine.low %v262_v59, %v270_v60 }
 0x67e   :  { %2801 = vmatprep.subr.bf16.mxu1 %v8761_v10  ;;  %v295_v10 = vld [vmem:[%s10585_s14 + $0x198] sm:$0xff] }
 0x67f   :  { %2843 = vmatpush1.bf16.msra.mxu0 %v8746_v9  ;;  %v8670_v9 = vcombine.low %v263_v61, %v271_v57  ;;  %v8703_v16 = vcombine.high %v295_v10, %v303_v12  ;;  %v257_v61 = vld [vmem:[%s10585_s14 + $0x68] sm:$0xff] }
 0x680   :  { %2844 = vmatprep.subr.bf16.mxu0 %v8763_v15  ;;  %v8701_v15 = vcombine.high %v294_v36, %v302_v39  ;;  %v280_v39 = vld [vmem:[%s10585_s14 + $0x120] sm:$0xff] }
 0x681   :  { %2802 = vmatpush1.bf16.msra.mxu1 %v8760_v13  ;;  %v8684_v13 = vcombine.low %v278_v2, %v286_v3  ;;  %v264_v3 = vld [vmem:[%s10585_s14 + $0xa0] sm:$0xff] }
 0x682   :  { %2873 = vmatprep.subr.bf16.mxu1 %v8653_v20  ;;  %v319_v20 = vld [vmem:[%s10585_s14 + $0x258] sm:$0xff] }
 0x683   :  { %2845 = vmatpush1.bf16.msra.mxu0 %v8762_v14  ;;  %v8686_v14 = vcombine.low %v279_v4, %v287_v6  ;;  %v272_v4 = vld [vmem:[%s10585_s14 + $0xe0] sm:$0xff]  ;;  %v265_v6 = vld [vmem:[%s10585_s14 + $0xa8] sm:$0xff] }
 0x684   :  { %2916 = vmatprep.subr.bf16.mxu0 %v8655_v21  ;;  %v8717_v21 = vcombine.high %v310_v17, %v318_v18 }
 0x6f0   :  { %v2020_v23 = vpop.xlane.xlu0 %2019 }
 0x6f1   :  { %v2024_v24 = vmul.f32 0.0078125, %v2020_v23 }
 0x6f2   :  { %v2022_v26 = vpop.xlane.xlu1 %2021 }
 0x6f3   :  { %v2034_v28 = vmul.f32 %v2024_v24, %v2024_v24  ;;  %v2025_v31 = vmul.f32 0.0078125, %v2022_v26  ;;  %v2040_v48 = vsub.f32 %v10944_v5, %v2024_v24  ;;  %v326_v24 = vld [vmem:[%s10585_s14 + $0x290] sm:$0xff] }
 0x6f4   :  { %v2029_v27 = vpop.xlane.xlu0 %2028  ;;  %v334_v26 = vld [vmem:[%s10585_s14 + $0x2d0] sm:$0xff] }
 0x6f5   :  { %v2032_v32 = vmul.f32 0.0078125, %v2029_v27  ;;  %v2035_v37 = vmul.f32 %v2025_v31, %v2025_v31  ;;  %v2041_v52 = vsub.f32 %v10948_v8, %v2025_v31  ;;  %v8669_v8 = vcombine.high %v262_v59, %v270_v60  ;;  %v327_v27 = vld [vmem:[%s10585_s14 + $0x298] sm:$0xff]  ;;  %v256_v59 = vld [vmem:[%s10585_s14 + $0x60] sm:$0xff]  ;;  %v249_v60 = vld [vmem:[%s10585_s14 + $0x28] sm:$0xff] }
 0x6f6   :  { %v8716_v31 = vcombine.low %v310_v17, %v318_v18  ;;  %v8659_v2 = vcombine.high %v249_v60, %v257_v61  ;;  %v296_v18 = vld [vmem:[%s10585_s14 + $0x1a0] sm:$0xff] }
 0x6f7   :  { %v2036_v34 = vsub.f32 %v2032_v32, %v2034_v28  ;;  %v335_v28 = vld [vmem:[%s10585_s14 + $0x2d8] sm:$0xff] }
 0x6f8   :  { %v2031_v35 = vpop.xlane.xlu0 %2030 }
 0x6f9   :  { %v2038_v40 = vmax.f32 %v2036_v34, 0.0  ;;  %v2033_v29 = vmul.f32 0.0078125, %v2031_v35  ;;  %v8733_v34 = vcombine.high %v326_v24, %v334_v26  ;;  %v8735_v35 = vcombine.high %v327_v27, %v335_v28 }
 0x6fb   :  { %v2042_v41 = vadd.f32 1e-05, %v2038_v40  ;;  %v2037_v44 = vsub.f32 %v2033_v29, %v2035_v37  ;;  %v342_v37 = vld [vmem:[%s10585_s14 + $0x310] sm:$0xff]  ;;  %v343_v29 = vld [vmem:[%s10585_s14 + $0x318] sm:$0xff] }
 0x6fc   :  { %v350_v40 = vld [vmem:[%s10585_s14 + $0x350] sm:$0xff] }
 0x6fd   :  { %10420 = vrsqrt.f32 %v2042_v41  ;;  %v2039_v46 = vmax.f32 %v2037_v44, 0.0  ;;  %v351_v41 = vld [vmem:[%s10585_s14 + $0x358] sm:$0xff]  ;;  %v8732_v44 = vcombine.low %v326_v24, %v334_v26  ;;  %v312_v26 = vld [vmem:[%s10585_s14 + $0x220] sm:$0xff] }
 0x6ff   :  { %v2043_v47 = vadd.f32 1e-05, %v2039_v46  ;;  %v8734_v46 = vcombine.low %v327_v27, %v335_v28  ;;  %v320_v27 = vld [vmem:[%s10585_s14 + $0x260] sm:$0xff]  ;;  %v313_v28 = vld [vmem:[%s10585_s14 + $0x228] sm:$0xff] }
 0x701   :  { %10422 = vrsqrt.f32 %v2043_v47  ;;  %v8749_v47 = vcombine.high %v342_v37, %v350_v40 }
 0x707   :  { %v10421_v49 = vpop.eup %10420 }
 0x708   :  { %v2046_v50 = vmul.f32 %v10421_v49, %v2040_v48  ;;  %v8751_v48 = vcombine.high %v343_v29, %v351_v41  ;;  %v358_v49 = vld [vmem:[%s10585_s14 + $0x390] sm:$0xff] }
 0x70a   :  { %v2054_v54 = vmul.f32 %v8646_v51, %v2046_v50  ;;  %v366_v50 = vld [vmem:[%s10585_s14 + $0x3d0] sm:$0xff] }
 0x70b   :  { %v10423_v53 = vpop.eup %10422  ;;  %v8764_v57 = vcombine.low %v358_v49, %v366_v50 }
 0x70c   :  { %v2047_v55 = vmul.f32 %v10423_v53, %v2041_v52  ;;  %v11000_v62 = vadd.f32 %v8647_v56, %v2054_v54  ;;  %v367_v52 = vld [vmem:[%s10585_s14 + $0x3d8] sm:$0xff]  ;;  %v8748_v53 = vcombine.low %v342_v37, %v350_v40  ;;  %v8750_v54 = vcombine.low %v343_v29, %v351_v41  ;;  %v328_v40 = vld [vmem:[%s10585_s14 + $0x2a0] sm:$0xff]  ;;  %v329_v41 = vld [vmem:[%s10585_s14 + $0x2a8] sm:$0xff] }
 0x70d   :  { %v336_v29 = vld [vmem:[%s10585_s14 + $0x2e0] sm:$0xff] }
 0x70e   :  { %v2055_v58 = vmul.f32 %v8646_v51, %v2047_v55  ;;  %v359_v51 = vld [vmem:[%s10585_s14 + $0x398] sm:$0xff]  ;;  %v8765_v55 = vcombine.high %v358_v49, %v366_v50  ;;  %v344_v50 = vld [vmem:[%s10585_s14 + $0x320] sm:$0xff] }
 0x710   :  { %v11002_v5 = vadd.f32 %v8647_v56, %v2055_v58  ;;  %v8767_v56 = vcombine.high %v359_v51, %v367_v52  ;;  %v248_v58 = vld [vmem:[%s10585_s14 + $0x20] sm:$0xff] }
 0x712   :  { %v11006_v63 = vpack.c.bf16 %v11002_v5, %v11000_v62 }
 0x714   :  { %2820 = vmatmul.mubr.bf16.vlgmr.msra.gmra.mrb[44].mxu1 %v11006_v63  ;;  %2863 = vmatmul.mubr.bf16.vlgmr.msra.gmra.mrb[48].mxu0 %v11006_v63 }
 0x715   :  { %2874 = vmatpush1.bf16.msra.mxu1 %v8652_v19  ;;  %2917 = vmatpush1.bf16.msra.mxu0 %v8654_v25  ;;  %v311_v19 = vld [vmem:[%s10585_s14 + $0x218] sm:$0xff]  ;;  %v8702_v25 = vcombine.low %v295_v10, %v303_v12  ;;  %v288_v10 = vld [vmem:[%s10585_s14 + $0x160] sm:$0xff]  ;;  %v281_v12 = vld [vmem:[%s10585_s14 + $0x128] sm:$0xff] }
 0x716   :  { %2875 = vmatprep.subr.bf16.mxu1 %v8669_v8  ;;  %2918 = vmatprep.subr.bf16.mxu0 %v8671_v1  ;;  %v8719_v23 = vcombine.high %v311_v19, %v319_v20  ;;  %v8718_v32 = vcombine.low %v311_v19, %v319_v20  ;;  %v8766_v8 = vcombine.low %v359_v51, %v367_v52  ;;  %v304_v19 = vld [vmem:[%s10585_s14 + $0x1e0] sm:$0xff]  ;;  %v297_v20 = vld [vmem:[%s10585_s14 + $0x1a8] sm:$0xff] }
 0x717   :  { %2905 = vmatprep.mubr.bf16.mxu1 %v10527_v30  ;;  %2948 = vmatprep.mubr.bf16.mxu0 %v10527_v30  ;;  %v8657_v1 = vcombine.high %v248_v58, %v256_v59  ;;  %v352_v51 = vld [vmem:[%s10585_s14 + $0x360] sm:$0xff]  ;;  %v345_v52 = vld [vmem:[%s10585_s14 + $0x328] sm:$0xff] }
 0x719   :  { %2876 = vmatpush1.bf16.msra.mxu1 %v8668_v7  ;;  %2919 = vmatpush1.bf16.msra.mxu0 %v8670_v9  ;;  %v273_v7 = vld [vmem:[%s10585_s14 + $0xe8] sm:$0xff]  ;;  %v8656_v9 = vcombine.low %v248_v58, %v256_v59  ;;  %v360_v59 = vld [vmem:[%s10585_s14 + $0x3a0] sm:$0xff] }
 0x71a   :  { %2877 = vmatprep.subr.bf16.mxu1 %v8685_v33  ;;  %2920 = vmatprep.subr.bf16.mxu0 %v8687_v38  ;;  %v8658_v33 = vcombine.low %v249_v60, %v257_v61  ;;  %v8673_v38 = vcombine.high %v264_v3, %v272_v4  ;;  %v8675_v36 = vcombine.high %v265_v6, %v273_v7  ;;  %v368_v60 = vld [vmem:[%s10585_s14 + $0x3e0] sm:$0xff]  ;;  %v361_v61 = vld [vmem:[%s10585_s14 + $0x3a8] sm:$0xff] }
 0x71d   :  { %2878 = vmatpush1.bf16.msra.mxu1 %v8684_v13  ;;  %2921 = vmatpush1.bf16.msra.mxu0 %v8686_v14  ;;  %v289_v13 = vld [vmem:[%s10585_s14 + $0x168] sm:$0xff]  ;;  %v8672_v14 = vcombine.low %v264_v3, %v272_v4  ;;  %v250_v4 = vld [vmem:[%s10585_s14 + $0x30] sm:$0xff] }
 0x71e   :  { %2879 = vmatprep.subr.bf16.mxu1 %v8701_v15  ;;  %2922 = vmatprep.subr.bf16.mxu0 %v8703_v16  ;;  %v8674_v15 = vcombine.low %v265_v6, %v273_v7  ;;  %v8689_v16 = vcombine.high %v280_v39, %v288_v10  ;;  %v8691_v17 = vcombine.high %v281_v12, %v289_v13  ;;  %v258_v6 = vld [vmem:[%s10585_s14 + $0x70] sm:$0xff]  ;;  %v251_v7 = vld [vmem:[%s10585_s14 + $0x38] sm:$0xff] }
 0x721   :  { %2880 = vmatpush1.bf16.msra.mxu1 %v8700_v22  ;;  %2923 = vmatpush1.bf16.msra.mxu0 %v8702_v25  ;;  %v305_v22 = vld [vmem:[%s10585_s14 + $0x1e8] sm:$0xff]  ;;  %v8688_v25 = vcombine.low %v280_v39, %v288_v10  ;;  %v266_v10 = vld [vmem:[%s10585_s14 + $0xb0] sm:$0xff] }
 0x722   :  { %2881 = vmatprep.subr.bf16.mxu1 %v8717_v21  ;;  %2924 = vmatprep.subr.bf16.mxu0 %v8719_v23  ;;  %v8690_v21 = vcombine.low %v281_v12, %v289_v13  ;;  %v8705_v23 = vcombine.high %v296_v18, %v304_v19  ;;  %v8707_v24 = vcombine.high %v297_v20, %v305_v22  ;;  %v274_v12 = vld [vmem:[%s10585_s14 + $0xf0] sm:$0xff]  ;;  %v267_v13 = vld [vmem:[%s10585_s14 + $0xb8] sm:$0xff] }
 0x725   :  { %2882 = vmatpush1.bf16.msra.mxu1 %v8716_v31  ;;  %2925 = vmatpush1.bf16.msra.mxu0 %v8718_v32  ;;  %v321_v31 = vld [vmem:[%s10585_s14 + $0x268] sm:$0xff]  ;;  %v8704_v32 = vcombine.low %v296_v18, %v304_v19  ;;  %v282_v19 = vld [vmem:[%s10585_s14 + $0x130] sm:$0xff] }
 0x726   :  { %2883 = vmatprep.subr.bf16.mxu1 %v8733_v34  ;;  %2926 = vmatprep.subr.bf16.mxu0 %v8735_v35  ;;  %v8706_v34 = vcombine.low %v297_v20, %v305_v22  ;;  %v8721_v35 = vcombine.high %v312_v26, %v320_v27  ;;  %v8723_v37 = vcombine.high %v313_v28, %v321_v31  ;;  %v290_v20 = vld [vmem:[%s10585_s14 + $0x170] sm:$0xff]  ;;  %v283_v22 = vld [vmem:[%s10585_s14 + $0x138] sm:$0xff] }
 0x729   :  { %2884 = vmatpush1.bf16.msra.mxu1 %v8732_v44  ;;  %2927 = vmatpush1.bf16.msra.mxu0 %v8734_v46  ;;  %v337_v44 = vld [vmem:[%s10585_s14 + $0x2e8] sm:$0xff]  ;;  %v8720_v46 = vcombine.low %v312_v26, %v320_v27  ;;  %v298_v27 = vld [vmem:[%s10585_s14 + $0x1b0] sm:$0xff] }
 0x72a   :  { %2885 = vmatprep.subr.bf16.mxu1 %v8749_v47  ;;  %2928 = vmatprep.subr.bf16.mxu0 %v8751_v48  ;;  %v8722_v47 = vcombine.low %v313_v28, %v321_v31  ;;  %v8737_v48 = vcombine.high %v328_v40, %v336_v29  ;;  %v8739_v49 = vcombine.high %v329_v41, %v337_v44  ;;  %v306_v28 = vld [vmem:[%s10585_s14 + $0x1f0] sm:$0xff]  ;;  %v299_v31 = vld [vmem:[%s10585_s14 + $0x1b8] sm:$0xff] }
 0x72d   :  { %2886 = vmatpush1.bf16.msra.mxu1 %v8748_v53  ;;  %2929 = vmatpush1.bf16.msra.mxu0 %v8750_v54  ;;  %v353_v53 = vld [vmem:[%s10585_s14 + $0x368] sm:$0xff]  ;;  %v8736_v54 = vcombine.low %v328_v40, %v336_v29  ;;  %v314_v29 = vld [vmem:[%s10585_s14 + $0x230] sm:$0xff] }
 0x72e   :  { %2887 = vmatprep.subr.bf16.mxu1 %v8765_v55  ;;  %2930 = vmatprep.subr.bf16.mxu0 %v8767_v56  ;;  %v8738_v55 = vcombine.low %v329_v41, %v337_v44  ;;  %v8753_v56 = vcombine.high %v344_v50, %v352_v51  ;;  %v8755_v58 = vcombine.high %v345_v52, %v353_v53  ;;  %v322_v41 = vld [vmem:[%s10585_s14 + $0x270] sm:$0xff]  ;;  %v315_v44 = vld [vmem:[%s10585_s14 + $0x238] sm:$0xff] }
 0x731   :  { %2888 = vmatpush1.bf16.msra.mxu1 %v8764_v57  ;;  %2931 = vmatpush1.bf16.msra.mxu0 %v8766_v8  ;;  %v369_v57 = vld [vmem:[%s10585_s14 + $0x3e8] sm:$0xff]  ;;  %v8752_v8 = vcombine.low %v344_v50, %v352_v51  ;;  %v330_v51 = vld [vmem:[%s10585_s14 + $0x2b0] sm:$0xff] }
 0x732   :  { %2959 = vmatprep.subr.bf16.mxu1 %v8657_v1  ;;  %3002 = vmatprep.subr.bf16.mxu0 %v8659_v2  ;;  %v8754_v1 = vcombine.low %v345_v52, %v353_v53  ;;  %v8769_v2 = vcombine.high %v360_v59, %v368_v60  ;;  %v8771_v3 = vcombine.high %v361_v61, %v369_v57  ;;  %v338_v52 = vld [vmem:[%s10585_s14 + $0x2f0] sm:$0xff]  ;;  %v331_v53 = vld [vmem:[%s10585_s14 + $0x2b8] sm:$0xff] }
 0x734   :  { %2906 = vmatmul.mubr.bf16.vlgmr.msra.gmra.mrb[48].mxu1 %v11006_v63  ;;  %2949 = vmatmul.mubr.bf16.vlgmr.msra.gmra.mrb[52].mxu0 %v11006_v63 }
 0x735   :  { %2960 = vmatpush1.bf16.msra.mxu1 %v8656_v9  ;;  %3003 = vmatpush1.bf16.msra.mxu0 %v8658_v33  ;;  %v259_v9 = vld [vmem:[%s10585_s14 + $0x78] sm:$0xff]  ;;  %v8768_v33 = vcombine.low %v360_v59, %v368_v60  ;;  %v346_v60 = vld [vmem:[%s10585_s14 + $0x330] sm:$0xff] }
 0x736   :  { %2961 = vmatprep.subr.bf16.mxu1 %v8673_v38  ;;  %3004 = vmatprep.subr.bf16.mxu0 %v8675_v36  ;;  %v8770_v38 = vcombine.low %v361_v61, %v369_v57  ;;  %v8661_v36 = vcombine.high %v250_v4, %v258_v6  ;;  %v8663_v39 = vcombine.high %v251_v7, %v259_v9  ;;  %v354_v61 = vld [vmem:[%s10585_s14 + $0x370] sm:$0xff]  ;;  %v347_v57 = vld [vmem:[%s10585_s14 + $0x338] sm:$0xff] }
 0x737   :  { %2991 = vmatprep.mubr.bf16.mxu1 %v10527_v30  ;;  %3034 = vmatprep.mubr.bf16.mxu0 %v10527_v30 }
 0x739   :  { %2962 = vmatpush1.bf16.msra.mxu1 %v8672_v14  ;;  %3005 = vmatpush1.bf16.msra.mxu0 %v8674_v15  ;;  %v275_v14 = vld [vmem:[%s10585_s14 + $0xf8] sm:$0xff]  ;;  %v8660_v15 = vcombine.low %v250_v4, %v258_v6  ;;  %v362_v6 = vld [vmem:[%s10585_s14 + $0x3b0] sm:$0xff] }
 0x73a   :  { %2963 = vmatprep.subr.bf16.mxu1 %v8689_v16  ;;  %3006 = vmatprep.subr.bf16.mxu0 %v8691_v17  ;;  %v8662_v16 = vcombine.low %v251_v7, %v259_v9  ;;  %v8677_v17 = vcombine.high %v266_v10, %v274_v12  ;;  %v8679_v18 = vcombine.high %v267_v13, %v275_v14  ;;  %v370_v7 = vld [vmem:[%s10585_s14 + $0x3f0] sm:$0xff]  ;;  %v363_v9 = vld [vmem:[%s10585_s14 + $0x3b8] sm:$0xff] }
 0x73d   :  { %2964 = vmatpush1.bf16.msra.mxu1 %v8688_v25  ;;  %3007 = vmatpush1.bf16.msra.mxu0 %v8690_v21  ;;  %v291_v25 = vld [vmem:[%s10585_s14 + $0x178] sm:$0xff]  ;;  %v8676_v21 = vcombine.low %v266_v10, %v274_v12  ;;  %v8772_v12 = vcombine.low %v362_v6, %v370_v7 }
 0x73e   :  { %2965 = vmatprep.subr.bf16.mxu1 %v8705_v23  ;;  %3008 = vmatprep.subr.bf16.mxu0 %v8707_v24  ;;  %v8678_v23 = vcombine.low %v267_v13, %v275_v14  ;;  %v8693_v24 = vcombine.high %v282_v19, %v290_v20  ;;  %v8695_v26 = vcombine.high %v283_v22, %v291_v25  ;;  %v10092_v14 = vld [vmem:[%s10595_s24 + $0x40] sm:$0xff]  }
 0x741   :  { %2966 = vmatpush1.bf16.msra.mxu1 %v8704_v32  ;;  %3009 = vmatpush1.bf16.msra.mxu0 %v8706_v34  ;;  %v307_v32 = vld [vmem:[%s10585_s14 + $0x1f8] sm:$0xff]  ;;  %v8692_v34 = vcombine.low %v282_v19, %v290_v20  ;;  %v10097_v19 = vld [vmem:[%s10595_s24 + $0xc8] sm:$0xff]  }
 0x742   :  { %2967 = vmatprep.subr.bf16.mxu1 %v8721_v35  ;;  %3010 = vmatprep.subr.bf16.mxu0 %v8723_v37  ;;  %v8694_v35 = vcombine.low %v283_v22, %v291_v25  ;;  %v8709_v37 = vcombine.high %v298_v27, %v306_v28  ;;  %v8711_v40 = vcombine.high %v299_v31, %v307_v32  ;;  %v10098_v20 = vld [vmem:[%s10595_s24 + $0x8] sm:$0xff]   ;;  %v10100_v25 = vld [vmem:[%s10595_s24 + $0x50] sm:$0xff]  }
 0x743   :  { %v10099_v22 = vld [vmem:[%s10595_s24 + $0x88] sm:$0xff]  }
 0x745   :  { %2968 = vmatpush1.bf16.msra.mxu1 %v8720_v46  ;;  %3011 = vmatpush1.bf16.msra.mxu0 %v8722_v47  ;;  %v323_v46 = vld [vmem:[%s10585_s14 + $0x278] sm:$0xff]  ;;  %v8708_v47 = vcombine.low %v298_v27, %v306_v28 }
 0x746   :  { %2969 = vmatprep.subr.bf16.mxu1 %v8737_v48  ;;  %3012 = vmatprep.subr.bf16.mxu0 %v8739_v49  ;;  %v8710_v48 = vcombine.low %v299_v31, %v307_v32  ;;  %v8725_v49 = vcombine.high %v314_v29, %v322_v41  ;;  %v8727_v50 = vcombine.high %v315_v44, %v323_v46  ;;  %v10106_v27 = vld [vmem:[%s10595_s24 + $0x18] sm:$0xff]   ;;  %v10108_v31 = vld [vmem:[%s10595_s24 + $0x60] sm:$0xff]  }
 0x747   :  { %v10107_v28 = vld [vmem:[%s10595_s24 + $0x98] sm:$0xff]   ;;  %v10109_v32 = vld [vmem:[%s10595_s24 + $0xe0] sm:$0xff]  }
 0x749   :  { %2970 = vmatpush1.bf16.msra.mxu1 %v8736_v54  ;;  %3013 = vmatpush1.bf16.msra.mxu0 %v8738_v55  ;;  %v339_v54 = vld [vmem:[%s10585_s14 + $0x2f8] sm:$0xff]  ;;  %v8724_v55 = vcombine.low %v314_v29, %v322_v41  ;;  %v10114_v29 = vld [vmem:[%s10595_s24 + $0x28] sm:$0xff]  }
 0x74a   :  { %2971 = vmatprep.subr.bf16.mxu1 %v8753_v56  ;;  %3014 = vmatprep.subr.bf16.mxu0 %v8755_v58  ;;  %v8726_v56 = vcombine.low %v315_v44, %v323_v46  ;;  %v8741_v58 = vcombine.high %v330_v51, %v338_v52  ;;  %v8743_v59 = vcombine.high %v331_v53, %v339_v54  ;;  %v10115_v41 = vld [vmem:[%s10595_s24 + $0xa8] sm:$0xff]   ;;  %v10116_v44 = vld [vmem:[%s10595_s24 + $0x70] sm:$0xff]  }
 0x74b   :  { %v10117_v46 = vld [vmem:[%s10595_s24 + $0xf0] sm:$0xff]  }
 0x74d   :  { %2972 = vmatpush1.bf16.msra.mxu1 %v8752_v8  ;;  %3015 = vmatpush1.bf16.msra.mxu0 %v8754_v1  ;;  %v355_v8 = vld [vmem:[%s10585_s14 + $0x378] sm:$0xff]  ;;  %v8740_v1 = vcombine.low %v330_v51, %v338_v52 }
 0x74e   :  { %2973 = vmatprep.subr.bf16.mxu1 %v8769_v2  ;;  %3016 = vmatprep.subr.bf16.mxu0 %v8771_v3  ;;  %v8742_v2 = vcombine.low %v331_v53, %v339_v54  ;;  %v8757_v3 = vcombine.high %v346_v60, %v354_v61  ;;  %v8759_v4 = vcombine.high %v347_v57, %v355_v8  ;;  %v10122_v51 = vld [vmem:[%s10595_s24 + $0x38] sm:$0xff]   ;;  %v10124_v53 = vld [vmem:[%s10595_s24 + $0x140] sm:$0xff]  }
 0x74f   :  { %v10123_v52 = vld [vmem:[%s10595_s24 + $0xb8] sm:$0xff]   ;;  %v10125_v54 = vld [vmem:[%s10595_s24 + $0x1c0] sm:$0xff]  }
 0x751   :  { %2974 = vmatpush1.bf16.msra.mxu1 %v8768_v33  ;;  %3017 = vmatpush1.bf16.msra.mxu0 %v8770_v38  ;;  %v371_v33 = vld [vmem:[%s10585_s14 + $0x3f8] sm:$0xff]  ;;  %v8756_v38 = vcombine.low %v346_v60, %v354_v61  ;;  %s11903_s14 = sld [smem:[#allocation11_spill]] }
 0x752   :  { %3045 = vmatprep.subr.bf16.mxu1 %v8661_v36  ;;  %3088 = vmatprep.subr.bf16.mxu0 %v8663_v39  ;;  %v8758_v36 = vcombine.low %v347_v57, %v355_v8  ;;  %v8773_v39 = vcombine.high %v362_v6, %v370_v7  ;;  %v8775_v10 = vcombine.high %v363_v9, %v371_v33 }
 0x753   :  { %v8774_v13 = vcombine.low %v363_v9, %v371_v33 }
 0x754   :  { %2992 = vmatmul.mubr.bf16.vlgmr.msra.gmra.mrb[52].mxu1 %v11006_v63  ;;  %3035 = vmatmul.mubr.bf16.vlgmr.msra.gmra.mrb[56].mxu0 %v11006_v63 }
 0x755   :  { %3046 = vmatpush1.bf16.msra.mxu1 %v8660_v15  ;;  %3089 = vmatpush1.bf16.msra.mxu0 %v8662_v16  ;;  %v10093_v15 = vld [vmem:[%s10595_s24 + $0xc0] sm:$0xff]  }
 0x756   :  { %3047 = vmatprep.subr.bf16.mxu1 %v8677_v17  ;;  %3090 = vmatprep.subr.bf16.mxu0 %v8679_v18  ;;  %v10094_v16 = vld [vmem:[%s10595_s24] sm:$0xff]   ;;  %v10096_v18 = vld [vmem:[%s10595_s24 + $0x48] sm:$0xff]  }
 0x757   :  { %3077 = vmatprep.mubr.bf16.mxu1 %v10527_v30  ;;  %3120 = vmatprep.mubr.bf16.mxu0 %v10527_v30  ;;  %v10095_v17 = vld [vmem:[%s10595_s24 + $0x80] sm:$0xff]  }
 0x759   :  { %3048 = vmatpush1.bf16.msra.mxu1 %v8676_v21  ;;  %3091 = vmatpush1.bf16.msra.mxu0 %v8678_v23  ;;  %v10101_v21 = vld [vmem:[%s10595_s24 + $0xd0] sm:$0xff]  }
 0x75a   :  { %3049 = vmatprep.subr.bf16.mxu1 %v8693_v24  ;;  %3092 = vmatprep.subr.bf16.mxu0 %v8695_v26  ;;  %v10102_v23 = vld [vmem:[%s10595_s24 + $0x10] sm:$0xff]   ;;  %v10105_v26 = vld [vmem:[%s10595_s24 + $0xd8] sm:$0xff]  }
 0x75b   :  { %v10103_v24 = vld [vmem:[%s10595_s24 + $0x90] sm:$0xff]  }
 0x75d   :  { %3050 = vmatpush1.bf16.msra.mxu1 %v8692_v34  ;;  %3093 = vmatpush1.bf16.msra.mxu0 %v8694_v35  ;;  %v10110_v34 = vld [vmem:[%s10595_s24 + $0x20] sm:$0xff]  }
 0x75e   :  { %3051 = vmatprep.subr.bf16.mxu1 %v8709_v37  ;;  %3094 = vmatprep.subr.bf16.mxu0 %v8711_v40  ;;  %v10111_v35 = vld [vmem:[%s10595_s24 + $0xa0] sm:$0xff]   ;;  %v10112_v37 = vld [vmem:[%s10595_s24 + $0x68] sm:$0xff]  }
 0x75f   :  { %v10113_v40 = vld [vmem:[%s10595_s24 + $0xe8] sm:$0xff]  }
 0x761   :  { %3052 = vmatpush1.bf16.msra.mxu1 %v8708_v47  ;;  %3095 = vmatpush1.bf16.msra.mxu0 %v8710_v48  ;;  %v10118_v47 = vld [vmem:[%s10595_s24 + $0x30] sm:$0xff]  }
 0x762   :  { %3053 = vmatprep.subr.bf16.mxu1 %v8725_v49  ;;  %3096 = vmatprep.subr.bf16.mxu0 %v8727_v50  ;;  %v10119_v48 = vld [vmem:[%s10595_s24 + $0xb0] sm:$0xff]   ;;  %v10120_v49 = vld [vmem:[%s10595_s24 + $0x78] sm:$0xff]  }
 0x763   :  { %v10121_v50 = vld [vmem:[%s10595_s24 + $0xf8] sm:$0xff]  }
 0x765   :  { %3054 = vmatpush1.bf16.msra.mxu1 %v8724_v55  ;;  %3097 = vmatpush1.bf16.msra.mxu0 %v8726_v56  ;;  %v11145_v55 = vld [vmem:[%s10590_s19] sm:$0xff]  ;;  %v11148_v56 = vsub.s32 3, %v10745_v42 }
 0x766   :  { %3055 = vmatprep.subr.bf16.mxu1 %v8741_v58  ;;  %3098 = vmatprep.subr.bf16.mxu0 %v8743_v59  ;;  %v2070_v58 = vrot.slane %v11145_v55, %v10748_v43  ;;  %v2078_v59 = vrot.slane %v11145_v55, %v10791_v11  ;;  %v2074_v60 = vrot.slane %v11145_v55, %v10754_v45 }
 0x767   :  { %v2082_v61 = vrot.slane %v11145_v55, %v11148_v56 }
 0x769   :  { %3056 = vmatpush1.bf16.msra.mxu1 %v8740_v1  ;;  %3099 = vmatpush1.bf16.msra.mxu0 %v8742_v2 }
 0x76a   :  { %3057 = vmatprep.subr.bf16.mxu1 %v8757_v3  ;;  %3100 = vmatprep.subr.bf16.mxu0 %v8759_v4 }
 0x76d   :  { %3058 = vmatpush1.bf16.msra.mxu1 %v8756_v38  ;;  %3101 = vmatpush1.bf16.msra.mxu0 %v8758_v36 }
 0x76e   :  { %3059 = vmatprep.subr.bf16.mxu1 %v8773_v39  ;;  %3102 = vmatprep.subr.bf16.mxu0 %v8775_v10 }
 0x771   :  { %3060 = vmatpush1.bf16.msra.mxu1 %v8772_v12  ;;  %3103 = vmatpush1.bf16.msra.mxu0 %v8774_v13 }
 0x772   :  { %9308 = vmatprep.subr.bf16.mxu1 %v10092_v14  ;;  %9330 = vmatprep.subr.bf16.mxu0 %v10093_v15 }
 0x774   :  { %3078 = vmatmul.mubr.bf16.vlgmr.msra.gmra.mrb[56].mxu1 %v11006_v63  ;;  %3121 = vmatmul.mubr.bf16.vlgmr.msra.gmra.mrb[60].mxu0 %v11006_v63  ;;  %v10104_v63 = vld [vmem:[%s10595_s24 + $0x58] sm:$0xff]  }
 0x775   :  { %9309 = vmatpush3.bf16.msra.mxu1 %v10094_v16  ;;  %9331 = vmatpush3.bf16.msra.mxu0 %v10095_v17 }
 0x776   :  { %9310 = vmatprep.subr.bf16.mxu1 %v10096_v18  ;;  %9332 = vmatprep.subr.bf16.mxu0 %v10097_v19 }
 0x779   :  { %9311 = vmatpush3.bf16.msra.mxu1 %v10098_v20  ;;  %9333 = vmatpush3.bf16.msra.mxu0 %v10099_v22 }
 0x77a   :  { %9312 = vmatprep.subr.bf16.mxu1 %v10100_v25  ;;  %9334 = vmatprep.subr.bf16.mxu0 %v10101_v21 }
 0x77d   :  { %9313 = vmatpush3.bf16.msra.mxu1 %v10102_v23  ;;  %9335 = vmatpush3.bf16.msra.mxu0 %v10103_v24 }
 0x77e   :  { %9314 = vmatprep.subr.bf16.mxu1 %v10104_v63  ;;  %9336 = vmatprep.subr.bf16.mxu0 %v10105_v26  ;;  %v10126_v63 = vld [vmem:[%s10595_s24 + $0x100] sm:$0xff]  }
 0x77f   :  { %v10127_v26 = vld [vmem:[%s10595_s24 + $0x180] sm:$0xff]  }
 0x781   :  { %9315 = vmatpush3.bf16.msra.mxu1 %v10106_v27  ;;  %9337 = vmatpush3.bf16.msra.mxu0 %v10107_v28  ;;  %v10128_v27 = vld [vmem:[%s10595_s24 + $0x148] sm:$0xff]  }
 0x782   :  { %9316 = vmatprep.subr.bf16.mxu1 %v10108_v31  ;;  %9338 = vmatprep.subr.bf16.mxu0 %v10109_v32  ;;  %v10129_v28 = vld [vmem:[%s10595_s24 + $0x1c8] sm:$0xff]  }
 0x783   :  { %v10130_v31 = vld [vmem:[%s10595_s24 + $0x108] sm:$0xff]  }
 0x784   :  { %v10131_v32 = vld [vmem:[%s10595_s24 + $0x188] sm:$0xff]  }
 0x785   :  { %9317 = vmatpush3.bf16.msra.mxu1 %v10110_v34  ;;  %9339 = vmatpush3.bf16.msra.mxu0 %v10111_v35  ;;  %v10132_v34 = vld [vmem:[%s10595_s24 + $0x150] sm:$0xff]  }
 0x786   :  { %9318 = vmatprep.subr.bf16.mxu1 %v10112_v37  ;;  %9340 = vmatprep.subr.bf16.mxu0 %v10113_v40  ;;  %v10133_v35 = vld [vmem:[%s10595_s24 + $0x1d0] sm:$0xff]  }
 0x787   :  { %v10134_v37 = vld [vmem:[%s10595_s24 + $0x110] sm:$0xff]  }
 0x788   :  { %v10135_v40 = vld [vmem:[%s10595_s24 + $0x190] sm:$0xff]  }
 0x789   :  { %9319 = vmatpush3.bf16.msra.mxu1 %v10114_v29  ;;  %9341 = vmatpush3.bf16.msra.mxu0 %v10115_v41  ;;  %v10136_v29 = vld [vmem:[%s10595_s24 + $0x158] sm:$0xff]  }
 0x78a   :  { %9320 = vmatprep.subr.bf16.mxu1 %v10116_v44  ;;  %9342 = vmatprep.subr.bf16.mxu0 %v10117_v46  ;;  %v10137_v41 = vld [vmem:[%s10595_s24 + $0x1d8] sm:$0xff]  }
 0x78b   :  { %v10138_v44 = vld [vmem:[%s10595_s24 + $0x118] sm:$0xff]  }
 0x78c   :  { %v10139_v46 = vld [vmem:[%s10595_s24 + $0x198] sm:$0xff]  }
 0x78d   :  { %9321 = vmatpush3.bf16.msra.mxu1 %v10118_v47  ;;  %9343 = vmatpush3.bf16.msra.mxu0 %v10119_v48  ;;  %v10140_v47 = vld [vmem:[%s10595_s24 + $0x160] sm:$0xff]  }
 0x78e   :  { %9322 = vmatprep.subr.bf16.mxu1 %v10120_v49  ;;  %9344 = vmatprep.subr.bf16.mxu0 %v10121_v50  ;;  %v10141_v48 = vld [vmem:[%s10595_s24 + $0x1e0] sm:$0xff]  }
 0x78f   :  { %v10142_v49 = vld [vmem:[%s10595_s24 + $0x120] sm:$0xff]  }
 0x790   :  { %v10143_v50 = vld [vmem:[%s10595_s24 + $0x1a0] sm:$0xff]  }
 0x791   :  { %9323 = vmatpush3.bf16.msra.mxu1 %v10122_v51  ;;  %9345 = vmatpush3.bf16.msra.mxu0 %v10123_v52  ;;  %v10144_v51 = vld [vmem:[%s10595_s24 + $0x168] sm:$0xff]  }
 0x792   :  { %9352 = vmatprep.subr.bf16.mxu1 %v10124_v53  ;;  %9374 = vmatprep.subr.bf16.mxu0 %v10125_v54  ;;  %v10145_v52 = vld [vmem:[%s10595_s24 + $0x1e8] sm:$0xff]   ;;  %v11179_v53 = vsub.s32 4, %v10745_v42  ;;  %v11182_v54 = vsub.s32 6, %v10745_v42 }
 0x7e7   :  { %v2821_v57 = vpop.f32.mrb[44].mxu1  ;;  %v2864_v8 = vpop.f32.mrb[48].mxu0 }
 0x7e8   :  { %v2822_v1 = vadd.f32 %v2821_v57, %v2070_v58  ;;  %v2865_v2 = vadd.f32 %v2864_v8, %v2078_v59  ;;  %v2823_v3 = vpop.f32.mrb[45].mxu1  ;;  %v2866_v4 = vpop.f32.mrb[49].mxu0  ;;  %v2086_v57 = vrot.slane %v11145_v55, %v11179_v53  ;;  %v2094_v8 = vrot.slane %v11145_v55, %v11182_v54 }
 0x7e9   :  { %v2824_v6 = vadd.f32 %v2823_v3, %v2074_v60  ;;  %v2867_v7 = vadd.f32 %v2866_v4, %v2082_v61  ;;  %v2825_v9 = vpop.f32.mrb[46].mxu1  ;;  %v2868_v33 = vpop.f32.mrb[50].mxu0 }
 0x7ea   :  { %v2826_v38 = vadd.f32 %v2825_v9, %v2070_v58  ;;  %v2869_v36 = vadd.f32 %v2868_v33, %v2078_v59  ;;  %v2827_v39 = vpop.f32.mrb[47].mxu1  ;;  %v2870_v10 = vpop.f32.mrb[51].mxu0  ;;  %v3131_v14 = vmax.f32 %v2822_v1, 0.0  ;;  %v3133_v15 = vmax.f32 %v2865_v2, 0.0  ;;  %v10148_v1 = vld [vmem:[%s10595_s24 + $0x170] sm:$0xff]  }
 0x7eb   :  { %v2828_v12 = vadd.f32 %v2827_v39, %v2074_v60  ;;  %v2871_v13 = vadd.f32 %v2870_v10, %v2082_v61  ;;  %v3132_v18 = vmax.f32 %v2824_v6, 0.0  ;;  %v3134_v19 = vmax.f32 %v2867_v7, 0.0  ;;  %v10146_v60 = vld [vmem:[%s10595_s24 + $0x128] sm:$0xff]   ;;  %v10149_v2 = vld [vmem:[%s10595_s24 + $0x1f0] sm:$0xff]   ;;  %v10152_v10 = vld [vmem:[%s10595_s24 + $0x178] sm:$0xff]  }
 0x7ec   :  { %v3147_v16 = vmax.f32 %v2826_v38, 0.0  ;;  %v3149_v17 = vmax.f32 %v2869_v36, 0.0  ;;  %v11185_v58 = vsub.s32 5, %v10745_v42  ;;  %v11188_v59 = vsub.s32 7, %v10745_v42  ;;  %v10147_v61 = vld [vmem:[%s10595_s24 + $0x1a8] sm:$0xff]   ;;  %v10150_v7 = vld [vmem:[%s10595_s24 + $0x130] sm:$0xff]  }
 0x7ed   :  { %v3148_v20 = vmax.f32 %v2828_v12, 0.0  ;;  %v3150_v22 = vmax.f32 %v2871_v13, 0.0  ;;  %v10151_v9 = vld [vmem:[%s10595_s24 + $0x1b0] sm:$0xff]   ;;  %v10153_v12 = vld [vmem:[%s10595_s24 + $0x1f8] sm:$0xff]  }
 0x7ee   :  { %v3163_v25 = vpack.c.bf16 %v3147_v16, %v3131_v14  ;;  %v3165_v21 = vpack.c.bf16 %v3149_v17, %v3133_v15  ;;  %v2090_v42 = vrot.slane %v11145_v55, %v11185_v58  ;;  %v2098_v3 = vrot.slane %v11145_v55, %v11188_v59 }
 0x7ef   :  { %v3164_v23 = vpack.c.bf16 %v3148_v20, %v3132_v18  ;;  %v3166_v24 = vpack.c.bf16 %v3150_v22, %v3134_v19 }
 0x7f1   :  { %3985 = vmatprep.mubr.bf16.mxu1 %v3164_v23  ;;  %4026 = vmatprep.mubr.bf16.mxu0 %v3166_v24 }
 0x7f2   :  { %3986 = vmatmul.mubr.bf16.vlgmr.msra.gmra.mrb[60].mxu1 %v3163_v25  ;;  %4027 = vmatmul.mubr.bf16.vlgmr.msra.gmra.mrb[64].mxu0 %v3165_v21  ;;  %v10154_v25 = vld [vmem:[%s10595_s24 + $0x138] sm:$0xff]  }
 0x7f3   :  { %9353 = vmatpush3.bf16.msra.mxu1 %v10126_v63  ;;  %9375 = vmatpush3.bf16.msra.mxu0 %v10127_v26  ;;  %v10155_v21 = vld [vmem:[%s10595_s24 + $0x1b8] sm:$0xff]  }
 0x7f4   :  { %9354 = vmatprep.subr.bf16.mxu1 %v10128_v27  ;;  %9376 = vmatprep.subr.bf16.mxu0 %v10129_v28  ;;  %v10156_v27 = vld [vmem:[%s10595_s24 + $0x240] sm:$0xff]  }
 0x7f5   :  { %v10157_v28 = vld [vmem:[%s10595_s24 + $0x2c0] sm:$0xff]  }
 0x7f7   :  { %9355 = vmatpush3.bf16.msra.mxu1 %v10130_v31  ;;  %9377 = vmatpush3.bf16.msra.mxu0 %v10131_v32 }
 0x7f8   :  { %9356 = vmatprep.subr.bf16.mxu1 %v10132_v34  ;;  %9378 = vmatprep.subr.bf16.mxu0 %v10133_v35 }
 0x7fb   :  { %9357 = vmatpush3.bf16.msra.mxu1 %v10134_v37  ;;  %9379 = vmatpush3.bf16.msra.mxu0 %v10135_v40 }
 0x7fc   :  { %9358 = vmatprep.subr.bf16.mxu1 %v10136_v29  ;;  %9380 = vmatprep.subr.bf16.mxu0 %v10137_v41 }
 0x7ff   :  { %9359 = vmatpush3.bf16.msra.mxu1 %v10138_v44  ;;  %9381 = vmatpush3.bf16.msra.mxu0 %v10139_v46  ;;  %v10158_v44 = vld [vmem:[%s10595_s24 + $0x200] sm:$0xff]  }
 0x800   :  { %9360 = vmatprep.subr.bf16.mxu1 %v10140_v47  ;;  %9382 = vmatprep.subr.bf16.mxu0 %v10141_v48  ;;  %v10159_v46 = vld [vmem:[%s10595_s24 + $0x280] sm:$0xff]   ;;  %v10160_v47 = vld [vmem:[%s10595_s24 + $0x248] sm:$0xff]  }
 0x801   :  { %v10161_v48 = vld [vmem:[%s10595_s24 + $0x2c8] sm:$0xff]  }
 0x803   :  { %9361 = vmatpush3.bf16.msra.mxu1 %v10142_v49  ;;  %9383 = vmatpush3.bf16.msra.mxu0 %v10143_v50  ;;  %v10162_v49 = vld [vmem:[%s10595_s24 + $0x208] sm:$0xff]  }
 0x804   :  { %9362 = vmatprep.subr.bf16.mxu1 %v10144_v51  ;;  %9384 = vmatprep.subr.bf16.mxu0 %v10145_v52  ;;  %v10163_v50 = vld [vmem:[%s10595_s24 + $0x288] sm:$0xff]   ;;  %v10164_v51 = vld [vmem:[%s10595_s24 + $0x250] sm:$0xff]  }
 0x805   :  { %v10165_v52 = vld [vmem:[%s10595_s24 + $0x2d0] sm:$0xff]  }
 0x807   :  { %v2907_v4 = vpop.f32.mrb[48].mxu1  ;;  %v2950_v6 = vpop.f32.mrb[52].mxu0  ;;  %9363 = vmatpush3.bf16.msra.mxu1 %v10146_v60  ;;  %9385 = vmatpush3.bf16.msra.mxu0 %v10147_v61  ;;  %v10166_v60 = vld [vmem:[%s10595_s24 + $0x210] sm:$0xff]  }
 0x808   :  { %v2908_v33 = vadd.f32 %v2907_v4, %v2086_v57  ;;  %v2951_v38 = vadd.f32 %v2950_v6, %v2094_v8  ;;  %v2909_v36 = vpop.f32.mrb[49].mxu1  ;;  %v2952_v39 = vpop.f32.mrb[53].mxu0  ;;  %9364 = vmatprep.subr.bf16.mxu1 %v10148_v1  ;;  %9386 = vmatprep.subr.bf16.mxu0 %v10149_v2  ;;  %v10167_v61 = vld [vmem:[%s10595_s24 + $0x290] sm:$0xff]   ;;  %v10170_v1 = vld [vmem:[%s10595_s24 + $0x218] sm:$0xff]   ;;  %v10174_v4 = vld [vmem:[%s10595_s24 + $0x220] sm:$0xff]  }
 0x809   :  { %v2910_v13 = vadd.f32 %v2909_v36, %v2090_v42  ;;  %v2953_v14 = vadd.f32 %v2952_v39, %v2098_v3  ;;  %v2911_v15 = vpop.f32.mrb[50].mxu1  ;;  %v2954_v55 = vpop.f32.mrb[54].mxu0  ;;  %v10171_v2 = vld [vmem:[%s10595_s24 + $0x298] sm:$0xff]   ;;  %v10175_v6 = vld [vmem:[%s10595_s24 + $0x2a0] sm:$0xff]   ;;  %v10179_v36 = vld [vmem:[%s10595_s24 + $0x2a8] sm:$0xff]  }
 0x80a   :  { %v2912_v16 = vadd.f32 %v2911_v15, %v2086_v57  ;;  %v2955_v17 = vadd.f32 %v2954_v55, %v2094_v8  ;;  %v2913_v18 = vpop.f32.mrb[51].mxu1  ;;  %v2956_v19 = vpop.f32.mrb[55].mxu0  ;;  %v3135_v23 = vmax.f32 %v2908_v33, 0.0  ;;  %v3137_v24 = vmax.f32 %v2951_v38, 0.0  ;;  %v10168_v57 = vld [vmem:[%s10595_s24 + $0x258] sm:$0xff]   ;;  %v11231_v33 = vld [vmem:[%s10590_s19 + $0x8] sm:$0xff] }
 0x80b   :  { %v2914_v20 = vadd.f32 %v2913_v18, %v2090_v42  ;;  %v2957_v22 = vadd.f32 %v2956_v19, %v2098_v3  ;;  %9365 = vmatpush3.bf16.msra.mxu1 %v10150_v7  ;;  %9387 = vmatpush3.bf16.msra.mxu0 %v10151_v9  ;;  %v3136_v31 = vmax.f32 %v2910_v13, 0.0  ;;  %v3138_v32 = vmax.f32 %v2953_v14, 0.0  ;;  %v10169_v8 = vld [vmem:[%s10595_s24 + $0x2d8] sm:$0xff]   ;;  %v10172_v42 = vld [vmem:[%s10595_s24 + $0x260] sm:$0xff]   ;;  %v10176_v7 = vld [vmem:[%s10595_s24 + $0x268] sm:$0xff]   ;;  %s11904_s19 = sld [smem:[#allocation14_spill]] }
 0x80c   :  { %v3151_v63 = vmax.f32 %v2912_v16, 0.0  ;;  %v3153_v26 = vmax.f32 %v2955_v17, 0.0  ;;  %9366 = vmatprep.subr.bf16.mxu1 %v10152_v10  ;;  %9388 = vmatprep.subr.bf16.mxu0 %v10153_v12  ;;  %v10173_v3 = vld [vmem:[%s10595_s24 + $0x2e0] sm:$0xff]   ;;  %v10177_v9 = vld [vmem:[%s10595_s24 + $0x2e8] sm:$0xff]   ;;  %v2102_v39 = vrot.slane %v11231_v33, %v10748_v43  ;;  %v2110_v10 = vrot.slane %v11231_v33, %v10791_v11  ;;  %v10180_v12 = vld [vmem:[%s10595_s24 + $0x270] sm:$0xff]  }
 0x80d   :  { %v3152_v34 = vmax.f32 %v2914_v20, 0.0  ;;  %v3154_v35 = vmax.f32 %v2957_v22, 0.0  ;;  %v10178_v38 = vld [vmem:[%s10595_s24 + $0x228] sm:$0xff]   ;;  %v10181_v13 = vld [vmem:[%s10595_s24 + $0x2f0] sm:$0xff]   ;;  %v2106_v14 = vrot.slane %v11231_v33, %v10754_v45  ;;  %v2114_v15 = vrot.slane %v11231_v33, %v11148_v56 }
 0x80e   :  { %v3167_v37 = vpack.c.bf16 %v3151_v63, %v3135_v23  ;;  %v3169_v40 = vpack.c.bf16 %v3153_v26, %v3137_v24  ;;  %v10182_v17 = vld [vmem:[%s10595_s24 + $0x230] sm:$0xff]   ;;  %v10185_v23 = vld [vmem:[%s10595_s24 + $0x2f8] sm:$0xff]  }
 0x80f   :  { %v3168_v29 = vpack.c.bf16 %v3152_v34, %v3136_v31  ;;  %v3170_v41 = vpack.c.bf16 %v3154_v35, %v3138_v32  ;;  %9367 = vmatpush3.bf16.msra.mxu1 %v10154_v25  ;;  %9389 = vmatpush3.bf16.msra.mxu0 %v10155_v21  ;;  %v10183_v18 = vld [vmem:[%s10595_s24 + $0x2b0] sm:$0xff]   ;;  %v10184_v21 = vld [vmem:[%s10595_s24 + $0x278] sm:$0xff]  }
 0x810   :  { %9396 = vmatprep.subr.bf16.mxu1 %v10156_v27  ;;  %9418 = vmatprep.subr.bf16.mxu0 %v10157_v28 }
 0x811   :  { %4067 = vmatprep.mubr.bf16.mxu1 %v3168_v29  ;;  %4108 = vmatprep.mubr.bf16.mxu0 %v3170_v41  ;;  %v10187_v29 = vld [vmem:[%s10595_s24 + $0x2b8] sm:$0xff]  }
 0x812   :  { %4068 = vmatmul.mubr.bf16.vlgmr.msra.gmra.mrb[64].mxu1 %v3167_v37  ;;  %4109 = vmatmul.mubr.bf16.vlgmr.msra.gmra.mrb[68].mxu0 %v3169_v40  ;;  %v10186_v40 = vld [vmem:[%s10595_s24 + $0x238] sm:$0xff]  }
 0x813   :  { %9397 = vmatpush3.bf16.msra.mxu1 %v10158_v44  ;;  %9419 = vmatpush3.bf16.msra.mxu0 %v10159_v46 }
 0x814   :  { %9398 = vmatprep.subr.bf16.mxu1 %v10160_v47  ;;  %9420 = vmatprep.subr.bf16.mxu0 %v10161_v48  ;;  %v10188_v48 = vld [vmem:[%s10595_s24 + $0x340] sm:$0xff]  }
 0x817   :  { %9399 = vmatpush3.bf16.msra.mxu1 %v10162_v49  ;;  %9421 = vmatpush3.bf16.msra.mxu0 %v10163_v50  ;;  %v10189_v49 = vld [vmem:[%s10595_s24 + $0x3c0] sm:$0xff]  }
 0x818   :  { %9400 = vmatprep.subr.bf16.mxu1 %v10164_v51  ;;  %9422 = vmatprep.subr.bf16.mxu0 %v10165_v52 }
 0x81b   :  { %9401 = vmatpush3.bf16.msra.mxu1 %v10166_v60  ;;  %9423 = vmatpush3.bf16.msra.mxu0 %v10167_v61 }
 0x81c   :  { %9402 = vmatprep.subr.bf16.mxu1 %v10168_v57  ;;  %9424 = vmatprep.subr.bf16.mxu0 %v10169_v8 }
 0x81f   :  { %9403 = vmatpush3.bf16.msra.mxu1 %v10170_v1  ;;  %9425 = vmatpush3.bf16.msra.mxu0 %v10171_v2  ;;  %v10190_v2 = vld [vmem:[%s10595_s24 + $0x300] sm:$0xff]  }
 0x820   :  { %9404 = vmatprep.subr.bf16.mxu1 %v10172_v42  ;;  %9426 = vmatprep.subr.bf16.mxu0 %v10173_v3  ;;  %v10191_v42 = vld [vmem:[%s10595_s24 + $0x380] sm:$0xff]   ;;  %v10192_v3 = vld [vmem:[%s10595_s24 + $0x348] sm:$0xff]  }
 0x823   :  { %9405 = vmatpush3.bf16.msra.mxu1 %v10174_v4  ;;  %9427 = vmatpush3.bf16.msra.mxu0 %v10175_v6  ;;  %v10193_v4 = vld [vmem:[%s10595_s24 + $0x3c8] sm:$0xff]  }
 0x824   :  { %9406 = vmatprep.subr.bf16.mxu1 %v10176_v7  ;;  %9428 = vmatprep.subr.bf16.mxu0 %v10177_v9  ;;  %v10194_v6 = vld [vmem:[%s10595_s24 + $0x308] sm:$0xff]   ;;  %v10196_v9 = vld [vmem:[%s10595_s24 + $0x350] sm:$0xff]  }
 0x825   :  { %v10195_v7 = vld [vmem:[%s10595_s24 + $0x388] sm:$0xff]  }
 0x827   :  { %v2993_v55 = vpop.f32.mrb[52].mxu1  ;;  %v3036_v16 = vpop.f32.mrb[56].mxu0  ;;  %9407 = vmatpush3.bf16.msra.mxu1 %v10178_v38  ;;  %9429 = vmatpush3.bf16.msra.mxu0 %v10179_v36  ;;  %v10197_v38 = vld [vmem:[%s10595_s24 + $0x3d0] sm:$0xff]  }
 0x828   :  { %v2994_v19 = vadd.f32 %v2993_v55, %v2102_v39  ;;  %v3037_v20 = vadd.f32 %v3036_v16, %v2110_v10  ;;  %v2995_v22 = vpop.f32.mrb[53].mxu1  ;;  %v3038_v25 = vpop.f32.mrb[57].mxu0  ;;  %9408 = vmatprep.subr.bf16.mxu1 %v10180_v12  ;;  %9430 = vmatprep.subr.bf16.mxu0 %v10181_v13  ;;  %v10198_v36 = vld [vmem:[%s10595_s24 + $0x310] sm:$0xff]   ;;  %v10201_v12 = vld [vmem:[%s10595_s24 + $0x3d8] sm:$0xff]   ;;  %v10205_v55 = vld [vmem:[%s10595_s24 + $0x3e0] sm:$0xff]  }
 0x829   :  { %v2996_v24 = vadd.f32 %v2995_v22, %v2106_v14  ;;  %v3039_v63 = vadd.f32 %v3038_v25, %v2114_v15  ;;  %v2997_v26 = vpop.f32.mrb[54].mxu1  ;;  %v3040_v27 = vpop.f32.mrb[58].mxu0  ;;  %v10202_v13 = vld [vmem:[%s10595_s24 + $0x318] sm:$0xff]   ;;  %v10206_v16 = vld [vmem:[%s10595_s24 + $0x320] sm:$0xff]   ;;  %v10211_v22 = vld [vmem:[%s10595_s24 + $0x3a8] sm:$0xff]   ;;  %v2118_v25 = vrot.slane %v11231_v33, %v11179_v53 }
 0x82a   :  { %v2998_v28 = vadd.f32 %v2997_v26, %v2102_v39  ;;  %v3041_v31 = vadd.f32 %v3040_v27, %v2110_v10  ;;  %v2999_v32 = vpop.f32.mrb[55].mxu1  ;;  %v3042_v34 = vpop.f32.mrb[59].mxu0  ;;  %v3139_v41 = vmax.f32 %v2994_v19, 0.0  ;;  %v3141_v44 = vmax.f32 %v3037_v20, 0.0  ;;  %v10199_v39 = vld [vmem:[%s10595_s24 + $0x390] sm:$0xff]   ;;  %v10200_v10 = vld [vmem:[%s10595_s24 + $0x358] sm:$0xff]  }
 0x82b   :  { %v3000_v35 = vadd.f32 %v2999_v32, %v2106_v14  ;;  %v3043_v37 = vadd.f32 %v3042_v34, %v2114_v15  ;;  %9409 = vmatpush3.bf16.msra.mxu1 %v10182_v17  ;;  %9431 = vmatpush3.bf16.msra.mxu0 %v10183_v18  ;;  %v3140_v50 = vmax.f32 %v2996_v24, 0.0  ;;  %v3142_v51 = vmax.f32 %v3039_v63, 0.0  ;;  %v10203_v14 = vld [vmem:[%s10595_s24 + $0x398] sm:$0xff]   ;;  %v10204_v15 = vld [vmem:[%s10595_s24 + $0x360] sm:$0xff]   ;;  %v10208_v18 = vld [vmem:[%s10595_s24 + $0x368] sm:$0xff]  }
 0x82c   :  { %v3155_v46 = vmax.f32 %v2998_v28, 0.0  ;;  %v3157_v47 = vmax.f32 %v3041_v31, 0.0  ;;  %9410 = vmatprep.subr.bf16.mxu1 %v10184_v21  ;;  %9432 = vmatprep.subr.bf16.mxu0 %v10185_v23  ;;  %v10207_v17 = vld [vmem:[%s10595_s24 + $0x3a0] sm:$0xff]   ;;  %v10209_v19 = vld [vmem:[%s10595_s24 + $0x3e8] sm:$0xff]   ;;  %v2126_v21 = vrot.slane %v11231_v33, %v11182_v54  ;;  %v10212_v23 = vld [vmem:[%s10595_s24 + $0x370] sm:$0xff]   ;;  %v2122_v63 = vrot.slane %v11231_v33, %v11185_v58 }
 0x82d   :  { %v3156_v52 = vmax.f32 %v3000_v35, 0.0  ;;  %v3158_v60 = vmax.f32 %v3043_v37, 0.0  ;;  %v10210_v20 = vld [vmem:[%s10595_s24 + $0x328] sm:$0xff]   ;;  %v10213_v24 = vld [vmem:[%s10595_s24 + $0x3f0] sm:$0xff]   ;;  %v2130_v26 = vrot.slane %v11231_v33, %v11188_v59 }
 0x82e   :  { %v3171_v61 = vpack.c.bf16 %v3155_v46, %v3139_v41  ;;  %v3173_v57 = vpack.c.bf16 %v3157_v47, %v3141_v44  ;;  %v10214_v31 = vld [vmem:[%s10595_s24 + $0x330] sm:$0xff]   ;;  %v10217_v41 = vld [vmem:[%s10595_s24 + $0x3f8] sm:$0xff]  }
 0x82f   :  { %v3172_v8 = vpack.c.bf16 %v3156_v52, %v3140_v50  ;;  %v3174_v1 = vpack.c.bf16 %v3158_v60, %v3142_v51  ;;  %9411 = vmatpush3.bf16.msra.mxu1 %v10186_v40  ;;  %9433 = vmatpush3.bf16.msra.mxu0 %v10187_v29  ;;  %v10215_v32 = vld [vmem:[%s10595_s24 + $0x3b0] sm:$0xff]   ;;  %v10216_v29 = vld [vmem:[%s10595_s24 + $0x378] sm:$0xff]  }
 0x830   :  { %9440 = vmatprep.subr.bf16.mxu1 %v10188_v48  ;;  %9462 = vmatprep.subr.bf16.mxu0 %v10189_v49 }
 0x831   :  { %4149 = vmatprep.mubr.bf16.mxu1 %v3172_v8  ;;  %4190 = vmatprep.mubr.bf16.mxu0 %v3174_v1 }
 0x832   :  { %4150 = vmatmul.mubr.bf16.vlgmr.msra.gmra.mrb[68].mxu1 %v3171_v61  ;;  %4191 = vmatmul.mubr.bf16.vlgmr.msra.gmra.mrb[72].mxu0 %v3173_v57  ;;  %v10218_v61 = vld [vmem:[%s10595_s24 + $0x338] sm:$0xff]  }
 0x833   :  { %9441 = vmatpush3.bf16.msra.mxu1 %v10190_v2  ;;  %9463 = vmatpush3.bf16.msra.mxu0 %v10191_v42  ;;  %v10219_v57 = vld [vmem:[%s10595_s24 + $0x3b8] sm:$0xff]   ;;  %s11905_s24 = sld [smem:[#allocation13_spill]] }
 0x834   :  { %9442 = vmatprep.subr.bf16.mxu1 %v10192_v3  ;;  %9464 = vmatprep.subr.bf16.mxu0 %v10193_v4 }
 0x837   :  { %9443 = vmatpush3.bf16.msra.mxu1 %v10194_v6  ;;  %9465 = vmatpush3.bf16.msra.mxu0 %v10195_v7 }
 0x838   :  { %9444 = vmatprep.subr.bf16.mxu1 %v10196_v9  ;;  %9466 = vmatprep.subr.bf16.mxu0 %v10197_v38 }
 0x83b   :  { %9445 = vmatpush3.bf16.msra.mxu1 %v10198_v36  ;;  %9467 = vmatpush3.bf16.msra.mxu0 %v10199_v39 }
 0x83c   :  { %9446 = vmatprep.subr.bf16.mxu1 %v10200_v10  ;;  %9468 = vmatprep.subr.bf16.mxu0 %v10201_v12 }
 0x83f   :  { %9447 = vmatpush3.bf16.msra.mxu1 %v10202_v13  ;;  %9469 = vmatpush3.bf16.msra.mxu0 %v10203_v14  ;;  %v8776_v13 = vld [vmem:[%s10600_s30] ss:$0 sm:$0xff]  ;;  %s11906_s30 = sld [smem:[#allocation15_spill]] }
 0x840   :  { %9448 = vmatprep.subr.bf16.mxu1 %v10204_v15  ;;  %9470 = vmatprep.subr.bf16.mxu0 %v10205_v55 }
 0x843   :  { %9449 = vmatpush3.bf16.msra.mxu1 %v10206_v16  ;;  %9471 = vmatpush3.bf16.msra.mxu0 %v10207_v17 }
 0x844   :  { %9450 = vmatprep.subr.bf16.mxu1 %v10208_v18  ;;  %9472 = vmatprep.subr.bf16.mxu0 %v10209_v19 }
 0x847   :  { %v3079_v27 = vpop.f32.mrb[56].mxu1  ;;  %v3122_v28 = vpop.f32.mrb[60].mxu0  ;;  %9451 = vmatpush3.bf16.msra.mxu1 %v10210_v20  ;;  %9473 = vmatpush3.bf16.msra.mxu0 %v10211_v22 }
 0x848   :  { %v3080_v34 = vadd.f32 %v3079_v27, %v2118_v25  ;;  %v3123_v35 = vadd.f32 %v3122_v28, %v2126_v21  ;;  %v3081_v37 = vpop.f32.mrb[57].mxu1  ;;  %v3124_v40 = vpop.f32.mrb[61].mxu0  ;;  %9452 = vmatprep.subr.bf16.mxu1 %v10212_v23  ;;  %9474 = vmatprep.subr.bf16.mxu0 %v10213_v24 }
 0x849   :  { %v3082_v44 = vadd.f32 %v3081_v37, %v2122_v63  ;;  %v3125_v46 = vadd.f32 %v3124_v40, %v2130_v26  ;;  %v3083_v47 = vpop.f32.mrb[58].mxu1  ;;  %v3126_v33 = vpop.f32.mrb[62].mxu0 }
 0x84a   :  { %v3084_v48 = vadd.f32 %v3083_v47, %v2118_v25  ;;  %v3127_v49 = vadd.f32 %v3126_v33, %v2126_v21  ;;  %v3085_v50 = vpop.f32.mrb[59].mxu1  ;;  %v3128_v51 = vpop.f32.mrb[63].mxu0  ;;  %v3143_v8 = vmax.f32 %v3080_v34, 0.0  ;;  %v3145_v1 = vmax.f32 %v3123_v35, 0.0 }
 0x84b   :  { %v3086_v52 = vadd.f32 %v3085_v50, %v2122_v63  ;;  %v3129_v60 = vadd.f32 %v3128_v51, %v2130_v26  ;;  %9453 = vmatpush3.bf16.msra.mxu1 %v10214_v31  ;;  %9475 = vmatpush3.bf16.msra.mxu0 %v10215_v32  ;;  %v3144_v3 = vmax.f32 %v3082_v44, 0.0  ;;  %v3146_v4 = vmax.f32 %v3125_v46, 0.0 }
 0x84c   :  { %v3159_v2 = vmax.f32 %v3084_v48, 0.0  ;;  %v3161_v42 = vmax.f32 %v3127_v49, 0.0  ;;  %9454 = vmatprep.subr.bf16.mxu1 %v10216_v29  ;;  %9476 = vmatprep.subr.bf16.mxu0 %v10217_v41 }
 0x84d   :  { %v3160_v6 = vmax.f32 %v3086_v52, 0.0  ;;  %v3162_v7 = vmax.f32 %v3129_v60, 0.0 }
 0x84e   :  { %v3175_v9 = vpack.c.bf16 %v3159_v2, %v3143_v8  ;;  %v3177_v38 = vpack.c.bf16 %v3161_v42, %v3145_v1 }
 0x84f   :  { %v3176_v36 = vpack.c.bf16 %v3160_v6, %v3144_v3  ;;  %v3178_v39 = vpack.c.bf16 %v3162_v7, %v3146_v4  ;;  %9455 = vmatpush3.bf16.msra.mxu1 %v10218_v61  ;;  %9477 = vmatpush3.bf16.msra.mxu0 %v10219_v57 }
 0x850   :  { %9867 = vmatprep.subr.bf16.mxu0 %v10525_v0 }
 0x851   :  { %4231 = vmatprep.mubr.bf16.mxu1 %v3176_v36  ;;  %4272 = vmatprep.mubr.bf16.mxu0 %v3178_v39 }
 0x852   :  { %4232 = vmatmul.mubr.bf16.vlgmr.msra.gmra.mrb[72].mxu1 %v3175_v9  ;;  %4273 = vmatmul.mubr.bf16.vlgmr.msra.gmra.mrb[76].mxu0 %v3177_v38 }
 0x853   :  { %4945 = vmatprep.mubr.bf16.mxu1 %v10527_v30  ;;  %9883 = vmatprep.mubr.msk.bf16.mxu0 %vm10526_vm1, %v10525_v0 }
 0x8c5   :  { %v9324_v10 = vpop.f32.mrb[60].mxu1  ;;  %v9346_v12 = vpop.f32.mrb[64].mxu0 }
 0x8c6   :  { %v9325_v14 = vpop.f32.mrb[61].mxu1  ;;  %v9347_v15 = vpop.f32.mrb[65].mxu0 }
 0x8c7   :  { %v9326_v55 = vadd.f32 %v9325_v14, %v9324_v10  ;;  %v9348_v16 = vadd.f32 %v9347_v15, %v9346_v12  ;;  %v9327_v17 = vpop.f32.mrb[62].mxu1  ;;  %v9349_v18 = vpop.f32.mrb[66].mxu0 }
 0x8c8   :  { %v9328_v19 = vpop.f32.mrb[63].mxu1  ;;  %v9350_v20 = vpop.f32.mrb[67].mxu0 }
 0x8c9   :  { %v3988_v22 = vadd.f32 %v9326_v55, %v8776_v13  ;;  %v9329_v25 = vadd.f32 %v9328_v19, %v9327_v17  ;;  %v9351_v21 = vadd.f32 %v9350_v20, %v9349_v18 }
 0x8cb   :  { %v4029_v23 = vadd.f32 %v9348_v16, %v3988_v22  ;;  %v3991_v24 = vadd.f32 %v9329_v25, %v8776_v13 }
 0x8cd   :  { %v4032_v63 = vadd.f32 %v9351_v21, %v3991_v24 }
 0x8e5   :  { %v9368_v26 = vpop.f32.mrb[64].mxu1  ;;  %v9390_v27 = vpop.f32.mrb[68].mxu0 }
 0x8e6   :  { %v9369_v28 = vpop.f32.mrb[65].mxu1  ;;  %v9391_v31 = vpop.f32.mrb[69].mxu0 }
 0x8e7   :  { %v9370_v32 = vadd.f32 %v9369_v28, %v9368_v26  ;;  %v9392_v34 = vadd.f32 %v9391_v31, %v9390_v27  ;;  %v9371_v35 = vpop.f32.mrb[66].mxu1  ;;  %v9393_v37 = vpop.f32.mrb[70].mxu0  ;;  %v10220_v26 = vld [vmem:[%s10615_s20] ss:$12 sps:$4 sm:$0xff]   ;;  %v10223_v27 = vld [vmem:[%s10615_s20 + $0x8] ss:$12 sps:$4 sm:$0xff]  }
 0x8e8   :  { %v9372_v40 = vpop.f32.mrb[67].mxu1  ;;  %v9394_v29 = vpop.f32.mrb[71].mxu0  ;;  %9868 = vmatpush3.bf16.msra.mxu0 %v10223_v27  ;;  %v10224_v28 = vld [vmem:[%s10615_s20 + $0x18] ss:$12 sps:$4 sm:$0xff]   ;;  %v10227_v31 = vld [vmem:[%s10615_s20 + $0x20] ss:$12 sps:$4 sm:$0xff]  }
 0x8e9   :  { %v4070_v41 = vadd.f32 %v9370_v32, %v4029_v23  ;;  %v9373_v44 = vadd.f32 %v9372_v40, %v9371_v35  ;;  %v9395_v46 = vadd.f32 %v9394_v29, %v9393_v37  ;;  %9869 = vmatprep.subr.bf16.mxu0 %v10525_v0  ;;  %v10230_v32 = vld [vmem:[%s10615_s20 + $0x34] ss:$12 sps:$4 sm:$0xff]   ;;  %v10231_v35 = vld [vmem:[%s10615_s20 + $0x38] ss:$12 sps:$4 sm:$0xff]   ;;  %v10235_v29 = vld [vmem:[%s10615_s20 + $0x50] ss:$12 sps:$4 sm:$0xff]  }
 0x8ea   :  { %v10234_v37 = vld [vmem:[%s10615_s20 + $0x4c] ss:$12 sps:$4 sm:$0xff]   ;;  %v10232_v40 = vld [vmem:[%s10615_s20 + $0x48] ss:$12 sps:$4 sm:$0xff]  }
 0x8eb   :  { %v4111_v47 = vadd.f32 %v9392_v34, %v4070_v41  ;;  %v4073_v33 = vadd.f32 %v9373_v44, %v4032_v63  ;;  %v10228_v34 = vld [vmem:[%s10615_s20 + $0x30] ss:$12 sps:$4 sm:$0xff]   ;;  %v10236_v41 = vld [vmem:[%s10615_s20 + $0x60] ss:$12 sps:$4 sm:$0xff]  }
 0x8ec   :  { %9870 = vmatpush3.bf16.msra.mxu0 %v10227_v31  ;;  %v10238_v44 = vld [vmem:[%s10615_s20 + $0x64] ss:$12 sps:$4 sm:$0xff]  }
 0x8ed   :  { %v4114_v48 = vadd.f32 %v9395_v46, %v4073_v33  ;;  %9871 = vmatprep.subr.bf16.mxu0 %v10525_v0  ;;  %v10239_v46 = vld [vmem:[%s10615_s20 + $0x68] ss:$12 sps:$4 sm:$0xff]   ;;  %v10240_v33 = vld [vmem:[%s10615_s20 + $0x78] ss:$12 sps:$4 sm:$0xff]  }
 0x8f0   :  { %9872 = vmatpush3.bf16.msra.mxu0 %v10231_v35 }
 0x8f1   :  { %9873 = vmatprep.subr.bf16.mxu0 %v10525_v0 }
 0x8f4   :  { %9874 = vmatpush3.bf16.msra.mxu0 %v10235_v29 }
 0x8f5   :  { %9875 = vmatprep.subr.bf16.mxu0 %v10525_v0 }
 0x8f8   :  { %9876 = vmatpush3.bf16.msra.mxu0 %v10239_v46 }
 0x8f9   :  { %9877 = vmatprep.subr.bf16.mxu0 %v10525_v0 }
 0x905   :  { %v9412_v49 = vpop.f32.mrb[68].mxu1  ;;  %v9434_v50 = vpop.f32.mrb[72].mxu0 }
 0x906   :  { %v9413_v51 = vpop.f32.mrb[69].mxu1  ;;  %v9435_v52 = vpop.f32.mrb[73].mxu0 }
 0x907   :  { %v9414_v60 = vadd.f32 %v9413_v51, %v9412_v49  ;;  %v9436_v61 = vadd.f32 %v9435_v52, %v9434_v50  ;;  %v9415_v57 = vpop.f32.mrb[70].mxu1  ;;  %v9437_v8 = vpop.f32.mrb[74].mxu0  ;;  %v10246_v49 = vld [vmem:[%s10615_s20 + $0x94] ss:$12 sps:$4 sm:$0xff]   ;;  %v10244_v50 = vld [vmem:[%s10615_s20 + $0x90] ss:$12 sps:$4 sm:$0xff]  }
 0x908   :  { %v9416_v1 = vpop.f32.mrb[71].mxu1  ;;  %v9438_v2 = vpop.f32.mrb[75].mxu0  ;;  %v10247_v51 = vld [vmem:[%s10615_s20 + $0x98] ss:$12 sps:$4 sm:$0xff]  }
 0x909   :  { %v4152_v42 = vadd.f32 %v9414_v60, %v4111_v47  ;;  %v9417_v3 = vadd.f32 %v9416_v1, %v9415_v57  ;;  %v9439_v4 = vadd.f32 %v9438_v2, %v9437_v8  ;;  %v10242_v47 = vld [vmem:[%s10615_s20 + $0x7c] ss:$12 sps:$4 sm:$0xff]   ;;  %v10250_v52 = vld [vmem:[%s10615_s20 + $0xac] ss:$12 sps:$4 sm:$0xff]  }
 0x90a   :  { %v10248_v60 = vld [vmem:[%s10615_s20 + $0xa8] ss:$12 sps:$4 sm:$0xff]  }
 0x90b   :  { %v4193_v6 = vadd.f32 %v9436_v61, %v4152_v42  ;;  %v4155_v7 = vadd.f32 %v9417_v3, %v4114_v48  ;;  %v10243_v48 = vld [vmem:[%s10615_s20 + $0x80] ss:$12 sps:$4 sm:$0xff]   ;;  %v10251_v61 = vld [vmem:[%s10615_s20 + $0xb0] ss:$12 sps:$4 sm:$0xff]  }
 0x90c   :  { %9878 = vmatpush3.bf16.msra.mxu0 %v10243_v48 }
 0x90d   :  { %v4196_v9 = vadd.f32 %v9439_v4, %v4155_v7  ;;  %9879 = vmatprep.subr.bf16.mxu0 %v10525_v0 }
 0x910   :  { %9880 = vmatpush3.bf16.msra.mxu0 %v10247_v51 }
 0x911   :  { %9881 = vmatprep.subr.bf16.mxu0 %v10525_v0 }
 0x914   :  { %9882 = vmatpush3.bf16.msra.mxu0 %v10251_v61 }
 0x915   :  { %9893 = vmatprep.subr.bf16.mxu0 %v10525_v0 }
 0x925   :  { %v9456_v38 = vpop.f32.mrb[72].mxu1  ;;  %v9478_v36 = vpop.f32.mrb[76].mxu0 }
 0x926   :  { %v9457_v39 = vpop.f32.mrb[73].mxu1  ;;  %v9479_v10 = vpop.f32.mrb[77].mxu0 }
 0x927   :  { %v9458_v12 = vadd.f32 %v9457_v39, %v9456_v38  ;;  %v9480_v13 = vadd.f32 %v9479_v10, %v9478_v36  ;;  %v9459_v14 = vpop.f32.mrb[74].mxu1  ;;  %v9481_v15 = vpop.f32.mrb[78].mxu0 }
 0x928   :  { %v9460_v55 = vpop.f32.mrb[75].mxu1  ;;  %v9482_v16 = vpop.f32.mrb[79].mxu0 }
 0x929   :  { %v4234_v17 = vadd.f32 %v9458_v12, %v4193_v6  ;;  %v9461_v18 = vadd.f32 %v9460_v55, %v9459_v14  ;;  %v9483_v19 = vadd.f32 %v9482_v16, %v9481_v15  ;;  %v8905_v55 = vld [vmem:[%s11896_s13] ss:$0 sm:$0xff] }
 0x92b   :  { %v4275_v20 = vadd.f32 %v9480_v13, %v4234_v17  ;;  %v4237_v22 = vadd.f32 %v9461_v18, %v4196_v9 }
 0x92d   :  { %v4278_v25 = vadd.f32 %v9483_v19, %v4237_v22  ;;  %v11297_v21 = vadd.f32 %v4275_v20, %v11000_v62  ;;  %v10222_v62 = vld [vmem:[%s10615_s20 + $0x4] ss:$12 sps:$4 sm:$0xff]   ;;  %v8906_v22 = vld [vmem:[%s11897_s17] ss:$0 sm:$0xff] }
 0x92e   :  { %4913 = vmatprep.subr.bf16.mxu1 %v10222_v62 }
 0x92f   :  { %4283 = vadd.xlane.f32.xlu1 %v11297_v21  ;;  %v11301_v23 = vadd.f32 %v4278_v25, %v11002_v5  ;;  %v4289_v24 = vmul.f32 %v11297_v21, %v11297_v21  ;;  %4914 = vmatpush1.bf16.msra.mxu1 %v10220_v26  ;;  %v10226_v5 = vld [vmem:[%s10615_s20 + $0x1c] ss:$12 sps:$4 sm:$0xff]   ;;  %s11907_s20 = sld [smem:[#allocation16_spill]] }
 0x930   :  { %4915 = vmatprep.subr.bf16.mxu1 %v10226_v5 }
 0x931   :  { %4285 = vadd.xlane.f32.xlu0 %v11301_v23  ;;  %v4290_v63 = vmul.f32 %v11301_v23, %v11301_v23 }
 0x933   :  { %4291 = vadd.xlane.f32.xlu1 %v4289_v24  ;;  %4916 = vmatpush1.bf16.msra.mxu1 %v10224_v28 }
 0x934   :  { %4917 = vmatprep.subr.bf16.mxu1 %v10230_v32 }
 0x935   :  { %4293 = vadd.xlane.f32.xlu0 %v4290_v63 }
 0x937   :  { %4918 = vmatpush1.bf16.msra.mxu1 %v10228_v34 }
 0x938   :  { %4919 = vmatprep.subr.bf16.mxu1 %v10234_v37 }
 0x93b   :  { %4920 = vmatpush1.bf16.msra.mxu1 %v10232_v40 }
 0x93c   :  { %4921 = vmatprep.subr.bf16.mxu1 %v10238_v44 }
 0x93f   :  { %4922 = vmatpush1.bf16.msra.mxu1 %v10236_v41 }
 0x940   :  { %4923 = vmatprep.subr.bf16.mxu1 %v10242_v47 }
 0x943   :  { %4924 = vmatpush1.bf16.msra.mxu1 %v10240_v33 }
 0x944   :  { %4925 = vmatprep.subr.bf16.mxu1 %v10246_v49 }
 0x947   :  { %4926 = vmatpush1.bf16.msra.mxu1 %v10244_v50 }
 0x948   :  { %4927 = vmatprep.subr.bf16.mxu1 %v10250_v52 }
 0x94b   :  { %4928 = vmatpush1.bf16.msra.mxu1 %v10248_v60 }
 0x94c   :  { %9887 = vmatprep.subr.bf16.mxu1 %v10525_v0 }
 0x9bc   :  { %v4284_v57 = vpop.xlane.xlu1 %4283 }
 0x9bd   :  { %v4287_v8 = vmul.f32 0.0078125, %v4284_v57 }
 0x9be   :  { %v4286_v1 = vpop.xlane.xlu0 %4285 }
 0x9bf   :  { %v4288_v2 = vmul.f32 0.0078125, %v4286_v1  ;;  %v4297_v3 = vmul.f32 %v4287_v8, %v4287_v8  ;;  %v4303_v14 = vsub.f32 %v11297_v21, %v4287_v8  ;;  %v4359_v21 = vld [vmem:[%s11898_s21] sm:$0x7] }
 0x9c0   :  { %v4292_v42 = vpop.xlane.xlu1 %4291  ;;  %v4773_v26 = vrot.slane %v4359_v21, %v10748_v43 }
 0x9c1   :  { %v4295_v4 = vmul.f32 0.0078125, %v4292_v42  ;;  %v4298_v7 = vmul.f32 %v4288_v2, %v4288_v2  ;;  %v4304_v16 = vsub.f32 %v11301_v23, %v4288_v2  ;;  %v4777_v23 = vrot.slane %v4359_v21, %v10754_v45 }
 0x9c2   :  { %v4294_v6 = vpop.xlane.xlu0 %4293 }
 0x9c3   :  { %v4299_v9 = vsub.f32 %v4295_v4, %v4297_v3  ;;  %v4296_v38 = vmul.f32 0.0078125, %v4294_v6  ;;  %v4781_v4 = vrot.slane %v4359_v21, %v10791_v11 }
 0x9c5   :  { %v4301_v36 = vmax.f32 %v4299_v9, 0.0  ;;  %v4300_v39 = vsub.f32 %v4296_v38, %v4298_v7 }
 0x9c7   :  { %v4305_v10 = vadd.f32 1e-05, %v4301_v36  ;;  %v4302_v12 = vmax.f32 %v4300_v39, 0.0 }
 0x9c9   :  { %10424 = vrsqrt.f32 %v4305_v10  ;;  %v4306_v13 = vadd.f32 1e-05, %v4302_v12 }
 0x9cb   :  { %10426 = vrsqrt.f32 %v4306_v13 }
 0x9d3   :  { %v10425_v15 = vpop.eup %10424 }
 0x9d4   :  { %v4309_v17 = vmul.f32 %v10425_v15, %v4303_v14 }
 0x9d5   :  { %v10427_v18 = vpop.eup %10426 }
 0x9d6   :  { %v4310_v19 = vmul.f32 %v10427_v18, %v4304_v16  ;;  %v4317_v20 = vmul.f32 %v8905_v55, %v4309_v17 }
 0x9d8   :  { %v4318_v25 = vmul.f32 %v8905_v55, %v4310_v19  ;;  %v11345_v24 = vadd.f32 %v8906_v22, %v4317_v20 }
 0x9da   :  { %v11347_v63 = vadd.f32 %v8906_v22, %v4318_v25 }
 0x9dc   :  { %v4768_v62 = vpack.c.bf16 %v11347_v63, %v11345_v24 }
 0x9de   :  { %4946 = vmatmul.mubr.bf16.vlgmr.msra.gmra.mrb[76].mxu1 %v4768_v62  ;;  %9884 = vmatmul.mubr.bf16.vlgmr.msra.gmra.mrb[80].mxu0 %v4768_v62 }
 0x9df   :  { %9889 = vmatprep.mubr.msk.bf16.mxu1 %vm10526_vm1, %v10525_v0  ;;  %9895 = vmatprep.mubr.msk.bf16.mxu0 %vm10526_vm1, %v10525_v0 }
 0xab1   :  { %v4947_v27 = vpop.f32.mrb[76].mxu1  ;;  %v11358_v5 = vpop.f32.mrb[80].mxu0 }
 0xab2   :  { %v4949_v28 = vpop.f32.mrb[77].mxu1  ;;  %v9885_v31 = vpop.f32.mrb[81].mxu0  ;;  %v4948_v29 = vadd.f32 %v4947_v27, %v4773_v26  ;;  %v4991_v38 = vadd.f32 %v11358_v5, %v4781_v4 }
 0xab3   :  { %v4950_v32 = vadd.f32 %v4949_v28, %v4777_v23  ;;  %v4951_v34 = vpop.f32.mrb[78].mxu1  ;;  %v11360_v35 = vpop.f32.mrb[82].mxu0 }
 0xab4   :  { %v4953_v37 = vpop.f32.mrb[79].mxu1  ;;  %v9886_v40 = vpop.f32.mrb[83].mxu0  ;;  %v9243_v33 = vpack.c.bf16 %v4948_v29, %v4948_v29  ;;  %v4952_v48 = vadd.f32 %v4951_v34, %v4773_v26  ;;  %v11405_v10 = vpack.c.bf16 %v4991_v38, %v4991_v38  ;;  %v4994_v12 = vadd.f32 %v11360_v35, %v4781_v4 }
 0xab5   :  { %v9245_v41 = vpack.c.bf16 %v4950_v32, %v4950_v32  ;;  %v4954_v44 = vadd.f32 %v4953_v37, %v4777_v23 }
 0xab6   :  { %v9244_v50 = vpack.c.bf16 %v4952_v48, %v4952_v48  ;;  %v11413_v15 = vpack.c.bf16 %v4994_v12, %v4994_v12  ;;  %v5519_v55 = vsel %vm1385_vm4, %v11405_v10, 0 }
 0xab7   :  { %v9246_v46 = vpack.c.bf16 %v4954_v44, %v4954_v44  ;;  %5022 = vrot.lane.b32.xlu1 %v9245_v41, %s10528_s0  ;;  %v5055_v47 = vsel %vm916_vm3, %v9245_v41, 0 }
 0xab8   :  { %9888 = vmatpush3.bf16.xpose.msra.mxu1 %v5055_v47  ;;  %v5565_v17 = vsel %vm1385_vm4, %v11413_v15, 0 }
 0xab9   :  { %5024 = vrot.lane.b32.xlu0 %v9246_v46, %s10528_s0  ;;  %v5101_v49 = vsel %vm916_vm3, %v9246_v46, 0  ;;  %9899 = vmatprep.subr.bf16.mxu1 %v10525_v0 }
 0xaba   :  { %9894 = vmatpush3.bf16.xpose.msra.mxu0 %v5101_v49 }
 0xabb   :  { %5005 = vrot.lane.b32.xlu1 %v9243_v33, %s10528_s0  ;;  %9905 = vmatprep.subr.bf16.mxu0 %v10525_v0 }
 0xabd   :  { %5026 = vrot.lane.b32.xlu0 %v9245_v41, %s10529_s5 }
 0xabf   :  { %5007 = vrot.lane.b32.xlu1 %v9244_v50, %s10528_s0  ;;  %9890 = vmatmul.mubr.msk.bf16.vlgmr.msra.gmra.mrb[80].mxu1 %vm916_vm3, %v9243_v33 }
 0xac0   :  { %9901 = vmatprep.mubr.msk.bf16.mxu1 %vm10526_vm1, %v10525_v0 }
 0xac1   :  { %9896 = vmatmul.mubr.msk.bf16.vlgmr.msra.gmra.mrb[84].mxu0 %vm916_vm3, %v9244_v50  ;;  %5009 = vrot.lane.b32.xlu0 %v9243_v33, %s10529_s5 }
 0xac2   :  { %9907 = vmatprep.mubr.msk.bf16.mxu0 %vm10526_vm1, %v10525_v0 }
 0xac3   :  { %5028 = vrot.lane.b32.xlu1 %v9246_v46, %s10529_s5 }
 0xac5   :  { %5030 = vrot.lane.b32.xlu0 %v9245_v41, %s10530_s9 }
 0xac7   :  { %5011 = vrot.lane.b32.xlu1 %v9244_v50, %s10529_s5 }
 0xac9   :  { %5013 = vrot.lane.b32.xlu0 %v9243_v33, %s10530_s9 }
 0xacb   :  { %5032 = vrot.lane.b32.xlu1 %v9246_v46, %s10530_s9 }
 0xacf   :  { %5015 = vrot.lane.b32.xlu1 %v9244_v50, %s10530_s9 }
 0xb29   :  { %v5023_v51 = vpop.permute.xlu1 %5022 }
 0xb2a   :  { %v5147_v52 = vsel %vm916_vm3, %v5023_v51, 0 }
 0xb2b   :  { %v5025_v60 = vpop.permute.xlu0 %5024  ;;  %9900 = vmatpush3.bf16.xpose.msra.mxu1 %v5147_v52 }
 0xb2c   :  { %v5193_v61 = vsel %vm916_vm3, %v5025_v60, 0  ;;  %9911 = vmatprep.subr.bf16.mxu1 %v10525_v0 }
 0xb2d   :  { %9906 = vmatpush3.bf16.xpose.msra.mxu0 %v5193_v61  ;;  %v5006_v57 = vpop.permute.xlu1 %5005 }
 0xb2e   :  { %9917 = vmatprep.subr.bf16.mxu0 %v10525_v0 }
 0xb2f   :  { %v5027_v8 = vpop.permute.xlu0 %5026 }
 0xb30   :  { %v5239_v2 = vsel %vm916_vm3, %v5027_v8, 0 }
 0xb31   :  { %v5008_v1 = vpop.permute.xlu1 %5007 }
 0xb32   :  { %9902 = vmatmul.mubr.msk.bf16.vlgmr.msra.gmra.mrb[84].mxu1 %vm916_vm3, %v5006_v57 }
 0xb33   :  { %v5010_v42 = vpop.permute.xlu0 %5009  ;;  %9912 = vmatpush3.bf16.xpose.msra.mxu1 %v5239_v2  ;;  %9913 = vmatprep.mubr.msk.bf16.mxu1 %vm10526_vm1, %v10525_v0 }
 0xb34   :  { %9908 = vmatmul.mubr.msk.bf16.vlgmr.msra.gmra.mrb[88].mxu0 %vm916_vm3, %v5008_v1  ;;  %9923 = vmatprep.subr.bf16.mxu1 %v10525_v0 }
 0xb35   :  { %v5029_v3 = vpop.permute.xlu1 %5028  ;;  %9919 = vmatprep.mubr.msk.bf16.mxu0 %vm10526_vm1, %v10525_v0 }
 0xb36   :  { %v5285_v6 = vsel %vm916_vm3, %v5029_v3, 0 }
 0xb37   :  { %v5031_v7 = vpop.permute.xlu0 %5030  ;;  %9918 = vmatpush3.bf16.xpose.msra.mxu0 %v5285_v6 }
 0xb38   :  { %9929 = vmatprep.subr.bf16.mxu0 %v10525_v0  ;;  %v5331_v36 = vsel %vm916_vm3, %v5031_v7, 0 }
 0xb39   :  { %v5012_v9 = vpop.permute.xlu1 %5011 }
 0xb3a   :  { %9914 = vmatmul.mubr.msk.bf16.vlgmr.msra.gmra.mrb[88].mxu1 %vm916_vm3, %v5010_v42 }
 0xb3b   :  { %9924 = vmatpush3.bf16.xpose.msra.mxu1 %v5331_v36  ;;  %9925 = vmatprep.mubr.msk.bf16.mxu1 %vm10526_vm1, %v10525_v0  ;;  %v5014_v14 = vpop.permute.xlu0 %5013 }
 0xb3c   :  { %9935 = vmatprep.subr.bf16.mxu1 %v10525_v0 }
 0xb3d   :  { %v5033_v39 = vpop.permute.xlu1 %5032 }
 0xb3e   :  { %v5377_v13 = vsel %vm916_vm3, %v5033_v39, 0  ;;  %9920 = vmatmul.mubr.msk.bf16.vlgmr.msra.gmra.mrb[92].mxu0 %vm916_vm3, %v5012_v9 }
 0xb3f   :  { %9930 = vmatpush3.bf16.xpose.msra.mxu0 %v5377_v13  ;;  %9931 = vmatprep.mubr.msk.bf16.mxu0 %vm10526_vm1, %v10525_v0 }
 0xb40   :  { %9941 = vmatprep.subr.bf16.mxu0 %v10525_v0 }
 0xb41   :  { %v5016_v16 = vpop.permute.xlu1 %5015 }
 0xb42   :  { %9926 = vmatmul.mubr.msk.bf16.vlgmr.msra.gmra.mrb[92].mxu1 %vm916_vm3, %v5014_v14 }
 0xb43   :  { %9936 = vmatpush3.bf16.msra.mxu1 %v5519_v55  ;;  %9937 = vmatprep.mubr.msk.bf16.mxu1 %vm10526_vm1, %v10525_v0 }
 0xb44   :  { %9947 = vmatprep.subr.bf16.mxu1 %v10525_v0 }
 0xb46   :  { %9932 = vmatmul.mubr.msk.bf16.vlgmr.msra.gmra.mrb[96].mxu0 %vm916_vm3, %v5016_v16 }
 0xb47   :  { %9942 = vmatpush3.bf16.msra.mxu0 %v5565_v17  ;;  %9943 = vmatprep.mubr.msk.bf16.mxu0 %vm10526_vm1, %v10525_v0 }
 0xb48   :  { %9953 = vmatprep.subr.bf16.mxu0 %v10525_v0 }
 0xb92   :  { %v5091_v18 = vpop.f32.mrb[80].mxu1 }
 0xb93   :  { %v9891_v19 = vpop.f32.mrb[81].mxu1  ;;  %v5419_v20 = vsel %vm1285_vm5, %v5091_v18, -inf }
 0xb94   :  { %v5137_v22 = vpop.f32.mrb[84].mxu0  ;;  %5420 = vmax.xlane.f32.xlu0 %v5419_v20  ;;  %v5094_v25 = vpop.f32.mrb[82].mxu1 }
 0xb95   :  { %v9892_v62 = vpop.f32.mrb[83].mxu1  ;;  %v9897_v21 = vpop.f32.mrb[85].mxu0  ;;  %v5422_v23 = vsel %vm1285_vm5, %v5137_v22, -inf }
 0xb96   :  { %v5140_v26 = vpop.f32.mrb[86].mxu0  ;;  %5423 = vmax.xlane.f32.xlu1 %v5422_v23 }
 0xb97   :  { %v9898_v27 = vpop.f32.mrb[87].mxu0 }
 0xc05   :  { %v5183_v5 = vpop.f32.mrb[84].mxu1 }
 0xc06   :  { %v9903_v28 = vpop.f32.mrb[85].mxu1  ;;  %v5425_v31 = vsel %vm1285_vm5, %v5183_v5, -inf }
 0xc07   :  { %v5229_v32 = vpop.f32.mrb[88].mxu0  ;;  %5426 = vmax.xlane.f32.xlu0 %v5425_v31  ;;  %v5186_v34 = vpop.f32.mrb[86].mxu1 }
 0xc08   :  { %v9904_v35 = vpop.f32.mrb[87].mxu1  ;;  %v9909_v37 = vpop.f32.mrb[89].mxu0  ;;  %v5428_v41 = vsel %vm1285_vm5, %v5229_v32, -inf }
 0xc09   :  { %v5232_v40 = vpop.f32.mrb[90].mxu0 }
 0xc0a   :  { %v9910_v29 = vpop.f32.mrb[91].mxu0 }
 0xc0b   :  { %5429 = vmax.xlane.f32.xlu0 %v5428_v41 }
 0xc0d   :  { %v11431_v44 = vpop.f32.mrb[88].mxu1 }
 0xc0e   :  { %v9915_v46 = vpop.f32.mrb[89].mxu1  ;;  %v5431_v47 = vsel %vm1285_vm5, %v11431_v44, -inf }
 0xc0f   :  { %5432 = vmax.xlane.f32.xlu1 %v5431_v47  ;;  %v5278_v33 = vpop.f32.mrb[90].mxu1 }
 0xc10   :  { %v9916_v48 = vpop.f32.mrb[91].mxu1 }
 0xc11   :  { %v5321_v49 = vpop.f32.mrb[92].mxu0 }
 0xc12   :  { %v9921_v50 = vpop.f32.mrb[93].mxu0  ;;  %v5434_v51 = vsel %vm1285_vm5, %v5321_v49, -inf }
 0xc13   :  { %v5324_v52 = vpop.f32.mrb[94].mxu0  ;;  %5435 = vmax.xlane.f32.xlu0 %v5434_v51 }
 0xc14   :  { %v9922_v60 = vpop.f32.mrb[95].mxu0 }
 0xc15   :  { %v5367_v61 = vpop.f32.mrb[92].mxu1 }
 0xc16   :  { %v9927_v57 = vpop.f32.mrb[93].mxu1  ;;  %v5437_v8 = vsel %vm1285_vm5, %v5367_v61, -inf }
 0xc17   :  { %5438 = vmax.xlane.f32.xlu1 %v5437_v8  ;;  %v5370_v1 = vpop.f32.mrb[94].mxu1 }
 0xc18   :  { %v9928_v2 = vpop.f32.mrb[95].mxu1 }
 0xc19   :  { %v5413_v42 = vpop.f32.mrb[96].mxu0 }
 0xc1a   :  { %v9933_v3 = vpop.f32.mrb[97].mxu0  ;;  %v5440_v4 = vsel %vm1285_vm5, %v5413_v42, -inf }
 0xc1b   :  { %v5416_v6 = vpop.f32.mrb[98].mxu0  ;;  %5441 = vmax.xlane.f32.xlu0 %v5440_v4 }
 0xc1c   :  { %v9934_v7 = vpop.f32.mrb[99].mxu0 }
 0xc21   :  { %v5421_v12 = vpop.xlane.xlu0 %5420 }
 0xc22   :  { %v5443_v14 = vsub.f32 %v5091_v18, %v5421_v12 }
 0xc23   :  { %v5424_v9 = vpop.xlane.xlu1 %5423 }
 0xc24   :  { %v5444_v38 = vsub.f32 %v5137_v22, %v5424_v9  ;;  %v5451_v55 = vmul.f32 1.442695, %v5443_v14 }
 0xc26   :  { %v5453_v36 = vmul.f32 1.442695, %v5444_v38 }
 0xc28   :  { %10428 = vpow2.f32 %v5453_v36  ;;  %5039 = vrot.lane.b32.xlu1 %v11405_v10, %s10528_s0 }
 0xc29   :  { %10430 = vpow2.f32 %v5451_v55 }
 0xc32   :  { %v10429_v39 = vpop.eup %10428 }
 0xc33   :  { %v5470_v13 = vsel %vm1285_vm5, %v10429_v39, 0.0  ;;  %v10431_v16 = vpop.eup %10430 }
 0xc34   :  { %5471 = vadd.xlane.f32.xlu0 %v5470_v13  ;;  %v5467_v17 = vsel %vm1285_vm5, %v10431_v16, 0.0 }
 0xc4c   :  { %5468 = vadd.xlane.f32.xlu1 %v5467_v17 }
 0xc94   :  { %v5427_v19 = vpop.xlane.xlu0 %5426 }
 0xc95   :  { %v5445_v20 = vsub.f32 %v5183_v5, %v5427_v19 }
 0xc97   :  { %v5455_v22 = vmul.f32 1.442695, %v5445_v20 }
 0xc98   :  { %v5430_v25 = vpop.xlane.xlu0 %5429 }
 0xc99   :  { %10432 = vpow2.f32 %v5455_v22  ;;  %v5446_v62 = vsub.f32 %v5229_v32, %v5430_v25 }
 0xc9b   :  { %v5457_v21 = vmul.f32 1.442695, %v5446_v62 }
 0xc9c   :  { %v5433_v32 = vpop.xlane.xlu1 %5432 }
 0xc9d   :  { %10434 = vpow2.f32 %v5457_v21  ;;  %v5447_v34 = vsub.f32 %v11431_v44, %v5433_v32 }
 0xc9f   :  { %v5459_v40 = vmul.f32 1.442695, %v5447_v34 }
 0xca0   :  { %v5436_v5 = vpop.xlane.xlu0 %5435 }
 0xca1   :  { %v5448_v35 = vsub.f32 %v5321_v49, %v5436_v5 }
 0xca3   :  { %v11442_v23 = vpop.eup %10432  ;;  %v5461_v46 = vmul.f32 1.442695, %v5448_v35 }
 0xca4   :  { %v5473_v26 = vsel %vm1285_vm5, %v11442_v23, 0.0  ;;  %v5439_v37 = vpop.xlane.xlu1 %5438 }
 0xca5   :  { %5474 = vadd.xlane.f32.xlu1 %v5473_v26  ;;  %v5449_v29 = vsub.f32 %v5367_v61, %v5439_v37 }
 0xca7   :  { %v11446_v18 = vpop.eup %10434  ;;  %v5463_v48 = vmul.f32 1.442695, %v5449_v29 }
 0xca8   :  { %v5476_v27 = vsel %vm1285_vm5, %v11446_v18, 0.0  ;;  %v5442_v28 = vpop.xlane.xlu0 %5441  ;;  %v5040_v44 = vpop.permute.xlu1 %5039 }
 0xca9   :  { %5477 = vadd.xlane.f32.xlu0 %v5476_v27  ;;  %v5450_v47 = vsub.f32 %v5413_v42, %v5442_v28  ;;  %v5611_v7 = vsel %vm1385_vm4, %v5040_v44, 0 }
 0xcab   :  { %v5465_v51 = vmul.f32 1.442695, %v5450_v47  ;;  %v10252_v47 = vld [vmem:[%s11899_s25] sm:$0xff]  }
 0xcb6   :  { %5043 = vrot.lane.b32.xlu1 %v11405_v10, %s10529_s5 }
 0xcba   :  { %5045 = vrot.lane.b32.xlu1 %v11413_v15, %s10529_s5 }
 0xcbf   :  { %5041 = vrot.lane.b32.xlu0 %v11413_v15, %s10528_s0 }
 0xcc1   :  { %v5472_v31 = vpop.xlane.xlu0 %5471 }
 0xcc2   :  { %10436 = vrcp.f32 %v5472_v31 }
 0xcc3   :  { %10438 = vpow2.f32 %v5459_v40 }
 0xcc4   :  { %10440 = vpow2.f32 %v5461_v46 }
 0xcc5   :  { %10442 = vpow2.f32 %v5463_v48  ;;  %v10253_v48 = vld [vmem:[%s11899_s25 + $0x8] sm:$0xff]  }
 0xcc6   :  { %10444 = vpow2.f32 %v5465_v51  ;;  %v10255_v51 = vld [vmem:[%s11899_s25 + $0x18] sm:$0xff]  }
 0xccc   :  { %v10437_v41 = vpop.eup %10436 }
 0xccd   :  { %v5500_v33 = vmul.f32 %v10437_v41, %v10429_v39  ;;  %v10439_v49 = vpop.eup %10438 }
 0xcce   :  { %v10441_v60 = vpop.eup %10440  ;;  %v5479_v8 = vsel %vm1285_vm5, %v10439_v49, 0.0 }
 0xccf   :  { %v5508_v50 = vpack.c.bf16 %v5500_v33, %v5500_v33  ;;  %v11460_v61 = vpop.eup %10442  ;;  %v5482_v57 = vsel %vm1285_vm5, %v10441_v60, 0.0 }
 0xcd0   :  { %v11464_v1 = vpop.eup %10444  ;;  %v5485_v42 = vsel %vm1285_vm5, %v11460_v61, 0.0 }
 0xcd1   :  { %9944 = vmatmul.mubr.msk.bf16.vlgmr.msra.gmra.mrb[100].mxu0 %vm1285_vm5, %v5508_v50  ;;  %v5488_v2 = vsel %vm1285_vm5, %v11464_v1, 0.0  ;;  %v10254_v50 = vld [vmem:[%s11899_s25 + $0x10] sm:$0xff]  }
 0xcd2   :  { %9955 = vmatprep.mubr.msk.bf16.mxu0 %vm10526_vm1, %v10525_v0 }
 0xcd9   :  { %v5469_v52 = vpop.xlane.xlu1 %5468 }
 0xcda   :  { %10446 = vrcp.f32 %v5469_v52 }
 0xcde   :  { %5483 = vadd.xlane.f32.xlu0 %v5482_v57  ;;  %5480 = vadd.xlane.f32.xlu1 %v5479_v8  ;;  %v10256_v57 = vld [vmem:[%s11899_s25 + $0x20] sm:$0xff]  }
 0xce2   :  { %5489 = vadd.xlane.f32.xlu0 %v5488_v2  ;;  %5486 = vadd.xlane.f32.xlu1 %v5485_v42 }
 0xce4   :  { %v10447_v3 = vpop.eup %10446 }
 0xce5   :  { %v5499_v4 = vmul.f32 %v10447_v3, %v10431_v16  ;;  %v10257_v3 = vld [vmem:[%s11899_s25 + $0x28] sm:$0xff]  }
 0xce7   :  { %v5507_v6 = vpack.c.bf16 %v5499_v4, %v5499_v4 }
 0xce9   :  { %9938 = vmatmul.mubr.msk.bf16.vlgmr.msra.gmra.mrb[96].mxu1 %vm1285_vm5, %v5507_v6 }
 0xcea   :  { %9948 = vmatpush3.bf16.msra.mxu1 %v5611_v7  ;;  %9949 = vmatprep.mubr.msk.bf16.mxu1 %vm10526_vm1, %v10525_v0 }
 0xceb   :  { %9959 = vmatprep.subr.bf16.mxu1 %v10525_v0 }
 0xcf3   :  { %5049 = vrot.lane.b32.xlu1 %v11413_v15, %s10530_s9 }
 0xcf8   :  { %5047 = vrot.lane.b32.xlu0 %v11405_v10, %s10530_s9 }
 0xd32   :  { %v5475_v9 = vpop.xlane.xlu1 %5474 }
 0xd33   :  { %10448 = vrcp.f32 %v5475_v9 }
 0xd36   :  { %v5478_v38 = vpop.xlane.xlu0 %5477  ;;  %v5044_v13 = vpop.permute.xlu1 %5043 }
 0xd37   :  { %10450 = vrcp.f32 %v5478_v38  ;;  %v5703_v10 = vsel %vm1385_vm4, %v5044_v13, 0 }
 0xd3a   :  { %v5042_v36 = vpop.permute.xlu0 %5041  ;;  %v5046_v17 = vpop.permute.xlu1 %5045 }
 0xd3b   :  { %v5657_v39 = vsel %vm1385_vm4, %v5042_v36, 0  ;;  %v5749_v20 = vsel %vm1385_vm4, %v5046_v17, 0  ;;  %v10258_v36 = vld [vmem:[%s11899_s25 + $0x30] sm:$0xff]  }
 0xd3c   :  { %9954 = vmatpush3.bf16.msra.mxu0 %v5657_v39 }
 0xd3d   :  { %v10449_v12 = vpop.eup %10448  ;;  %9965 = vmatprep.subr.bf16.mxu0 %v10525_v0 }
 0xd3e   :  { %v5501_v14 = vmul.f32 %v10449_v12, %v11442_v23 }
 0xd40   :  { %v5509_v55 = vpack.c.bf16 %v5501_v14, %v5501_v14 }
 0xd41   :  { %v10451_v16 = vpop.eup %10450 }
 0xd42   :  { %v5502_v15 = vmul.f32 %v10451_v16, %v11446_v18  ;;  %9950 = vmatmul.mubr.msk.bf16.vlgmr.msra.gmra.mrb[100].mxu1 %vm1285_vm5, %v5509_v55  ;;  %v10259_v55 = vld [vmem:[%s11899_s25 + $0x38] sm:$0xff]  }
 0xd43   :  { %9960 = vmatpush3.bf16.msra.mxu1 %v5703_v10  ;;  %9961 = vmatprep.mubr.msk.bf16.mxu1 %vm10526_vm1, %v10525_v0 }
 0xd44   :  { %v5510_v19 = vpack.c.bf16 %v5502_v15, %v5502_v15  ;;  %9971 = vmatprep.subr.bf16.mxu1 %v10525_v0 }
 0xd46   :  { %9956 = vmatmul.mubr.msk.bf16.vlgmr.msra.gmra.mrb[104].mxu0 %vm1285_vm5, %v5510_v19 }
 0xd47   :  { %9966 = vmatpush3.bf16.msra.mxu0 %v5749_v20  ;;  %9967 = vmatprep.mubr.msk.bf16.mxu0 %vm10526_vm1, %v10525_v0 }
 0xd48   :  { %9977 = vmatprep.subr.bf16.mxu0 %v10525_v0 }
 0xd6b   :  { %v5484_v22 = vpop.xlane.xlu0 %5483  ;;  %v5481_v25 = vpop.xlane.xlu1 %5480 }
 0xd6c   :  { %10452 = vrcp.f32 %v5484_v22 }
 0xd6d   :  { %10454 = vrcp.f32 %v5481_v25 }
 0xd6f   :  { %v5490_v62 = vpop.xlane.xlu0 %5489  ;;  %v5487_v21 = vpop.xlane.xlu1 %5486 }
 0xd70   :  { %10456 = vrcp.f32 %v5490_v62 }
 0xd71   :  { %10458 = vrcp.f32 %v5487_v21 }
 0xd73   :  { %v5050_v5 = vpop.permute.xlu1 %5049  ;;  %v5048_v28 = vpop.permute.xlu0 %5047 }
 0xd74   :  { %v5841_v37 = vsel %vm1385_vm4, %v5050_v5, 0  ;;  %v5795_v40 = vsel %vm1385_vm4, %v5048_v28, 0 }
 0xd76   :  { %v10453_v23 = vpop.eup %10452 }
 0xd77   :  { %v10455_v26 = vpop.eup %10454  ;;  %v5504_v18 = vmul.f32 %v10453_v23, %v10441_v60 }
 0xd78   :  { %v5503_v27 = vmul.f32 %v10455_v26, %v10439_v49 }
 0xd79   :  { %v5512_v31 = vpack.c.bf16 %v5504_v18, %v5504_v18 }
 0xd7a   :  { %v10457_v32 = vpop.eup %10456  ;;  %v5511_v34 = vpack.c.bf16 %v5503_v27, %v5503_v27 }
 0xd7b   :  { %v10459_v35 = vpop.eup %10458  ;;  %9968 = vmatmul.mubr.msk.bf16.vlgmr.msra.gmra.mrb[108].mxu0 %vm1285_vm5, %v5512_v31  ;;  %v5506_v29 = vmul.f32 %v10457_v32, %v11464_v1 }
 0xd7c   :  { %9962 = vmatmul.mubr.msk.bf16.vlgmr.msra.gmra.mrb[104].mxu1 %vm1285_vm5, %v5511_v34  ;;  %9978 = vmatpush3.bf16.msra.mxu0 %v5841_v37  ;;  %v5505_v41 = vmul.f32 %v10459_v35, %v11460_v61 }
 0xd7d   :  { %9972 = vmatpush3.bf16.msra.mxu1 %v5795_v40  ;;  %9973 = vmatprep.mubr.msk.bf16.mxu1 %vm10526_vm1, %v10525_v0  ;;  %v5514_v46 = vpack.c.bf16 %v5506_v29, %v5506_v29  ;;  %v8957_v40 = vld [vmem:[%s11900_s29] ss:$0 sm:$0xff] }
 0xd7e   :  { %9979 = vmatprep.mubr.msk.bf16.mxu0 %vm10526_vm1, %v10525_v0  ;;  %9983 = vmatprep.subr.bf16.mxu1 %v10525_v0  ;;  %v5513_v33 = vpack.c.bf16 %v5505_v41, %v5505_v41 }
 0xd7f   :  { %9991 = vmatprep.subr.bf16.mxu0 %v10525_v0 }
 0xd83   :  { %9980 = vmatmul.mubr.msk.bf16.vlgmr.msra.gmra.mrb[112].mxu0 %vm1285_vm5, %v5514_v46 }
 0xd84   :  { %9974 = vmatmul.mubr.msk.bf16.vlgmr.msra.gmra.mrb[108].mxu1 %vm1285_vm5, %v5513_v33  ;;  %9995 = vmatprep.mubr.msk.bf16.mxu0 %vm10526_vm1, %v10525_v0 }
 0xd85   :  { %9984 = vmatpush3.bf16.msra.mxu1 %v10252_v47  ;;  %9987 = vmatprep.mubr.msk.bf16.mxu1 %vm10526_vm1, %v10525_v0 }
 0xd86   :  { %9985 = vmatprep.subr.bf16.mxu1 %v10525_v0  ;;  %9992 = vmatpush3.bf16.msra.mxu0 %v10254_v50 }
 0xd87   :  { %9993 = vmatprep.subr.bf16.mxu0 %v10525_v0 }
 0xd89   :  { %9986 = vmatpush3.bf16.msra.mxu1 %v10253_v48 }
 0xd8a   :  { %9999 = vmatprep.subr.bf16.mxu1 %v10525_v0  ;;  %9994 = vmatpush3.bf16.msra.mxu0 %v10255_v51 }
 0xd8b   :  { %10007 = vmatprep.subr.bf16.mxu0 %v10525_v0 }
 0xda4   :  { %v5601_v44 = vpop.f32.mrb[100].mxu0 }
 0xda5   :  { %v9945_v49 = vpop.f32.mrb[101].mxu0 }
 0xda6   :  { %v5604_v52 = vpop.f32.mrb[102].mxu0 }
 0xda7   :  { %v9946_v60 = vpop.f32.mrb[103].mxu0 }
 0xdbc   :  { %v5555_v61 = vpop.f32.mrb[96].mxu1 }
 0xdbd   :  { %v9249_v8 = vpack.c.bf16 %v5601_v44, %v5555_v61  ;;  %v9939_v1 = vpop.f32.mrb[97].mxu1 }
 0xdbe   :  { %v5558_v2 = vpop.f32.mrb[98].mxu1 }
 0xdbf   :  { %v9940_v42 = vpop.f32.mrb[99].mxu1  ;;  %9988 = vmatmul.mubr.msk.bf16.vlgmr.msra.gmra.mrb[112].mxu1 %vm916_vm3, %v9249_v8 }
 0xdc0   :  { %10000 = vmatpush3.bf16.msra.mxu1 %v10256_v57  ;;  %10003 = vmatprep.mubr.msk.bf16.mxu1 %vm10526_vm1, %v10525_v0 }
 0xdc1   :  { %10001 = vmatprep.subr.bf16.mxu1 %v10525_v0 }
 0xdc4   :  { %10002 = vmatpush3.bf16.msra.mxu1 %v10257_v3 }
 0xe15   :  { %v5647_v4 = vpop.f32.mrb[100].mxu1 }
 0xe16   :  { %v9951_v6 = vpop.f32.mrb[101].mxu1 }
 0xe17   :  { %v5650_v7 = vpop.f32.mrb[102].mxu1 }
 0xe18   :  { %v9952_v9 = vpop.f32.mrb[103].mxu1 }
 0xe19   :  { %v5693_v38 = vpop.f32.mrb[104].mxu0 }
 0xe1a   :  { %v9250_v39 = vpack.c.bf16 %v5693_v38, %v5647_v4  ;;  %v9957_v12 = vpop.f32.mrb[105].mxu0 }
 0xe1b   :  { %v5696_v13 = vpop.f32.mrb[106].mxu0  ;;  %v4388_v12 = vld [vmem:[%s11901_s3 + $0x48] sm:$0xff] }
 0xe1c   :  { %v9958_v14 = vpop.f32.mrb[107].mxu0  ;;  %9996 = vmatmul.mubr.msk.bf16.vlgmr.msra.gmra.mrb[116].mxu0 %vm916_vm3, %v9250_v39 }
 0xe1d   :  { %10008 = vmatpush3.bf16.msra.mxu0 %v10258_v36  ;;  %10011 = vmatprep.mubr.msk.bf16.mxu0 %vm10526_vm1, %v10525_v0  ;;  %v4387_v36 = vld [vmem:[%s11901_s3 + $0x40] sm:$0xff] }
 0xe1e   :  { %10009 = vmatprep.subr.bf16.mxu0 %v10525_v0 }
 0xe21   :  { %10010 = vmatpush3.bf16.msra.mxu0 %v10259_v55 }
 0xe4e   :  { %v5785_v16 = vpop.f32.mrb[108].mxu0 }
 0xe4f   :  { %v5739_v15 = vpop.f32.mrb[104].mxu1  ;;  %v9969_v10 = vpop.f32.mrb[109].mxu0 }
 0xe50   :  { %v9251_v17 = vpack.c.bf16 %v5785_v16, %v5739_v15  ;;  %v9963_v19 = vpop.f32.mrb[105].mxu1  ;;  %v5788_v20 = vpop.f32.mrb[110].mxu0  ;;  %v4395_v16 = vld [vmem:[%s11901_s3 + $0x80] sm:$0xff]  ;;  %v4396_v10 = vld [vmem:[%s11901_s3 + $0x88] sm:$0xff] }
 0xe51   :  { %v5742_v22 = vpop.f32.mrb[106].mxu1  ;;  %v9970_v25 = vpop.f32.mrb[111].mxu0  ;;  %v4403_v15 = vld [vmem:[%s11901_s3 + $0xc0] sm:$0xff] }
 0xe52   :  { %v9964_v62 = vpop.f32.mrb[107].mxu1  ;;  %10004 = vmatmul.mubr.msk.bf16.vlgmr.msra.gmra.mrb[116].mxu1 %vm916_vm3, %v9251_v17  ;;  %v4404_v17 = vld [vmem:[%s11901_s3 + $0xc8] sm:$0xff]  ;;  %v8988_v19 = vcombine.low %v4395_v16, %v4403_v15  ;;  %v8989_v20 = vcombine.high %v4395_v16, %v4403_v15 }
 0xe53   :  { %6950 = vmatprep.mubr.bf16.mxu1 %v10527_v30  ;;  %v8990_v22 = vcombine.low %v4396_v10, %v4404_v17  ;;  %v8991_v25 = vcombine.high %v4396_v10, %v4404_v17  ;;  %v4411_v62 = vld [vmem:[%s11901_s3 + $0x100] sm:$0xff]  ;;  %v4381_v17 = vld [vmem:[%s11901_s3 + $0x10] sm:$0xff] }
 0xe56   :  { %v5877_v21 = vpop.f32.mrb[112].mxu0 }
 0xe57   :  { %v5831_v23 = vpop.f32.mrb[108].mxu1  ;;  %v9981_v26 = vpop.f32.mrb[113].mxu0 }
 0xe58   :  { %v9252_v18 = vpack.c.bf16 %v5877_v21, %v5831_v23  ;;  %v9975_v0 = vpop.f32.mrb[109].mxu1  ;;  %v5880_v27 = vpop.f32.mrb[114].mxu0  ;;  %v4419_v21 = vld [vmem:[%s11901_s3 + $0x140] sm:$0xff]  ;;  %v4412_v23 = vld [vmem:[%s11901_s3 + $0x108] sm:$0xff] }
 0xe59   :  { %v5834_v5 = vpop.f32.mrb[110].mxu1  ;;  %v9982_v28 = vpop.f32.mrb[115].mxu0  ;;  %v9005_v26 = vcombine.high %v4411_v62, %v4419_v21  ;;  %v9004_v0 = vcombine.low %v4411_v62, %v4419_v21  ;;  %v4390_v62 = vld [vmem:[%s11901_s3 + $0x58] sm:$0xff] }
 0xe5a   :  { %v9976_v31 = vpop.f32.mrb[111].mxu1  ;;  %10012 = vmatmul.mubr.msk.bf16.vlgmr.msra.gmra.mrb[120].mxu0 %vm916_vm3, %v9252_v18  ;;  %v4420_v18 = vld [vmem:[%s11901_s3 + $0x148] sm:$0xff]  ;;  %v4427_v28 = vld [vmem:[%s11901_s3 + $0x180] sm:$0xff] }
 0xe5b   :  { %6993 = vmatprep.mubr.bf16.mxu0 %v10527_v30  ;;  %v9006_v27 = vcombine.low %v4412_v23, %v4420_v18  ;;  %v9007_v5 = vcombine.high %v4412_v23, %v4420_v18  ;;  %v4435_v31 = vld [vmem:[%s11901_s3 + $0x1c0] sm:$0xff] }
 0xe92   :  { %v5945_v32 = vpop.f32.mrb[112].mxu1 }
 0xe93   :  { %v9989_v34 = vpop.f32.mrb[113].mxu1  ;;  %v5958_v29 = vadd.f32 %v8957_v40, %v5945_v32  ;;  %v4428_v32 = vld [vmem:[%s11901_s3 + $0x188] sm:$0xff] }
 0xe94   :  { %v5948_v35 = vpop.f32.mrb[114].mxu1  ;;  %v9021_v34 = vcombine.high %v4427_v28, %v4435_v31 }
 0xe95   :  { %v9990_v37 = vpop.f32.mrb[115].mxu1  ;;  %v5959_v46 = vadd.f32 %v8957_v40, %v5948_v35  ;;  %v4436_v35 = vld [vmem:[%s11901_s3 + $0x1c8] sm:$0xff] }
 0xe96   :  { %v9020_v37 = vcombine.low %v4427_v28, %v4435_v31  ;;  %v9022_v40 = vcombine.low %v4428_v32, %v4436_v35 }
 0xeef   :  { %v6014_v41 = vpop.f32.mrb[116].mxu0 }
 0xef0   :  { %v6021_v47 = vadd.f32 %v6014_v41, %v5958_v29  ;;  %v9997_v33 = vpop.f32.mrb[117].mxu0  ;;  %v9023_v29 = vcombine.high %v4428_v32, %v4436_v35  ;;  %v4443_v41 = vld [vmem:[%s11901_s3 + $0x200] sm:$0xff] }
 0xef1   :  { %v6017_v48 = vpop.f32.mrb[118].mxu0 }
 0xef2   :  { %v6022_v50 = vadd.f32 %v6017_v48, %v5959_v46  ;;  %v9998_v51 = vpop.f32.mrb[119].mxu0  ;;  %v4451_v46 = vld [vmem:[%s11901_s3 + $0x240] sm:$0xff]  ;;  %v4452_v48 = vld [vmem:[%s11901_s3 + $0x248] sm:$0xff] }
 0xef3   :  { %v9037_v33 = vcombine.high %v4443_v41, %v4451_v46 }
 0xf25   :  { %v6077_v44 = vpop.f32.mrb[116].mxu1 }
 0xf26   :  { %v6084_v49 = vadd.f32 %v6077_v44, %v6021_v47  ;;  %v10005_v52 = vpop.f32.mrb[117].mxu1  ;;  %v4444_v47 = vld [vmem:[%s11901_s3 + $0x208] sm:$0xff] }
 0xf27   :  { %v6080_v60 = vpop.f32.mrb[118].mxu1  ;;  %v9038_v51 = vcombine.low %v4444_v47, %v4452_v48  ;;  %v9039_v44 = vcombine.high %v4444_v47, %v4452_v48  ;;  %v4467_v52 = vld [vmem:[%s11901_s3 + $0x2c0] sm:$0xff] }
 0xf28   :  { %v6085_v61 = vadd.f32 %v6080_v60, %v6022_v50  ;;  %v10006_v57 = vpop.f32.mrb[119].mxu1  ;;  %v9036_v50 = vcombine.low %v4443_v41, %v4451_v46  ;;  %v4460_v60 = vld [vmem:[%s11901_s3 + $0x288] sm:$0xff] }
 0xf29   :  { %v4468_v57 = vld [vmem:[%s11901_s3 + $0x2c8] sm:$0xff] }
 0xf2d   :  { %v6140_v8 = vpop.f32.mrb[120].mxu0 }
 0xf2e   :  { %v6147_v1 = vadd.f32 %v6140_v8, %v6084_v49  ;;  %v10013_v2 = vpop.f32.mrb[121].mxu0  ;;  %v4459_v49 = vld [vmem:[%s11901_s3 + $0x280] sm:$0xff] }
 0xf2f   :  { %v6143_v42 = vpop.f32.mrb[122].mxu0  ;;  %v9052_v8 = vcombine.low %v4459_v49, %v4467_v52  ;;  %v9055_v2 = vcombine.high %v4460_v60, %v4468_v57 }
 0xf30   :  { %v11537_v3 = vadd.f32 %v6147_v1, %v11345_v24  ;;  %v6148_v4 = vadd.f32 %v6143_v42, %v6085_v61  ;;  %v10014_v6 = vpop.f32.mrb[123].mxu0  ;;  %v4379_v24 = vld [vmem:[%s11901_s3] sm:$0xff]  ;;  %v9053_v61 = vcombine.high %v4459_v49, %v4467_v52  ;;  %v9054_v1 = vcombine.low %v4460_v60, %v4468_v57 }
 0xf31   :  { %v8973_v39 = vcombine.high %v4379_v24, %v4387_v36  ;;  %v8972_v13 = vcombine.low %v4379_v24, %v4387_v36  ;;  %v4475_v42 = vld [vmem:[%s11901_s3 + $0x300] sm:$0xff]  ;;  %v4476_v6 = vld [vmem:[%s11901_s3 + $0x308] sm:$0xff] }
 0xf32   :  { %v11540_v7 = vadd.f32 %v6148_v4, %v11347_v63  ;;  %6151 = vadd.xlane.f32.xlu0 %v11537_v3  ;;  %v6157_v9 = vmul.f32 %v11537_v3, %v11537_v3  ;;  %v4380_v63 = vld [vmem:[%s11901_s3 + $0x8] sm:$0xff]  ;;  %v4483_v4 = vld [vmem:[%s11901_s3 + $0x340] sm:$0xff] }
 0xf33   :  { %v8974_v14 = vcombine.low %v4380_v63, %v4388_v12  ;;  %v8975_v55 = vcombine.high %v4380_v63, %v4388_v12  ;;  %6918 = vmatprep.subr.bf16.mxu1 %v8973_v39  ;;  %v9068_v24 = vcombine.low %v4475_v42, %v4483_v4  ;;  %v4491_v39 = vld [vmem:[%s11901_s3 + $0x380] sm:$0xff] }
 0xf34   :  { %6153 = vadd.xlane.f32.xlu1 %v11540_v7  ;;  %v6158_v38 = vmul.f32 %v11540_v7, %v11540_v7  ;;  %6919 = vmatpush1.bf16.msra.mxu1 %v8972_v13  ;;  %v4499_v12 = vld [vmem:[%s11901_s3 + $0x3c0] sm:$0xff]  ;;  %v4492_v13 = vld [vmem:[%s11901_s3 + $0x388] sm:$0xff] }
 0xf35   :  { %6961 = vmatprep.subr.bf16.mxu0 %v8975_v55  ;;  %6920 = vmatprep.subr.bf16.mxu1 %v8989_v20  ;;  %v4500_v55 = vld [vmem:[%s11901_s3 + $0x3c8] sm:$0xff]  ;;  %v9084_v16 = vcombine.low %v4491_v39, %v4499_v12  ;;  %v4382_v20 = vld [vmem:[%s11901_s3 + $0x18] sm:$0xff] }
 0xf36   :  { %6159 = vadd.xlane.f32.xlu0 %v6157_v9  ;;  %6962 = vmatpush1.bf16.msra.mxu0 %v8974_v14  ;;  %v9069_v9 = vcombine.high %v4475_v42, %v4483_v4  ;;  %v9085_v14 = vcombine.high %v4491_v39, %v4499_v12  ;;  %v9086_v15 = vcombine.low %v4492_v13, %v4500_v55  ;;  %v4406_v42 = vld [vmem:[%s11901_s3 + $0xd8] sm:$0xff] }
 0xf37   :  { %6963 = vmatprep.subr.bf16.mxu0 %v8991_v25  ;;  %v9087_v10 = vcombine.high %v4492_v13, %v4500_v55  ;;  %v8978_v21 = vcombine.low %v4382_v20, %v4390_v62  ;;  %v8979_v23 = vcombine.high %v4382_v20, %v4390_v62  ;;  %v4429_v55 = vld [vmem:[%s11901_s3 + $0x190] sm:$0xff] }
 0xf38   :  { %6921 = vmatpush1.bf16.msra.mxu1 %v8988_v19  ;;  %v4389_v19 = vld [vmem:[%s11901_s3 + $0x50] sm:$0xff] }
 0xf39   :  { %6922 = vmatprep.subr.bf16.mxu1 %v9005_v26  ;;  %v8977_v25 = vcombine.high %v4381_v17, %v4389_v19  ;;  %v4453_v62 = vld [vmem:[%s11901_s3 + $0x250] sm:$0xff] }
 0xf3a   :  { %6161 = vadd.xlane.f32.xlu0 %v6158_v38  ;;  %6964 = vmatpush1.bf16.msra.mxu0 %v8990_v22  ;;  %v4484_v38 = vld [vmem:[%s11901_s3 + $0x348] sm:$0xff]  ;;  %v8976_v22 = vcombine.low %v4381_v17, %v4389_v19 }
 0xf3b   :  { %6965 = vmatprep.subr.bf16.mxu0 %v9007_v5  ;;  %v9070_v36 = vcombine.low %v4476_v6, %v4484_v38  ;;  %v9071_v63 = vcombine.high %v4476_v6, %v4484_v38  ;;  %v4413_v38 = vld [vmem:[%s11901_s3 + $0x110] sm:$0xff] }
 0xf3c   :  { %6923 = vmatpush1.bf16.msra.mxu1 %v9004_v0 }
 0xf3d   :  { %6924 = vmatprep.subr.bf16.mxu1 %v9021_v34 }
 0xf3e   :  { %6966 = vmatpush1.bf16.msra.mxu0 %v9006_v27 }
 0xf3f   :  { %6967 = vmatprep.subr.bf16.mxu0 %v9023_v29 }
 0xf40   :  { %6925 = vmatpush1.bf16.msra.mxu1 %v9020_v37 }
 0xf41   :  { %6926 = vmatprep.subr.bf16.mxu1 %v9037_v33 }
 0xf42   :  { %6968 = vmatpush1.bf16.msra.mxu0 %v9022_v40 }
 0xf43   :  { %6969 = vmatprep.subr.bf16.mxu0 %v9039_v44 }
 0xf44   :  { %6927 = vmatpush1.bf16.msra.mxu1 %v9036_v50 }
 0xf45   :  { %6928 = vmatprep.subr.bf16.mxu1 %v9053_v61  ;;  %v8971_v61 = vld [vmem:[%s11903_s14] ss:$0 sm:$0xff] }
 0xf46   :  { %6970 = vmatpush1.bf16.msra.mxu0 %v9038_v51  ;;  %v8970_v51 = vld [vmem:[%s11902_s8] ss:$0 sm:$0xff] }
 0xf47   :  { %6971 = vmatprep.subr.bf16.mxu0 %v9055_v2  ;;  %v4398_v2 = vld [vmem:[%s11901_s3 + $0x98] sm:$0xff] }
 0xf48   :  { %6929 = vmatpush1.bf16.msra.mxu1 %v9052_v8  ;;  %v4397_v8 = vld [vmem:[%s11901_s3 + $0x90] sm:$0xff]  ;;  %v8994_v12 = vcombine.low %v4398_v2, %v4406_v42 }
 0xf49   :  { %6930 = vmatprep.subr.bf16.mxu1 %v9069_v9  ;;  %v8995_v9 = vcombine.high %v4398_v2, %v4406_v42  ;;  %v4383_v2 = vld [vmem:[%s11901_s3 + $0x20] sm:$0xff] }
 0xf4a   :  { %6972 = vmatpush1.bf16.msra.mxu0 %v9054_v1  ;;  %v4405_v1 = vld [vmem:[%s11901_s3 + $0xd0] sm:$0xff]  ;;  %v4391_v42 = vld [vmem:[%s11901_s3 + $0x60] sm:$0xff] }
 0xf4b   :  { %6973 = vmatprep.subr.bf16.mxu0 %v9071_v63  ;;  %v4422_v63 = vld [vmem:[%s11901_s3 + $0x158] sm:$0xff]  ;;  %v8992_v39 = vcombine.low %v4397_v8, %v4405_v1 }
 0xf4c   :  { %6931 = vmatpush1.bf16.msra.mxu1 %v9068_v24  ;;  %v4421_v24 = vld [vmem:[%s11901_s3 + $0x150] sm:$0xff] }
 0xf4d   :  { %6932 = vmatprep.subr.bf16.mxu1 %v9085_v14  ;;  %v9009_v13 = vcombine.high %v4413_v38, %v4421_v24  ;;  %v9008_v17 = vcombine.low %v4413_v38, %v4421_v24 }
 0xf4e   :  { %6974 = vmatpush1.bf16.msra.mxu0 %v9070_v36  ;;  %v4414_v36 = vld [vmem:[%s11901_s3 + $0x118] sm:$0xff] }
 0xf4f   :  { %6975 = vmatprep.subr.bf16.mxu0 %v9087_v10  ;;  %v9011_v14 = vcombine.high %v4414_v36, %v4422_v63  ;;  %v4438_v10 = vld [vmem:[%s11901_s3 + $0x1d8] sm:$0xff]  ;;  %v9010_v19 = vcombine.low %v4414_v36, %v4422_v63  ;;  %v8981_v36 = vcombine.high %v4383_v2, %v4391_v42 }
 0xf50   :  { %6933 = vmatpush1.bf16.msra.mxu1 %v9084_v16  ;;  %v4437_v16 = vld [vmem:[%s11901_s3 + $0x1d0] sm:$0xff] }
 0xf51   :  { %7004 = vmatprep.subr.bf16.mxu1 %v8977_v25  ;;  %v9025_v20 = vcombine.high %v4429_v55, %v4437_v16  ;;  %v4445_v25 = vld [vmem:[%s11901_s3 + $0x210] sm:$0xff] }
 0xf52   :  { %6976 = vmatpush1.bf16.msra.mxu0 %v9086_v15  ;;  %v4430_v15 = vld [vmem:[%s11901_s3 + $0x198] sm:$0xff] }
 0xf53   :  { %7047 = vmatprep.subr.bf16.mxu0 %v8979_v23  ;;  %v4454_v23 = vld [vmem:[%s11901_s3 + $0x258] sm:$0xff] }
 0xfbf   :  { %v6152_v26 = vpop.xlane.xlu0 %6151 }
 0xfc0   :  { %v6155_v18 = vmul.f32 0.0078125, %v6152_v26  ;;  %v9024_v26 = vcombine.low %v4429_v55, %v4437_v16  ;;  %v8980_v55 = vcombine.low %v4383_v2, %v4391_v42 }
 0xfc1   :  { %v6154_v0 = vpop.xlane.xlu1 %6153 }
 0xfc2   :  { %v6165_v5 = vmul.f32 %v6155_v18, %v6155_v18  ;;  %v6156_v28 = vmul.f32 0.0078125, %v6154_v0  ;;  %v6171_v33 = vsub.f32 %v11537_v3, %v6155_v18  ;;  %v9026_v18 = vcombine.low %v4430_v15, %v4438_v10 }
 0xfc3   :  { %v6160_v27 = vpop.xlane.xlu0 %6159  ;;  %v9041_v0 = vcombine.high %v4445_v25, %v4453_v62 }
 0xfc4   :  { %v6163_v31 = vmul.f32 0.0078125, %v6160_v27  ;;  %v6166_v35 = vmul.f32 %v6156_v28, %v6156_v28  ;;  %v6172_v44 = vsub.f32 %v11540_v7, %v6156_v28  ;;  %v8993_v7 = vcombine.high %v4397_v8, %v4405_v1  ;;  %v4469_v28 = vld [vmem:[%s11901_s3 + $0x2d0] sm:$0xff] }
 0xfc6   :  { %v6167_v32 = vsub.f32 %v6163_v31, %v6165_v5  ;;  %v4461_v5 = vld [vmem:[%s11901_s3 + $0x290] sm:$0xff]  ;;  %v4462_v31 = vld [vmem:[%s11901_s3 + $0x298] sm:$0xff] }
 0xfc7   :  { %v6162_v34 = vpop.xlane.xlu0 %6161 }
 0xfc8   :  { %v6169_v37 = vmax.f32 %v6167_v32, 0.0  ;;  %v6164_v40 = vmul.f32 0.0078125, %v6162_v34  ;;  %v4470_v32 = vld [vmem:[%s11901_s3 + $0x2d8] sm:$0xff]  ;;  %v9040_v34 = vcombine.low %v4445_v25, %v4453_v62 }
 0xfca   :  { %v6173_v29 = vadd.f32 1e-05, %v6169_v37  ;;  %v6168_v41 = vsub.f32 %v6164_v40, %v6166_v35  ;;  %v9057_v37 = vcombine.high %v4461_v5, %v4469_v28  ;;  %v9059_v40 = vcombine.high %v4462_v31, %v4470_v32 }
 0xfcc   :  { %10460 = vrsqrt.f32 %v6173_v29  ;;  %v6170_v46 = vmax.f32 %v6168_v41, 0.0  ;;  %v4477_v29 = vld [vmem:[%s11901_s3 + $0x310] sm:$0xff] }
 0xfcd   :  { %v4485_v41 = vld [vmem:[%s11901_s3 + $0x350] sm:$0xff] }
 0xfce   :  { %v6174_v47 = vadd.f32 1e-05, %v6170_v46  ;;  %v4478_v46 = vld [vmem:[%s11901_s3 + $0x318] sm:$0xff] }
 0xfd0   :  { %10462 = vrsqrt.f32 %v6174_v47  ;;  %v4486_v47 = vld [vmem:[%s11901_s3 + $0x358] sm:$0xff] }
 0xfd6   :  { %v10461_v48 = vpop.eup %10460 }
 0xfd7   :  { %v6177_v50 = vmul.f32 %v10461_v48, %v6171_v33  ;;  %v9056_v33 = vcombine.low %v4461_v5, %v4469_v28  ;;  %v9058_v48 = vcombine.low %v4462_v31, %v4470_v32 }
 0xfd9   :  { %v6185_v52 = vmul.f32 %v8970_v51, %v6177_v50  ;;  %v9073_v50 = vcombine.high %v4477_v29, %v4485_v41 }
 0xfda   :  { %v10463_v49 = vpop.eup %10462 }
 0xfdb   :  { %v6178_v60 = vmul.f32 %v10463_v49, %v6172_v44  ;;  %v11592_v4 = vadd.f32 %v8971_v61, %v6185_v52  ;;  %v4493_v44 = vld [vmem:[%s11901_s3 + $0x390] sm:$0xff]  ;;  %v4494_v52 = vld [vmem:[%s11901_s3 + $0x398] sm:$0xff] }
 0xfdc   :  { %v4501_v49 = vld [vmem:[%s11901_s3 + $0x3d0] sm:$0xff] }
 0xfdd   :  { %v6186_v57 = vmul.f32 %v8970_v51, %v6178_v60  ;;  %v9075_v51 = vcombine.high %v4478_v46, %v4486_v47  ;;  %v4502_v60 = vld [vmem:[%s11901_s3 + $0x3d8] sm:$0xff]  ;;  %v9089_v8 = vcombine.high %v4493_v44, %v4501_v49  ;;  %v9088_v38 = vcombine.low %v4493_v44, %v4501_v49 }
 0xfde   :  { %v9091_v1 = vcombine.high %v4494_v52, %v4502_v60  ;;  %v9090_v24 = vcombine.low %v4494_v52, %v4502_v60 }
 0xfdf   :  { %v11594_v3 = vadd.f32 %v8971_v61, %v6186_v57  ;;  %v9072_v61 = vcombine.low %v4477_v29, %v4485_v41  ;;  %v9074_v57 = vcombine.low %v4478_v46, %v4486_v47 }
 0xfe1   :  { %v11598_v6 = vpack.c.bf16 %v11594_v3, %v11592_v4 }
 0xfe3   :  { %6951 = vmatmul.mubr.bf16.vlgmr.msra.gmra.mrb[120].mxu1 %v11598_v6  ;;  %6994 = vmatmul.mubr.bf16.vlgmr.msra.gmra.mrb[124].mxu0 %v11598_v6 }
 0xfe4   :  { %7005 = vmatpush1.bf16.msra.mxu1 %v8976_v22  ;;  %7048 = vmatpush1.bf16.msra.mxu0 %v8978_v21  ;;  %v9027_v22 = vcombine.high %v4430_v15, %v4438_v10  ;;  %v4446_v21 = vld [vmem:[%s11901_s3 + $0x218] sm:$0xff] }
 0xfe5   :  { %7006 = vmatprep.subr.bf16.mxu1 %v8993_v7  ;;  %7049 = vmatprep.subr.bf16.mxu0 %v8995_v9  ;;  %v9043_v27 = vcombine.high %v4446_v21, %v4454_v23  ;;  %v9042_v35 = vcombine.low %v4446_v21, %v4454_v23  ;;  %v4384_v7 = vld [vmem:[%s11901_s3 + $0x28] sm:$0xff] }
 0xfe6   :  { %7036 = vmatprep.mubr.bf16.mxu1 %v10527_v30  ;;  %7079 = vmatprep.mubr.bf16.mxu0 %v10527_v30  ;;  %v4392_v9 = vld [vmem:[%s11901_s3 + $0x68] sm:$0xff] }
 0xfe7   :  { %v8983_v63 = vcombine.high %v4384_v7, %v4392_v9  ;;  %v8982_v16 = vcombine.low %v4384_v7, %v4392_v9 }
 0xfe8   :  { %7007 = vmatpush1.bf16.msra.mxu1 %v8992_v39  ;;  %7050 = vmatpush1.bf16.msra.mxu0 %v8994_v12  ;;  %v4399_v39 = vld [vmem:[%s11901_s3 + $0xa0] sm:$0xff] }
 0xfe9   :  { %7008 = vmatprep.subr.bf16.mxu1 %v9009_v13  ;;  %7051 = vmatprep.subr.bf16.mxu0 %v9011_v14  ;;  %v4407_v12 = vld [vmem:[%s11901_s3 + $0xe0] sm:$0xff]  ;;  %v4400_v13 = vld [vmem:[%s11901_s3 + $0xa8] sm:$0xff] }
 0xfea   :  { %v4408_v14 = vld [vmem:[%s11901_s3 + $0xe8] sm:$0xff]  ;;  %v8997_v15 = vcombine.high %v4399_v39, %v4407_v12  ;;  %v8996_v25 = vcombine.low %v4399_v39, %v4407_v12 }
 0xfeb   :  { %v8999_v10 = vcombine.high %v4400_v13, %v4408_v14  ;;  %v8998_v62 = vcombine.low %v4400_v13, %v4408_v14 }
 0xfec   :  { %7009 = vmatpush1.bf16.msra.mxu1 %v9008_v17  ;;  %7052 = vmatpush1.bf16.msra.mxu0 %v9010_v19  ;;  %v4415_v17 = vld [vmem:[%s11901_s3 + $0x120] sm:$0xff] }
 0xfed   :  { %7010 = vmatprep.subr.bf16.mxu1 %v9025_v20  ;;  %7053 = vmatprep.subr.bf16.mxu0 %v9027_v22  ;;  %v4423_v19 = vld [vmem:[%s11901_s3 + $0x160] sm:$0xff]  ;;  %v4416_v20 = vld [vmem:[%s11901_s3 + $0x128] sm:$0xff] }
 0xfee   :  { %v4424_v22 = vld [vmem:[%s11901_s3 + $0x168] sm:$0xff]  ;;  %v9013_v21 = vcombine.high %v4415_v17, %v4423_v19  ;;  %v9012_v5 = vcombine.low %v4415_v17, %v4423_v19 }
 0xfef   :  { %v9015_v23 = vcombine.high %v4416_v20, %v4424_v22  ;;  %v9014_v28 = vcombine.low %v4416_v20, %v4424_v22 }
 0xff0   :  { %7011 = vmatpush1.bf16.msra.mxu1 %v9024_v26  ;;  %7054 = vmatpush1.bf16.msra.mxu0 %v9026_v18  ;;  %v4431_v26 = vld [vmem:[%s11901_s3 + $0x1a0] sm:$0xff] }
 0xff1   :  { %7012 = vmatprep.subr.bf16.mxu1 %v9041_v0  ;;  %7055 = vmatprep.subr.bf16.mxu0 %v9043_v27  ;;  %v4439_v18 = vld [vmem:[%s11901_s3 + $0x1e0] sm:$0xff]  ;;  %v4432_v0 = vld [vmem:[%s11901_s3 + $0x1a8] sm:$0xff] }
 0xff2   :  { %v4440_v27 = vld [vmem:[%s11901_s3 + $0x1e8] sm:$0xff]  ;;  %v9029_v31 = vcombine.high %v4431_v26, %v4439_v18  ;;  %v9028_v29 = vcombine.low %v4431_v26, %v4439_v18 }
 0xff3   :  { %v9031_v32 = vcombine.high %v4432_v0, %v4440_v27  ;;  %v9030_v41 = vcombine.low %v4432_v0, %v4440_v27 }
 0xff4   :  { %7013 = vmatpush1.bf16.msra.mxu1 %v9040_v34  ;;  %7056 = vmatpush1.bf16.msra.mxu0 %v9042_v35  ;;  %v4447_v34 = vld [vmem:[%s11901_s3 + $0x220] sm:$0xff] }
 0xff5   :  { %7014 = vmatprep.subr.bf16.mxu1 %v9057_v37  ;;  %7057 = vmatprep.subr.bf16.mxu0 %v9059_v40  ;;  %v4455_v35 = vld [vmem:[%s11901_s3 + $0x260] sm:$0xff]  ;;  %v4448_v37 = vld [vmem:[%s11901_s3 + $0x228] sm:$0xff] }
 0xff6   :  { %v4456_v40 = vld [vmem:[%s11901_s3 + $0x268] sm:$0xff]  ;;  %v9045_v46 = vcombine.high %v4447_v34, %v4455_v35  ;;  %v9044_v44 = vcombine.low %v4447_v34, %v4455_v35 }
 0xff7   :  { %v9047_v47 = vcombine.high %v4448_v37, %v4456_v40  ;;  %v9046_v49 = vcombine.low %v4448_v37, %v4456_v40 }
 0xff8   :  { %7015 = vmatpush1.bf16.msra.mxu1 %v9056_v33  ;;  %7058 = vmatpush1.bf16.msra.mxu0 %v9058_v48  ;;  %v4463_v33 = vld [vmem:[%s11901_s3 + $0x2a0] sm:$0xff] }
 0xff9   :  { %7016 = vmatprep.subr.bf16.mxu1 %v9073_v50  ;;  %7059 = vmatprep.subr.bf16.mxu0 %v9075_v51  ;;  %v4471_v48 = vld [vmem:[%s11901_s3 + $0x2e0] sm:$0xff]  ;;  %v4464_v50 = vld [vmem:[%s11901_s3 + $0x2a8] sm:$0xff] }
 0xffa   :  { %v4472_v51 = vld [vmem:[%s11901_s3 + $0x2e8] sm:$0xff]  ;;  %v9061_v52 = vcombine.high %v4463_v33, %v4471_v48  ;;  %v9060_v2 = vcombine.low %v4463_v33, %v4471_v48 }
 0xffb   :  { %v9063_v60 = vcombine.high %v4464_v50, %v4472_v51  ;;  %v9062_v42 = vcombine.low %v4464_v50, %v4472_v51 }
 0xffc   :  { %7017 = vmatpush1.bf16.msra.mxu1 %v9072_v61  ;;  %7060 = vmatpush1.bf16.msra.mxu0 %v9074_v57  ;;  %v4479_v61 = vld [vmem:[%s11901_s3 + $0x320] sm:$0xff] }
 0xffd   :  { %7018 = vmatprep.subr.bf16.mxu1 %v9089_v8  ;;  %7061 = vmatprep.subr.bf16.mxu0 %v9091_v1  ;;  %v4487_v57 = vld [vmem:[%s11901_s3 + $0x360] sm:$0xff]  ;;  %v4480_v8 = vld [vmem:[%s11901_s3 + $0x328] sm:$0xff] }
 0xffe   :  { %v4488_v1 = vld [vmem:[%s11901_s3 + $0x368] sm:$0xff]  ;;  %v9077_v7 = vcombine.high %v4479_v61, %v4487_v57  ;;  %v9076_v39 = vcombine.low %v4479_v61, %v4487_v57 }
 0xfff   :  { %v9079_v9 = vcombine.high %v4480_v8, %v4488_v1  ;;  %v9078_v12 = vcombine.low %v4480_v8, %v4488_v1  ;;  %v4465_v1 = vld [vmem:[%s11901_s3 + $0x2b0] sm:$0xff] }
0x1000   :  { %7019 = vmatpush1.bf16.msra.mxu1 %v9088_v38  ;;  %7062 = vmatpush1.bf16.msra.mxu0 %v9090_v24  ;;  %v4495_v38 = vld [vmem:[%s11901_s3 + $0x3a0] sm:$0xff] }
0x1001   :  { %7090 = vmatprep.subr.bf16.mxu1 %v8981_v36  ;;  %7133 = vmatprep.subr.bf16.mxu0 %v8983_v63  ;;  %v4503_v24 = vld [vmem:[%s11901_s3 + $0x3e0] sm:$0xff]  ;;  %v4496_v36 = vld [vmem:[%s11901_s3 + $0x3a8] sm:$0xff] }
0x1002   :  { %v4504_v63 = vld [vmem:[%s11901_s3 + $0x3e8] sm:$0xff]  ;;  %v9093_v13 = vcombine.high %v4495_v38, %v4503_v24  ;;  %v9092_v17 = vcombine.low %v4495_v38, %v4503_v24 }
0x1003   :  { %7037 = vmatmul.mubr.bf16.vlgmr.msra.gmra.mrb[124].mxu1 %v11598_v6  ;;  %7080 = vmatmul.mubr.bf16.vlgmr.msra.gmra.mrb[128].mxu0 %v11598_v6  ;;  %v9095_v14 = vcombine.high %v4496_v36, %v4504_v63  ;;  %v9094_v19 = vcombine.low %v4496_v36, %v4504_v63  ;;  %v4481_v63 = vld [vmem:[%s11901_s3 + $0x330] sm:$0xff] }
0x1004   :  { %7091 = vmatpush1.bf16.msra.mxu1 %v8980_v55  ;;  %7134 = vmatpush1.bf16.msra.mxu0 %v8982_v16  ;;  %v4385_v55 = vld [vmem:[%s11901_s3 + $0x30] sm:$0xff] }
0x1005   :  { %7092 = vmatprep.subr.bf16.mxu1 %v8997_v15  ;;  %7135 = vmatprep.subr.bf16.mxu0 %v8999_v10  ;;  %v4393_v16 = vld [vmem:[%s11901_s3 + $0x70] sm:$0xff]  ;;  %v4386_v15 = vld [vmem:[%s11901_s3 + $0x38] sm:$0xff] }
0x1006   :  { %7122 = vmatprep.mubr.bf16.mxu1 %v10527_v30  ;;  %7165 = vmatprep.mubr.bf16.mxu0 %v10527_v30  ;;  %v4394_v10 = vld [vmem:[%s11901_s3 + $0x78] sm:$0xff]  ;;  %v8985_v20 = vcombine.high %v4385_v55, %v4393_v16  ;;  %v8984_v26 = vcombine.low %v4385_v55, %v4393_v16 }
0x1007   :  { %v8987_v22 = vcombine.high %v4386_v15, %v4394_v10  ;;  %v8986_v18 = vcombine.low %v4386_v15, %v4394_v10  ;;  %v4497_v10 = vld [vmem:[%s11901_s3 + $0x3b0] sm:$0xff] }
0x1008   :  { %7093 = vmatpush1.bf16.msra.mxu1 %v8996_v25  ;;  %7136 = vmatpush1.bf16.msra.mxu0 %v8998_v62  ;;  %v4401_v25 = vld [vmem:[%s11901_s3 + $0xb0] sm:$0xff] }
0x1009   :  { %7094 = vmatprep.subr.bf16.mxu1 %v9013_v21  ;;  %7137 = vmatprep.subr.bf16.mxu0 %v9015_v23  ;;  %v4409_v62 = vld [vmem:[%s11901_s3 + $0xf0] sm:$0xff]  ;;  %v4402_v21 = vld [vmem:[%s11901_s3 + $0xb8] sm:$0xff] }
0x100a   :  { %v4410_v23 = vld [vmem:[%s11901_s3 + $0xf8] sm:$0xff]  ;;  %v9001_v0 = vcombine.high %v4401_v25, %v4409_v62  ;;  %v9000_v34 = vcombine.low %v4401_v25, %v4409_v62 }
0x100b   :  { %v9003_v27 = vcombine.high %v4402_v21, %v4410_v23  ;;  %v9002_v35 = vcombine.low %v4402_v21, %v4410_v23 }
0x100c   :  { %7095 = vmatpush1.bf16.msra.mxu1 %v9012_v5  ;;  %7138 = vmatpush1.bf16.msra.mxu0 %v9014_v28  ;;  %v4417_v5 = vld [vmem:[%s11901_s3 + $0x130] sm:$0xff] }
0x100d   :  { %7096 = vmatprep.subr.bf16.mxu1 %v9029_v31  ;;  %7139 = vmatprep.subr.bf16.mxu0 %v9031_v32  ;;  %v4425_v28 = vld [vmem:[%s11901_s3 + $0x170] sm:$0xff]  ;;  %v4418_v31 = vld [vmem:[%s11901_s3 + $0x138] sm:$0xff] }
0x100e   :  { %v4426_v32 = vld [vmem:[%s11901_s3 + $0x178] sm:$0xff]  ;;  %v9017_v37 = vcombine.high %v4417_v5, %v4425_v28  ;;  %v9016_v33 = vcombine.low %v4417_v5, %v4425_v28  ;;  %v10263_v5 = vld [vmem:[%s11904_s19 + $0x80] sm:$0xff]   ;;  %v10264_v28 = vld [vmem:[%s11904_s19 + $0x48] sm:$0xff]  }
0x100f   :  { %v9019_v40 = vcombine.high %v4418_v31, %v4426_v32  ;;  %v9018_v48 = vcombine.low %v4418_v31, %v4426_v32  ;;  %v10265_v31 = vld [vmem:[%s11904_s19 + $0xc8] sm:$0xff]  }
0x1010   :  { %7097 = vmatpush1.bf16.msra.mxu1 %v9028_v29  ;;  %7140 = vmatpush1.bf16.msra.mxu0 %v9030_v41  ;;  %v4433_v29 = vld [vmem:[%s11901_s3 + $0x1b0] sm:$0xff]  ;;  %v10266_v32 = vld [vmem:[%s11904_s19 + $0x8] sm:$0xff]  }
0x1011   :  { %7098 = vmatprep.subr.bf16.mxu1 %v9045_v46  ;;  %7141 = vmatprep.subr.bf16.mxu0 %v9047_v47  ;;  %v4441_v41 = vld [vmem:[%s11901_s3 + $0x1f0] sm:$0xff]  ;;  %v4434_v46 = vld [vmem:[%s11901_s3 + $0x1b8] sm:$0xff] }
0x1012   :  { %v4442_v47 = vld [vmem:[%s11901_s3 + $0x1f8] sm:$0xff]  ;;  %v9033_v50 = vcombine.high %v4433_v29, %v4441_v41  ;;  %v9032_v61 = vcombine.low %v4433_v29, %v4441_v41  ;;  %v10271_v29 = vld [vmem:[%s11904_s19 + $0x90] sm:$0xff]  }
0x1013   :  { %v9035_v51 = vcombine.high %v4434_v46, %v4442_v47  ;;  %v10273_v41 = vld [vmem:[%s11904_s19 + $0xd8] sm:$0xff]  }
0x1014   :  { %7099 = vmatpush1.bf16.msra.mxu1 %v9044_v44  ;;  %7142 = vmatpush1.bf16.msra.mxu0 %v9046_v49  ;;  %v4449_v44 = vld [vmem:[%s11901_s3 + $0x230] sm:$0xff] }
0x1015   :  { %7100 = vmatprep.subr.bf16.mxu1 %v9061_v52  ;;  %7143 = vmatprep.subr.bf16.mxu0 %v9063_v60  ;;  %v4457_v49 = vld [vmem:[%s11901_s3 + $0x270] sm:$0xff]  ;;  %v4450_v52 = vld [vmem:[%s11901_s3 + $0x238] sm:$0xff] }
0x1016   :  { %v4458_v60 = vld [vmem:[%s11901_s3 + $0x278] sm:$0xff]  ;;  %v9049_v57 = vcombine.high %v4449_v44, %v4457_v49 }
0x1017   :  { %v9051_v8 = vcombine.high %v4450_v52, %v4458_v60  ;;  %v9050_v38 = vcombine.low %v4450_v52, %v4458_v60  ;;  %v10282_v52 = vld [vmem:[%s11904_s19 + $0x28] sm:$0xff]  }
0x1018   :  { %7101 = vmatpush1.bf16.msra.mxu1 %v9060_v2  ;;  %7144 = vmatpush1.bf16.msra.mxu0 %v9062_v42  ;;  %v4473_v2 = vld [vmem:[%s11901_s3 + $0x2f0] sm:$0xff]  ;;  %v4466_v42 = vld [vmem:[%s11901_s3 + $0x2b8] sm:$0xff]  ;;  %v10283_v60 = vld [vmem:[%s11904_s19 + $0xa8] sm:$0xff]  }
0x1019   :  { %7102 = vmatprep.subr.bf16.mxu1 %v9077_v7  ;;  %7145 = vmatprep.subr.bf16.mxu0 %v9079_v9  ;;  %v4474_v7 = vld [vmem:[%s11901_s3 + $0x2f8] sm:$0xff]  ;;  %v9048_v9 = vcombine.low %v4449_v44, %v4457_v49  ;;  %v9065_v24 = vcombine.high %v4465_v1, %v4473_v2  ;;  %v10280_v44 = vld [vmem:[%s11904_s19 + $0x68] sm:$0xff]  }
0x101a   :  { %v9067_v36 = vcombine.high %v4466_v42, %v4474_v7  ;;  %v9066_v55 = vcombine.low %v4466_v42, %v4474_v7  ;;  %v10281_v49 = vld [vmem:[%s11904_s19 + $0xe8] sm:$0xff]   ;;  %v10290_v42 = vld [vmem:[%s11904_s19 + $0x38] sm:$0xff]  }
0x101b   :  { %v10291_v7 = vld [vmem:[%s11904_s19 + $0xb8] sm:$0xff]  }
0x101c   :  { %7103 = vmatpush1.bf16.msra.mxu1 %v9076_v39  ;;  %7146 = vmatpush1.bf16.msra.mxu0 %v9078_v12  ;;  %v4489_v39 = vld [vmem:[%s11901_s3 + $0x370] sm:$0xff]  ;;  %v4482_v12 = vld [vmem:[%s11901_s3 + $0x338] sm:$0xff] }
0x101d   :  { %7104 = vmatprep.subr.bf16.mxu1 %v9093_v13  ;;  %7147 = vmatprep.subr.bf16.mxu0 %v9095_v14  ;;  %v4490_v13 = vld [vmem:[%s11901_s3 + $0x378] sm:$0xff]  ;;  %v9064_v14 = vcombine.low %v4465_v1, %v4473_v2  ;;  %v9081_v16 = vcombine.high %v4481_v63, %v4489_v39 }
0x101e   :  { %v9083_v15 = vcombine.high %v4482_v12, %v4490_v13  ;;  %v9082_v25 = vcombine.low %v4482_v12, %v4490_v13  ;;  %v10288_v1 = vld [vmem:[%s11904_s19 + $0x78] sm:$0xff]  }
0x101f   :  { %v10289_v2 = vld [vmem:[%s11904_s19 + $0xf8] sm:$0xff]  }
0x1020   :  { %7105 = vmatpush1.bf16.msra.mxu1 %v9092_v17  ;;  %7148 = vmatpush1.bf16.msra.mxu0 %v9094_v19  ;;  %v4505_v17 = vld [vmem:[%s11901_s3 + $0x3f0] sm:$0xff]  ;;  %v4498_v19 = vld [vmem:[%s11901_s3 + $0x3b8] sm:$0xff] }
0x1021   :  { %7176 = vmatprep.subr.bf16.mxu1 %v8985_v20  ;;  %7219 = vmatprep.subr.bf16.mxu0 %v8987_v22  ;;  %v4506_v20 = vld [vmem:[%s11901_s3 + $0x3f8] sm:$0xff]  ;;  %v9080_v22 = vcombine.low %v4481_v63, %v4489_v39  ;;  %v9097_v62 = vcombine.high %v4497_v10, %v4505_v17  ;;  %v9096_v23 = vcombine.low %v4497_v10, %v4505_v17 }
0x1022   :  { %v9099_v21 = vcombine.high %v4498_v19, %v4506_v20 }
0x1023   :  { %7123 = vmatmul.mubr.bf16.vlgmr.msra.gmra.mrb[128].mxu1 %v11598_v6  ;;  %7166 = vmatmul.mubr.bf16.vlgmr.msra.gmra.mrb[132].mxu0 %v11598_v6 }
0x1024   :  { %7177 = vmatpush1.bf16.msra.mxu1 %v8984_v26  ;;  %7220 = vmatpush1.bf16.msra.mxu0 %v8986_v18  ;;  %v9098_v26 = vcombine.low %v4498_v19, %v4506_v20  ;;  %v10260_v18 = vld [vmem:[%s11904_s19 + $0x40] sm:$0xff]  }
0x1025   :  { %7178 = vmatprep.subr.bf16.mxu1 %v9001_v0  ;;  %7221 = vmatprep.subr.bf16.mxu0 %v9003_v27  ;;  %v10261_v0 = vld [vmem:[%s11904_s19 + $0xc0] sm:$0xff]  }
0x1026   :  { %7208 = vmatprep.mubr.bf16.mxu1 %v10527_v30  ;;  %7251 = vmatprep.mubr.bf16.mxu0 %v10527_v30  ;;  %v9034_v30 = vcombine.low %v4434_v46, %v4442_v47  ;;  %v10262_v27 = vld [vmem:[%s11904_s19] sm:$0xff]   ;;  %v10274_v46 = vld [vmem:[%s11904_s19 + $0x18] sm:$0xff]  }
0x1027   :  { %v10275_v47 = vld [vmem:[%s11904_s19 + $0x98] sm:$0xff]  }
0x1028   :  { %7179 = vmatpush1.bf16.msra.mxu1 %v9000_v34  ;;  %7222 = vmatpush1.bf16.msra.mxu0 %v9002_v35  ;;  %v10267_v34 = vld [vmem:[%s11904_s19 + $0x88] sm:$0xff]   ;;  %v10268_v35 = vld [vmem:[%s11904_s19 + $0x50] sm:$0xff]  }
0x1029   :  { %7180 = vmatprep.subr.bf16.mxu1 %v9017_v37  ;;  %7223 = vmatprep.subr.bf16.mxu0 %v9019_v40  ;;  %v10269_v37 = vld [vmem:[%s11904_s19 + $0xd0] sm:$0xff]  }
0x102a   :  { %v10270_v40 = vld [vmem:[%s11904_s19 + $0x10] sm:$0xff]  }
0x102c   :  { %7181 = vmatpush1.bf16.msra.mxu1 %v9016_v33  ;;  %7224 = vmatpush1.bf16.msra.mxu0 %v9018_v48  ;;  %v10276_v33 = vld [vmem:[%s11904_s19 + $0x60] sm:$0xff]  }
0x102d   :  { %7182 = vmatprep.subr.bf16.mxu1 %v9033_v50  ;;  %7225 = vmatprep.subr.bf16.mxu0 %v9035_v51  ;;  %v10277_v48 = vld [vmem:[%s11904_s19 + $0xe0] sm:$0xff]  }
0x102e   :  { %v10278_v50 = vld [vmem:[%s11904_s19 + $0x20] sm:$0xff]  }
0x102f   :  { %v10279_v51 = vld [vmem:[%s11904_s19 + $0xa0] sm:$0xff]  }
0x1030   :  { %7183 = vmatpush1.bf16.msra.mxu1 %v9032_v61  ;;  %7226 = vmatpush1.bf16.msra.mxu0 %v9034_v30  ;;  %v10284_v61 = vld [vmem:[%s11904_s19 + $0x70] sm:$0xff]  }
0x1031   :  { %7184 = vmatprep.subr.bf16.mxu1 %v9049_v57  ;;  %7227 = vmatprep.subr.bf16.mxu0 %v9051_v8  ;;  %v10285_v30 = vld [vmem:[%s11904_s19 + $0xf0] sm:$0xff]  }
0x1032   :  { %v10286_v57 = vld [vmem:[%s11904_s19 + $0x30] sm:$0xff]  }
0x1033   :  { %v10287_v8 = vld [vmem:[%s11904_s19 + $0xb0] sm:$0xff]  }
0x1034   :  { %7185 = vmatpush1.bf16.msra.mxu1 %v9048_v9  ;;  %7228 = vmatpush1.bf16.msra.mxu0 %v9050_v38  ;;  %v10292_v9 = vld [vmem:[%s11904_s19 + $0x140] sm:$0xff]  }
0x1035   :  { %7186 = vmatprep.subr.bf16.mxu1 %v9065_v24  ;;  %7229 = vmatprep.subr.bf16.mxu0 %v9067_v36  ;;  %v10293_v38 = vld [vmem:[%s11904_s19 + $0x1c0] sm:$0xff]  }
0x1036   :  { %v11737_v24 = vld [vmem:[%s11905_s24] sm:$0xff] }
0x1037   :  { %v6201_v36 = vrot.slane %v11737_v24, %v10748_v43  ;;  %v6209_v63 = vrot.slane %v11737_v24, %v10791_v11  ;;  %v6205_v39 = vrot.slane %v11737_v24, %v10754_v45  ;;  %v6213_v12 = vrot.slane %v11737_v24, %v11148_v56 }
0x1038   :  { %7187 = vmatpush1.bf16.msra.mxu1 %v9064_v14  ;;  %7230 = vmatpush1.bf16.msra.mxu0 %v9066_v55 }
0x1039   :  { %7188 = vmatprep.subr.bf16.mxu1 %v9081_v16  ;;  %7231 = vmatprep.subr.bf16.mxu0 %v9083_v15 }
0x103c   :  { %7189 = vmatpush1.bf16.msra.mxu1 %v9080_v22  ;;  %7232 = vmatpush1.bf16.msra.mxu0 %v9082_v25 }
0x103d   :  { %7190 = vmatprep.subr.bf16.mxu1 %v9097_v62  ;;  %7233 = vmatprep.subr.bf16.mxu0 %v9099_v21 }
0x1040   :  { %7191 = vmatpush1.bf16.msra.mxu1 %v9096_v23  ;;  %7234 = vmatpush1.bf16.msra.mxu0 %v9098_v26 }
0x1041   :  { %9537 = vmatprep.subr.bf16.mxu1 %v10260_v18  ;;  %9559 = vmatprep.subr.bf16.mxu0 %v10261_v0 }
0x1043   :  { %7209 = vmatmul.mubr.bf16.vlgmr.msra.gmra.mrb[132].mxu1 %v11598_v6  ;;  %7252 = vmatmul.mubr.bf16.vlgmr.msra.gmra.mrb[136].mxu0 %v11598_v6  ;;  %v10272_v6 = vld [vmem:[%s11904_s19 + $0x58] sm:$0xff]  }
0x1044   :  { %9538 = vmatpush3.bf16.msra.mxu1 %v10262_v27  ;;  %9560 = vmatpush3.bf16.msra.mxu0 %v10263_v5 }
0x1045   :  { %9539 = vmatprep.subr.bf16.mxu1 %v10264_v28  ;;  %9561 = vmatprep.subr.bf16.mxu0 %v10265_v31 }
0x1048   :  { %9540 = vmatpush3.bf16.msra.mxu1 %v10266_v32  ;;  %9562 = vmatpush3.bf16.msra.mxu0 %v10267_v34 }
0x1049   :  { %9541 = vmatprep.subr.bf16.mxu1 %v10268_v35  ;;  %9563 = vmatprep.subr.bf16.mxu0 %v10269_v37 }
0x104c   :  { %9542 = vmatpush3.bf16.msra.mxu1 %v10270_v40  ;;  %9564 = vmatpush3.bf16.msra.mxu0 %v10271_v29 }
0x104d   :  { %9543 = vmatprep.subr.bf16.mxu1 %v10272_v6  ;;  %9565 = vmatprep.subr.bf16.mxu0 %v10273_v41  ;;  %v10294_v41 = vld [vmem:[%s11904_s19 + $0x100] sm:$0xff]  }
0x1050   :  { %9544 = vmatpush3.bf16.msra.mxu1 %v10274_v46  ;;  %9566 = vmatpush3.bf16.msra.mxu0 %v10275_v47  ;;  %v10295_v46 = vld [vmem:[%s11904_s19 + $0x180] sm:$0xff]   ;;  %v10296_v47 = vld [vmem:[%s11904_s19 + $0x148] sm:$0xff]  }
0x1051   :  { %9545 = vmatprep.subr.bf16.mxu1 %v10276_v33  ;;  %9567 = vmatprep.subr.bf16.mxu0 %v10277_v48  ;;  %v10297_v33 = vld [vmem:[%s11904_s19 + $0x1c8] sm:$0xff]  }
0x1052   :  { %v10298_v48 = vld [vmem:[%s11904_s19 + $0x108] sm:$0xff]  }
0x1054   :  { %9546 = vmatpush3.bf16.msra.mxu1 %v10278_v50  ;;  %9568 = vmatpush3.bf16.msra.mxu0 %v10279_v51  ;;  %v10299_v50 = vld [vmem:[%s11904_s19 + $0x188] sm:$0xff]   ;;  %v10300_v51 = vld [vmem:[%s11904_s19 + $0x150] sm:$0xff]  }
0x1055   :  { %9547 = vmatprep.subr.bf16.mxu1 %v10280_v44  ;;  %9569 = vmatprep.subr.bf16.mxu0 %v10281_v49  ;;  %v10301_v44 = vld [vmem:[%s11904_s19 + $0x1d0] sm:$0xff]  }
0x1056   :  { %v10302_v49 = vld [vmem:[%s11904_s19 + $0x110] sm:$0xff]  }
0x1058   :  { %9548 = vmatpush3.bf16.msra.mxu1 %v10282_v52  ;;  %9570 = vmatpush3.bf16.msra.mxu0 %v10283_v60  ;;  %v10303_v52 = vld [vmem:[%s11904_s19 + $0x190] sm:$0xff]   ;;  %v10304_v60 = vld [vmem:[%s11904_s19 + $0x158] sm:$0xff]  }
0x1059   :  { %9549 = vmatprep.subr.bf16.mxu1 %v10284_v61  ;;  %9571 = vmatprep.subr.bf16.mxu0 %v10285_v30  ;;  %v10305_v61 = vld [vmem:[%s11904_s19 + $0x1d8] sm:$0xff]  }
0x105a   :  { %v10306_v30 = vld [vmem:[%s11904_s19 + $0x118] sm:$0xff]  }
0x105c   :  { %9550 = vmatpush3.bf16.msra.mxu1 %v10286_v57  ;;  %9572 = vmatpush3.bf16.msra.mxu0 %v10287_v8  ;;  %v10307_v57 = vld [vmem:[%s11904_s19 + $0x198] sm:$0xff]   ;;  %v10308_v8 = vld [vmem:[%s11904_s19 + $0x160] sm:$0xff]  }
0x105d   :  { %9551 = vmatprep.subr.bf16.mxu1 %v10288_v1  ;;  %9573 = vmatprep.subr.bf16.mxu0 %v10289_v2  ;;  %v10309_v1 = vld [vmem:[%s11904_s19 + $0x1e0] sm:$0xff]  }
0x105e   :  { %v10310_v2 = vld [vmem:[%s11904_s19 + $0x120] sm:$0xff]  }
0x1060   :  { %9552 = vmatpush3.bf16.msra.mxu1 %v10290_v42  ;;  %9574 = vmatpush3.bf16.msra.mxu0 %v10291_v7  ;;  %v10311_v42 = vld [vmem:[%s11904_s19 + $0x1a0] sm:$0xff]   ;;  %v10312_v7 = vld [vmem:[%s11904_s19 + $0x168] sm:$0xff]  }
0x1061   :  { %9581 = vmatprep.subr.bf16.mxu1 %v10292_v9  ;;  %9603 = vmatprep.subr.bf16.mxu0 %v10293_v38  ;;  %v10313_v9 = vld [vmem:[%s11904_s19 + $0x1e8] sm:$0xff]  }
0x1062   :  { %v10314_v38 = vld [vmem:[%s11904_s19 + $0x128] sm:$0xff]  }
0x10b6   :  { %v6952_v13 = vpop.f32.mrb[120].mxu1  ;;  %v6995_v14 = vpop.f32.mrb[124].mxu0 }
0x10b7   :  { %v6953_v55 = vadd.f32 %v6952_v13, %v6201_v36  ;;  %v6996_v16 = vadd.f32 %v6995_v14, %v6209_v63  ;;  %v6954_v15 = vpop.f32.mrb[121].mxu1  ;;  %v6997_v10 = vpop.f32.mrb[125].mxu0  ;;  %v10317_v13 = vld [vmem:[%s11904_s19 + $0x1f0] sm:$0xff]   ;;  %v6221_v14 = vrot.slane %v11737_v24, %v11185_v58 }
0x10b8   :  { %v6955_v17 = vadd.f32 %v6954_v15, %v6205_v39  ;;  %v6998_v19 = vadd.f32 %v6997_v10, %v6213_v12  ;;  %v6956_v20 = vpop.f32.mrb[122].mxu1  ;;  %v6999_v22 = vpop.f32.mrb[126].mxu0  ;;  %v10318_v10 = vld [vmem:[%s11904_s19 + $0x130] sm:$0xff]  }
0x10b9   :  { %v6957_v25 = vadd.f32 %v6956_v20, %v6201_v36  ;;  %v7000_v62 = vadd.f32 %v6999_v22, %v6209_v63  ;;  %v6958_v21 = vpop.f32.mrb[123].mxu1  ;;  %v7001_v23 = vpop.f32.mrb[127].mxu0  ;;  %v7262_v0 = vmax.f32 %v6953_v55, 0.0  ;;  %v7264_v27 = vmax.f32 %v6996_v16, 0.0  ;;  %v10315_v36 = vld [vmem:[%s11904_s19 + $0x1a8] sm:$0xff]  }
0x10ba   :  { %v6959_v26 = vadd.f32 %v6958_v21, %v6205_v39  ;;  %v7002_v18 = vadd.f32 %v7001_v23, %v6213_v12  ;;  %v7263_v31 = vmax.f32 %v6955_v17, 0.0  ;;  %v7265_v32 = vmax.f32 %v6998_v19, 0.0  ;;  %v10316_v12 = vld [vmem:[%s11904_s19 + $0x170] sm:$0xff]   ;;  %v10321_v21 = vld [vmem:[%s11904_s19 + $0x1f8] sm:$0xff]  }
0x10bb   :  { %v7278_v5 = vmax.f32 %v6957_v25, 0.0  ;;  %v7280_v28 = vmax.f32 %v7000_v62, 0.0  ;;  %v6217_v63 = vrot.slane %v11737_v24, %v11179_v53  ;;  %v6225_v39 = vrot.slane %v11737_v24, %v11182_v54  ;;  %v10319_v17 = vld [vmem:[%s11904_s19 + $0x1b0] sm:$0xff]   ;;  %v10320_v62 = vld [vmem:[%s11904_s19 + $0x178] sm:$0xff]  }
0x10bc   :  { %v7279_v34 = vmax.f32 %v6959_v26, 0.0  ;;  %v7281_v35 = vmax.f32 %v7002_v18, 0.0  ;;  %v6229_v55 = vrot.slane %v11737_v24, %v11188_v59 }
0x10bd   :  { %v7294_v37 = vpack.c.bf16 %v7278_v5, %v7262_v0  ;;  %v7296_v40 = vpack.c.bf16 %v7280_v28, %v7264_v27 }
0x10be   :  { %v7295_v29 = vpack.c.bf16 %v7279_v34, %v7263_v31  ;;  %v7297_v6 = vpack.c.bf16 %v7281_v35, %v7265_v32  ;;  %v10322_v34 = vld [vmem:[%s11904_s19 + $0x138] sm:$0xff]  }
0x10bf   :  { %v10323_v35 = vld [vmem:[%s11904_s19 + $0x1b8] sm:$0xff]  }
0x10c0   :  { %8116 = vmatprep.mubr.bf16.mxu1 %v7295_v29  ;;  %8157 = vmatprep.mubr.bf16.mxu0 %v7297_v6 }
0x10c1   :  { %8117 = vmatmul.mubr.bf16.vlgmr.msra.gmra.mrb[136].mxu1 %v7294_v37  ;;  %8158 = vmatmul.mubr.bf16.vlgmr.msra.gmra.mrb[140].mxu0 %v7296_v40 }
0x10c2   :  { %9582 = vmatpush3.bf16.msra.mxu1 %v10294_v41  ;;  %9604 = vmatpush3.bf16.msra.mxu0 %v10295_v46  ;;  %v10324_v41 = vld [vmem:[%s11904_s19 + $0x240] sm:$0xff]  }
0x10c3   :  { %9583 = vmatprep.subr.bf16.mxu1 %v10296_v47  ;;  %9605 = vmatprep.subr.bf16.mxu0 %v10297_v33  ;;  %v10325_v46 = vld [vmem:[%s11904_s19 + $0x2c0] sm:$0xff]  }
0x10c6   :  { %9584 = vmatpush3.bf16.msra.mxu1 %v10298_v48  ;;  %9606 = vmatpush3.bf16.msra.mxu0 %v10299_v50 }
0x10c7   :  { %9585 = vmatprep.subr.bf16.mxu1 %v10300_v51  ;;  %9607 = vmatprep.subr.bf16.mxu0 %v10301_v44 }
0x10ca   :  { %9586 = vmatpush3.bf16.msra.mxu1 %v10302_v49  ;;  %9608 = vmatpush3.bf16.msra.mxu0 %v10303_v52 }
0x10cb   :  { %9587 = vmatprep.subr.bf16.mxu1 %v10304_v60  ;;  %9609 = vmatprep.subr.bf16.mxu0 %v10305_v61  ;;  %v10326_v60 = vld [vmem:[%s11904_s19 + $0x200] sm:$0xff]  }
0x10cc   :  { %v10327_v61 = vld [vmem:[%s11904_s19 + $0x280] sm:$0xff]  }
0x10ce   :  { %9588 = vmatpush3.bf16.msra.mxu1 %v10306_v30  ;;  %9610 = vmatpush3.bf16.msra.mxu0 %v10307_v57  ;;  %v10328_v30 = vld [vmem:[%s11904_s19 + $0x248] sm:$0xff]  }
0x10cf   :  { %9589 = vmatprep.subr.bf16.mxu1 %v10308_v8  ;;  %9611 = vmatprep.subr.bf16.mxu0 %v10309_v1  ;;  %v10329_v57 = vld [vmem:[%s11904_s19 + $0x2c8] sm:$0xff]  }
0x10d0   :  { %v10330_v8 = vld [vmem:[%s11904_s19 + $0x208] sm:$0xff]  }
0x10d1   :  { %v10331_v1 = vld [vmem:[%s11904_s19 + $0x288] sm:$0xff]  }
0x10d2   :  { %9590 = vmatpush3.bf16.msra.mxu1 %v10310_v2  ;;  %9612 = vmatpush3.bf16.msra.mxu0 %v10311_v42  ;;  %v10332_v2 = vld [vmem:[%s11904_s19 + $0x250] sm:$0xff]  }
0x10d3   :  { %9591 = vmatprep.subr.bf16.mxu1 %v10312_v7  ;;  %9613 = vmatprep.subr.bf16.mxu0 %v10313_v9  ;;  %v10333_v42 = vld [vmem:[%s11904_s19 + $0x2d0] sm:$0xff]  }
0x10d4   :  { %v10334_v7 = vld [vmem:[%s11904_s19 + $0x210] sm:$0xff]  }
0x10d5   :  { %v10335_v9 = vld [vmem:[%s11904_s19 + $0x290] sm:$0xff]  }
0x10d6   :  { %v7038_v16 = vpop.f32.mrb[124].mxu1  ;;  %v7081_v15 = vpop.f32.mrb[128].mxu0  ;;  %9592 = vmatpush3.bf16.msra.mxu1 %v10314_v38  ;;  %9614 = vmatpush3.bf16.msra.mxu0 %v10315_v36  ;;  %v10336_v38 = vld [vmem:[%s11904_s19 + $0x258] sm:$0xff]  }
0x10d7   :  { %v7039_v19 = vadd.f32 %v7038_v16, %v6217_v63  ;;  %v7082_v20 = vadd.f32 %v7081_v15, %v6225_v39  ;;  %v7040_v22 = vpop.f32.mrb[125].mxu1  ;;  %v7083_v25 = vpop.f32.mrb[129].mxu0  ;;  %9593 = vmatprep.subr.bf16.mxu1 %v10316_v12  ;;  %9615 = vmatprep.subr.bf16.mxu0 %v10317_v13  ;;  %v10337_v36 = vld [vmem:[%s11904_s19 + $0x2d8] sm:$0xff]   ;;  %v10340_v12 = vld [vmem:[%s11904_s19 + $0x260] sm:$0xff]   ;;  %v10344_v16 = vld [vmem:[%s11904_s19 + $0x268] sm:$0xff]  }
0x10d8   :  { %v7041_v23 = vadd.f32 %v7040_v22, %v6221_v14  ;;  %v7084_v26 = vadd.f32 %v7083_v25, %v6229_v55  ;;  %v7042_v18 = vpop.f32.mrb[126].mxu1  ;;  %v7085_v24 = vpop.f32.mrb[130].mxu0  ;;  %v10341_v13 = vld [vmem:[%s11904_s19 + $0x2e0] sm:$0xff]   ;;  %v10345_v15 = vld [vmem:[%s11904_s19 + $0x2e8] sm:$0xff]   ;;  %v10348_v25 = vld [vmem:[%s11904_s19 + $0x270] sm:$0xff]  }
0x10d9   :  { %v7043_v0 = vadd.f32 %v7042_v18, %v6217_v63  ;;  %v7086_v27 = vadd.f32 %v7085_v24, %v6225_v39  ;;  %v7044_v5 = vpop.f32.mrb[127].mxu1  ;;  %v7087_v28 = vpop.f32.mrb[131].mxu0  ;;  %v7266_v37 = vmax.f32 %v7039_v19, 0.0  ;;  %v7268_v40 = vmax.f32 %v7082_v20, 0.0  ;;  %v10338_v63 = vld [vmem:[%s11904_s19 + $0x218] sm:$0xff]   ;;  %v10347_v19 = vld [vmem:[%s11904_s19 + $0x2a8] sm:$0xff]  }
0x10da   :  { %v7045_v31 = vadd.f32 %v7044_v5, %v6221_v14  ;;  %v7088_v32 = vadd.f32 %v7087_v28, %v6229_v55  ;;  %9594 = vmatpush3.bf16.msra.mxu1 %v10318_v10  ;;  %9616 = vmatpush3.bf16.msra.mxu0 %v10319_v17  ;;  %v7267_v47 = vmax.f32 %v7041_v23, 0.0  ;;  %v7269_v33 = vmax.f32 %v7084_v26, 0.0  ;;  %v10339_v39 = vld [vmem:[%s11904_s19 + $0x298] sm:$0xff]   ;;  %v10342_v14 = vld [vmem:[%s11904_s19 + $0x220] sm:$0xff]   ;;  %v11808_v10 = vld [vmem:[%s11905_s24 + $0x8] sm:$0xff] }
0x10db   :  { %v7282_v29 = vmax.f32 %v7043_v0, 0.0  ;;  %v7284_v6 = vmax.f32 %v7086_v27, 0.0  ;;  %9595 = vmatprep.subr.bf16.mxu1 %v10320_v62  ;;  %9617 = vmatprep.subr.bf16.mxu0 %v10321_v21  ;;  %v10343_v55 = vld [vmem:[%s11904_s19 + $0x2a0] sm:$0xff]   ;;  %v10346_v17 = vld [vmem:[%s11904_s19 + $0x228] sm:$0xff]   ;;  %v6233_v20 = vrot.slane %v11808_v10, %v10748_v43  ;;  %v6241_v22 = vrot.slane %v11808_v10, %v10791_v11  ;;  %v10349_v62 = vld [vmem:[%s11904_s19 + $0x2f0] sm:$0xff]  }
0x10dc   :  { %v7283_v48 = vmax.f32 %v7045_v31, 0.0  ;;  %v7285_v50 = vmax.f32 %v7088_v32, 0.0  ;;  %v6237_v21 = vrot.slane %v11808_v10, %v10754_v45  ;;  %v6245_v23 = vrot.slane %v11808_v10, %v11148_v56  ;;  %v10350_v24 = vld [vmem:[%s11904_s19 + $0x230] sm:$0xff]   ;;  %v10352_v28 = vld [vmem:[%s11904_s19 + $0x278] sm:$0xff]  }
0x10dd   :  { %v7298_v51 = vpack.c.bf16 %v7282_v29, %v7266_v37  ;;  %v7300_v44 = vpack.c.bf16 %v7284_v6, %v7268_v40  ;;  %v10351_v0 = vld [vmem:[%s11904_s19 + $0x2b0] sm:$0xff]   ;;  %v10353_v31 = vld [vmem:[%s11904_s19 + $0x2f8] sm:$0xff]  }
0x10de   :  { %v7299_v49 = vpack.c.bf16 %v7283_v48, %v7267_v47  ;;  %v7301_v52 = vpack.c.bf16 %v7285_v50, %v7269_v33  ;;  %9596 = vmatpush3.bf16.msra.mxu1 %v10322_v34  ;;  %9618 = vmatpush3.bf16.msra.mxu0 %v10323_v35  ;;  %v10355_v47 = vld [vmem:[%s11904_s19 + $0x2b8] sm:$0xff]  }
0x10df   :  { %9625 = vmatprep.subr.bf16.mxu1 %v10324_v41  ;;  %9647 = vmatprep.subr.bf16.mxu0 %v10325_v46  ;;  %v10354_v46 = vld [vmem:[%s11904_s19 + $0x238] sm:$0xff]  }
0x10e0   :  { %8198 = vmatprep.mubr.bf16.mxu1 %v7299_v49  ;;  %8239 = vmatprep.mubr.bf16.mxu0 %v7301_v52  ;;  %v10357_v49 = vld [vmem:[%s11904_s19 + $0x3c0] sm:$0xff]  }
0x10e1   :  { %8199 = vmatmul.mubr.bf16.vlgmr.msra.gmra.mrb[140].mxu1 %v7298_v51  ;;  %8240 = vmatmul.mubr.bf16.vlgmr.msra.gmra.mrb[144].mxu0 %v7300_v44  ;;  %v10356_v44 = vld [vmem:[%s11904_s19 + $0x340] sm:$0xff]  }
0x10e2   :  { %9626 = vmatpush3.bf16.msra.mxu1 %v10326_v60  ;;  %9648 = vmatpush3.bf16.msra.mxu0 %v10327_v61 }
0x10e3   :  { %9627 = vmatprep.subr.bf16.mxu1 %v10328_v30  ;;  %9649 = vmatprep.subr.bf16.mxu0 %v10329_v57 }
0x10e6   :  { %9628 = vmatpush3.bf16.msra.mxu1 %v10330_v8  ;;  %9650 = vmatpush3.bf16.msra.mxu0 %v10331_v1 }
0x10e7   :  { %9629 = vmatprep.subr.bf16.mxu1 %v10332_v2  ;;  %9651 = vmatprep.subr.bf16.mxu0 %v10333_v42  ;;  %v10358_v42 = vld [vmem:[%s11904_s19 + $0x300] sm:$0xff]  }
0x10ea   :  { %9630 = vmatpush3.bf16.msra.mxu1 %v10334_v7  ;;  %9652 = vmatpush3.bf16.msra.mxu0 %v10335_v9  ;;  %v10359_v7 = vld [vmem:[%s11904_s19 + $0x380] sm:$0xff]   ;;  %v10360_v9 = vld [vmem:[%s11904_s19 + $0x348] sm:$0xff]  }
0x10eb   :  { %9631 = vmatprep.subr.bf16.mxu1 %v10336_v38  ;;  %9653 = vmatprep.subr.bf16.mxu0 %v10337_v36  ;;  %v10361_v38 = vld [vmem:[%s11904_s19 + $0x3c8] sm:$0xff]  }
0x10ec   :  { %v10362_v36 = vld [vmem:[%s11904_s19 + $0x308] sm:$0xff]  }
0x10ee   :  { %9632 = vmatpush3.bf16.msra.mxu1 %v10338_v63  ;;  %9654 = vmatpush3.bf16.msra.mxu0 %v10339_v39  ;;  %v10363_v63 = vld [vmem:[%s11904_s19 + $0x388] sm:$0xff]   ;;  %v10364_v39 = vld [vmem:[%s11904_s19 + $0x350] sm:$0xff]  }
0x10ef   :  { %9633 = vmatprep.subr.bf16.mxu1 %v10340_v12  ;;  %9655 = vmatprep.subr.bf16.mxu0 %v10341_v13  ;;  %v10365_v12 = vld [vmem:[%s11904_s19 + $0x3d0] sm:$0xff]  }
0x10f0   :  { %v10366_v13 = vld [vmem:[%s11904_s19 + $0x310] sm:$0xff]  }
0x10f2   :  { %9634 = vmatpush3.bf16.msra.mxu1 %v10342_v14  ;;  %9656 = vmatpush3.bf16.msra.mxu0 %v10343_v55  ;;  %v10367_v14 = vld [vmem:[%s11904_s19 + $0x390] sm:$0xff]   ;;  %v10368_v55 = vld [vmem:[%s11904_s19 + $0x358] sm:$0xff]  }
0x10f3   :  { %9635 = vmatprep.subr.bf16.mxu1 %v10344_v16  ;;  %9657 = vmatprep.subr.bf16.mxu0 %v10345_v15  ;;  %v10369_v16 = vld [vmem:[%s11904_s19 + $0x3d8] sm:$0xff]  }
0x10f4   :  { %v10370_v15 = vld [vmem:[%s11904_s19 + $0x318] sm:$0xff]  }
0x10f6   :  { %v7124_v26 = vpop.f32.mrb[128].mxu1  ;;  %v7167_v18 = vpop.f32.mrb[132].mxu0  ;;  %9636 = vmatpush3.bf16.msra.mxu1 %v10346_v17  ;;  %9658 = vmatpush3.bf16.msra.mxu0 %v10347_v19  ;;  %v10371_v17 = vld [vmem:[%s11904_s19 + $0x398] sm:$0xff]   ;;  %v10372_v19 = vld [vmem:[%s11904_s19 + $0x360] sm:$0xff]  }
0x10f7   :  { %v7125_v43 = vadd.f32 %v7124_v26, %v6233_v20  ;;  %v7168_v27 = vadd.f32 %v7167_v18, %v6241_v22  ;;  %v7126_v5 = vpop.f32.mrb[129].mxu1  ;;  %v7169_v11 = vpop.f32.mrb[133].mxu0  ;;  %9637 = vmatprep.subr.bf16.mxu1 %v10348_v25  ;;  %9659 = vmatprep.subr.bf16.mxu0 %v10349_v62  ;;  %v10375_v25 = vld [vmem:[%s11904_s19 + $0x3a0] sm:$0xff]   ;;  %v10376_v62 = vld [vmem:[%s11904_s19 + $0x368] sm:$0xff]   ;;  %v6249_v18 = vrot.slane %v11808_v10, %v11179_v53 }
0x10f8   :  { %v7127_v45 = vadd.f32 %v7126_v5, %v6237_v21  ;;  %v7170_v32 = vadd.f32 %v7169_v11, %v6245_v23  ;;  %v7128_v34 = vpop.f32.mrb[130].mxu1  ;;  %v7171_v56 = vpop.f32.mrb[134].mxu0  ;;  %v10379_v26 = vld [vmem:[%s11904_s19 + $0x3a8] sm:$0xff]   ;;  %v6261_v5 = vrot.slane %v11808_v10, %v11188_v59 }
0x10f9   :  { %v7129_v35 = vadd.f32 %v7128_v34, %v6233_v20  ;;  %v7172_v37 = vadd.f32 %v7171_v56, %v6241_v22  ;;  %v7130_v40 = vpop.f32.mrb[131].mxu1  ;;  %v7173_v29 = vpop.f32.mrb[135].mxu0  ;;  %v7270_v33 = vmax.f32 %v7125_v43, 0.0  ;;  %v7272_v48 = vmax.f32 %v7168_v27, 0.0  ;;  %v10373_v20 = vld [vmem:[%s11904_s19 + $0x3e0] sm:$0xff]   ;;  %v10381_v43 = vld [vmem:[%s11904_s19 + $0x3f0] sm:$0xff]  }
0x10fa   :  { %v7131_v6 = vadd.f32 %v7130_v40, %v6237_v21  ;;  %v7174_v41 = vadd.f32 %v7173_v29, %v6245_v23  ;;  %9638 = vmatpush3.bf16.msra.mxu1 %v10350_v24  ;;  %9660 = vmatpush3.bf16.msra.mxu0 %v10351_v0  ;;  %v7271_v52 = vmax.f32 %v7127_v45, 0.0  ;;  %v7273_v60 = vmax.f32 %v7170_v32, 0.0  ;;  %v10374_v22 = vld [vmem:[%s11904_s19 + $0x320] sm:$0xff]   ;;  %v10377_v21 = vld [vmem:[%s11904_s19 + $0x3e8] sm:$0xff]   ;;  %v10380_v0 = vld [vmem:[%s11904_s19 + $0x370] sm:$0xff]  }
0x10fb   :  { %v7286_v50 = vmax.f32 %v7129_v35, 0.0  ;;  %v7288_v51 = vmax.f32 %v7172_v37, 0.0  ;;  %9639 = vmatprep.subr.bf16.mxu1 %v10352_v28  ;;  %9661 = vmatprep.subr.bf16.mxu0 %v10353_v31  ;;  %v10378_v23 = vld [vmem:[%s11904_s19 + $0x328] sm:$0xff]   ;;  %v6257_v24 = vrot.slane %v11808_v10, %v11182_v54  ;;  %v6253_v27 = vrot.slane %v11808_v10, %v11185_v58  ;;  %v10382_v31 = vld [vmem:[%s11904_s19 + $0x330] sm:$0xff]   ;;  %v10384_v56 = vld [vmem:[%s11904_s19 + $0x378] sm:$0xff]  }
0x10fc   :  { %v7287_v61 = vmax.f32 %v7131_v6, 0.0  ;;  %v7289_v30 = vmax.f32 %v7174_v41, 0.0  ;;  %v10383_v45 = vld [vmem:[%s11904_s19 + $0x3b0] sm:$0xff]   ;;  %v10385_v35 = vld [vmem:[%s11904_s19 + $0x3f8] sm:$0xff]  }
0x10fd   :  { %v7302_v57 = vpack.c.bf16 %v7286_v50, %v7270_v33  ;;  %v7304_v8 = vpack.c.bf16 %v7288_v51, %v7272_v48  ;;  %v10386_v33 = vld [vmem:[%s11904_s19 + $0x338] sm:$0xff]  }
0x10fe   :  { %v7303_v1 = vpack.c.bf16 %v7287_v61, %v7271_v52  ;;  %v7305_v2 = vpack.c.bf16 %v7289_v30, %v7273_v60  ;;  %9640 = vmatpush3.bf16.msra.mxu1 %v10354_v46  ;;  %9662 = vmatpush3.bf16.msra.mxu0 %v10355_v47  ;;  %v10387_v48 = vld [vmem:[%s11904_s19 + $0x3b8] sm:$0xff]  }
0x10ff   :  { %9669 = vmatprep.subr.bf16.mxu1 %v10356_v44  ;;  %9691 = vmatprep.subr.bf16.mxu0 %v10357_v49 }
0x1100   :  { %8280 = vmatprep.mubr.bf16.mxu1 %v7303_v1  ;;  %8321 = vmatprep.mubr.bf16.mxu0 %v7305_v2 }
0x1101   :  { %8281 = vmatmul.mubr.bf16.vlgmr.msra.gmra.mrb[144].mxu1 %v7302_v57  ;;  %8322 = vmatmul.mubr.bf16.vlgmr.msra.gmra.mrb[148].mxu0 %v7304_v8 }
0x1102   :  { %9670 = vmatpush3.bf16.msra.mxu1 %v10358_v42  ;;  %9692 = vmatpush3.bf16.msra.mxu0 %v10359_v7 }
0x1103   :  { %9671 = vmatprep.subr.bf16.mxu1 %v10360_v9  ;;  %9693 = vmatprep.subr.bf16.mxu0 %v10361_v38  ;;  %v9100_v9 = vld [vmem:[%s11906_s30] ss:$0 sm:$0xff] }
0x1106   :  { %9672 = vmatpush3.bf16.msra.mxu1 %v10362_v36  ;;  %9694 = vmatpush3.bf16.msra.mxu0 %v10363_v63 }
0x1107   :  { %9673 = vmatprep.subr.bf16.mxu1 %v10364_v39  ;;  %9695 = vmatprep.subr.bf16.mxu0 %v10365_v12 }
0x110a   :  { %9674 = vmatpush3.bf16.msra.mxu1 %v10366_v13  ;;  %9696 = vmatpush3.bf16.msra.mxu0 %v10367_v14 }
0x110b   :  { %9675 = vmatprep.subr.bf16.mxu1 %v10368_v55  ;;  %9697 = vmatprep.subr.bf16.mxu0 %v10369_v16 }
0x110e   :  { %9676 = vmatpush3.bf16.msra.mxu1 %v10370_v15  ;;  %9698 = vmatpush3.bf16.msra.mxu0 %v10371_v17 }
0x110f   :  { %9677 = vmatprep.subr.bf16.mxu1 %v10372_v19  ;;  %9699 = vmatprep.subr.bf16.mxu0 %v10373_v20 }
0x1112   :  { %9678 = vmatpush3.bf16.msra.mxu1 %v10374_v22  ;;  %9700 = vmatpush3.bf16.msra.mxu0 %v10375_v25 }
0x1113   :  { %9679 = vmatprep.subr.bf16.mxu1 %v10376_v62  ;;  %9701 = vmatprep.subr.bf16.mxu0 %v10377_v21 }
0x1116   :  { %v7210_v11 = vpop.f32.mrb[132].mxu1  ;;  %v7253_v28 = vpop.f32.mrb[136].mxu0  ;;  %9680 = vmatpush3.bf16.msra.mxu1 %v10378_v23  ;;  %9702 = vmatpush3.bf16.msra.mxu0 %v10379_v26 }
0x1117   :  { %v7211_v53 = vadd.f32 %v7210_v11, %v6249_v18  ;;  %v7254_v32 = vadd.f32 %v7253_v28, %v6257_v24  ;;  %v7212_v34 = vpop.f32.mrb[133].mxu1  ;;  %v7255_v54 = vpop.f32.mrb[137].mxu0  ;;  %9681 = vmatprep.subr.bf16.mxu1 %v10380_v0  ;;  %9703 = vmatprep.subr.bf16.mxu0 %v10381_v43 }
0x1118   :  { %v7213_v58 = vadd.f32 %v7212_v34, %v6253_v27  ;;  %v7256_v37 = vadd.f32 %v7255_v54, %v6261_v5  ;;  %v7214_v40 = vpop.f32.mrb[134].mxu1  ;;  %v7257_v59 = vpop.f32.mrb[138].mxu0 }
0x1119   :  { %v7215_v10 = vadd.f32 %v7214_v40, %v6249_v18  ;;  %v7258_v29 = vadd.f32 %v7257_v59, %v6257_v24  ;;  %v7216_v6 = vpop.f32.mrb[135].mxu1  ;;  %v7259_v41 = vpop.f32.mrb[139].mxu0  ;;  %v7274_v50 = vmax.f32 %v7211_v53, 0.0  ;;  %v7276_v51 = vmax.f32 %v7254_v32, 0.0 }
0x111a   :  { %v7217_v46 = vadd.f32 %v7216_v6, %v6253_v27  ;;  %v7260_v47 = vadd.f32 %v7259_v41, %v6261_v5  ;;  %9682 = vmatpush3.bf16.msra.mxu1 %v10382_v31  ;;  %9704 = vmatpush3.bf16.msra.mxu0 %v10383_v45  ;;  %v7275_v52 = vmax.f32 %v7213_v58, 0.0  ;;  %v7277_v60 = vmax.f32 %v7256_v37, 0.0 }
0x111b   :  { %v7290_v44 = vmax.f32 %v7215_v10, 0.0  ;;  %v7292_v49 = vmax.f32 %v7258_v29, 0.0  ;;  %9683 = vmatprep.subr.bf16.mxu1 %v10384_v56  ;;  %9705 = vmatprep.subr.bf16.mxu0 %v10385_v35 }
0x111c   :  { %v7291_v61 = vmax.f32 %v7217_v46, 0.0  ;;  %v7293_v30 = vmax.f32 %v7260_v47, 0.0 }
0x111d   :  { %v7306_v57 = vpack.c.bf16 %v7290_v44, %v7274_v50  ;;  %v7308_v8 = vpack.c.bf16 %v7292_v49, %v7276_v51 }
0x111e   :  { %v7307_v1 = vpack.c.bf16 %v7291_v61, %v7275_v52  ;;  %v7309_v2 = vpack.c.bf16 %v7293_v30, %v7277_v60  ;;  %9684 = vmatpush3.bf16.msra.mxu1 %v10386_v33  ;;  %9706 = vmatpush3.bf16.msra.mxu0 %v10387_v48 }
0x1120   :  { %8362 = vmatprep.mubr.bf16.mxu1 %v7307_v1  ;;  %8403 = vmatprep.mubr.bf16.mxu0 %v7309_v2 }
0x1121   :  { %8363 = vmatmul.mubr.bf16.vlgmr.msra.gmra.mrb[148].mxu1 %v7306_v57  ;;  %8404 = vmatmul.mubr.bf16.vlgmr.msra.gmra.mrb[152].mxu0 %v7308_v8 }
0x1194   :  { %v9553_v42 = vpop.f32.mrb[136].mxu1  ;;  %v9575_v7 = vpop.f32.mrb[140].mxu0 }
0x1195   :  { %v9554_v38 = vpop.f32.mrb[137].mxu1  ;;  %v9576_v36 = vpop.f32.mrb[141].mxu0 }
0x1196   :  { %v9555_v63 = vadd.f32 %v9554_v38, %v9553_v42  ;;  %v9577_v39 = vadd.f32 %v9576_v36, %v9575_v7  ;;  %v9556_v12 = vpop.f32.mrb[138].mxu1  ;;  %v9578_v13 = vpop.f32.mrb[142].mxu0 }
0x1197   :  { %v9557_v14 = vpop.f32.mrb[139].mxu1  ;;  %v9579_v55 = vpop.f32.mrb[143].mxu0 }
0x1198   :  { %v8119_v16 = vadd.f32 %v9555_v63, %v9100_v9  ;;  %v9558_v15 = vadd.f32 %v9557_v14, %v9556_v12  ;;  %v9580_v17 = vadd.f32 %v9579_v55, %v9578_v13 }
0x119a   :  { %v8160_v19 = vadd.f32 %v9577_v39, %v8119_v16  ;;  %v8122_v20 = vadd.f32 %v9558_v15, %v9100_v9 }
0x119c   :  { %v8163_v22 = vadd.f32 %v9580_v17, %v8122_v20 }
0x11b4   :  { %v9597_v25 = vpop.f32.mrb[140].mxu1  ;;  %v9619_v62 = vpop.f32.mrb[144].mxu0 }
0x11b5   :  { %v9598_v21 = vpop.f32.mrb[141].mxu1  ;;  %v9620_v23 = vpop.f32.mrb[145].mxu0 }
0x11b6   :  { %v9599_v26 = vadd.f32 %v9598_v21, %v9597_v25  ;;  %v9621_v18 = vadd.f32 %v9620_v23, %v9619_v62  ;;  %v9600_v24 = vpop.f32.mrb[142].mxu1  ;;  %v9622_v0 = vpop.f32.mrb[146].mxu0 }
0x11b7   :  { %v9601_v43 = vpop.f32.mrb[143].mxu1  ;;  %v9623_v27 = vpop.f32.mrb[147].mxu0 }
0x11b8   :  { %v8201_v5 = vadd.f32 %v9599_v26, %v8160_v19  ;;  %v9602_v11 = vadd.f32 %v9601_v43, %v9600_v24  ;;  %v9624_v28 = vadd.f32 %v9623_v27, %v9622_v0  ;;  %v9229_v24 = vld [vmem:[%s11907_s20] ss:$0 sm:$0xff] }
0x11b9   :  { %v9230_v43 = vld [vmem:[%s10670_s12] ss:$0 sm:$0xff]  ;;  %s10531_s12 = smov [#allocation2]  }
0x11ba   :  { %v8242_v31 = vadd.f32 %v9621_v18, %v8201_v5  ;;  %v8204_v45 = vadd.f32 %v9602_v11, %v8163_v22  ;;  %s8543_s7 = sshll.u32 %s10531_s12, 4  ;;  %s8544_s7 = int_to_ptr.vmem [resolvable:$true] %s8543_s7 }
0x11bb   :  { %s10472_s10 = scalar_lea.vmem %s8544_s7, 32  ;;  %p10477_p1 = scmp.lt.s32.totalorder %s8544_s7, %s8544_s7 }
0x11bc   :  { %v8245_v53 = vadd.f32 %v9624_v28, %v8204_v45  ;;  %p10473_p0 = scmp.ne.s32.totalorder %s8544_s7, %s10472_s10  ;;  %p10478_p2 = scmp.lt.s32.totalorder %s10472_s10, %s10472_s10 }
0x11be   :  { %p10479_p3 = por %p10478_p2, %p10477_p1 }
0x11c0   :  { %p10480_p4 = pnand %p10479_p3, %p10473_p0 }
0x11d4   :  { %v9641_v32 = vpop.f32.mrb[144].mxu1  ;;  %v9663_v34 = vpop.f32.mrb[148].mxu0 }
0x11d5   :  { %v9642_v54 = vpop.f32.mrb[145].mxu1  ;;  %v9664_v56 = vpop.f32.mrb[149].mxu0 }
0x11d6   :  { %v9643_v35 = vadd.f32 %v9642_v54, %v9641_v32  ;;  %v9665_v58 = vadd.f32 %v9664_v56, %v9663_v34  ;;  %v9644_v37 = vpop.f32.mrb[146].mxu1  ;;  %v9666_v40 = vpop.f32.mrb[150].mxu0 }
0x11d7   :  { %v9645_v59 = vpop.f32.mrb[147].mxu1  ;;  %v9667_v10 = vpop.f32.mrb[151].mxu0 }
0x11d8   :  { %v8283_v29 = vadd.f32 %v9643_v35, %v8242_v31  ;;  %v9646_v6 = vadd.f32 %v9645_v59, %v9644_v37  ;;  %v9668_v41 = vadd.f32 %v9667_v10, %v9666_v40 }
0x11da   :  { %v8324_v46 = vadd.f32 %v9665_v58, %v8283_v29  ;;  %v8286_v47 = vadd.f32 %v9646_v6, %v8245_v53 }
0x11dc   :  { %v8327_v33 = vadd.f32 %v9668_v41, %v8286_v47 }
0x11f4   :  { %v9685_v48 = vpop.f32.mrb[148].mxu1  ;;  %v9707_v50 = vpop.f32.mrb[152].mxu0 }
0x11f5   :  { %v9686_v51 = vpop.f32.mrb[149].mxu1  ;;  %v9708_v44 = vpop.f32.mrb[153].mxu0 }
0x11f6   :  { %v9687_v49 = vadd.f32 %v9686_v51, %v9685_v48  ;;  %v9709_v52 = vadd.f32 %v9708_v44, %v9707_v50  ;;  %v9688_v60 = vpop.f32.mrb[150].mxu1  ;;  %v9710_v61 = vpop.f32.mrb[154].mxu0 }
0x11f7   :  { %v9689_v30 = vpop.f32.mrb[151].mxu1  ;;  %v9711_v57 = vpop.f32.mrb[155].mxu0 }
0x11f8   :  { %v8365_v8 = vadd.f32 %v9687_v49, %v8324_v46  ;;  %v9690_v1 = vadd.f32 %v9689_v30, %v9688_v60  ;;  %v9712_v2 = vadd.f32 %v9711_v57, %v9710_v61 }
0x11fa   :  { %v8406_v42 = vadd.f32 %v9709_v52, %v8365_v8  ;;  %v8368_v7 = vadd.f32 %v9690_v1, %v8327_v33 }
0x11fc   :  { %v8409_v9 = vadd.f32 %v9712_v2, %v8368_v7  ;;  %v8412_v63 = vadd.f32 %v8406_v42, %v11592_v4  ;;  %v9231_v2 = vld [vmem:[%s10675_s6] ss:$0 sm:$0xff] }
0x11fe   :  { %v8413_v38 = vadd.f32 %v8409_v9, %v11594_v3  ;;  %v8420_v39 = vmul.f32 %v8412_v63, %v8412_v63 }
0x1200   :  { %8416 = vadd.xlane.f32.xlu1 %v8413_v38  ;;  %v8421_v36 = vmul.f32 %v8413_v38, %v8413_v38 }
0x1202   :  { %8424 = vadd.xlane.f32.xlu0 %v8421_v36 }
0x1204   :  { %8414 = vadd.xlane.f32.xlu1 %v8412_v63 }
0x1206   :  { %8422 = vadd.xlane.f32.xlu0 %v8420_v39 }
0x128d   :  { %v8417_v12 = vpop.xlane.xlu1 %8416 }
0x128e   :  { %v8419_v13 = vmul.f32 0.0078125, %v8417_v12 }
0x128f   :  { %v8425_v14 = vpop.xlane.xlu0 %8424 }
0x1290   :  { %v8429_v55 = vmul.f32 %v8419_v13, %v8419_v13  ;;  %v8427_v16 = vmul.f32 0.0078125, %v8425_v14  ;;  %v8435_v26 = vsub.f32 %v8413_v38, %v8419_v13  ;;  %v9232_v38 = vld [vmem:[%s10680_s27] ss:$0 sm:$0xff] }
0x1291   :  { %v8415_v15 = vpop.xlane.xlu1 %8414 }
0x1292   :  { %v8431_v17 = vsub.f32 %v8427_v16, %v8429_v55  ;;  %v8418_v19 = vmul.f32 0.0078125, %v8415_v15 }
0x1293   :  { %v8423_v20 = vpop.xlane.xlu0 %8422 }
0x1294   :  { %v8433_v3 = vmax.f32 %v8431_v17, 0.0  ;;  %v8428_v22 = vmul.f32 %v8418_v19, %v8418_v19  ;;  %v8426_v25 = vmul.f32 0.0078125, %v8423_v20  ;;  %v8434_v27 = vsub.f32 %v8412_v63, %v8418_v19 }
0x1296   :  { %v8437_v62 = vadd.f32 1e-05, %v8433_v3  ;;  %v8430_v4 = vsub.f32 %v8426_v25, %v8428_v22 }
0x1298   :  { %10464 = vrsqrt.f32 %v8437_v62  ;;  %v8432_v21 = vmax.f32 %v8430_v4, 0.0 }
0x129a   :  { %v8436_v23 = vadd.f32 1e-05, %v8432_v21 }
0x129c   :  { %10466 = vrsqrt.f32 %v8436_v23 }
0x12a2   :  { %v10465_v18 = vpop.eup %10464 }
0x12a3   :  { %v8441_v0 = vmul.f32 %v10465_v18, %v8435_v26 }
0x12a5   :  { %v8449_v5 = vmul.f32 %v9229_v24, %v8441_v0 }
0x12a6   :  { %v10467_v11 = vpop.eup %10466 }
0x12a7   :  { %v8457_v28 = vadd.f32 %v9230_v43, %v8449_v5  ;;  %v8440_v31 = vmul.f32 %v10467_v11, %v8434_v27 }
0x12a9   :  { %v8462_v45 = vrot.slane %v8457_v28, 7  ;;  %v8476_v53 = vmul.f32 %v8457_v28, %v8457_v28  ;;  %v8448_v32 = vmul.f32 %v9229_v24, %v8440_v31 }
0x12ab   :  { %v8470_v34 = vsel %vm8469_vm6, %v8462_v45, 0.0  ;;  %v8479_v54 = vrot.slane %v8476_v53, 7  ;;  %v8456_v56 = vadd.f32 %v9230_v43, %v8448_v32 }
0x12ac   :  { %8471 = vadd.xlane.f32.xlu1 %v8470_v34 }
0x12ad   :  { %v8485_v35 = vsel %vm8469_vm6, %v8479_v54, 0.0  ;;  %v8475_v58 = vmul.f32 %v8456_v56, %v8456_v56  ;;  %v8466_v37 = vsel %vm8465_vm7, %v8456_v56, 0.0 }
0x12ae   :  { %8486 = vadd.xlane.f32.xlu0 %v8485_v35 }
0x12af   :  { %v8482_v40 = vsel %vm8465_vm7, %v8475_v58, 0.0 }
0x12b0   :  { %8467 = vadd.xlane.f32.xlu1 %v8466_v37 }
0x12b2   :  { %8483 = vadd.xlane.f32.xlu0 %v8482_v40 }
0x1339   :  { %v8472_v59 = vpop.xlane.xlu1 %8471 }
0x133a   :  { %v8474_v10 = vmul.f32 0.0078125, %v8472_v59 }
0x133b   :  { %v8487_v29 = vpop.xlane.xlu0 %8486 }
0x133c   :  { %v8491_v6 = vmul.f32 %v8474_v10, %v8474_v10  ;;  %v8489_v41 = vmul.f32 0.0078125, %v8487_v29  ;;  %v8498_v30 = vrot.slane %v8474_v10, 1 }
0x133d   :  { %v8468_v46 = vpop.xlane.xlu1 %8467 }
0x133e   :  { %v8493_v47 = vsub.f32 %v8489_v41, %v8491_v6  ;;  %v8473_v33 = vmul.f32 0.0078125, %v8468_v46  ;;  %v8502_v8 = vsub.f32 %v8457_v28, %v8498_v30 }
0x133f   :  { %v8484_v48 = vpop.xlane.xlu0 %8483 }
0x1340   :  { %v8495_v50 = vmax.f32 %v8493_v47, 0.0  ;;  %v8490_v51 = vmul.f32 %v8473_v33, %v8473_v33  ;;  %v8488_v44 = vmul.f32 0.0078125, %v8484_v48  ;;  %v8501_v42 = vsub.f32 %v8456_v56, %v8473_v33 }
0x1342   :  { %v8504_v49 = vadd.f32 1e-05, %v8495_v50  ;;  %v8492_v52 = vsub.f32 %v8488_v44, %v8490_v51 }
0x1344   :  { %10468 = vrsqrt.f32 %v8504_v49  ;;  %v8494_v60 = vmax.f32 %v8492_v52, 0.0 }
0x1346   :  { %v8503_v61 = vadd.f32 1e-05, %v8494_v60 }
0x1348   :  { %10470 = vrsqrt.f32 %v8503_v61 }
0x134e   :  { %v10469_v57 = vpop.eup %10468 }
0x134f   :  { %v8509_v1 = vrot.slane %v10469_v57, 1 }
0x1351   :  { %v8513_v7 = vmul.f32 %v8509_v1, %v8502_v8 }
0x1352   :  { %v10471_v9 = vpop.eup %10470 }
0x1353   :  { %v8512_v36 = vmul.f32 %v10471_v9, %v8501_v42  ;;  %v8521_v63 = vmul.f32 %v9231_v2, %v8513_v7 }
0x1355   :  { %v8520_v39 = vmul.f32 %v9231_v2, %v8512_v36  ;;  %v8529_v12 = vadd.f32 %v9232_v38, %v8521_v63 }
0x1357   :  { %v8528_v13 = vadd.f32 %v9232_v38, %v8520_v39  ;;  %v8532_v14 = vrot.slane %v8529_v12, 7 }
0x1359   :  { %8535 = vst [vmem:[#allocation2 - $0x7] sm:$0x80] %v8528_v13  ;;  %8536 = vst [vmem:[#allocation2 + $0x1] sm:$0x1] %v8532_v14 }
0x135a   :  { %10483 = shalt.err (!%p10480_p4)
}
0x135b   :  { %s10484_s6 = scalar_lea.hbm %s10685_s4, 32 }
0x135c   :  { %p10485_p5 = scmp.ne.s32.totalorder %s10685_s4, %s10484_s6  ;;  %p10488_p6 = scmp.lt.u32.totalorder %s10484_s6, %s10685_s4 }
0x135e   :  { %p10490_p7 = pnand %p10488_p6, %p10485_p5 }
0x1360   :  { %10493 = shalt.err (!%p10490_p7)
}
0x1361   :  { %8546 = dma.vmem_to_hbm [thread:$0]  %s8544_s7, 32, %s10685_s4, [#allocation3]  }
0x1362   :  { %10494 = dma.done.wait [#allocation3], 32  }
0x1363   :  { %10495 = vsyncadd [#allocation3], 4294967264 }
0x1364   :  { %8550 = vsyncpa [#allocation3], 1 }

// kernel: temporal_layer_forward.1
= control target key start
LH: loop header
LB: loop body
LE: loop exit
PB: predicated region body
PF: predicated region fallthrough
CT: control target
= control target key end

     0   :  { %s10496_s6 = smov 1   ;;  %s10497_s10 = smov 2   ;;  %s11879_s0 = inlined_call_operand.smem [shape: u32[30], index: -1, kind: input, shape index: {}] }
   0x1   :  { %s10540_s5 = sld [smem:[%s11879_s0]]   ;;  %s10498_s14 = smov 3  }
   0x2   :  { %s10545_s9 = sld [smem:[%s11879_s0 + %s10496_s6]]   ;;  %s10499_s18 = smov 4  }
   0x3   :  { %s10550_s13 = sld [smem:[%s11879_s0 + %s10497_s10]]   ;;  %s10500_s22 = smov 5  }
   0x4   :  { %s10555_s17 = sld [smem:[%s11879_s0 + %s10498_s14]]   ;;  %s10501_s26 = smov 6  }
   0x5   :  { %s10560_s21 = sld [smem:[%s11879_s0 + %s10499_s18]]   ;;  %s10502_s30 = smov 7  }
   0x6   :  { %s10565_s25 = sld [smem:[%s11879_s0 + %s10500_s22]]   ;;  %s10503_s4 = smov 8  }
   0x7   :  { %s10570_s29 = sld [smem:[%s11879_s0 + %s10501_s26]]   ;;  %s10504_s10 = smov 9  }
   0x8   :  { %s10575_s3 = sld [smem:[%s11879_s0 + %s10502_s30]]   ;;  %s10505_s15 = smov 10  }
   0x9   :  { %s10580_s8 = sld [smem:[%s11879_s0 + %s10503_s4]]   ;;  %s10506_s20 = smov 11  }
   0xa   :  { %s10585_s14 = sld [smem:[%s11879_s0 + %s10504_s10]]   ;;  %s10507_s26 = smov 12  }
   0xb   :  { %s10590_s19 = sld [smem:[%s11879_s0 + %s10505_s15]]   ;;  %s10508_s1 = smov 13  }
   0xc   :  { %s10595_s24 = sld [smem:[%s11879_s0 + %s10506_s20]]   ;;  %s10509_s7 = smov 14  }
   0xd   :  { %s10600_s30 = sld [smem:[%s11879_s0 + %s10507_s26]]   ;;  %s10510_s15 = smov 15  }
   0xe   :  { %s10605_s6 = sld [smem:[%s11879_s0 + %s10508_s1]]   ;;  %s10511_s22 = smov 16  }
   0xf   :  { %s10610_s12 = sld [smem:[%s11879_s0 + %s10509_s7]]   ;;  %s10512_s28 = smov 17  }
  0x10   :  { %s10615_s20 = sld [smem:[%s11879_s0 + %s10510_s15]]   ;;  %s10513_s7 = smov 18  }
  0x11   :  { %s10620_s27 = sld [smem:[%s11879_s0 + %s10511_s22]]   ;;  %s10514_s15 = smov 19  }
  0x12   :  { %s10625_s4 = sld [smem:[%s11879_s0 + %s10512_s28]]   ;;  %s10515_s22 = smov 20  }
  0x13   :  { %s10516_s28 = smov 21  }
  0x14   :  { %11884 = sst [smem:[#allocation5_spill]] %s10605_s6 }
  0x15   :  { %11885 = sst [smem:[#allocation6_spill]] %s10610_s12 }
  0x16   :  { %s10630_s12 = sld [smem:[%s11879_s0 + %s10513_s7]]   ;;  %s10517_s7 = smov 22  }
  0x17   :  { %11886 = sst [smem:[#allocation7_spill]] %s10620_s27 }
  0x18   :  { %11887 = sst [smem:[#allocation8_spill]] %s10625_s4 }
  0x19   :  { %s10635_s6 = sld [smem:[%s11879_s0 + %s10514_s15]]   ;;  %s10518_s15 = smov 23  }
  0x1a   :  { %s10640_s27 = sld [smem:[%s11879_s0 + %s10515_s22]]   ;;  %s10519_s22 = smov 24  }
  0x1b   :  { %s10645_s4 = sld [smem:[%s11879_s0 + %s10516_s28]]   ;;  %s10520_s28 = smov 25  }
  0x1c   :  { %11888 = sst [smem:[#allocation9_spill]] %s10630_s12 }
  0x1d   :  { %s10650_s12 = sld [smem:[%s11879_s0 + %s10517_s7]]   ;;  %s10521_s7 = smov 26  }
  0x1f   :  { %11889 = sst [smem:[#allocation10_spill]] %s10635_s6 }
  0x20   :  { %11890 = sst [smem:[#allocation11_spill]] %s10640_s27 }
  0x21   :  { %11891 = sst [smem:[#allocation12_spill]] %s10645_s4 }
  0x22   :  { %s10655_s6 = sld [smem:[%s11879_s0 + %s10518_s15]]   ;;  %s10522_s15 = smov 27  }
  0x23   :  { %11892 = sst [smem:[#allocation13_spill]] %s10650_s12 }
  0x24   :  { %s10660_s27 = sld [smem:[%s11879_s0 + %s10519_s22]]   ;;  %s10523_s22 = smov 28  }
  0x25   :  { %s10665_s4 = sld [smem:[%s11879_s0 + %s10520_s28]]   ;;  %s10524_s28 = smov 29  }
  0x26   :  { %s10670_s12 = sld [smem:[%s11879_s0 + %s10521_s7]]  }
  0x28   :  { %11893 = sst [smem:[#allocation14_spill]] %s10655_s6 }
  0x29   :  { %s10675_s6 = sld [smem:[%s11879_s0 + %s10522_s15]]  }
  0x2a   :  { %11894 = sst [smem:[#allocation15_spill]] %s10660_s27 }
  0x2b   :  { %11895 = sst [smem:[#allocation16_spill]] %s10665_s4 }
  0x2c   :  { %s10680_s27 = sld [smem:[%s11879_s0 + %s10523_s22]]  }
  0x2d   :  { %s10685_s4 = sld [smem:[%s11879_s0 + %s10524_s28]]  }
  0x2e   :  { %vm145_vm0 = vcmask 1045504   ;;  %v10525_v0 = vmov 0.0   ;;  %v10051_v1 = vld [vmem:[%s10545_s9] sm:$0x3f]   ;;  %v125_v3 = vld [vmem:[%s10540_s5 + $0x8] sm:$0xff]  ;;  %vm10526_vm1 = vmmov 0  }
  0x2f   :  { %9713 = vmatprep.subr.bf16.mxu0 %v10525_v0  ;;  %v124_v2 = vld [vmem:[%s10540_s5] sm:$0xff]  ;;  %9715 = vmatprep.mubr.msk.bf16.mxu0 %vm10526_vm1, %v10525_v0  ;;  %v147_v5 = vsel %vm145_vm0, %v10051_v1, 0  ;;  %vm141_vm2 = vcmask 97280   ;;  %v10055_v8 = vld [vmem:[%s10555_s17 + $0x8] ss:$12 sps:$4 sm:$0xff]   ;;  %v10527_v30 = vmov 0  }
  0x30   :  { %v10052_v4 = vld [vmem:[%s10555_s17 + $0x4] ss:$12 sps:$4 sm:$0xff]   ;;  %v126_v6 = vpack.c.bf16 %v125_v3, %v124_v2  ;;  %v10054_v7 = vld [vmem:[%s10555_s17] ss:$12 sps:$4 sm:$0xff]   ;;  %9714 = vmatpush3.bf16.msra.mxu0 %v147_v5  ;;  %v10056_v9 = vld [vmem:[%s10555_s17 + $0x1c] ss:$12 sps:$4 sm:$0xff]   ;;  %810 = vmatprep.mubr.bf16.mxu1 %v10527_v30 }
  0x31   :  { %778 = vmatprep.subr.bf16.mxu1 %v10052_v4  ;;  %9719 = vmatprep.subr.bf16.mxu0 %v10525_v0  ;;  %v10058_v10 = vld [vmem:[%s10555_s17 + $0x18] ss:$12 sps:$4 sm:$0xff]   ;;  %v10060_v11 = vld [vmem:[%s10555_s17 + $0x34] ss:$12 sps:$4 sm:$0xff]   ;;  %v10062_v13 = vld [vmem:[%s10555_s17 + $0x30] ss:$12 sps:$4 sm:$0xff]  }
  0x32   :  { %779 = vmatpush1.bf16.msra.mxu1 %v10054_v7  ;;  %v10059_v12 = vld [vmem:[%s10555_s17 + $0x20] ss:$12 sps:$4 sm:$0xff]   ;;  %v10063_v15 = vld [vmem:[%s10555_s17 + $0x38] ss:$12 sps:$4 sm:$0xff]   ;;  %v10066_v16 = vld [vmem:[%s10555_s17 + $0x48] ss:$12 sps:$4 sm:$0xff]  }
  0x33   :  { %9716 = vmatmul.mubr.msk.bf16.vlgmr.msra.gmra.mrb[0].mxu0 %vm141_vm2, %v126_v6  ;;  %780 = vmatprep.subr.bf16.mxu1 %v10056_v9  ;;  %v10064_v14 = vld [vmem:[%s10555_s17 + $0x4c] ss:$12 sps:$4 sm:$0xff]   ;;  %v10067_v17 = vld [vmem:[%s10555_s17 + $0x50] ss:$12 sps:$4 sm:$0xff]   ;;  %v10071_v21 = vld [vmem:[%s10555_s17 + $0x68] ss:$12 sps:$4 sm:$0xff]  }
  0x34   :  { %9720 = vmatpush3.bf16.msra.mxu0 %v10055_v8  ;;  %9735 = vmatprep.mubr.msk.bf16.mxu0 %vm10526_vm1, %v10525_v0  ;;  %v10068_v18 = vld [vmem:[%s10555_s17 + $0x64] ss:$12 sps:$4 sm:$0xff]   ;;  %v10070_v19 = vld [vmem:[%s10555_s17 + $0x60] ss:$12 sps:$4 sm:$0xff]   ;;  %v10072_v20 = vld [vmem:[%s10555_s17 + $0x7c] ss:$12 sps:$4 sm:$0xff]  }
  0x35   :  { %9721 = vmatprep.subr.bf16.mxu0 %v10525_v0  ;;  %v10074_v22 = vld [vmem:[%s10555_s17 + $0x78] ss:$12 sps:$4 sm:$0xff]   ;;  %v10075_v23 = vld [vmem:[%s10555_s17 + $0x80] ss:$12 sps:$4 sm:$0xff]   ;;  %v10078_v25 = vld [vmem:[%s10555_s17 + $0x90] ss:$12 sps:$4 sm:$0xff]  }
  0x36   :  { %781 = vmatpush1.bf16.msra.mxu1 %v10058_v10  ;;  %v10076_v24 = vld [vmem:[%s10555_s17 + $0x94] ss:$12 sps:$4 sm:$0xff]   ;;  %v10079_v26 = vld [vmem:[%s10555_s17 + $0x98] ss:$12 sps:$4 sm:$0xff]   ;;  %v10083_v29 = vld [vmem:[%s10555_s17 + $0xb0] ss:$12 sps:$4 sm:$0xff]  }
  0x37   :  { %782 = vmatprep.subr.bf16.mxu1 %v10060_v11  ;;  %v10080_v27 = vld [vmem:[%s10555_s17 + $0xac] ss:$12 sps:$4 sm:$0xff]   ;;  %v10082_v28 = vld [vmem:[%s10555_s17 + $0xa8] ss:$12 sps:$4 sm:$0xff]  }
  0x38   :  { %9722 = vmatpush3.bf16.msra.mxu0 %v10059_v12 }
  0x39   :  { %9723 = vmatprep.subr.bf16.mxu0 %v10525_v0 }
  0x3a   :  { %783 = vmatpush1.bf16.msra.mxu1 %v10062_v13 }
  0x3b   :  { %784 = vmatprep.subr.bf16.mxu1 %v10064_v14 }
  0x3c   :  { %9724 = vmatpush3.bf16.msra.mxu0 %v10063_v15 }
  0x3d   :  { %9725 = vmatprep.subr.bf16.mxu0 %v10525_v0 }
  0x3e   :  { %785 = vmatpush1.bf16.msra.mxu1 %v10066_v16 }
  0x3f   :  { %786 = vmatprep.subr.bf16.mxu1 %v10068_v18 }
  0x40   :  { %9726 = vmatpush3.bf16.msra.mxu0 %v10067_v17 }
  0x41   :  { %9727 = vmatprep.subr.bf16.mxu0 %v10525_v0 }
  0x42   :  { %787 = vmatpush1.bf16.msra.mxu1 %v10070_v19 }
  0x43   :  { %788 = vmatprep.subr.bf16.mxu1 %v10072_v20 }
  0x44   :  { %9728 = vmatpush3.bf16.msra.mxu0 %v10071_v21 }
  0x45   :  { %9729 = vmatprep.subr.bf16.mxu0 %v10525_v0 }
  0x46   :  { %789 = vmatpush1.bf16.msra.mxu1 %v10074_v22 }
  0x47   :  { %790 = vmatprep.subr.bf16.mxu1 %v10076_v24 }
  0x48   :  { %9730 = vmatpush3.bf16.msra.mxu0 %v10075_v23 }
  0x49   :  { %9731 = vmatprep.subr.bf16.mxu0 %v10525_v0 }
  0x4a   :  { %791 = vmatpush1.bf16.msra.mxu1 %v10078_v25 }
  0x4b   :  { %792 = vmatprep.subr.bf16.mxu1 %v10080_v27 }
  0x4c   :  { %9732 = vmatpush3.bf16.msra.mxu0 %v10079_v26 }
  0x4d   :  { %9733 = vmatprep.subr.bf16.mxu0 %v10525_v0 }
  0x4e   :  { %793 = vmatpush1.bf16.msra.mxu1 %v10082_v28 }
  0x4f   :  { %9739 = vmatprep.subr.bf16.mxu1 %v10525_v0 }
  0x50   :  { %9734 = vmatpush3.bf16.msra.mxu0 %v10083_v29 }
  0x51   :  { %9745 = vmatprep.subr.bf16.mxu0 %v10525_v0 }
  0x52   :  { %64 = vsyncpa [#allocation3], 0  ;;  %v8580_v31 = vld [vmem:[%s10550_s13] ss:$0 sm:$0xff]  ;;  %v635_v41 = vlaneseq  ;;  %vm916_vm3 = vcmask 261120   ;;  %s10528_s0 = smov 96  }
  0x53   :  { %v10751_v44 = vld [vmem:[%s10560_s21] sm:$0x7]  ;;  %s10529_s5 = smov 64   ;;  %s10530_s9 = smov 32   ;;  %vm1385_vm4 = vcmask 1043456   ;;  %vm1285_vm5 = vcmask 64512  }
  0x54   :  { %v10745_v42 = vshrl.u32 %v635_v41, 7  ;;  %s11896_s13 = sld [smem:[#allocation5_spill]]  ;;  %s11897_s17 = sld [smem:[#allocation6_spill]]  ;;  %vm8469_vm6 = vcmask 1040384   ;;  %vm8465_vm7 = vcmask 1047559  }
  0x55   :  { %s11898_s21 = sld [smem:[#allocation7_spill]] }
  0x56   :  { %v10748_v43 = vsub.s32 0, %v10745_v42  ;;  %v10754_v45 = vsub.s32 1, %v10745_v42  ;;  %v10791_v11 = vsub.s32 2, %v10745_v42 }
  0x58   :  { %v638_v46 = vrot.slane %v10751_v44, %v10748_v43  ;;  %v642_v47 = vrot.slane %v10751_v44, %v10754_v45  ;;  %v646_v15 = vrot.slane %v10751_v44, %v10791_v11 }
 0x106   :  { %v183_v32 = vpop.f32.mrb[0].mxu0 }
 0x107   :  { %v10731_v33 = vadd.f32 %v8580_v31, %v183_v32  ;;  %v9717_v34 = vpop.f32.mrb[1].mxu0 }
 0x108   :  { %v186_v35 = vpop.f32.mrb[2].mxu0 }
 0x109   :  { %v10733_v36 = vadd.f32 %v8580_v31, %v186_v35  ;;  %v9718_v37 = vpop.f32.mrb[3].mxu0  ;;  %v190_v38 = vmax.f32 %v10731_v33, 0.0 }
 0x10b   :  { %v191_v39 = vmax.f32 %v10733_v36, 0.0  ;;  %v252_v36 = vld [vmem:[%s10585_s14 + $0x40] sm:$0xff] }
 0x10d   :  { %v633_v40 = vpack.c.bf16 %v191_v39, %v190_v38 }
 0x10f   :  { %811 = vmatmul.mubr.bf16.vlgmr.msra.gmra.mrb[0].mxu1 %v633_v40  ;;  %9736 = vmatmul.mubr.bf16.vlgmr.msra.gmra.mrb[4].mxu0 %v633_v40 }
 0x110   :  { %9741 = vmatprep.mubr.msk.bf16.mxu1 %vm10526_vm1, %v10525_v0  ;;  %9747 = vmatprep.mubr.msk.bf16.mxu0 %vm10526_vm1, %v10525_v0 }
 0x1e2   :  { %v812_v48 = vpop.f32.mrb[0].mxu1  ;;  %v10760_v49 = vpop.f32.mrb[4].mxu0 }
 0x1e3   :  { %v813_v50 = vadd.f32 %v812_v48, %v638_v46  ;;  %v814_v51 = vpop.f32.mrb[1].mxu1  ;;  %v9737_v52 = vpop.f32.mrb[5].mxu0  ;;  %v856_v18 = vadd.f32 %v10760_v49, %v646_v15 }
 0x1e4   :  { %v815_v53 = vadd.f32 %v814_v51, %v642_v47  ;;  %v816_v54 = vpop.f32.mrb[2].mxu1  ;;  %v10762_v55 = vpop.f32.mrb[6].mxu0 }
 0x1e5   :  { %v9233_v56 = vpack.c.bf16 %v813_v50, %v813_v50  ;;  %v817_v57 = vadd.f32 %v816_v54, %v638_v46  ;;  %v818_v58 = vpop.f32.mrb[3].mxu1  ;;  %v9738_v59 = vpop.f32.mrb[7].mxu0  ;;  %v10811_v21 = vpack.c.bf16 %v856_v18, %v856_v18  ;;  %v859_v22 = vadd.f32 %v10762_v55, %v646_v15 }
 0x1e6   :  { %v9235_v60 = vpack.c.bf16 %v815_v53, %v815_v53  ;;  %v819_v61 = vadd.f32 %v818_v58, %v642_v47 }
 0x1e7   :  { %870 = vrot.lane.b32.xlu1 %v9233_v56, %s10528_s0  ;;  %v9234_v1 = vpack.c.bf16 %v817_v57, %v817_v57  ;;  %v10819_v25 = vpack.c.bf16 %v859_v22, %v859_v22  ;;  %v1387_v26 = vsel %vm1385_vm4, %v10811_v21, 0 }
 0x1e8   :  { %v9236_v62 = vpack.c.bf16 %v819_v61, %v819_v61  ;;  %887 = vrot.lane.b32.xlu0 %v9235_v60, %s10528_s0  ;;  %v921_v63 = vsel %vm916_vm3, %v9235_v60, 0 }
 0x1e9   :  { %9740 = vmatpush3.bf16.xpose.msra.mxu1 %v921_v63  ;;  %v1433_v28 = vsel %vm1385_vm4, %v10819_v25, 0 }
 0x1ea   :  { %v967_v2 = vsel %vm916_vm3, %v9236_v62, 0  ;;  %9751 = vmatprep.subr.bf16.mxu1 %v10525_v0 }
 0x1eb   :  { %9746 = vmatpush3.bf16.xpose.msra.mxu0 %v967_v2  ;;  %872 = vrot.lane.b32.xlu1 %v9234_v1, %s10528_s0 }
 0x1ec   :  { %889 = vrot.lane.b32.xlu0 %v9236_v62, %s10528_s0  ;;  %9757 = vmatprep.subr.bf16.mxu0 %v10525_v0 }
 0x1ef   :  { %893 = vrot.lane.b32.xlu1 %v9236_v62, %s10529_s5 }
 0x1f0   :  { %891 = vrot.lane.b32.xlu0 %v9235_v60, %s10529_s5  ;;  %9742 = vmatmul.mubr.msk.bf16.vlgmr.msra.gmra.mrb[4].mxu1 %vm916_vm3, %v9233_v56 }
 0x1f1   :  { %9753 = vmatprep.mubr.msk.bf16.mxu1 %vm10526_vm1, %v10525_v0 }
 0x1f2   :  { %9748 = vmatmul.mubr.msk.bf16.vlgmr.msra.gmra.mrb[8].mxu0 %vm916_vm3, %v9234_v1 }
 0x1f3   :  { %876 = vrot.lane.b32.xlu1 %v9234_v1, %s10529_s5  ;;  %9759 = vmatprep.mubr.msk.bf16.mxu0 %vm10526_vm1, %v10525_v0 }
 0x1f4   :  { %874 = vrot.lane.b32.xlu0 %v9233_v56, %s10529_s5 }
 0x1f7   :  { %897 = vrot.lane.b32.xlu1 %v9236_v62, %s10530_s9 }
 0x1f8   :  { %895 = vrot.lane.b32.xlu0 %v9235_v60, %s10530_s9 }
 0x1fb   :  { %880 = vrot.lane.b32.xlu1 %v9234_v1, %s10530_s9 }
 0x1fc   :  { %878 = vrot.lane.b32.xlu0 %v9233_v56, %s10530_s9 }
 0x259   :  { %v871_v3 = vpop.permute.xlu1 %870 }
 0x25a   :  { %v888_v4 = vpop.permute.xlu0 %887 }
 0x25b   :  { %v1013_v5 = vsel %vm916_vm3, %v888_v4, 0 }
 0x25c   :  { %9752 = vmatpush3.bf16.xpose.msra.mxu1 %v1013_v5 }
 0x25d   :  { %v873_v6 = vpop.permute.xlu1 %872  ;;  %9763 = vmatprep.subr.bf16.mxu1 %v10525_v0 }
 0x25e   :  { %v890_v7 = vpop.permute.xlu0 %889 }
 0x25f   :  { %v1059_v8 = vsel %vm916_vm3, %v890_v7, 0 }
 0x260   :  { %9758 = vmatpush3.bf16.xpose.msra.mxu0 %v1059_v8 }
 0x261   :  { %v894_v9 = vpop.permute.xlu1 %893  ;;  %9769 = vmatprep.subr.bf16.mxu0 %v10525_v0 }
 0x262   :  { %v892_v10 = vpop.permute.xlu0 %891  ;;  %v1151_v16 = vsel %vm916_vm3, %v894_v9, 0 }
 0x263   :  { %v1105_v12 = vsel %vm916_vm3, %v892_v10, 0  ;;  %9754 = vmatmul.mubr.msk.bf16.vlgmr.msra.gmra.mrb[8].mxu1 %vm916_vm3, %v871_v3 }
 0x264   :  { %9764 = vmatpush3.bf16.xpose.msra.mxu1 %v1105_v12  ;;  %9765 = vmatprep.mubr.msk.bf16.mxu1 %vm10526_vm1, %v10525_v0 }
 0x265   :  { %9775 = vmatprep.subr.bf16.mxu1 %v10525_v0  ;;  %v877_v13 = vpop.permute.xlu1 %876 }
 0x266   :  { %v875_v14 = vpop.permute.xlu0 %874 }
 0x267   :  { %9760 = vmatmul.mubr.msk.bf16.vlgmr.msra.gmra.mrb[12].mxu0 %vm916_vm3, %v873_v6 }
 0x268   :  { %9770 = vmatpush3.bf16.xpose.msra.mxu0 %v1151_v16  ;;  %9771 = vmatprep.mubr.msk.bf16.mxu0 %vm10526_vm1, %v10525_v0 }
 0x269   :  { %9781 = vmatprep.subr.bf16.mxu0 %v10525_v0  ;;  %v898_v20 = vpop.permute.xlu1 %897 }
 0x26a   :  { %v896_v17 = vpop.permute.xlu0 %895  ;;  %v1243_v23 = vsel %vm916_vm3, %v898_v20, 0 }
 0x26b   :  { %v1197_v19 = vsel %vm916_vm3, %v896_v17, 0  ;;  %9766 = vmatmul.mubr.msk.bf16.vlgmr.msra.gmra.mrb[12].mxu1 %vm916_vm3, %v875_v14 }
 0x26c   :  { %9776 = vmatpush3.bf16.xpose.msra.mxu1 %v1197_v19  ;;  %9777 = vmatprep.mubr.msk.bf16.mxu1 %vm10526_vm1, %v10525_v0 }
 0x26d   :  { %9787 = vmatprep.subr.bf16.mxu1 %v10525_v0  ;;  %v881_v27 = vpop.permute.xlu1 %880 }
 0x26e   :  { %v879_v24 = vpop.permute.xlu0 %878 }
 0x26f   :  { %9772 = vmatmul.mubr.msk.bf16.vlgmr.msra.gmra.mrb[16].mxu0 %vm916_vm3, %v877_v13 }
 0x270   :  { %9782 = vmatpush3.bf16.xpose.msra.mxu0 %v1243_v23  ;;  %9783 = vmatprep.mubr.msk.bf16.mxu0 %vm10526_vm1, %v10525_v0 }
 0x271   :  { %9793 = vmatprep.subr.bf16.mxu0 %v10525_v0 }
 0x273   :  { %9778 = vmatmul.mubr.msk.bf16.vlgmr.msra.gmra.mrb[16].mxu1 %vm916_vm3, %v879_v24 }
 0x274   :  { %9788 = vmatpush3.bf16.msra.mxu1 %v1387_v26  ;;  %9789 = vmatprep.mubr.msk.bf16.mxu1 %vm10526_vm1, %v10525_v0 }
 0x275   :  { %9799 = vmatprep.subr.bf16.mxu1 %v10525_v0 }
 0x277   :  { %9784 = vmatmul.mubr.msk.bf16.vlgmr.msra.gmra.mrb[20].mxu0 %vm916_vm3, %v881_v27 }
 0x278   :  { %9794 = vmatpush3.bf16.msra.mxu0 %v1433_v28  ;;  %9795 = vmatprep.mubr.msk.bf16.mxu0 %vm10526_vm1, %v10525_v0 }
 0x279   :  { %9805 = vmatprep.subr.bf16.mxu0 %v10525_v0 }
 0x2c3   :  { %v957_v29 = vpop.f32.mrb[4].mxu1 }
 0x2c4   :  { %v9743_v31 = vpop.f32.mrb[5].mxu1  ;;  %v1286_v32 = vsel %vm1285_vm5, %v957_v29, -inf }
 0x2c5   :  { %1287 = vmax.xlane.f32.xlu0 %v1286_v32  ;;  %v960_v34 = vpop.f32.mrb[6].mxu1  ;;  %v1003_v35 = vpop.f32.mrb[8].mxu0 }
 0x2c6   :  { %v9744_v37 = vpop.f32.mrb[7].mxu1  ;;  %v9749_v40 = vpop.f32.mrb[9].mxu0  ;;  %v1289_v41 = vsel %vm1285_vm5, %v1003_v35, -inf }
 0x2c7   :  { %1290 = vmax.xlane.f32.xlu1 %v1289_v41  ;;  %v1006_v44 = vpop.f32.mrb[10].mxu0 }
 0x2c8   :  { %v9750_v46 = vpop.f32.mrb[11].mxu0 }
 0x336   :  { %v1049_v47 = vpop.f32.mrb[8].mxu1 }
 0x337   :  { %v9755_v48 = vpop.f32.mrb[9].mxu1  ;;  %v1292_v49 = vsel %vm1285_vm5, %v1049_v47, -inf }
 0x338   :  { %1293 = vmax.xlane.f32.xlu0 %v1292_v49  ;;  %v1052_v50 = vpop.f32.mrb[10].mxu1 }
 0x339   :  { %v9756_v51 = vpop.f32.mrb[11].mxu1 }
 0x33a   :  { %v1095_v52 = vpop.f32.mrb[12].mxu0 }
 0x33b   :  { %v9761_v53 = vpop.f32.mrb[13].mxu0  ;;  %v1295_v54 = vsel %vm1285_vm5, %v1095_v52, -inf }
 0x33c   :  { %1296 = vmax.xlane.f32.xlu0 %v1295_v54  ;;  %v1098_v55 = vpop.f32.mrb[14].mxu0 }
 0x33d   :  { %v9762_v56 = vpop.f32.mrb[15].mxu0 }
 0x33e   :  { %v10837_v57 = vpop.f32.mrb[12].mxu1 }
 0x33f   :  { %v9767_v58 = vpop.f32.mrb[13].mxu1  ;;  %v1298_v59 = vsel %vm1285_vm5, %v10837_v57, -inf }
 0x340   :  { %v1144_v60 = vpop.f32.mrb[14].mxu1  ;;  %1299 = vmax.xlane.f32.xlu1 %v1298_v59 }
 0x341   :  { %v9768_v61 = vpop.f32.mrb[15].mxu1 }
 0x342   :  { %v1187_v62 = vpop.f32.mrb[16].mxu0 }
 0x343   :  { %v9773_v63 = vpop.f32.mrb[17].mxu0  ;;  %v1301_v1 = vsel %vm1285_vm5, %v1187_v62, -inf }
 0x344   :  { %1302 = vmax.xlane.f32.xlu0 %v1301_v1  ;;  %v1190_v2 = vpop.f32.mrb[18].mxu0 }
 0x345   :  { %v9774_v3 = vpop.f32.mrb[19].mxu0 }
 0x346   :  { %v1233_v4 = vpop.f32.mrb[16].mxu1 }
 0x347   :  { %v9779_v5 = vpop.f32.mrb[17].mxu1  ;;  %v1304_v6 = vsel %vm1285_vm5, %v1233_v4, -inf }
 0x348   :  { %v1236_v7 = vpop.f32.mrb[18].mxu1  ;;  %1305 = vmax.xlane.f32.xlu1 %v1304_v6 }
 0x349   :  { %v9780_v8 = vpop.f32.mrb[19].mxu1 }
 0x34a   :  { %v1279_v9 = vpop.f32.mrb[20].mxu0 }
 0x34b   :  { %v9785_v10 = vpop.f32.mrb[21].mxu0  ;;  %v1307_v12 = vsel %vm1285_vm5, %v1279_v9, -inf }
 0x34c   :  { %1308 = vmax.xlane.f32.xlu0 %v1307_v12  ;;  %v1282_v13 = vpop.f32.mrb[22].mxu0 }
 0x34d   :  { %v9786_v14 = vpop.f32.mrb[23].mxu0 }
 0x352   :  { %v1288_v19 = vpop.xlane.xlu0 %1287 }
 0x353   :  { %v1310_v22 = vsub.f32 %v957_v29, %v1288_v19 }
 0x354   :  { %v1291_v15 = vpop.xlane.xlu1 %1290 }
 0x355   :  { %v1311_v16 = vsub.f32 %v1003_v35, %v1291_v15  ;;  %v1318_v23 = vmul.f32 1.442695, %v1310_v22 }
 0x357   :  { %v1320_v17 = vmul.f32 1.442695, %v1311_v16 }
 0x359   :  { %10388 = vpow2.f32 %v1320_v17  ;;  %904 = vrot.lane.b32.xlu1 %v10811_v21, %s10528_s0 }
 0x35a   :  { %10390 = vpow2.f32 %v1318_v23 }
 0x363   :  { %v10389_v18 = vpop.eup %10388 }
 0x364   :  { %v1337_v20 = vsel %vm1285_vm5, %v10389_v18, 0.0  ;;  %v10391_v24 = vpop.eup %10390 }
 0x365   :  { %1338 = vadd.xlane.f32.xlu0 %v1337_v20  ;;  %v1334_v26 = vsel %vm1285_vm5, %v10391_v24, 0.0 }
 0x37d   :  { %1335 = vadd.xlane.f32.xlu1 %v1334_v26 }
 0x3c5   :  { %v1294_v27 = vpop.xlane.xlu0 %1293 }
 0x3c6   :  { %v1312_v28 = vsub.f32 %v1049_v47, %v1294_v27 }
 0x3c8   :  { %v1322_v31 = vmul.f32 1.442695, %v1312_v28 }
 0x3c9   :  { %v1297_v32 = vpop.xlane.xlu0 %1296 }
 0x3ca   :  { %10392 = vpow2.f32 %v1322_v31  ;;  %v1313_v34 = vsub.f32 %v1095_v52, %v1297_v32 }
 0x3cc   :  { %v1324_v35 = vmul.f32 1.442695, %v1313_v34 }
 0x3cd   :  { %v1300_v48 = vpop.xlane.xlu1 %1299 }
 0x3ce   :  { %10394 = vpow2.f32 %v1324_v35  ;;  %v1314_v49 = vsub.f32 %v10837_v57, %v1300_v48 }
 0x3d0   :  { %v1326_v52 = vmul.f32 1.442695, %v1314_v49 }
 0x3d1   :  { %v1303_v44 = vpop.xlane.xlu0 %1302 }
 0x3d2   :  { %v1315_v50 = vsub.f32 %v1187_v62, %v1303_v44 }
 0x3d4   :  { %v10848_v37 = vpop.eup %10392  ;;  %v1328_v55 = vmul.f32 1.442695, %v1315_v50 }
 0x3d5   :  { %v1340_v40 = vsel %vm1285_vm5, %v10848_v37, 0.0  ;;  %v1306_v51 = vpop.xlane.xlu1 %1305 }
 0x3d6   :  { %1341 = vadd.xlane.f32.xlu1 %v1340_v40  ;;  %v1316_v53 = vsub.f32 %v1233_v4, %v1306_v51 }
 0x3d8   :  { %v10852_v29 = vpop.eup %10394  ;;  %v1330_v59 = vmul.f32 1.442695, %v1316_v53  ;;  %v10084_v53 = vld [vmem:[%s10565_s25] sm:$0xff]  }
 0x3d9   :  { %v1343_v41 = vsel %vm1285_vm5, %v10852_v29, 0.0  ;;  %v1309_v46 = vpop.xlane.xlu0 %1308  ;;  %v905_v57 = vpop.permute.xlu1 %904 }
 0x3da   :  { %1344 = vadd.xlane.f32.xlu0 %v1343_v41  ;;  %v1317_v56 = vsub.f32 %v1279_v9, %v1309_v46  ;;  %v1479_v12 = vsel %vm1385_vm4, %v905_v57, 0 }
 0x3dc   :  { %v1332_v61 = vmul.f32 1.442695, %v1317_v56  ;;  %v10085_v56 = vld [vmem:[%s10565_s25 + $0x8] sm:$0xff]  }
 0x3e7   :  { %908 = vrot.lane.b32.xlu1 %v10811_v21, %s10529_s5 }
 0x3eb   :  { %910 = vrot.lane.b32.xlu1 %v10819_v25, %s10529_s5 }
 0x3f0   :  { %906 = vrot.lane.b32.xlu0 %v10819_v25, %s10528_s0 }
 0x3f2   :  { %v1339_v47 = vpop.xlane.xlu0 %1338 }
 0x3f3   :  { %10396 = vrcp.f32 %v1339_v47 }
 0x3f4   :  { %10398 = vpow2.f32 %v1326_v52 }
 0x3f5   :  { %10400 = vpow2.f32 %v1328_v55 }
 0x3f6   :  { %10402 = vpow2.f32 %v1330_v59  ;;  %v10087_v59 = vld [vmem:[%s10565_s25 + $0x18] sm:$0xff]  }
 0x3f7   :  { %10404 = vpow2.f32 %v1332_v61 }
 0x3fd   :  { %v10397_v54 = vpop.eup %10396 }
 0x3fe   :  { %v1367_v58 = vmul.f32 %v10397_v54, %v10389_v18  ;;  %v10399_v62 = vpop.eup %10398 }
 0x3ff   :  { %v10401_v1 = vpop.eup %10400  ;;  %v1346_v3 = vsel %vm1285_vm5, %v10399_v62, 0.0 }
 0x400   :  { %v1375_v60 = vpack.c.bf16 %v1367_v58, %v1367_v58  ;;  %v10866_v2 = vpop.eup %10402  ;;  %v1349_v4 = vsel %vm1285_vm5, %v10401_v1, 0.0  ;;  %v10086_v58 = vld [vmem:[%s10565_s25 + $0x10] sm:$0xff]  }
 0x401   :  { %v10870_v5 = vpop.eup %10404  ;;  %v1352_v6 = vsel %vm1285_vm5, %v10866_v2, 0.0 }
 0x402   :  { %9796 = vmatmul.mubr.msk.bf16.vlgmr.msra.gmra.mrb[24].mxu0 %vm1285_vm5, %v1375_v60  ;;  %v1355_v7 = vsel %vm1285_vm5, %v10870_v5, 0.0 }
 0x403   :  { %9807 = vmatprep.mubr.msk.bf16.mxu0 %vm10526_vm1, %v10525_v0 }
 0x40a   :  { %v1336_v63 = vpop.xlane.xlu1 %1335 }
 0x40b   :  { %10406 = vrcp.f32 %v1336_v63 }
 0x40f   :  { %1347 = vadd.xlane.f32.xlu1 %v1346_v3  ;;  %1350 = vadd.xlane.f32.xlu0 %v1349_v4 }
 0x413   :  { %1353 = vadd.xlane.f32.xlu1 %v1352_v6  ;;  %1356 = vadd.xlane.f32.xlu0 %v1355_v7  ;;  %v10089_v6 = vld [vmem:[%s10565_s25 + $0x28] sm:$0xff]  }
 0x415   :  { %v10407_v8 = vpop.eup %10406 }
 0x416   :  { %v1366_v9 = vmul.f32 %v10407_v8, %v10391_v24 }
 0x418   :  { %v1374_v10 = vpack.c.bf16 %v1366_v9, %v1366_v9 }
 0x41a   :  { %9790 = vmatmul.mubr.msk.bf16.vlgmr.msra.gmra.mrb[20].mxu1 %vm1285_vm5, %v1374_v10 }
 0x41b   :  { %9800 = vmatpush3.bf16.msra.mxu1 %v1479_v12  ;;  %9801 = vmatprep.mubr.msk.bf16.mxu1 %vm10526_vm1, %v10525_v0 }
 0x41c   :  { %9811 = vmatprep.subr.bf16.mxu1 %v10525_v0 }
 0x424   :  { %914 = vrot.lane.b32.xlu1 %v10819_v25, %s10530_s9 }
 0x429   :  { %912 = vrot.lane.b32.xlu0 %v10811_v21, %s10530_s9 }
 0x463   :  { %v1342_v13 = vpop.xlane.xlu1 %1341 }
 0x464   :  { %10408 = vrcp.f32 %v1342_v13  ;;  %v10090_v13 = vld [vmem:[%s10565_s25 + $0x30] sm:$0xff]  }
 0x467   :  { %v1345_v14 = vpop.xlane.xlu0 %1344  ;;  %v909_v18 = vpop.permute.xlu1 %908 }
 0x468   :  { %10410 = vrcp.f32 %v1345_v14  ;;  %v1571_v25 = vsel %vm1385_vm4, %v909_v18, 0  ;;  %v10091_v18 = vld [vmem:[%s10565_s25 + $0x38] sm:$0xff]  }
 0x46b   :  { %v907_v15 = vpop.permute.xlu0 %906  ;;  %v911_v23 = vpop.permute.xlu1 %910 }
 0x46c   :  { %v1525_v16 = vsel %vm1385_vm4, %v907_v15, 0  ;;  %v1617_v26 = vsel %vm1385_vm4, %v911_v23, 0 }
 0x46d   :  { %9806 = vmatpush3.bf16.msra.mxu0 %v1525_v16 }
 0x46e   :  { %v10409_v17 = vpop.eup %10408  ;;  %9817 = vmatprep.subr.bf16.mxu0 %v10525_v0 }
 0x46f   :  { %v1368_v19 = vmul.f32 %v10409_v17, %v10848_v37 }
 0x471   :  { %v1376_v20 = vpack.c.bf16 %v1368_v19, %v1368_v19 }
 0x472   :  { %v10411_v22 = vpop.eup %10410 }
 0x473   :  { %v1369_v21 = vmul.f32 %v10411_v22, %v10852_v29  ;;  %9802 = vmatmul.mubr.msk.bf16.vlgmr.msra.gmra.mrb[24].mxu1 %vm1285_vm5, %v1376_v20 }
 0x474   :  { %9812 = vmatpush3.bf16.msra.mxu1 %v1571_v25  ;;  %9813 = vmatprep.mubr.msk.bf16.mxu1 %vm10526_vm1, %v10525_v0 }
 0x475   :  { %v1377_v24 = vpack.c.bf16 %v1369_v21, %v1369_v21  ;;  %9823 = vmatprep.subr.bf16.mxu1 %v10525_v0 }
 0x477   :  { %9808 = vmatmul.mubr.msk.bf16.vlgmr.msra.gmra.mrb[28].mxu0 %vm1285_vm5, %v1377_v24 }
 0x478   :  { %9818 = vmatpush3.bf16.msra.mxu0 %v1617_v26  ;;  %9819 = vmatprep.mubr.msk.bf16.mxu0 %vm10526_vm1, %v10525_v0 }
 0x479   :  { %9829 = vmatprep.subr.bf16.mxu0 %v10525_v0 }
 0x49c   :  { %v1348_v27 = vpop.xlane.xlu1 %1347  ;;  %v1351_v28 = vpop.xlane.xlu0 %1350 }
 0x49d   :  { %10412 = vrcp.f32 %v1348_v27 }
 0x49e   :  { %10414 = vrcp.f32 %v1351_v28 }
 0x4a0   :  { %v1354_v31 = vpop.xlane.xlu1 %1353  ;;  %v1357_v32 = vpop.xlane.xlu0 %1356 }
 0x4a1   :  { %10416 = vrcp.f32 %v1354_v31 }
 0x4a2   :  { %10418 = vrcp.f32 %v1357_v32 }
 0x4a4   :  { %v913_v29 = vpop.permute.xlu0 %912  ;;  %v915_v41 = vpop.permute.xlu1 %914 }
 0x4a5   :  { %v1663_v49 = vsel %vm1385_vm4, %v913_v29, 0  ;;  %v1709_v50 = vsel %vm1385_vm4, %v915_v41, 0 }
 0x4a7   :  { %v10413_v34 = vpop.eup %10412 }
 0x4a8   :  { %v10415_v35 = vpop.eup %10414  ;;  %v1370_v37 = vmul.f32 %v10413_v34, %v10399_v62 }
 0x4a9   :  { %v1371_v40 = vmul.f32 %v10415_v35, %v10401_v1  ;;  %v10088_v1 = vld [vmem:[%s10565_s25 + $0x20] sm:$0xff]   ;;  %s11899_s25 = sld [smem:[#allocation8_spill]] }
 0x4aa   :  { %v1378_v44 = vpack.c.bf16 %v1370_v37, %v1370_v37 }
 0x4ab   :  { %v10417_v46 = vpop.eup %10416  ;;  %v1379_v47 = vpack.c.bf16 %v1371_v40, %v1371_v40 }
 0x4ac   :  { %v10419_v48 = vpop.eup %10418  ;;  %9814 = vmatmul.mubr.msk.bf16.vlgmr.msra.gmra.mrb[28].mxu1 %vm1285_vm5, %v1378_v44  ;;  %v1372_v51 = vmul.f32 %v10417_v46, %v10866_v2 }
 0x4ad   :  { %9820 = vmatmul.mubr.msk.bf16.vlgmr.msra.gmra.mrb[32].mxu0 %vm1285_vm5, %v1379_v47  ;;  %9824 = vmatpush3.bf16.msra.mxu1 %v1663_v49  ;;  %v1373_v52 = vmul.f32 %v10419_v48, %v10870_v5  ;;  %v8633_v49 = vld [vmem:[%s10570_s29] ss:$0 sm:$0xff]  ;;  %s11900_s29 = sld [smem:[#allocation9_spill]] }
 0x4ae   :  { %9830 = vmatpush3.bf16.msra.mxu0 %v1709_v50  ;;  %9825 = vmatprep.mubr.msk.bf16.mxu1 %vm10526_vm1, %v10525_v0  ;;  %v1380_v54 = vpack.c.bf16 %v1372_v51, %v1372_v51 }
 0x4af   :  { %9831 = vmatprep.mubr.msk.bf16.mxu0 %vm10526_vm1, %v10525_v0  ;;  %9835 = vmatprep.subr.bf16.mxu1 %v10525_v0  ;;  %v1381_v55 = vpack.c.bf16 %v1373_v52, %v1373_v52 }
 0x4b0   :  { %9843 = vmatprep.subr.bf16.mxu0 %v10525_v0 }
 0x4b4   :  { %9826 = vmatmul.mubr.msk.bf16.vlgmr.msra.gmra.mrb[32].mxu1 %vm1285_vm5, %v1380_v54 }
 0x4b5   :  { %9832 = vmatmul.mubr.msk.bf16.vlgmr.msra.gmra.mrb[36].mxu0 %vm1285_vm5, %v1381_v55  ;;  %9836 = vmatpush3.bf16.msra.mxu1 %v10084_v53 }
 0x4b6   :  { %9837 = vmatprep.subr.bf16.mxu1 %v10525_v0  ;;  %9839 = vmatprep.mubr.msk.bf16.mxu1 %vm10526_vm1, %v10525_v0 }
 0x4b7   :  { %9847 = vmatprep.mubr.msk.bf16.mxu0 %vm10526_vm1, %v10525_v0  ;;  %9844 = vmatpush3.bf16.msra.mxu0 %v10086_v58 }
 0x4b8   :  { %9845 = vmatprep.subr.bf16.mxu0 %v10525_v0 }
 0x4b9   :  { %9838 = vmatpush3.bf16.msra.mxu1 %v10085_v56 }
 0x4ba   :  { %9851 = vmatprep.subr.bf16.mxu1 %v10525_v0 }
 0x4bb   :  { %9846 = vmatpush3.bf16.msra.mxu0 %v10087_v59 }
 0x4bc   :  { %9859 = vmatprep.subr.bf16.mxu0 %v10525_v0 }
 0x4d5   :  { %v1469_v60 = vpop.f32.mrb[24].mxu0 }
 0x4d6   :  { %v9797_v61 = vpop.f32.mrb[25].mxu0 }
 0x4d7   :  { %v1472_v57 = vpop.f32.mrb[26].mxu0 }
 0x4d8   :  { %v9798_v62 = vpop.f32.mrb[27].mxu0 }
 0x4ed   :  { %v1423_v63 = vpop.f32.mrb[20].mxu1 }
 0x4ee   :  { %v9239_v2 = vpack.c.bf16 %v1469_v60, %v1423_v63  ;;  %v9791_v3 = vpop.f32.mrb[21].mxu1 }
 0x4ef   :  { %v1426_v4 = vpop.f32.mrb[22].mxu1 }
 0x4f0   :  { %v9792_v5 = vpop.f32.mrb[23].mxu1  ;;  %9840 = vmatmul.mubr.msk.bf16.vlgmr.msra.gmra.mrb[36].mxu1 %vm916_vm3, %v9239_v2 }
 0x4f1   :  { %9852 = vmatpush3.bf16.msra.mxu1 %v10088_v1  ;;  %9855 = vmatprep.mubr.msk.bf16.mxu1 %vm10526_vm1, %v10525_v0 }
 0x4f2   :  { %9853 = vmatprep.subr.bf16.mxu1 %v10525_v0 }
 0x4f5   :  { %9854 = vmatpush3.bf16.msra.mxu1 %v10089_v6 }
 0x546   :  { %v1515_v7 = vpop.f32.mrb[24].mxu1 }
 0x547   :  { %v9803_v8 = vpop.f32.mrb[25].mxu1 }
 0x548   :  { %v1518_v9 = vpop.f32.mrb[26].mxu1 }
 0x549   :  { %v9804_v10 = vpop.f32.mrb[27].mxu1 }
 0x54a   :  { %v1561_v12 = vpop.f32.mrb[28].mxu0 }
 0x54b   :  { %v9240_v14 = vpack.c.bf16 %v1561_v12, %v1515_v7  ;;  %v9809_v15 = vpop.f32.mrb[29].mxu0  ;;  %v253_v12 = vld [vmem:[%s10585_s14 + $0x48] sm:$0xff] }
 0x54c   :  { %v1564_v16 = vpop.f32.mrb[30].mxu0 }
 0x54d   :  { %v9810_v17 = vpop.f32.mrb[31].mxu0  ;;  %9848 = vmatmul.mubr.msk.bf16.vlgmr.msra.gmra.mrb[40].mxu0 %vm916_vm3, %v9240_v14  ;;  %v260_v16 = vld [vmem:[%s10585_s14 + $0x80] sm:$0xff] }
 0x54e   :  { %9860 = vmatpush3.bf16.msra.mxu0 %v10090_v13  ;;  %9863 = vmatprep.mubr.msk.bf16.mxu0 %vm10526_vm1, %v10525_v0  ;;  %v268_v17 = vld [vmem:[%s10585_s14 + $0xc0] sm:$0xff] }
 0x54f   :  { %9861 = vmatprep.subr.bf16.mxu0 %v10525_v0 }
 0x552   :  { %9862 = vmatpush3.bf16.msra.mxu0 %v10091_v18  ;;  %v261_v18 = vld [vmem:[%s10585_s14 + $0x88] sm:$0xff] }
 0x57f   :  { %v1607_v19 = vpop.f32.mrb[28].mxu1 }
 0x580   :  { %v1653_v20 = vpop.f32.mrb[32].mxu0  ;;  %v9815_v22 = vpop.f32.mrb[29].mxu1 }
 0x581   :  { %v9241_v25 = vpack.c.bf16 %v1653_v20, %v1607_v19  ;;  %v9821_v21 = vpop.f32.mrb[33].mxu0  ;;  %v1610_v23 = vpop.f32.mrb[30].mxu1  ;;  %v269_v19 = vld [vmem:[%s10585_s14 + $0xc8] sm:$0xff]  ;;  %v8664_v20 = vcombine.low %v260_v16, %v268_v17  ;;  %v8665_v22 = vcombine.high %v260_v16, %v268_v17  ;;  %v246_v16 = vld [vmem:[%s10585_s14 + $0x10] sm:$0xff] }
 0x582   :  { %v1656_v24 = vpop.f32.mrb[34].mxu0  ;;  %v9816_v26 = vpop.f32.mrb[31].mxu1  ;;  %v8667_v21 = vcombine.high %v261_v18, %v269_v19  ;;  %v276_v23 = vld [vmem:[%s10585_s14 + $0x100] sm:$0xff]  ;;  %v254_v17 = vld [vmem:[%s10585_s14 + $0x50] sm:$0xff] }
 0x583   :  { %v9822_v27 = vpop.f32.mrb[35].mxu0  ;;  %9856 = vmatmul.mubr.msk.bf16.vlgmr.msra.gmra.mrb[40].mxu1 %vm916_vm3, %v9241_v25  ;;  %v8666_v25 = vcombine.low %v261_v18, %v269_v19  ;;  %v284_v24 = vld [vmem:[%s10585_s14 + $0x140] sm:$0xff]  ;;  %v277_v26 = vld [vmem:[%s10585_s14 + $0x108] sm:$0xff]  ;;  %v247_v18 = vld [vmem:[%s10585_s14 + $0x18] sm:$0xff]  ;;  %v8652_v19 = vcombine.low %v246_v16, %v254_v17 }
 0x584   :  { %2819 = vmatprep.mubr.bf16.mxu1 %v10527_v30  ;;  %v8681_v27 = vcombine.high %v276_v23, %v284_v24 }
 0x587   :  { %v1699_v28 = vpop.f32.mrb[32].mxu1 }
 0x588   :  { %v1745_v31 = vpop.f32.mrb[36].mxu0  ;;  %v9827_v32 = vpop.f32.mrb[33].mxu1 }
 0x589   :  { %v9242_v34 = vpack.c.bf16 %v1745_v31, %v1699_v28  ;;  %v9833_v35 = vpop.f32.mrb[37].mxu0  ;;  %v1702_v37 = vpop.f32.mrb[34].mxu1  ;;  %v285_v28 = vld [vmem:[%s10585_s14 + $0x148] sm:$0xff]  ;;  %v8680_v31 = vcombine.low %v276_v23, %v284_v24 }
 0x58a   :  { %v1748_v40 = vpop.f32.mrb[38].mxu0  ;;  %v9828_v29 = vpop.f32.mrb[35].mxu1  ;;  %v8682_v32 = vcombine.low %v277_v26, %v285_v28  ;;  %v292_v35 = vld [vmem:[%s10585_s14 + $0x180] sm:$0xff] }
 0x58b   :  { %v9834_v41 = vpop.f32.mrb[39].mxu0  ;;  %9864 = vmatmul.mubr.msk.bf16.vlgmr.msra.gmra.mrb[44].mxu0 %vm916_vm3, %v9242_v34  ;;  %v8683_v34 = vcombine.high %v277_v26, %v285_v28  ;;  %v300_v37 = vld [vmem:[%s10585_s14 + $0x1c0] sm:$0xff]  ;;  %v293_v40 = vld [vmem:[%s10585_s14 + $0x188] sm:$0xff] }
 0x58c   :  { %2862 = vmatprep.mubr.bf16.mxu0 %v10527_v30  ;;  %v8697_v29 = vcombine.high %v292_v35, %v300_v37  ;;  %v301_v41 = vld [vmem:[%s10585_s14 + $0x1c8] sm:$0xff] }
 0x5c3   :  { %v1813_v44 = vpop.f32.mrb[36].mxu1 }
 0x5c4   :  { %v9841_v46 = vpop.f32.mrb[37].mxu1  ;;  %v1826_v50 = vadd.f32 %v8633_v49, %v1813_v44  ;;  %v8696_v44 = vcombine.low %v292_v35, %v300_v37 }
 0x5c5   :  { %v1816_v47 = vpop.f32.mrb[38].mxu1  ;;  %v8698_v46 = vcombine.low %v293_v40, %v301_v41 }
 0x5c6   :  { %v9842_v48 = vpop.f32.mrb[39].mxu1  ;;  %v1827_v52 = vadd.f32 %v8633_v49, %v1816_v47  ;;  %v8699_v47 = vcombine.high %v293_v40, %v301_v41  ;;  %v316_v49 = vld [vmem:[%s10585_s14 + $0x240] sm:$0xff] }
 0x5c7   :  { %v308_v48 = vld [vmem:[%s10585_s14 + $0x200] sm:$0xff] }
 0x620   :  { %v1882_v51 = vpop.f32.mrb[40].mxu0 }
 0x621   :  { %v1889_v53 = vadd.f32 %v1882_v51, %v1826_v50  ;;  %v9849_v54 = vpop.f32.mrb[41].mxu0  ;;  %v309_v50 = vld [vmem:[%s10585_s14 + $0x208] sm:$0xff]  ;;  %v8713_v51 = vcombine.high %v308_v48, %v316_v49 }
 0x622   :  { %v1885_v55 = vpop.f32.mrb[42].mxu0 }
 0x623   :  { %v1890_v56 = vadd.f32 %v1885_v55, %v1827_v52  ;;  %v9850_v58 = vpop.f32.mrb[43].mxu0  ;;  %v317_v52 = vld [vmem:[%s10585_s14 + $0x248] sm:$0xff] }
 0x624   :  { %v8714_v54 = vcombine.low %v309_v50, %v317_v52  ;;  %v8715_v55 = vcombine.high %v309_v50, %v317_v52  ;;  %v332_v58 = vld [vmem:[%s10585_s14 + $0x2c0] sm:$0xff] }
 0x656   :  { %v1945_v59 = vpop.f32.mrb[40].mxu1 }
 0x657   :  { %v1952_v60 = vadd.f32 %v1945_v59, %v1889_v53  ;;  %v9857_v61 = vpop.f32.mrb[41].mxu1  ;;  %v8712_v53 = vcombine.low %v308_v48, %v316_v49  ;;  %v325_v59 = vld [vmem:[%s10585_s14 + $0x288] sm:$0xff] }
 0x658   :  { %v1948_v57 = vpop.f32.mrb[42].mxu1  ;;  %v333_v61 = vld [vmem:[%s10585_s14 + $0x2c8] sm:$0xff] }
 0x659   :  { %v1953_v62 = vadd.f32 %v1948_v57, %v1890_v56  ;;  %v9858_v63 = vpop.f32.mrb[43].mxu1  ;;  %v324_v56 = vld [vmem:[%s10585_s14 + $0x280] sm:$0xff] }
 0x65a   :  { %v8728_v57 = vcombine.low %v324_v56, %v332_v58  ;;  %v8731_v63 = vcombine.high %v325_v59, %v333_v61 }
 0x65e   :  { %v2008_v1 = vpop.f32.mrb[44].mxu0 }
 0x65f   :  { %v2015_v2 = vadd.f32 %v2008_v1, %v1952_v60  ;;  %v9865_v3 = vpop.f32.mrb[45].mxu0  ;;  %v8729_v60 = vcombine.high %v324_v56, %v332_v58  ;;  %v340_v1 = vld [vmem:[%s10585_s14 + $0x300] sm:$0xff] }
 0x660   :  { %v2011_v4 = vpop.f32.mrb[46].mxu0  ;;  %v341_v3 = vld [vmem:[%s10585_s14 + $0x308] sm:$0xff]  ;;  %v8647_v56 = vld [vmem:[%s10580_s8] ss:$0 sm:$0xff]  ;;  %s11902_s8 = sld [smem:[#allocation10_spill]] }
 0x661   :  { %v10944_v5 = vadd.f32 %v2015_v2, %v190_v38  ;;  %v2016_v6 = vadd.f32 %v2011_v4, %v1953_v62  ;;  %v9866_v7 = vpop.f32.mrb[47].mxu0  ;;  %v244_v38 = vld [vmem:[%s10585_s14] sm:$0xff]  ;;  %v8730_v62 = vcombine.low %v325_v59, %v333_v61  ;;  %v262_v59 = vld [vmem:[%s10585_s14 + $0x90] sm:$0xff]  ;;  %v263_v61 = vld [vmem:[%s10585_s14 + $0x98] sm:$0xff] }
 0x662   :  { %v8649_v10 = vcombine.high %v244_v38, %v252_v36  ;;  %v8648_v13 = vcombine.low %v244_v38, %v252_v36  ;;  %v348_v2 = vld [vmem:[%s10585_s14 + $0x340] sm:$0xff] }
 0x663   :  { %v10948_v8 = vadd.f32 %v2016_v6, %v191_v39  ;;  %2019 = vadd.xlane.f32.xlu0 %v10944_v5  ;;  %v2026_v9 = vmul.f32 %v10944_v5, %v10944_v5  ;;  %v245_v39 = vld [vmem:[%s10585_s14 + $0x8] sm:$0xff]  ;;  %v8745_v4 = vcombine.high %v340_v1, %v348_v2  ;;  %v8744_v7 = vcombine.low %v340_v1, %v348_v2  ;;  %v356_v38 = vld [vmem:[%s10585_s14 + $0x380] sm:$0xff]  ;;  %v278_v2 = vld [vmem:[%s10585_s14 + $0x110] sm:$0xff] }
 0x664   :  { %v8650_v14 = vcombine.low %v245_v39, %v253_v12  ;;  %v8651_v15 = vcombine.high %v245_v39, %v253_v12  ;;  %2787 = vmatprep.subr.bf16.mxu1 %v8649_v10  ;;  %v349_v6 = vld [vmem:[%s10585_s14 + $0x348] sm:$0xff]  ;;  %v364_v36 = vld [vmem:[%s10585_s14 + $0x3c0] sm:$0xff] }
 0x665   :  { %2021 = vadd.xlane.f32.xlu1 %v10948_v8  ;;  %v2027_v33 = vmul.f32 %v10948_v8, %v10948_v8  ;;  %2788 = vmatpush1.bf16.msra.mxu1 %v8648_v13  ;;  %v357_v39 = vld [vmem:[%s10585_s14 + $0x388] sm:$0xff]  ;;  %v8761_v10 = vcombine.high %v356_v38, %v364_v36  ;;  %v8760_v13 = vcombine.low %v356_v38, %v364_v36  ;;  %v294_v36 = vld [vmem:[%s10585_s14 + $0x190] sm:$0xff] }
 0x666   :  { %2830 = vmatprep.subr.bf16.mxu0 %v8651_v15  ;;  %2789 = vmatprep.subr.bf16.mxu1 %v8665_v22  ;;  %v365_v12 = vld [vmem:[%s10585_s14 + $0x3c8] sm:$0xff]  ;;  %v255_v22 = vld [vmem:[%s10585_s14 + $0x58] sm:$0xff] }
 0x667   :  { %2028 = vadd.xlane.f32.xlu0 %v2026_v9  ;;  %2831 = vmatpush1.bf16.msra.mxu0 %v8650_v14  ;;  %v8746_v9 = vcombine.low %v341_v3, %v349_v6  ;;  %v8762_v14 = vcombine.low %v357_v39, %v365_v12  ;;  %v8763_v15 = vcombine.high %v357_v39, %v365_v12  ;;  %v302_v39 = vld [vmem:[%s10585_s14 + $0x1d0] sm:$0xff]  ;;  %v303_v12 = vld [vmem:[%s10585_s14 + $0x1d8] sm:$0xff] }
 0x668   :  { %2832 = vmatprep.subr.bf16.mxu0 %v8667_v21  ;;  %v8655_v21 = vcombine.high %v247_v18, %v255_v22 }
 0x669   :  { %2790 = vmatpush1.bf16.msra.mxu1 %v8664_v20  ;;  %v8653_v20 = vcombine.high %v246_v16, %v254_v17  ;;  %v310_v17 = vld [vmem:[%s10585_s14 + $0x210] sm:$0xff] }
 0x66a   :  { %2791 = vmatprep.subr.bf16.mxu1 %v8681_v27 }
 0x66b   :  { %2030 = vadd.xlane.f32.xlu0 %v2027_v33  ;;  %2833 = vmatpush1.bf16.msra.mxu0 %v8666_v25  ;;  %v8747_v33 = vcombine.high %v341_v3, %v349_v6  ;;  %v8654_v25 = vcombine.low %v247_v18, %v255_v22  ;;  %v286_v3 = vld [vmem:[%s10585_s14 + $0x150] sm:$0xff]  ;;  %v287_v6 = vld [vmem:[%s10585_s14 + $0x158] sm:$0xff]  ;;  %v8700_v22 = vcombine.low %v294_v36, %v302_v39 }
 0x66c   :  { %2834 = vmatprep.subr.bf16.mxu0 %v8683_v34  ;;  %v318_v18 = vld [vmem:[%s10585_s14 + $0x250] sm:$0xff] }
 0x66d   :  { %2792 = vmatpush1.bf16.msra.mxu1 %v8680_v31 }
 0x66e   :  { %2793 = vmatprep.subr.bf16.mxu1 %v8697_v29 }
 0x66f   :  { %2835 = vmatpush1.bf16.msra.mxu0 %v8682_v32 }
 0x670   :  { %2836 = vmatprep.subr.bf16.mxu0 %v8699_v47 }
 0x671   :  { %2794 = vmatpush1.bf16.msra.mxu1 %v8696_v44 }
 0x672   :  { %2795 = vmatprep.subr.bf16.mxu1 %v8713_v51  ;;  %v8646_v51 = vld [vmem:[%s10575_s3] ss:$0 sm:$0xff]  ;;  %s11901_s3 = sld [smem:[#allocation12_spill]] }
 0x673   :  { %2837 = vmatpush1.bf16.msra.mxu0 %v8698_v46 }
 0x674   :  { %2838 = vmatprep.subr.bf16.mxu0 %v8715_v55 }
 0x675   :  { %2796 = vmatpush1.bf16.msra.mxu1 %v8712_v53 }
 0x676   :  { %2797 = vmatprep.subr.bf16.mxu1 %v8729_v60  ;;  %v270_v60 = vld [vmem:[%s10585_s14 + $0xd0] sm:$0xff] }
 0x677   :  { %2839 = vmatpush1.bf16.msra.mxu0 %v8714_v54 }
 0x678   :  { %2840 = vmatprep.subr.bf16.mxu0 %v8731_v63 }
 0x679   :  { %2798 = vmatpush1.bf16.msra.mxu1 %v8728_v57  ;;  %v271_v57 = vld [vmem:[%s10585_s14 + $0xd8] sm:$0xff] }
 0x67a   :  { %2799 = vmatprep.subr.bf16.mxu1 %v8745_v4  ;;  %v8671_v1 = vcombine.high %v263_v61, %v271_v57  ;;  %v279_v4 = vld [vmem:[%s10585_s14 + $0x118] sm:$0xff] }
 0x67b   :  { %2841 = vmatpush1.bf16.msra.mxu0 %v8730_v62  ;;  %v8687_v38 = vcombine.high %v279_v4, %v287_v6 }
 0x67c   :  { %2842 = vmatprep.subr.bf16.mxu0 %v8747_v33  ;;  %v8685_v33 = vcombine.high %v278_v2, %v286_v3 }
 0x67d   :  { %2800 = vmatpush1.bf16.msra.mxu1 %v8744_v7  ;;  %v8668_v7 = vcombine.low %v262_v59, %v270_v60 }
 0x67e   :  { %2801 = vmatprep.subr.bf16.mxu1 %v8761_v10  ;;  %v295_v10 = vld [vmem:[%s10585_s14 + $0x198] sm:$0xff] }
 0x67f   :  { %2843 = vmatpush1.bf16.msra.mxu0 %v8746_v9  ;;  %v8670_v9 = vcombine.low %v263_v61, %v271_v57  ;;  %v8703_v16 = vcombine.high %v295_v10, %v303_v12  ;;  %v257_v61 = vld [vmem:[%s10585_s14 + $0x68] sm:$0xff] }
 0x680   :  { %2844 = vmatprep.subr.bf16.mxu0 %v8763_v15  ;;  %v8701_v15 = vcombine.high %v294_v36, %v302_v39  ;;  %v280_v39 = vld [vmem:[%s10585_s14 + $0x120] sm:$0xff] }
 0x681   :  { %2802 = vmatpush1.bf16.msra.mxu1 %v8760_v13  ;;  %v8684_v13 = vcombine.low %v278_v2, %v286_v3  ;;  %v264_v3 = vld [vmem:[%s10585_s14 + $0xa0] sm:$0xff] }
 0x682   :  { %2873 = vmatprep.subr.bf16.mxu1 %v8653_v20  ;;  %v319_v20 = vld [vmem:[%s10585_s14 + $0x258] sm:$0xff] }
 0x683   :  { %2845 = vmatpush1.bf16.msra.mxu0 %v8762_v14  ;;  %v8686_v14 = vcombine.low %v279_v4, %v287_v6  ;;  %v272_v4 = vld [vmem:[%s10585_s14 + $0xe0] sm:$0xff]  ;;  %v265_v6 = vld [vmem:[%s10585_s14 + $0xa8] sm:$0xff] }
 0x684   :  { %2916 = vmatprep.subr.bf16.mxu0 %v8655_v21  ;;  %v8717_v21 = vcombine.high %v310_v17, %v318_v18 }
 0x6f0   :  { %v2020_v23 = vpop.xlane.xlu0 %2019 }
 0x6f1   :  { %v2024_v24 = vmul.f32 0.0078125, %v2020_v23 }
 0x6f2   :  { %v2022_v26 = vpop.xlane.xlu1 %2021 }
 0x6f3   :  { %v2034_v28 = vmul.f32 %v2024_v24, %v2024_v24  ;;  %v2025_v31 = vmul.f32 0.0078125, %v2022_v26  ;;  %v2040_v48 = vsub.f32 %v10944_v5, %v2024_v24  ;;  %v326_v24 = vld [vmem:[%s10585_s14 + $0x290] sm:$0xff] }
 0x6f4   :  { %v2029_v27 = vpop.xlane.xlu0 %2028  ;;  %v334_v26 = vld [vmem:[%s10585_s14 + $0x2d0] sm:$0xff] }
 0x6f5   :  { %v2032_v32 = vmul.f32 0.0078125, %v2029_v27  ;;  %v2035_v37 = vmul.f32 %v2025_v31, %v2025_v31  ;;  %v2041_v52 = vsub.f32 %v10948_v8, %v2025_v31  ;;  %v8669_v8 = vcombine.high %v262_v59, %v270_v60  ;;  %v327_v27 = vld [vmem:[%s10585_s14 + $0x298] sm:$0xff]  ;;  %v256_v59 = vld [vmem:[%s10585_s14 + $0x60] sm:$0xff]  ;;  %v249_v60 = vld [vmem:[%s10585_s14 + $0x28] sm:$0xff] }
 0x6f6   :  { %v8716_v31 = vcombine.low %v310_v17, %v318_v18  ;;  %v8659_v2 = vcombine.high %v249_v60, %v257_v61  ;;  %v296_v18 = vld [vmem:[%s10585_s14 + $0x1a0] sm:$0xff] }
 0x6f7   :  { %v2036_v34 = vsub.f32 %v2032_v32, %v2034_v28  ;;  %v335_v28 = vld [vmem:[%s10585_s14 + $0x2d8] sm:$0xff] }
 0x6f8   :  { %v2031_v35 = vpop.xlane.xlu0 %2030 }
 0x6f9   :  { %v2038_v40 = vmax.f32 %v2036_v34, 0.0  ;;  %v2033_v29 = vmul.f32 0.0078125, %v2031_v35  ;;  %v8733_v34 = vcombine.high %v326_v24, %v334_v26  ;;  %v8735_v35 = vcombine.high %v327_v27, %v335_v28 }
 0x6fb   :  { %v2042_v41 = vadd.f32 1e-05, %v2038_v40  ;;  %v2037_v44 = vsub.f32 %v2033_v29, %v2035_v37  ;;  %v342_v37 = vld [vmem:[%s10585_s14 + $0x310] sm:$0xff]  ;;  %v343_v29 = vld [vmem:[%s10585_s14 + $0x318] sm:$0xff] }
 0x6fc   :  { %v350_v40 = vld [vmem:[%s10585_s14 + $0x350] sm:$0xff] }
 0x6fd   :  { %10420 = vrsqrt.f32 %v2042_v41  ;;  %v2039_v46 = vmax.f32 %v2037_v44, 0.0  ;;  %v351_v41 = vld [vmem:[%s10585_s14 + $0x358] sm:$0xff]  ;;  %v8732_v44 = vcombine.low %v326_v24, %v334_v26  ;;  %v312_v26 = vld [vmem:[%s10585_s14 + $0x220] sm:$0xff] }
 0x6ff   :  { %v2043_v47 = vadd.f32 1e-05, %v2039_v46  ;;  %v8734_v46 = vcombine.low %v327_v27, %v335_v28  ;;  %v320_v27 = vld [vmem:[%s10585_s14 + $0x260] sm:$0xff]  ;;  %v313_v28 = vld [vmem:[%s10585_s14 + $0x228] sm:$0xff] }
 0x701   :  { %10422 = vrsqrt.f32 %v2043_v47  ;;  %v8749_v47 = vcombine.high %v342_v37, %v350_v40 }
 0x707   :  { %v10421_v49 = vpop.eup %10420 }
 0x708   :  { %v2046_v50 = vmul.f32 %v10421_v49, %v2040_v48  ;;  %v8751_v48 = vcombine.high %v343_v29, %v351_v41  ;;  %v358_v49 = vld [vmem:[%s10585_s14 + $0x390] sm:$0xff] }
 0x70a   :  { %v2054_v54 = vmul.f32 %v8646_v51, %v2046_v50  ;;  %v366_v50 = vld [vmem:[%s10585_s14 + $0x3d0] sm:$0xff] }
 0x70b   :  { %v10423_v53 = vpop.eup %10422  ;;  %v8764_v57 = vcombine.low %v358_v49, %v366_v50 }
 0x70c   :  { %v2047_v55 = vmul.f32 %v10423_v53, %v2041_v52  ;;  %v11000_v62 = vadd.f32 %v8647_v56, %v2054_v54  ;;  %v367_v52 = vld [vmem:[%s10585_s14 + $0x3d8] sm:$0xff]  ;;  %v8748_v53 = vcombine.low %v342_v37, %v350_v40  ;;  %v8750_v54 = vcombine.low %v343_v29, %v351_v41  ;;  %v328_v40 = vld [vmem:[%s10585_s14 + $0x2a0] sm:$0xff]  ;;  %v329_v41 = vld [vmem:[%s10585_s14 + $0x2a8] sm:$0xff] }
 0x70d   :  { %v336_v29 = vld [vmem:[%s10585_s14 + $0x2e0] sm:$0xff] }
 0x70e   :  { %v2055_v58 = vmul.f32 %v8646_v51, %v2047_v55  ;;  %v359_v51 = vld [vmem:[%s10585_s14 + $0x398] sm:$0xff]  ;;  %v8765_v55 = vcombine.high %v358_v49, %v366_v50  ;;  %v344_v50 = vld [vmem:[%s10585_s14 + $0x320] sm:$0xff] }
 0x710   :  { %v11002_v5 = vadd.f32 %v8647_v56, %v2055_v58  ;;  %v8767_v56 = vcombine.high %v359_v51, %v367_v52  ;;  %v248_v58 = vld [vmem:[%s10585_s14 + $0x20] sm:$0xff] }
 0x712   :  { %v11006_v63 = vpack.c.bf16 %v11002_v5, %v11000_v62 }
 0x714   :  { %2820 = vmatmul.mubr.bf16.vlgmr.msra.gmra.mrb[44].mxu1 %v11006_v63  ;;  %2863 = vmatmul.mubr.bf16.vlgmr.msra.gmra.mrb[48].mxu0 %v11006_v63 }
 0x715   :  { %2874 = vmatpush1.bf16.msra.mxu1 %v8652_v19  ;;  %2917 = vmatpush1.bf16.msra.mxu0 %v8654_v25  ;;  %v311_v19 = vld [vmem:[%s10585_s14 + $0x218] sm:$0xff]  ;;  %v8702_v25 = vcombine.low %v295_v10, %v303_v12  ;;  %v288_v10 = vld [vmem:[%s10585_s14 + $0x160] sm:$0xff]  ;;  %v281_v12 = vld [vmem:[%s10585_s14 + $0x128] sm:$0xff] }
 0x716   :  { %2875 = vmatprep.subr.bf16.mxu1 %v8669_v8  ;;  %2918 = vmatprep.subr.bf16.mxu0 %v8671_v1  ;;  %v8719_v23 = vcombine.high %v311_v19, %v319_v20  ;;  %v8718_v32 = vcombine.low %v311_v19, %v319_v20  ;;  %v8766_v8 = vcombine.low %v359_v51, %v367_v52  ;;  %v304_v19 = vld [vmem:[%s10585_s14 + $0x1e0] sm:$0xff]  ;;  %v297_v20 = vld [vmem:[%s10585_s14 + $0x1a8] sm:$0xff] }
 0x717   :  { %2905 = vmatprep.mubr.bf16.mxu1 %v10527_v30  ;;  %2948 = vmatprep.mubr.bf16.mxu0 %v10527_v30  ;;  %v8657_v1 = vcombine.high %v248_v58, %v256_v59  ;;  %v352_v51 = vld [vmem:[%s10585_s14 + $0x360] sm:$0xff]  ;;  %v345_v52 = vld [vmem:[%s10585_s14 + $0x328] sm:$0xff] }
 0x719   :  { %2876 = vmatpush1.bf16.msra.mxu1 %v8668_v7  ;;  %2919 = vmatpush1.bf16.msra.mxu0 %v8670_v9  ;;  %v273_v7 = vld [vmem:[%s10585_s14 + $0xe8] sm:$0xff]  ;;  %v8656_v9 = vcombine.low %v248_v58, %v256_v59  ;;  %v360_v59 = vld [vmem:[%s10585_s14 + $0x3a0] sm:$0xff] }
 0x71a   :  { %2877 = vmatprep.subr.bf16.mxu1 %v8685_v33  ;;  %2920 = vmatprep.subr.bf16.mxu0 %v8687_v38  ;;  %v8658_v33 = vcombine.low %v249_v60, %v257_v61  ;;  %v8673_v38 = vcombine.high %v264_v3, %v272_v4  ;;  %v8675_v36 = vcombine.high %v265_v6, %v273_v7  ;;  %v368_v60 = vld [vmem:[%s10585_s14 + $0x3e0] sm:$0xff]  ;;  %v361_v61 = vld [vmem:[%s10585_s14 + $0x3a8] sm:$0xff] }
 0x71d   :  { %2878 = vmatpush1.bf16.msra.mxu1 %v8684_v13  ;;  %2921 = vmatpush1.bf16.msra.mxu0 %v8686_v14  ;;  %v289_v13 = vld [vmem:[%s10585_s14 + $0x168] sm:$0xff]  ;;  %v8672_v14 = vcombine.low %v264_v3, %v272_v4  ;;  %v250_v4 = vld [vmem:[%s10585_s14 + $0x30] sm:$0xff] }
 0x71e   :  { %2879 = vmatprep.subr.bf16.mxu1 %v8701_v15  ;;  %2922 = vmatprep.subr.bf16.mxu0 %v8703_v16  ;;  %v8674_v15 = vcombine.low %v265_v6, %v273_v7  ;;  %v8689_v16 = vcombine.high %v280_v39, %v288_v10  ;;  %v8691_v17 = vcombine.high %v281_v12, %v289_v13  ;;  %v258_v6 = vld [vmem:[%s10585_s14 + $0x70] sm:$0xff]  ;;  %v251_v7 = vld [vmem:[%s10585_s14 + $0x38] sm:$0xff] }
 0x721   :  { %2880 = vmatpush1.bf16.msra.mxu1 %v8700_v22  ;;  %2923 = vmatpush1.bf16.msra.mxu0 %v8702_v25  ;;  %v305_v22 = vld [vmem:[%s10585_s14 + $0x1e8] sm:$0xff]  ;;  %v8688_v25 = vcombine.low %v280_v39, %v288_v10  ;;  %v266_v10 = vld [vmem:[%s10585_s14 + $0xb0] sm:$0xff] }
 0x722   :  { %2881 = vmatprep.subr.bf16.mxu1 %v8717_v21  ;;  %2924 = vmatprep.subr.bf16.mxu0 %v8719_v23  ;;  %v8690_v21 = vcombine.low %v281_v12, %v289_v13  ;;  %v8705_v23 = vcombine.high %v296_v18, %v304_v19  ;;  %v8707_v24 = vcombine.high %v297_v20, %v305_v22  ;;  %v274_v12 = vld [vmem:[%s10585_s14 + $0xf0] sm:$0xff]  ;;  %v267_v13 = vld [vmem:[%s10585_s14 + $0xb8] sm:$0xff] }
 0x725   :  { %2882 = vmatpush1.bf16.msra.mxu1 %v8716_v31  ;;  %2925 = vmatpush1.bf16.msra.mxu0 %v8718_v32  ;;  %v321_v31 = vld [vmem:[%s10585_s14 + $0x268] sm:$0xff]  ;;  %v8704_v32 = vcombine.low %v296_v18, %v304_v19  ;;  %v282_v19 = vld [vmem:[%s10585_s14 + $0x130] sm:$0xff] }
 0x726   :  { %2883 = vmatprep.subr.bf16.mxu1 %v8733_v34  ;;  %2926 = vmatprep.subr.bf16.mxu0 %v8735_v35  ;;  %v8706_v34 = vcombine.low %v297_v20, %v305_v22  ;;  %v8721_v35 = vcombine.high %v312_v26, %v320_v27  ;;  %v8723_v37 = vcombine.high %v313_v28, %v321_v31  ;;  %v290_v20 = vld [vmem:[%s10585_s14 + $0x170] sm:$0xff]  ;;  %v283_v22 = vld [vmem:[%s10585_s14 + $0x138] sm:$0xff] }
 0x729   :  { %2884 = vmatpush1.bf16.msra.mxu1 %v8732_v44  ;;  %2927 = vmatpush1.bf16.msra.mxu0 %v8734_v46  ;;  %v337_v44 = vld [vmem:[%s10585_s14 + $0x2e8] sm:$0xff]  ;;  %v8720_v46 = vcombine.low %v312_v26, %v320_v27  ;;  %v298_v27 = vld [vmem:[%s10585_s14 + $0x1b0] sm:$0xff] }
 0x72a   :  { %2885 = vmatprep.subr.bf16.mxu1 %v8749_v47  ;;  %2928 = vmatprep.subr.bf16.mxu0 %v8751_v48  ;;  %v8722_v47 = vcombine.low %v313_v28, %v321_v31  ;;  %v8737_v48 = vcombine.high %v328_v40, %v336_v29  ;;  %v8739_v49 = vcombine.high %v329_v41, %v337_v44  ;;  %v306_v28 = vld [vmem:[%s10585_s14 + $0x1f0] sm:$0xff]  ;;  %v299_v31 = vld [vmem:[%s10585_s14 + $0x1b8] sm:$0xff] }
 0x72d   :  { %2886 = vmatpush1.bf16.msra.mxu1 %v8748_v53  ;;  %2929 = vmatpush1.bf16.msra.mxu0 %v8750_v54  ;;  %v353_v53 = vld [vmem:[%s10585_s14 + $0x368] sm:$0xff]  ;;  %v8736_v54 = vcombine.low %v328_v40, %v336_v29  ;;  %v314_v29 = vld [vmem:[%s10585_s14 + $0x230] sm:$0xff] }
 0x72e   :  { %2887 = vmatprep.subr.bf16.mxu1 %v8765_v55  ;;  %2930 = vmatprep.subr.bf16.mxu0 %v8767_v56  ;;  %v8738_v55 = vcombine.low %v329_v41, %v337_v44  ;;  %v8753_v56 = vcombine.high %v344_v50, %v352_v51  ;;  %v8755_v58 = vcombine.high %v345_v52, %v353_v53  ;;  %v322_v41 = vld [vmem:[%s10585_s14 + $0x270] sm:$0xff]  ;;  %v315_v44 = vld [vmem:[%s10585_s14 + $0x238] sm:$0xff] }
 0x731   :  { %2888 = vmatpush1.bf16.msra.mxu1 %v8764_v57  ;;  %2931 = vmatpush1.bf16.msra.mxu0 %v8766_v8  ;;  %v369_v57 = vld [vmem:[%s10585_s14 + $0x3e8] sm:$0xff]  ;;  %v8752_v8 = vcombine.low %v344_v50, %v352_v51  ;;  %v330_v51 = vld [vmem:[%s10585_s14 + $0x2b0] sm:$0xff] }
 0x732   :  { %2959 = vmatprep.subr.bf16.mxu1 %v8657_v1  ;;  %3002 = vmatprep.subr.bf16.mxu0 %v8659_v2  ;;  %v8754_v1 = vcombine.low %v345_v52, %v353_v53  ;;  %v8769_v2 = vcombine.high %v360_v59, %v368_v60  ;;  %v8771_v3 = vcombine.high %v361_v61, %v369_v57  ;;  %v338_v52 = vld [vmem:[%s10585_s14 + $0x2f0] sm:$0xff]  ;;  %v331_v53 = vld [vmem:[%s10585_s14 + $0x2b8] sm:$0xff] }
 0x734   :  { %2906 = vmatmul.mubr.bf16.vlgmr.msra.gmra.mrb[48].mxu1 %v11006_v63  ;;  %2949 = vmatmul.mubr.bf16.vlgmr.msra.gmra.mrb[52].mxu0 %v11006_v63 }
 0x735   :  { %2960 = vmatpush1.bf16.msra.mxu1 %v8656_v9  ;;  %3003 = vmatpush1.bf16.msra.mxu0 %v8658_v33  ;;  %v259_v9 = vld [vmem:[%s10585_s14 + $0x78] sm:$0xff]  ;;  %v8768_v33 = vcombine.low %v360_v59, %v368_v60  ;;  %v346_v60 = vld [vmem:[%s10585_s14 + $0x330] sm:$0xff] }
 0x736   :  { %2961 = vmatprep.subr.bf16.mxu1 %v8673_v38  ;;  %3004 = vmatprep.subr.bf16.mxu0 %v8675_v36  ;;  %v8770_v38 = vcombine.low %v361_v61, %v369_v57  ;;  %v8661_v36 = vcombine.high %v250_v4, %v258_v6  ;;  %v8663_v39 = vcombine.high %v251_v7, %v259_v9  ;;  %v354_v61 = vld [vmem:[%s10585_s14 + $0x370] sm:$0xff]  ;;  %v347_v57 = vld [vmem:[%s10585_s14 + $0x338] sm:$0xff] }
 0x737   :  { %2991 = vmatprep.mubr.bf16.mxu1 %v10527_v30  ;;  %3034 = vmatprep.mubr.bf16.mxu0 %v10527_v30 }
 0x739   :  { %2962 = vmatpush1.bf16.msra.mxu1 %v8672_v14  ;;  %3005 = vmatpush1.bf16.msra.mxu0 %v8674_v15  ;;  %v275_v14 = vld [vmem:[%s10585_s14 + $0xf8] sm:$0xff]  ;;  %v8660_v15 = vcombine.low %v250_v4, %v258_v6  ;;  %v362_v6 = vld [vmem:[%s10585_s14 + $0x3b0] sm:$0xff] }
 0x73a   :  { %2963 = vmatprep.subr.bf16.mxu1 %v8689_v16  ;;  %3006 = vmatprep.subr.bf16.mxu0 %v8691_v17  ;;  %v8662_v16 = vcombine.low %v251_v7, %v259_v9  ;;  %v8677_v17 = vcombine.high %v266_v10, %v274_v12  ;;  %v8679_v18 = vcombine.high %v267_v13, %v275_v14  ;;  %v370_v7 = vld [vmem:[%s10585_s14 + $0x3f0] sm:$0xff]  ;;  %v363_v9 = vld [vmem:[%s10585_s14 + $0x3b8] sm:$0xff] }
 0x73d   :  { %2964 = vmatpush1.bf16.msra.mxu1 %v8688_v25  ;;  %3007 = vmatpush1.bf16.msra.mxu0 %v8690_v21  ;;  %v291_v25 = vld [vmem:[%s10585_s14 + $0x178] sm:$0xff]  ;;  %v8676_v21 = vcombine.low %v266_v10, %v274_v12  ;;  %v8772_v12 = vcombine.low %v362_v6, %v370_v7 }
 0x73e   :  { %2965 = vmatprep.subr.bf16.mxu1 %v8705_v23  ;;  %3008 = vmatprep.subr.bf16.mxu0 %v8707_v24  ;;  %v8678_v23 = vcombine.low %v267_v13, %v275_v14  ;;  %v8693_v24 = vcombine.high %v282_v19, %v290_v20  ;;  %v8695_v26 = vcombine.high %v283_v22, %v291_v25  ;;  %v10092_v14 = vld [vmem:[%s10595_s24 + $0x40] sm:$0xff]  }
 0x741   :  { %2966 = vmatpush1.bf16.msra.mxu1 %v8704_v32  ;;  %3009 = vmatpush1.bf16.msra.mxu0 %v8706_v34  ;;  %v307_v32 = vld [vmem:[%s10585_s14 + $0x1f8] sm:$0xff]  ;;  %v8692_v34 = vcombine.low %v282_v19, %v290_v20  ;;  %v10097_v19 = vld [vmem:[%s10595_s24 + $0xc8] sm:$0xff]  }
 0x742   :  { %2967 = vmatprep.subr.bf16.mxu1 %v8721_v35  ;;  %3010 = vmatprep.subr.bf16.mxu0 %v8723_v37  ;;  %v8694_v35 = vcombine.low %v283_v22, %v291_v25  ;;  %v8709_v37 = vcombine.high %v298_v27, %v306_v28  ;;  %v8711_v40 = vcombine.high %v299_v31, %v307_v32  ;;  %v10098_v20 = vld [vmem:[%s10595_s24 + $0x8] sm:$0xff]   ;;  %v10100_v25 = vld [vmem:[%s10595_s24 + $0x50] sm:$0xff]  }
 0x743   :  { %v10099_v22 = vld [vmem:[%s10595_s24 + $0x88] sm:$0xff]  }
 0x745   :  { %2968 = vmatpush1.bf16.msra.mxu1 %v8720_v46  ;;  %3011 = vmatpush1.bf16.msra.mxu0 %v8722_v47  ;;  %v323_v46 = vld [vmem:[%s10585_s14 + $0x278] sm:$0xff]  ;;  %v8708_v47 = vcombine.low %v298_v27, %v306_v28 }
 0x746   :  { %2969 = vmatprep.subr.bf16.mxu1 %v8737_v48  ;;  %3012 = vmatprep.subr.bf16.mxu0 %v8739_v49  ;;  %v8710_v48 = vcombine.low %v299_v31, %v307_v32  ;;  %v8725_v49 = vcombine.high %v314_v29, %v322_v41  ;;  %v8727_v50 = vcombine.high %v315_v44, %v323_v46  ;;  %v10106_v27 = vld [vmem:[%s10595_s24 + $0x18] sm:$0xff]   ;;  %v10108_v31 = vld [vmem:[%s10595_s24 + $0x60] sm:$0xff]  }
 0x747   :  { %v10107_v28 = vld [vmem:[%s10595_s24 + $0x98] sm:$0xff]   ;;  %v10109_v32 = vld [vmem:[%s10595_s24 + $0xe0] sm:$0xff]  }
 0x749   :  { %2970 = vmatpush1.bf16.msra.mxu1 %v8736_v54  ;;  %3013 = vmatpush1.bf16.msra.mxu0 %v8738_v55  ;;  %v339_v54 = vld [vmem:[%s10585_s14 + $0x2f8] sm:$0xff]  ;;  %v8724_v55 = vcombine.low %v314_v29, %v322_v41  ;;  %v10114_v29 = vld [vmem:[%s10595_s24 + $0x28] sm:$0xff]  }
 0x74a   :  { %2971 = vmatprep.subr.bf16.mxu1 %v8753_v56  ;;  %3014 = vmatprep.subr.bf16.mxu0 %v8755_v58  ;;  %v8726_v56 = vcombine.low %v315_v44, %v323_v46  ;;  %v8741_v58 = vcombine.high %v330_v51, %v338_v52  ;;  %v8743_v59 = vcombine.high %v331_v53, %v339_v54  ;;  %v10115_v41 = vld [vmem:[%s10595_s24 + $0xa8] sm:$0xff]   ;;  %v10116_v44 = vld [vmem:[%s10595_s24 + $0x70] sm:$0xff]  }
 0x74b   :  { %v10117_v46 = vld [vmem:[%s10595_s24 + $0xf0] sm:$0xff]  }
 0x74d   :  { %2972 = vmatpush1.bf16.msra.mxu1 %v8752_v8  ;;  %3015 = vmatpush1.bf16.msra.mxu0 %v8754_v1  ;;  %v355_v8 = vld [vmem:[%s10585_s14 + $0x378] sm:$0xff]  ;;  %v8740_v1 = vcombine.low %v330_v51, %v338_v52 }
 0x74e   :  { %2973 = vmatprep.subr.bf16.mxu1 %v8769_v2  ;;  %3016 = vmatprep.subr.bf16.mxu0 %v8771_v3  ;;  %v8742_v2 = vcombine.low %v331_v53, %v339_v54  ;;  %v8757_v3 = vcombine.high %v346_v60, %v354_v61  ;;  %v8759_v4 = vcombine.high %v347_v57, %v355_v8  ;;  %v10122_v51 = vld [vmem:[%s10595_s24 + $0x38] sm:$0xff]   ;;  %v10124_v53 = vld [vmem:[%s10595_s24 + $0x140] sm:$0xff]  }
 0x74f   :  { %v10123_v52 = vld [vmem:[%s10595_s24 + $0xb8] sm:$0xff]   ;;  %v10125_v54 = vld [vmem:[%s10595_s24 + $0x1c0] sm:$0xff]  }
 0x751   :  { %2974 = vmatpush1.bf16.msra.mxu1 %v8768_v33  ;;  %3017 = vmatpush1.bf16.msra.mxu0 %v8770_v38  ;;  %v371_v33 = vld [vmem:[%s10585_s14 + $0x3f8] sm:$0xff]  ;;  %v8756_v38 = vcombine.low %v346_v60, %v354_v61  ;;  %s11903_s14 = sld [smem:[#allocation11_spill]] }
 0x752   :  { %3045 = vmatprep.subr.bf16.mxu1 %v8661_v36  ;;  %3088 = vmatprep.subr.bf16.mxu0 %v8663_v39  ;;  %v8758_v36 = vcombine.low %v347_v57, %v355_v8  ;;  %v8773_v39 = vcombine.high %v362_v6, %v370_v7  ;;  %v8775_v10 = vcombine.high %v363_v9, %v371_v33 }
 0x753   :  { %v8774_v13 = vcombine.low %v363_v9, %v371_v33 }
 0x754   :  { %2992 = vmatmul.mubr.bf16.vlgmr.msra.gmra.mrb[52].mxu1 %v11006_v63  ;;  %3035 = vmatmul.mubr.bf16.vlgmr.msra.gmra.mrb[56].mxu0 %v11006_v63 }
 0x755   :  { %3046 = vmatpush1.bf16.msra.mxu1 %v8660_v15  ;;  %3089 = vmatpush1.bf16.msra.mxu0 %v8662_v16  ;;  %v10093_v15 = vld [vmem:[%s10595_s24 + $0xc0] sm:$0xff]  }
 0x756   :  { %3047 = vmatprep.subr.bf16.mxu1 %v8677_v17  ;;  %3090 = vmatprep.subr.bf16.mxu0 %v8679_v18  ;;  %v10094_v16 = vld [vmem:[%s10595_s24] sm:$0xff]   ;;  %v10096_v18 = vld [vmem:[%s10595_s24 + $0x48] sm:$0xff]  }
 0x757   :  { %3077 = vmatprep.mubr.bf16.mxu1 %v10527_v30  ;;  %3120 = vmatprep.mubr.bf16.mxu0 %v10527_v30  ;;  %v10095_v17 = vld [vmem:[%s10595_s24 + $0x80] sm:$0xff]  }
 0x759   :  { %3048 = vmatpush1.bf16.msra.mxu1 %v8676_v21  ;;  %3091 = vmatpush1.bf16.msra.mxu0 %v8678_v23  ;;  %v10101_v21 = vld [vmem:[%s10595_s24 + $0xd0] sm:$0xff]  }
 0x75a   :  { %3049 = vmatprep.subr.bf16.mxu1 %v8693_v24  ;;  %3092 = vmatprep.subr.bf16.mxu0 %v8695_v26  ;;  %v10102_v23 = vld [vmem:[%s10595_s24 + $0x10] sm:$0xff]   ;;  %v10105_v26 = vld [vmem:[%s10595_s24 + $0xd8] sm:$0xff]  }
 0x75b   :  { %v10103_v24 = vld [vmem:[%s10595_s24 + $0x90] sm:$0xff]  }
 0x75d   :  { %3050 = vmatpush1.bf16.msra.mxu1 %v8692_v34  ;;  %3093 = vmatpush1.bf16.msra.mxu0 %v8694_v35  ;;  %v10110_v34 = vld [vmem:[%s10595_s24 + $0x20] sm:$0xff]  }
 0x75e   :  { %3051 = vmatprep.subr.bf16.mxu1 %v8709_v37  ;;  %3094 = vmatprep.subr.bf16.mxu0 %v8711_v40  ;;  %v10111_v35 = vld [vmem:[%s10595_s24 + $0xa0] sm:$0xff]   ;;  %v10112_v37 = vld [vmem:[%s10595_s24 + $0x68] sm:$0xff]  }
 0x75f   :  { %v10113_v40 = vld [vmem:[%s10595_s24 + $0xe8] sm:$0xff]  }
 0x761   :  { %3052 = vmatpush1.bf16.msra.mxu1 %v8708_v47  ;;  %3095 = vmatpush1.bf16.msra.mxu0 %v8710_v48  ;;  %v10118_v47 = vld [vmem:[%s10595_s24 + $0x30] sm:$0xff]  }
 0x762   :  { %3053 = vmatprep.subr.bf16.mxu1 %v8725_v49  ;;  %3096 = vmatprep.subr.bf16.mxu0 %v8727_v50  ;;  %v10119_v48 = vld [vmem:[%s10595_s24 + $0xb0] sm:$0xff]   ;;  %v10120_v49 = vld [vmem:[%s10595_s24 + $0x78] sm:$0xff]  }
 0x763   :  { %v10121_v50 = vld [vmem:[%s10595_s24 + $0xf8] sm:$0xff]  }
 0x765   :  { %3054 = vmatpush1.bf16.msra.mxu1 %v8724_v55  ;;  %3097 = vmatpush1.bf16.msra.mxu0 %v8726_v56  ;;  %v11145_v55 = vld [vmem:[%s10590_s19] sm:$0xff]  ;;  %v11148_v56 = vsub.s32 3, %v10745_v42 }
 0x766   :  { %3055 = vmatprep.subr.bf16.mxu1 %v8741_v58  ;;  %3098 = vmatprep.subr.bf16.mxu0 %v8743_v59  ;;  %v2070_v58 = vrot.slane %v11145_v55, %v10748_v43  ;;  %v2078_v59 = vrot.slane %v11145_v55, %v10791_v11  ;;  %v2074_v60 = vrot.slane %v11145_v55, %v10754_v45 }
 0x767   :  { %v2082_v61 = vrot.slane %v11145_v55, %v11148_v56 }
 0x769   :  { %3056 = vmatpush1.bf16.msra.mxu1 %v8740_v1  ;;  %3099 = vmatpush1.bf16.msra.mxu0 %v8742_v2 }
 0x76a   :  { %3057 = vmatprep.subr.bf16.mxu1 %v8757_v3  ;;  %3100 = vmatprep.subr.bf16.mxu0 %v8759_v4 }
 0x76d   :  { %3058 = vmatpush1.bf16.msra.mxu1 %v8756_v38  ;;  %3101 = vmatpush1.bf16.msra.mxu0 %v8758_v36 }
 0x76e   :  { %3059 = vmatprep.subr.bf16.mxu1 %v8773_v39  ;;  %3102 = vmatprep.subr.bf16.mxu0 %v8775_v10 }
 0x771   :  { %3060 = vmatpush1.bf16.msra.mxu1 %v8772_v12  ;;  %3103 = vmatpush1.bf16.msra.mxu0 %v8774_v13 }
 0x772   :  { %9308 = vmatprep.subr.bf16.mxu1 %v10092_v14  ;;  %9330 = vmatprep.subr.bf16.mxu0 %v10093_v15 }
 0x774   :  { %3078 = vmatmul.mubr.bf16.vlgmr.msra.gmra.mrb[56].mxu1 %v11006_v63  ;;  %3121 = vmatmul.mubr.bf16.vlgmr.msra.gmra.mrb[60].mxu0 %v11006_v63  ;;  %v10104_v63 = vld [vmem:[%s10595_s24 + $0x58] sm:$0xff]  }
 0x775   :  { %9309 = vmatpush3.bf16.msra.mxu1 %v10094_v16  ;;  %9331 = vmatpush3.bf16.msra.mxu0 %v10095_v17 }
 0x776   :  { %9310 = vmatprep.subr.bf16.mxu1 %v10096_v18  ;;  %9332 = vmatprep.subr.bf16.mxu0 %v10097_v19 }
 0x779   :  { %9311 = vmatpush3.bf16.msra.mxu1 %v10098_v20  ;;  %9333 = vmatpush3.bf16.msra.mxu0 %v10099_v22 }
 0x77a   :  { %9312 = vmatprep.subr.bf16.mxu1 %v10100_v25  ;;  %9334 = vmatprep.subr.bf16.mxu0 %v10101_v21 }
 0x77d   :  { %9313 = vmatpush3.bf16.msra.mxu1 %v10102_v23  ;;  %9335 = vmatpush3.bf16.msra.mxu0 %v10103_v24 }
 0x77e   :  { %9314 = vmatprep.subr.bf16.mxu1 %v10104_v63  ;;  %9336 = vmatprep.subr.bf16.mxu0 %v10105_v26  ;;  %v10126_v63 = vld [vmem:[%s10595_s24 + $0x100] sm:$0xff]  }
 0x77f   :  { %v10127_v26 = vld [vmem:[%s10595_s24 + $0x180] sm:$0xff]  }
 0x781   :  { %9315 = vmatpush3.bf16.msra.mxu1 %v10106_v27  ;;  %9337 = vmatpush3.bf16.msra.mxu0 %v10107_v28  ;;  %v10128_v27 = vld [vmem:[%s10595_s24 + $0x148] sm:$0xff]  }
 0x782   :  { %9316 = vmatprep.subr.bf16.mxu1 %v10108_v31  ;;  %9338 = vmatprep.subr.bf16.mxu0 %v10109_v32  ;;  %v10129_v28 = vld [vmem:[%s10595_s24 + $0x1c8] sm:$0xff]  }
 0x783   :  { %v10130_v31 = vld [vmem:[%s10595_s24 + $0x108] sm:$0xff]  }
 0x784   :  { %v10131_v32 = vld [vmem:[%s10595_s24 + $0x188] sm:$0xff]  }
 0x785   :  { %9317 = vmatpush3.bf16.msra.mxu1 %v10110_v34  ;;  %9339 = vmatpush3.bf16.msra.mxu0 %v10111_v35  ;;  %v10132_v34 = vld [vmem:[%s10595_s24 + $0x150] sm:$0xff]  }
 0x786   :  { %9318 = vmatprep.subr.bf16.mxu1 %v10112_v37  ;;  %9340 = vmatprep.subr.bf16.mxu0 %v10113_v40  ;;  %v10133_v35 = vld [vmem:[%s10595_s24 + $0x1d0] sm:$0xff]  }
 0x787   :  { %v10134_v37 = vld [vmem:[%s10595_s24 + $0x110] sm:$0xff]  }
 0x788   :  { %v10135_v40 = vld [vmem:[%s10595_s24 + $0x190] sm:$0xff]  }
 0x789   :  { %9319 = vmatpush3.bf16.msra.mxu1 %v10114_v29  ;;  %9341 = vmatpush3.bf16.msra.mxu0 %v10115_v41  ;;  %v10136_v29 = vld [vmem:[%s10595_s24 + $0x158] sm:$0xff]  }
 0x78a   :  { %9320 = vmatprep.subr.bf16.mxu1 %v10116_v44  ;;  %9342 = vmatprep.subr.bf16.mxu0 %v10117_v46  ;;  %v10137_v41 = vld [vmem:[%s10595_s24 + $0x1d8] sm:$0xff]  }
 0x78b   :  { %v10138_v44 = vld [vmem:[%s10595_s24 + $0x118] sm:$0xff]  }
 0x78c   :  { %v10139_v46 = vld [vmem:[%s10595_s24 + $0x198] sm:$0xff]  }
 0x78d   :  { %9321 = vmatpush3.bf16.msra.mxu1 %v10118_v47  ;;  %9343 = vmatpush3.bf16.msra.mxu0 %v10119_v48  ;;  %v10140_v47 = vld [vmem:[%s10595_s24 + $0x160] sm:$0xff]  }
 0x78e   :  { %9322 = vmatprep.subr.bf16.mxu1 %v10120_v49  ;;  %9344 = vmatprep.subr.bf16.mxu0 %v10121_v50  ;;  %v10141_v48 = vld [vmem:[%s10595_s24 + $0x1e0] sm:$0xff]  }
 0x78f   :  { %v10142_v49 = vld [vmem:[%s10595_s24 + $0x120] sm:$0xff]  }
 0x790   :  { %v10143_v50 = vld [vmem:[%s10595_s24 + $0x1a0] sm:$0xff]  }
 0x791   :  { %9323 = vmatpush3.bf16.msra.mxu1 %v10122_v51  ;;  %9345 = vmatpush3.bf16.msra.mxu0 %v10123_v52  ;;  %v10144_v51 = vld [vmem:[%s10595_s24 + $0x168] sm:$0xff]  }
 0x792   :  { %9352 = vmatprep.subr.bf16.mxu1 %v10124_v53  ;;  %9374 = vmatprep.subr.bf16.mxu0 %v10125_v54  ;;  %v10145_v52 = vld [vmem:[%s10595_s24 + $0x1e8] sm:$0xff]   ;;  %v11179_v53 = vsub.s32 4, %v10745_v42  ;;  %v11182_v54 = vsub.s32 6, %v10745_v42 }
 0x7e7   :  { %v2821_v57 = vpop.f32.mrb[44].mxu1  ;;  %v2864_v8 = vpop.f32.mrb[48].mxu0 }
 0x7e8   :  { %v2822_v1 = vadd.f32 %v2821_v57, %v2070_v58  ;;  %v2865_v2 = vadd.f32 %v2864_v8, %v2078_v59  ;;  %v2823_v3 = vpop.f32.mrb[45].mxu1  ;;  %v2866_v4 = vpop.f32.mrb[49].mxu0  ;;  %v2086_v57 = vrot.slane %v11145_v55, %v11179_v53  ;;  %v2094_v8 = vrot.slane %v11145_v55, %v11182_v54 }
 0x7e9   :  { %v2824_v6 = vadd.f32 %v2823_v3, %v2074_v60  ;;  %v2867_v7 = vadd.f32 %v2866_v4, %v2082_v61  ;;  %v2825_v9 = vpop.f32.mrb[46].mxu1  ;;  %v2868_v33 = vpop.f32.mrb[50].mxu0 }
 0x7ea   :  { %v2826_v38 = vadd.f32 %v2825_v9, %v2070_v58  ;;  %v2869_v36 = vadd.f32 %v2868_v33, %v2078_v59  ;;  %v2827_v39 = vpop.f32.mrb[47].mxu1  ;;  %v2870_v10 = vpop.f32.mrb[51].mxu0  ;;  %v3131_v14 = vmax.f32 %v2822_v1, 0.0  ;;  %v3133_v15 = vmax.f32 %v2865_v2, 0.0  ;;  %v10148_v1 = vld [vmem:[%s10595_s24 + $0x170] sm:$0xff]  }
 0x7eb   :  { %v2828_v12 = vadd.f32 %v2827_v39, %v2074_v60  ;;  %v2871_v13 = vadd.f32 %v2870_v10, %v2082_v61  ;;  %v3132_v18 = vmax.f32 %v2824_v6, 0.0  ;;  %v3134_v19 = vmax.f32 %v2867_v7, 0.0  ;;  %v10146_v60 = vld [vmem:[%s10595_s24 + $0x128] sm:$0xff]   ;;  %v10149_v2 = vld [vmem:[%s10595_s24 + $0x1f0] sm:$0xff]   ;;  %v10152_v10 = vld [vmem:[%s10595_s24 + $0x178] sm:$0xff]  }
 0x7ec   :  { %v3147_v16 = vmax.f32 %v2826_v38, 0.0  ;;  %v3149_v17 = vmax.f32 %v2869_v36, 0.0  ;;  %v11185_v58 = vsub.s32 5, %v10745_v42  ;;  %v11188_v59 = vsub.s32 7, %v10745_v42  ;;  %v10147_v61 = vld [vmem:[%s10595_s24 + $0x1a8] sm:$0xff]   ;;  %v10150_v7 = vld [vmem:[%s10595_s24 + $0x130] sm:$0xff]  }
 0x7ed   :  { %v3148_v20 = vmax.f32 %v2828_v12, 0.0  ;;  %v3150_v22 = vmax.f32 %v2871_v13, 0.0  ;;  %v10151_v9 = vld [vmem:[%s10595_s24 + $0x1b0] sm:$0xff]   ;;  %v10153_v12 = vld [vmem:[%s10595_s24 + $0x1f8] sm:$0xff]  }
 0x7ee   :  { %v3163_v25 = vpack.c.bf16 %v3147_v16, %v3131_v14  ;;  %v3165_v21 = vpack.c.bf16 %v3149_v17, %v3133_v15  ;;  %v2090_v42 = vrot.slane %v11145_v55, %v11185_v58  ;;  %v2098_v3 = vrot.slane %v11145_v55, %v11188_v59 }
 0x7ef   :  { %v3164_v23 = vpack.c.bf16 %v3148_v20, %v3132_v18  ;;  %v3166_v24 = vpack.c.bf16 %v3150_v22, %v3134_v19 }
 0x7f1   :  { %3985 = vmatprep.mubr.bf16.mxu1 %v3164_v23  ;;  %4026 = vmatprep.mubr.bf16.mxu0 %v3166_v24 }
 0x7f2   :  { %3986 = vmatmul.mubr.bf16.vlgmr.msra.gmra.mrb[60].mxu1 %v3163_v25  ;;  %4027 = vmatmul.mubr.bf16.vlgmr.msra.gmra.mrb[64].mxu0 %v3165_v21  ;;  %v10154_v25 = vld [vmem:[%s10595_s24 + $0x138] sm:$0xff]  }
 0x7f3   :  { %9353 = vmatpush3.bf16.msra.mxu1 %v10126_v63  ;;  %9375 = vmatpush3.bf16.msra.mxu0 %v10127_v26  ;;  %v10155_v21 = vld [vmem:[%s10595_s24 + $0x1b8] sm:$0xff]  }
 0x7f4   :  { %9354 = vmatprep.subr.bf16.mxu1 %v10128_v27  ;;  %9376 = vmatprep.subr.bf16.mxu0 %v10129_v28  ;;  %v10156_v27 = vld [vmem:[%s10595_s24 + $0x240] sm:$0xff]  }
 0x7f5   :  { %v10157_v28 = vld [vmem:[%s10595_s24 + $0x2c0] sm:$0xff]  }
 0x7f7   :  { %9355 = vmatpush3.bf16.msra.mxu1 %v10130_v31  ;;  %9377 = vmatpush3.bf16.msra.mxu0 %v10131_v32 }
 0x7f8   :  { %9356 = vmatprep.subr.bf16.mxu1 %v10132_v34  ;;  %9378 = vmatprep.subr.bf16.mxu0 %v10133_v35 }
 0x7fb   :  { %9357 = vmatpush3.bf16.msra.mxu1 %v10134_v37  ;;  %9379 = vmatpush3.bf16.msra.mxu0 %v10135_v40 }
 0x7fc   :  { %9358 = vmatprep.subr.bf16.mxu1 %v10136_v29  ;;  %9380 = vmatprep.subr.bf16.mxu0 %v10137_v41 }
 0x7ff   :  { %9359 = vmatpush3.bf16.msra.mxu1 %v10138_v44  ;;  %9381 = vmatpush3.bf16.msra.mxu0 %v10139_v46  ;;  %v10158_v44 = vld [vmem:[%s10595_s24 + $0x200] sm:$0xff]  }
 0x800   :  { %9360 = vmatprep.subr.bf16.mxu1 %v10140_v47  ;;  %9382 = vmatprep.subr.bf16.mxu0 %v10141_v48  ;;  %v10159_v46 = vld [vmem:[%s10595_s24 + $0x280] sm:$0xff]   ;;  %v10160_v47 = vld [vmem:[%s10595_s24 + $0x248] sm:$0xff]  }
 0x801   :  { %v10161_v48 = vld [vmem:[%s10595_s24 + $0x2c8] sm:$0xff]  }
 0x803   :  { %9361 = vmatpush3.bf16.msra.mxu1 %v10142_v49  ;;  %9383 = vmatpush3.bf16.msra.mxu0 %v10143_v50  ;;  %v10162_v49 = vld [vmem:[%s10595_s24 + $0x208] sm:$0xff]  }
 0x804   :  { %9362 = vmatprep.subr.bf16.mxu1 %v10144_v51  ;;  %9384 = vmatprep.subr.bf16.mxu0 %v10145_v52  ;;  %v10163_v50 = vld [vmem:[%s10595_s24 + $0x288] sm:$0xff]   ;;  %v10164_v51 = vld [vmem:[%s10595_s24 + $0x250] sm:$0xff]  }
 0x805   :  { %v10165_v52 = vld [vmem:[%s10595_s24 + $0x2d0] sm:$0xff]  }
 0x807   :  { %v2907_v4 = vpop.f32.mrb[48].mxu1  ;;  %v2950_v6 = vpop.f32.mrb[52].mxu0  ;;  %9363 = vmatpush3.bf16.msra.mxu1 %v10146_v60  ;;  %9385 = vmatpush3.bf16.msra.mxu0 %v10147_v61  ;;  %v10166_v60 = vld [vmem:[%s10595_s24 + $0x210] sm:$0xff]  }
 0x808   :  { %v2908_v33 = vadd.f32 %v2907_v4, %v2086_v57  ;;  %v2951_v38 = vadd.f32 %v2950_v6, %v2094_v8  ;;  %v2909_v36 = vpop.f32.mrb[49].mxu1  ;;  %v2952_v39 = vpop.f32.mrb[53].mxu0  ;;  %9364 = vmatprep.subr.bf16.mxu1 %v10148_v1  ;;  %9386 = vmatprep.subr.bf16.mxu0 %v10149_v2  ;;  %v10167_v61 = vld [vmem:[%s10595_s24 + $0x290] sm:$0xff]   ;;  %v10170_v1 = vld [vmem:[%s10595_s24 + $0x218] sm:$0xff]   ;;  %v10174_v4 = vld [vmem:[%s10595_s24 + $0x220] sm:$0xff]  }
 0x809   :  { %v2910_v13 = vadd.f32 %v2909_v36, %v2090_v42  ;;  %v2953_v14 = vadd.f32 %v2952_v39, %v2098_v3  ;;  %v2911_v15 = vpop.f32.mrb[50].mxu1  ;;  %v2954_v55 = vpop.f32.mrb[54].mxu0  ;;  %v10171_v2 = vld [vmem:[%s10595_s24 + $0x298] sm:$0xff]   ;;  %v10175_v6 = vld [vmem:[%s10595_s24 + $0x2a0] sm:$0xff]   ;;  %v10179_v36 = vld [vmem:[%s10595_s24 + $0x2a8] sm:$0xff]  }
 0x80a   :  { %v2912_v16 = vadd.f32 %v2911_v15, %v2086_v57  ;;  %v2955_v17 = vadd.f32 %v2954_v55, %v2094_v8  ;;  %v2913_v18 = vpop.f32.mrb[51].mxu1  ;;  %v2956_v19 = vpop.f32.mrb[55].mxu0  ;;  %v3135_v23 = vmax.f32 %v2908_v33, 0.0  ;;  %v3137_v24 = vmax.f32 %v2951_v38, 0.0  ;;  %v10168_v57 = vld [vmem:[%s10595_s24 + $0x258] sm:$0xff]   ;;  %v11231_v33 = vld [vmem:[%s10590_s19 + $0x8] sm:$0xff] }
 0x80b   :  { %v2914_v20 = vadd.f32 %v2913_v18, %v2090_v42  ;;  %v2957_v22 = vadd.f32 %v2956_v19, %v2098_v3  ;;  %9365 = vmatpush3.bf16.msra.mxu1 %v10150_v7  ;;  %9387 = vmatpush3.bf16.msra.mxu0 %v10151_v9  ;;  %v3136_v31 = vmax.f32 %v2910_v13, 0.0  ;;  %v3138_v32 = vmax.f32 %v2953_v14, 0.0  ;;  %v10169_v8 = vld [vmem:[%s10595_s24 + $0x2d8] sm:$0xff]   ;;  %v10172_v42 = vld [vmem:[%s10595_s24 + $0x260] sm:$0xff]   ;;  %v10176_v7 = vld [vmem:[%s10595_s24 + $0x268] sm:$0xff]   ;;  %s11904_s19 = sld [smem:[#allocation14_spill]] }
 0x80c   :  { %v3151_v63 = vmax.f32 %v2912_v16, 0.0  ;;  %v3153_v26 = vmax.f32 %v2955_v17, 0.0  ;;  %9366 = vmatprep.subr.bf16.mxu1 %v10152_v10  ;;  %9388 = vmatprep.subr.bf16.mxu0 %v10153_v12  ;;  %v10173_v3 = vld [vmem:[%s10595_s24 + $0x2e0] sm:$0xff]   ;;  %v10177_v9 = vld [vmem:[%s10595_s24 + $0x2e8] sm:$0xff]   ;;  %v2102_v39 = vrot.slane %v11231_v33, %v10748_v43  ;;  %v2110_v10 = vrot.slane %v11231_v33, %v10791_v11  ;;  %v10180_v12 = vld [vmem:[%s10595_s24 + $0x270] sm:$0xff]  }
 0x80d   :  { %v3152_v34 = vmax.f32 %v2914_v20, 0.0  ;;  %v3154_v35 = vmax.f32 %v2957_v22, 0.0  ;;  %v10178_v38 = vld [vmem:[%s10595_s24 + $0x228] sm:$0xff]   ;;  %v10181_v13 = vld [vmem:[%s10595_s24 + $0x2f0] sm:$0xff]   ;;  %v2106_v14 = vrot.slane %v11231_v33, %v10754_v45  ;;  %v2114_v15 = vrot.slane %v11231_v33, %v11148_v56 }
 0x80e   :  { %v3167_v37 = vpack.c.bf16 %v3151_v63, %v3135_v23  ;;  %v3169_v40 = vpack.c.bf16 %v3153_v26, %v3137_v24  ;;  %v10182_v17 = vld [vmem:[%s10595_s24 + $0x230] sm:$0xff]   ;;  %v10185_v23 = vld [vmem:[%s10595_s24 + $0x2f8] sm:$0xff]  }
 0x80f   :  { %v3168_v29 = vpack.c.bf16 %v3152_v34, %v3136_v31  ;;  %v3170_v41 = vpack.c.bf16 %v3154_v35, %v3138_v32  ;;  %9367 = vmatpush3.bf16.msra.mxu1 %v10154_v25  ;;  %9389 = vmatpush3.bf16.msra.mxu0 %v10155_v21  ;;  %v10183_v18 = vld [vmem:[%s10595_s24 + $0x2b0] sm:$0xff]   ;;  %v10184_v21 = vld [vmem:[%s10595_s24 + $0x278] sm:$0xff]  }
 0x810   :  { %9396 = vmatprep.subr.bf16.mxu1 %v10156_v27  ;;  %9418 = vmatprep.subr.bf16.mxu0 %v10157_v28 }
 0x811   :  { %4067 = vmatprep.mubr.bf16.mxu1 %v3168_v29  ;;  %4108 = vmatprep.mubr.bf16.mxu0 %v3170_v41  ;;  %v10187_v29 = vld [vmem:[%s10595_s24 + $0x2b8] sm:$0xff]  }
 0x812   :  { %4068 = vmatmul.mubr.bf16.vlgmr.msra.gmra.mrb[64].mxu1 %v3167_v37  ;;  %4109 = vmatmul.mubr.bf16.vlgmr.msra.gmra.mrb[68].mxu0 %v3169_v40  ;;  %v10186_v40 = vld [vmem:[%s10595_s24 + $0x238] sm:$0xff]  }
 0x813   :  { %9397 = vmatpush3.bf16.msra.mxu1 %v10158_v44  ;;  %9419 = vmatpush3.bf16.msra.mxu0 %v10159_v46 }
 0x814   :  { %9398 = vmatprep.subr.bf16.mxu1 %v10160_v47  ;;  %9420 = vmatprep.subr.bf16.mxu0 %v10161_v48  ;;  %v10188_v48 = vld [vmem:[%s10595_s24 + $0x340] sm:$0xff]  }
 0x817   :  { %9399 = vmatpush3.bf16.msra.mxu1 %v10162_v49  ;;  %9421 = vmatpush3.bf16.msra.mxu0 %v10163_v50  ;;  %v10189_v49 = vld [vmem:[%s10595_s24 + $0x3c0] sm:$0xff]  }
 0x818   :  { %9400 = vmatprep.subr.bf16.mxu1 %v10164_v51  ;;  %9422 = vmatprep.subr.bf16.mxu0 %v10165_v52 }
 0x81b   :  { %9401 = vmatpush3.bf16.msra.mxu1 %v10166_v60  ;;  %9423 = vmatpush3.bf16.msra.mxu0 %v10167_v61 }
 0x81c   :  { %9402 = vmatprep.subr.bf16.mxu1 %v10168_v57  ;;  %9424 = vmatprep.subr.bf16.mxu0 %v10169_v8 }
 0x81f   :  { %9403 = vmatpush3.bf16.msra.mxu1 %v10170_v1  ;;  %9425 = vmatpush3.bf16.msra.mxu0 %v10171_v2  ;;  %v10190_v2 = vld [vmem:[%s10595_s24 + $0x300] sm:$0xff]  }
 0x820   :  { %9404 = vmatprep.subr.bf16.mxu1 %v10172_v42  ;;  %9426 = vmatprep.subr.bf16.mxu0 %v10173_v3  ;;  %v10191_v42 = vld [vmem:[%s10595_s24 + $0x380] sm:$0xff]   ;;  %v10192_v3 = vld [vmem:[%s10595_s24 + $0x348] sm:$0xff]  }
 0x823   :  { %9405 = vmatpush3.bf16.msra.mxu1 %v10174_v4  ;;  %9427 = vmatpush3.bf16.msra.mxu0 %v10175_v6  ;;  %v10193_v4 = vld [vmem:[%s10595_s24 + $0x3c8] sm:$0xff]  }
 0x824   :  { %9406 = vmatprep.subr.bf16.mxu1 %v10176_v7  ;;  %9428 = vmatprep.subr.bf16.mxu0 %v10177_v9  ;;  %v10194_v6 = vld [vmem:[%s10595_s24 + $0x308] sm:$0xff]   ;;  %v10196_v9 = vld [vmem:[%s10595_s24 + $0x350] sm:$0xff]  }
 0x825   :  { %v10195_v7 = vld [vmem:[%s10595_s24 + $0x388] sm:$0xff]  }
 0x827   :  { %v2993_v55 = vpop.f32.mrb[52].mxu1  ;;  %v3036_v16 = vpop.f32.mrb[56].mxu0  ;;  %9407 = vmatpush3.bf16.msra.mxu1 %v10178_v38  ;;  %9429 = vmatpush3.bf16.msra.mxu0 %v10179_v36  ;;  %v10197_v38 = vld [vmem:[%s10595_s24 + $0x3d0] sm:$0xff]  }
 0x828   :  { %v2994_v19 = vadd.f32 %v2993_v55, %v2102_v39  ;;  %v3037_v20 = vadd.f32 %v3036_v16, %v2110_v10  ;;  %v2995_v22 = vpop.f32.mrb[53].mxu1  ;;  %v3038_v25 = vpop.f32.mrb[57].mxu0  ;;  %9408 = vmatprep.subr.bf16.mxu1 %v10180_v12  ;;  %9430 = vmatprep.subr.bf16.mxu0 %v10181_v13  ;;  %v10198_v36 = vld [vmem:[%s10595_s24 + $0x310] sm:$0xff]   ;;  %v10201_v12 = vld [vmem:[%s10595_s24 + $0x3d8] sm:$0xff]   ;;  %v10205_v55 = vld [vmem:[%s10595_s24 + $0x3e0] sm:$0xff]  }
 0x829   :  { %v2996_v24 = vadd.f32 %v2995_v22, %v2106_v14  ;;  %v3039_v63 = vadd.f32 %v3038_v25, %v2114_v15  ;;  %v2997_v26 = vpop.f32.mrb[54].mxu1  ;;  %v3040_v27 = vpop.f32.mrb[58].mxu0  ;;  %v10202_v13 = vld [vmem:[%s10595_s24 + $0x318] sm:$0xff]   ;;  %v10206_v16 = vld [vmem:[%s10595_s24 + $0x320] sm:$0xff]   ;;  %v10211_v22 = vld [vmem:[%s10595_s24 + $0x3a8] sm:$0xff]   ;;  %v2118_v25 = vrot.slane %v11231_v33, %v11179_v53 }
 0x82a   :  { %v2998_v28 = vadd.f32 %v2997_v26, %v2102_v39  ;;  %v3041_v31 = vadd.f32 %v3040_v27, %v2110_v10  ;;  %v2999_v32 = vpop.f32.mrb[55].mxu1  ;;  %v3042_v34 = vpop.f32.mrb[59].mxu0  ;;  %v3139_v41 = vmax.f32 %v2994_v19, 0.0  ;;  %v3141_v44 = vmax.f32 %v3037_v20, 0.0  ;;  %v10199_v39 = vld [vmem:[%s10595_s24 + $0x390] sm:$0xff]   ;;  %v10200_v10 = vld [vmem:[%s10595_s24 + $0x358] sm:$0xff]  }
 0x82b   :  { %v3000_v35 = vadd.f32 %v2999_v32, %v2106_v14  ;;  %v3043_v37 = vadd.f32 %v3042_v34, %v2114_v15  ;;  %9409 = vmatpush3.bf16.msra.mxu1 %v10182_v17  ;;  %9431 = vmatpush3.bf16.msra.mxu0 %v10183_v18  ;;  %v3140_v50 = vmax.f32 %v2996_v24, 0.0  ;;  %v3142_v51 = vmax.f32 %v3039_v63, 0.0  ;;  %v10203_v14 = vld [vmem:[%s10595_s24 + $0x398] sm:$0xff]   ;;  %v10204_v15 = vld [vmem:[%s10595_s24 + $0x360] sm:$0xff]   ;;  %v10208_v18 = vld [vmem:[%s10595_s24 + $0x368] sm:$0xff]  }
 0x82c   :  { %v3155_v46 = vmax.f32 %v2998_v28, 0.0  ;;  %v3157_v47 = vmax.f32 %v3041_v31, 0.0  ;;  %9410 = vmatprep.subr.bf16.mxu1 %v10184_v21  ;;  %9432 = vmatprep.subr.bf16.mxu0 %v10185_v23  ;;  %v10207_v17 = vld [vmem:[%s10595_s24 + $0x3a0] sm:$0xff]   ;;  %v10209_v19 = vld [vmem:[%s10595_s24 + $0x3e8] sm:$0xff]   ;;  %v2126_v21 = vrot.slane %v11231_v33, %v11182_v54  ;;  %v10212_v23 = vld [vmem:[%s10595_s24 + $0x370] sm:$0xff]   ;;  %v2122_v63 = vrot.slane %v11231_v33, %v11185_v58 }
 0x82d   :  { %v3156_v52 = vmax.f32 %v3000_v35, 0.0  ;;  %v3158_v60 = vmax.f32 %v3043_v37, 0.0  ;;  %v10210_v20 = vld [vmem:[%s10595_s24 + $0x328] sm:$0xff]   ;;  %v10213_v24 = vld [vmem:[%s10595_s24 + $0x3f0] sm:$0xff]   ;;  %v2130_v26 = vrot.slane %v11231_v33, %v11188_v59 }
 0x82e   :  { %v3171_v61 = vpack.c.bf16 %v3155_v46, %v3139_v41  ;;  %v3173_v57 = vpack.c.bf16 %v3157_v47, %v3141_v44  ;;  %v10214_v31 = vld [vmem:[%s10595_s24 + $0x330] sm:$0xff]   ;;  %v10217_v41 = vld [vmem:[%s10595_s24 + $0x3f8] sm:$0xff]  }
 0x82f   :  { %v3172_v8 = vpack.c.bf16 %v3156_v52, %v3140_v50  ;;  %v3174_v1 = vpack.c.bf16 %v3158_v60, %v3142_v51  ;;  %9411 = vmatpush3.bf16.msra.mxu1 %v10186_v40  ;;  %9433 = vmatpush3.bf16.msra.mxu0 %v10187_v29  ;;  %v10215_v32 = vld [vmem:[%s10595_s24 + $0x3b0] sm:$0xff]   ;;  %v10216_v29 = vld [vmem:[%s10595_s24 + $0x378] sm:$0xff]  }
 0x830   :  { %9440 = vmatprep.subr.bf16.mxu1 %v10188_v48  ;;  %9462 = vmatprep.subr.bf16.mxu0 %v10189_v49 }
 0x831   :  { %4149 = vmatprep.mubr.bf16.mxu1 %v3172_v8  ;;  %4190 = vmatprep.mubr.bf16.mxu0 %v3174_v1 }
 0x832   :  { %4150 = vmatmul.mubr.bf16.vlgmr.msra.gmra.mrb[68].mxu1 %v3171_v61  ;;  %4191 = vmatmul.mubr.bf16.vlgmr.msra.gmra.mrb[72].mxu0 %v3173_v57  ;;  %v10218_v61 = vld [vmem:[%s10595_s24 + $0x338] sm:$0xff]  }
 0x833   :  { %9441 = vmatpush3.bf16.msra.mxu1 %v10190_v2  ;;  %9463 = vmatpush3.bf16.msra.mxu0 %v10191_v42  ;;  %v10219_v57 = vld [vmem:[%s10595_s24 + $0x3b8] sm:$0xff]   ;;  %s11905_s24 = sld [smem:[#allocation13_spill]] }
 0x834   :  { %9442 = vmatprep.subr.bf16.mxu1 %v10192_v3  ;;  %9464 = vmatprep.subr.bf16.mxu0 %v10193_v4 }
 0x837   :  { %9443 = vmatpush3.bf16.msra.mxu1 %v10194_v6  ;;  %9465 = vmatpush3.bf16.msra.mxu0 %v10195_v7 }
 0x838   :  { %9444 = vmatprep.subr.bf16.mxu1 %v10196_v9  ;;  %9466 = vmatprep.subr.bf16.mxu0 %v10197_v38 }
 0x83b   :  { %9445 = vmatpush3.bf16.msra.mxu1 %v10198_v36  ;;  %9467 = vmatpush3.bf16.msra.mxu0 %v10199_v39 }
 0x83c   :  { %9446 = vmatprep.subr.bf16.mxu1 %v10200_v10  ;;  %9468 = vmatprep.subr.bf16.mxu0 %v10201_v12 }
 0x83f   :  { %9447 = vmatpush3.bf16.msra.mxu1 %v10202_v13  ;;  %9469 = vmatpush3.bf16.msra.mxu0 %v10203_v14  ;;  %v8776_v13 = vld [vmem:[%s10600_s30] ss:$0 sm:$0xff]  ;;  %s11906_s30 = sld [smem:[#allocation15_spill]] }
 0x840   :  { %9448 = vmatprep.subr.bf16.mxu1 %v10204_v15  ;;  %9470 = vmatprep.subr.bf16.mxu0 %v10205_v55 }
 0x843   :  { %9449 = vmatpush3.bf16.msra.mxu1 %v10206_v16  ;;  %9471 = vmatpush3.bf16.msra.mxu0 %v10207_v17 }
 0x844   :  { %9450 = vmatprep.subr.bf16.mxu1 %v10208_v18  ;;  %9472 = vmatprep.subr.bf16.mxu0 %v10209_v19 }
 0x847   :  { %v3079_v27 = vpop.f32.mrb[56].mxu1  ;;  %v3122_v28 = vpop.f32.mrb[60].mxu0  ;;  %9451 = vmatpush3.bf16.msra.mxu1 %v10210_v20  ;;  %9473 = vmatpush3.bf16.msra.mxu0 %v10211_v22 }
 0x848   :  { %v3080_v34 = vadd.f32 %v3079_v27, %v2118_v25  ;;  %v3123_v35 = vadd.f32 %v3122_v28, %v2126_v21  ;;  %v3081_v37 = vpop.f32.mrb[57].mxu1  ;;  %v3124_v40 = vpop.f32.mrb[61].mxu0  ;;  %9452 = vmatprep.subr.bf16.mxu1 %v10212_v23  ;;  %9474 = vmatprep.subr.bf16.mxu0 %v10213_v24 }
 0x849   :  { %v3082_v44 = vadd.f32 %v3081_v37, %v2122_v63  ;;  %v3125_v46 = vadd.f32 %v3124_v40, %v2130_v26  ;;  %v3083_v47 = vpop.f32.mrb[58].mxu1  ;;  %v3126_v33 = vpop.f32.mrb[62].mxu0 }
 0x84a   :  { %v3084_v48 = vadd.f32 %v3083_v47, %v2118_v25  ;;  %v3127_v49 = vadd.f32 %v3126_v33, %v2126_v21  ;;  %v3085_v50 = vpop.f32.mrb[59].mxu1  ;;  %v3128_v51 = vpop.f32.mrb[63].mxu0  ;;  %v3143_v8 = vmax.f32 %v3080_v34, 0.0  ;;  %v3145_v1 = vmax.f32 %v3123_v35, 0.0 }
 0x84b   :  { %v3086_v52 = vadd.f32 %v3085_v50, %v2122_v63  ;;  %v3129_v60 = vadd.f32 %v3128_v51, %v2130_v26  ;;  %9453 = vmatpush3.bf16.msra.mxu1 %v10214_v31  ;;  %9475 = vmatpush3.bf16.msra.mxu0 %v10215_v32  ;;  %v3144_v3 = vmax.f32 %v3082_v44, 0.0  ;;  %v3146_v4 = vmax.f32 %v3125_v46, 0.0 }
 0x84c   :  { %v3159_v2 = vmax.f32 %v3084_v48, 0.0  ;;  %v3161_v42 = vmax.f32 %v3127_v49, 0.0  ;;  %9454 = vmatprep.subr.bf16.mxu1 %v10216_v29  ;;  %9476 = vmatprep.subr.bf16.mxu0 %v10217_v41 }
 0x84d   :  { %v3160_v6 = vmax.f32 %v3086_v52, 0.0  ;;  %v3162_v7 = vmax.f32 %v3129_v60, 0.0 }
 0x84e   :  { %v3175_v9 = vpack.c.bf16 %v3159_v2, %v3143_v8  ;;  %v3177_v38 = vpack.c.bf16 %v3161_v42, %v3145_v1 }
 0x84f   :  { %v3176_v36 = vpack.c.bf16 %v3160_v6, %v3144_v3  ;;  %v3178_v39 = vpack.c.bf16 %v3162_v7, %v3146_v4  ;;  %9455 = vmatpush3.bf16.msra.mxu1 %v10218_v61  ;;  %9477 = vmatpush3.bf16.msra.mxu0 %v10219_v57 }
 0x850   :  { %9867 = vmatprep.subr.bf16.mxu0 %v10525_v0 }
 0x851   :  { %4231 = vmatprep.mubr.bf16.mxu1 %v3176_v36  ;;  %4272 = vmatprep.mubr.bf16.mxu0 %v3178_v39 }
 0x852   :  { %4232 = vmatmul.mubr.bf16.vlgmr.msra.gmra.mrb[72].mxu1 %v3175_v9  ;;  %4273 = vmatmul.mubr.bf16.vlgmr.msra.gmra.mrb[76].mxu0 %v3177_v38 }
 0x853   :  { %4945 = vmatprep.mubr.bf16.mxu1 %v10527_v30  ;;  %9883 = vmatprep.mubr.msk.bf16.mxu0 %vm10526_vm1, %v10525_v0 }
 0x8c5   :  { %v9324_v10 = vpop.f32.mrb[60].mxu1  ;;  %v9346_v12 = vpop.f32.mrb[64].mxu0 }
 0x8c6   :  { %v9325_v14 = vpop.f32.mrb[61].mxu1  ;;  %v9347_v15 = vpop.f32.mrb[65].mxu0 }
 0x8c7   :  { %v9326_v55 = vadd.f32 %v9325_v14, %v9324_v10  ;;  %v9348_v16 = vadd.f32 %v9347_v15, %v9346_v12  ;;  %v9327_v17 = vpop.f32.mrb[62].mxu1  ;;  %v9349_v18 = vpop.f32.mrb[66].mxu0 }
 0x8c8   :  { %v9328_v19 = vpop.f32.mrb[63].mxu1  ;;  %v9350_v20 = vpop.f32.mrb[67].mxu0 }
 0x8c9   :  { %v3988_v22 = vadd.f32 %v9326_v55, %v8776_v13  ;;  %v9329_v25 = vadd.f32 %v9328_v19, %v9327_v17  ;;  %v9351_v21 = vadd.f32 %v9350_v20, %v9349_v18 }
 0x8cb   :  { %v4029_v23 = vadd.f32 %v9348_v16, %v3988_v22  ;;  %v3991_v24 = vadd.f32 %v9329_v25, %v8776_v13 }
 0x8cd   :  { %v4032_v63 = vadd.f32 %v9351_v21, %v3991_v24 }
 0x8e5   :  { %v9368_v26 = vpop.f32.mrb[64].mxu1  ;;  %v9390_v27 = vpop.f32.mrb[68].mxu0 }
 0x8e6   :  { %v9369_v28 = vpop.f32.mrb[65].mxu1  ;;  %v9391_v31 = vpop.f32.mrb[69].mxu0 }
 0x8e7   :  { %v9370_v32 = vadd.f32 %v9369_v28, %v9368_v26  ;;  %v9392_v34 = vadd.f32 %v9391_v31, %v9390_v27  ;;  %v9371_v35 = vpop.f32.mrb[66].mxu1  ;;  %v9393_v37 = vpop.f32.mrb[70].mxu0  ;;  %v10220_v26 = vld [vmem:[%s10615_s20] ss:$12 sps:$4 sm:$0xff]   ;;  %v10223_v27 = vld [vmem:[%s10615_s20 + $0x8] ss:$12 sps:$4 sm:$0xff]  }
 0x8e8   :  { %v9372_v40 = vpop.f32.mrb[67].mxu1  ;;  %v9394_v29 = vpop.f32.mrb[71].mxu0  ;;  %9868 = vmatpush3.bf16.msra.mxu0 %v10223_v27  ;;  %v10224_v28 = vld [vmem:[%s10615_s20 + $0x18] ss:$12 sps:$4 sm:$0xff]   ;;  %v10227_v31 = vld [vmem:[%s10615_s20 + $0x20] ss:$12 sps:$4 sm:$0xff]  }
 0x8e9   :  { %v4070_v41 = vadd.f32 %v9370_v32, %v4029_v23  ;;  %v9373_v44 = vadd.f32 %v9372_v40, %v9371_v35  ;;  %v9395_v46 = vadd.f32 %v9394_v29, %v9393_v37  ;;  %9869 = vmatprep.subr.bf16.mxu0 %v10525_v0  ;;  %v10230_v32 = vld [vmem:[%s10615_s20 + $0x34] ss:$12 sps:$4 sm:$0xff]   ;;  %v10231_v35 = vld [vmem:[%s10615_s20 + $0x38] ss:$12 sps:$4 sm:$0xff]   ;;  %v10235_v29 = vld [vmem:[%s10615_s20 + $0x50] ss:$12 sps:$4 sm:$0xff]  }
 0x8ea   :  { %v10234_v37 = vld [vmem:[%s10615_s20 + $0x4c] ss:$12 sps:$4 sm:$0xff]   ;;  %v10232_v40 = vld [vmem:[%s10615_s20 + $0x48] ss:$12 sps:$4 sm:$0xff]  }
 0x8eb   :  { %v4111_v47 = vadd.f32 %v9392_v34, %v4070_v41  ;;  %v4073_v33 = vadd.f32 %v9373_v44, %v4032_v63  ;;  %v10228_v34 = vld [vmem:[%s10615_s20 + $0x30] ss:$12 sps:$4 sm:$0xff]   ;;  %v10236_v41 = vld [vmem:[%s10615_s20 + $0x60] ss:$12 sps:$4 sm:$0xff]  }
 0x8ec   :  { %9870 = vmatpush3.bf16.msra.mxu0 %v10227_v31  ;;  %v10238_v44 = vld [vmem:[%s10615_s20 + $0x64] ss:$12 sps:$4 sm:$0xff]  }
 0x8ed   :  { %v4114_v48 = vadd.f32 %v9395_v46, %v4073_v33  ;;  %9871 = vmatprep.subr.bf16.mxu0 %v10525_v0  ;;  %v10239_v46 = vld [vmem:[%s10615_s20 + $0x68] ss:$12 sps:$4 sm:$0xff]   ;;  %v10240_v33 = vld [vmem:[%s10615_s20 + $0x78] ss:$12 sps:$4 sm:$0xff]  }
 0x8f0   :  { %9872 = vmatpush3.bf16.msra.mxu0 %v10231_v35 }
 0x8f1   :  { %9873 = vmatprep.subr.bf16.mxu0 %v10525_v0 }
 0x8f4   :  { %9874 = vmatpush3.bf16.msra.mxu0 %v10235_v29 }
 0x8f5   :  { %9875 = vmatprep.subr.bf16.mxu0 %v10525_v0 }
 0x8f8   :  { %9876 = vmatpush3.bf16.msra.mxu0 %v10239_v46 }
 0x8f9   :  { %9877 = vmatprep.subr.bf16.mxu0 %v10525_v0 }
 0x905   :  { %v9412_v49 = vpop.f32.mrb[68].mxu1  ;;  %v9434_v50 = vpop.f32.mrb[72].mxu0 }
 0x906   :  { %v9413_v51 = vpop.f32.mrb[69].mxu1  ;;  %v9435_v52 = vpop.f32.mrb[73].mxu0 }
 0x907   :  { %v9414_v60 = vadd.f32 %v9413_v51, %v9412_v49  ;;  %v9436_v61 = vadd.f32 %v9435_v52, %v9434_v50  ;;  %v9415_v57 = vpop.f32.mrb[70].mxu1  ;;  %v9437_v8 = vpop.f32.mrb[74].mxu0  ;;  %v10246_v49 = vld [vmem:[%s10615_s20 + $0x94] ss:$12 sps:$4 sm:$0xff]   ;;  %v10244_v50 = vld [vmem:[%s10615_s20 + $0x90] ss:$12 sps:$4 sm:$0xff]  }
 0x908   :  { %v9416_v1 = vpop.f32.mrb[71].mxu1  ;;  %v9438_v2 = vpop.f32.mrb[75].mxu0  ;;  %v10247_v51 = vld [vmem:[%s10615_s20 + $0x98] ss:$12 sps:$4 sm:$0xff]  }
 0x909   :  { %v4152_v42 = vadd.f32 %v9414_v60, %v4111_v47  ;;  %v9417_v3 = vadd.f32 %v9416_v1, %v9415_v57  ;;  %v9439_v4 = vadd.f32 %v9438_v2, %v9437_v8  ;;  %v10242_v47 = vld [vmem:[%s10615_s20 + $0x7c] ss:$12 sps:$4 sm:$0xff]   ;;  %v10250_v52 = vld [vmem:[%s10615_s20 + $0xac] ss:$12 sps:$4 sm:$0xff]  }
 0x90a   :  { %v10248_v60 = vld [vmem:[%s10615_s20 + $0xa8] ss:$12 sps:$4 sm:$0xff]  }
 0x90b   :  { %v4193_v6 = vadd.f32 %v9436_v61, %v4152_v42  ;;  %v4155_v7 = vadd.f32 %v9417_v3, %v4114_v48  ;;  %v10243_v48 = vld [vmem:[%s10615_s20 + $0x80] ss:$12 sps:$4 sm:$0xff]   ;;  %v10251_v61 = vld [vmem:[%s10615_s20 + $0xb0] ss:$12 sps:$4 sm:$0xff]  }
 0x90c   :  { %9878 = vmatpush3.bf16.msra.mxu0 %v10243_v48 }
 0x90d   :  { %v4196_v9 = vadd.f32 %v9439_v4, %v4155_v7  ;;  %9879 = vmatprep.subr.bf16.mxu0 %v10525_v0 }
 0x910   :  { %9880 = vmatpush3.bf16.msra.mxu0 %v10247_v51 }
 0x911   :  { %9881 = vmatprep.subr.bf16.mxu0 %v10525_v0 }
 0x914   :  { %9882 = vmatpush3.bf16.msra.mxu0 %v10251_v61 }
 0x915   :  { %9893 = vmatprep.subr.bf16.mxu0 %v10525_v0 }
 0x925   :  { %v9456_v38 = vpop.f32.mrb[72].mxu1  ;;  %v9478_v36 = vpop.f32.mrb[76].mxu0 }
 0x926   :  { %v9457_v39 = vpop.f32.mrb[73].mxu1  ;;  %v9479_v10 = vpop.f32.mrb[77].mxu0 }
 0x927   :  { %v9458_v12 = vadd.f32 %v9457_v39, %v9456_v38  ;;  %v9480_v13 = vadd.f32 %v9479_v10, %v9478_v36  ;;  %v9459_v14 = vpop.f32.mrb[74].mxu1  ;;  %v9481_v15 = vpop.f32.mrb[78].mxu0 }
 0x928   :  { %v9460_v55 = vpop.f32.mrb[75].mxu1  ;;  %v9482_v16 = vpop.f32.mrb[79].mxu0 }
 0x929   :  { %v4234_v17 = vadd.f32 %v9458_v12, %v4193_v6  ;;  %v9461_v18 = vadd.f32 %v9460_v55, %v9459_v14  ;;  %v9483_v19 = vadd.f32 %v9482_v16, %v9481_v15  ;;  %v8905_v55 = vld [vmem:[%s11896_s13] ss:$0 sm:$0xff] }
 0x92b   :  { %v4275_v20 = vadd.f32 %v9480_v13, %v4234_v17  ;;  %v4237_v22 = vadd.f32 %v9461_v18, %v4196_v9 }
 0x92d   :  { %v4278_v25 = vadd.f32 %v9483_v19, %v4237_v22  ;;  %v11297_v21 = vadd.f32 %v4275_v20, %v11000_v62  ;;  %v10222_v62 = vld [vmem:[%s10615_s20 + $0x4] ss:$12 sps:$4 sm:$0xff]   ;;  %v8906_v22 = vld [vmem:[%s11897_s17] ss:$0 sm:$0xff] }
 0x92e   :  { %4913 = vmatprep.subr.bf16.mxu1 %v10222_v62 }
 0x92f   :  { %4283 = vadd.xlane.f32.xlu1 %v11297_v21  ;;  %v11301_v23 = vadd.f32 %v4278_v25, %v11002_v5  ;;  %v4289_v24 = vmul.f32 %v11297_v21, %v11297_v21  ;;  %4914 = vmatpush1.bf16.msra.mxu1 %v10220_v26  ;;  %v10226_v5 = vld [vmem:[%s10615_s20 + $0x1c] ss:$12 sps:$4 sm:$0xff]   ;;  %s11907_s20 = sld [smem:[#allocation16_spill]] }
 0x930   :  { %4915 = vmatprep.subr.bf16.mxu1 %v10226_v5 }
 0x931   :  { %4285 = vadd.xlane.f32.xlu0 %v11301_v23  ;;  %v4290_v63 = vmul.f32 %v11301_v23, %v11301_v23 }
 0x933   :  { %4291 = vadd.xlane.f32.xlu1 %v4289_v24  ;;  %4916 = vmatpush1.bf16.msra.mxu1 %v10224_v28 }
 0x934   :  { %4917 = vmatprep.subr.bf16.mxu1 %v10230_v32 }
 0x935   :  { %4293 = vadd.xlane.f32.xlu0 %v4290_v63 }
 0x937   :  { %4918 = vmatpush1.bf16.msra.mxu1 %v10228_v34 }
 0x938   :  { %4919 = vmatprep.subr.bf16.mxu1 %v10234_v37 }
 0x93b   :  { %4920 = vmatpush1.bf16.msra.mxu1 %v10232_v40 }
 0x93c   :  { %4921 = vmatprep.subr.bf16.mxu1 %v10238_v44 }
 0x93f   :  { %4922 = vmatpush1.bf16.msra.mxu1 %v10236_v41 }
 0x940   :  { %4923 = vmatprep.subr.bf16.mxu1 %v10242_v47 }
 0x943   :  { %4924 = vmatpush1.bf16.msra.mxu1 %v10240_v33 }
 0x944   :  { %4925 = vmatprep.subr.bf16.mxu1 %v10246_v49 }
 0x947   :  { %4926 = vmatpush1.bf16.msra.mxu1 %v10244_v50 }
 0x948   :  { %4927 = vmatprep.subr.bf16.mxu1 %v10250_v52 }
 0x94b   :  { %4928 = vmatpush1.bf16.msra.mxu1 %v10248_v60 }
 0x94c   :  { %9887 = vmatprep.subr.bf16.mxu1 %v10525_v0 }
 0x9bc   :  { %v4284_v57 = vpop.xlane.xlu1 %4283 }
 0x9bd   :  { %v4287_v8 = vmul.f32 0.0078125, %v4284_v57 }
 0x9be   :  { %v4286_v1 = vpop.xlane.xlu0 %4285 }
 0x9bf   :  { %v4288_v2 = vmul.f32 0.0078125, %v4286_v1  ;;  %v4297_v3 = vmul.f32 %v4287_v8, %v4287_v8  ;;  %v4303_v14 = vsub.f32 %v11297_v21, %v4287_v8  ;;  %v4359_v21 = vld [vmem:[%s11898_s21] sm:$0x7] }
 0x9c0   :  { %v4292_v42 = vpop.xlane.xlu1 %4291  ;;  %v4773_v26 = vrot.slane %v4359_v21, %v10748_v43 }
 0x9c1   :  { %v4295_v4 = vmul.f32 0.0078125, %v4292_v42  ;;  %v4298_v7 = vmul.f32 %v4288_v2, %v4288_v2  ;;  %v4304_v16 = vsub.f32 %v11301_v23, %v4288_v2  ;;  %v4777_v23 = vrot.slane %v4359_v21, %v10754_v45 }
 0x9c2   :  { %v4294_v6 = vpop.xlane.xlu0 %4293 }
 0x9c3   :  { %v4299_v9 = vsub.f32 %v4295_v4, %v4297_v3  ;;  %v4296_v38 = vmul.f32 0.0078125, %v4294_v6  ;;  %v4781_v4 = vrot.slane %v4359_v21, %v10791_v11 }
 0x9c5   :  { %v4301_v36 = vmax.f32 %v4299_v9, 0.0  ;;  %v4300_v39 = vsub.f32 %v4296_v38, %v4298_v7 }
 0x9c7   :  { %v4305_v10 = vadd.f32 1e-05, %v4301_v36  ;;  %v4302_v12 = vmax.f32 %v4300_v39, 0.0 }
 0x9c9   :  { %10424 = vrsqrt.f32 %v4305_v10  ;;  %v4306_v13 = vadd.f32 1e-05, %v4302_v12 }
 0x9cb   :  { %10426 = vrsqrt.f32 %v4306_v13 }
 0x9d3   :  { %v10425_v15 = vpop.eup %10424 }
 0x9d4   :  { %v4309_v17 = vmul.f32 %v10425_v15, %v4303_v14 }
 0x9d5   :  { %v10427_v18 = vpop.eup %10426 }
 0x9d6   :  { %v4310_v19 = vmul.f32 %v10427_v18, %v4304_v16  ;;  %v4317_v20 = vmul.f32 %v8905_v55, %v4309_v17 }
 0x9d8   :  { %v4318_v25 = vmul.f32 %v8905_v55, %v4310_v19  ;;  %v11345_v24 = vadd.f32 %v8906_v22, %v4317_v20 }
 0x9da   :  { %v11347_v63 = vadd.f32 %v8906_v22, %v4318_v25 }
 0x9dc   :  { %v4768_v62 = vpack.c.bf16 %v11347_v63, %v11345_v24 }
 0x9de   :  { %4946 = vmatmul.mubr.bf16.vlgmr.msra.gmra.mrb[76].mxu1 %v4768_v62  ;;  %9884 = vmatmul.mubr.bf16.vlgmr.msra.gmra.mrb[80].mxu0 %v4768_v62 }
 0x9df   :  { %9889 = vmatprep.mubr.msk.bf16.mxu1 %vm10526_vm1, %v10525_v0  ;;  %9895 = vmatprep.mubr.msk.bf16.mxu0 %vm10526_vm1, %v10525_v0 }
 0xab1   :  { %v4947_v27 = vpop.f32.mrb[76].mxu1  ;;  %v11358_v5 = vpop.f32.mrb[80].mxu0 }
 0xab2   :  { %v4949_v28 = vpop.f32.mrb[77].mxu1  ;;  %v9885_v31 = vpop.f32.mrb[81].mxu0  ;;  %v4948_v29 = vadd.f32 %v4947_v27, %v4773_v26  ;;  %v4991_v38 = vadd.f32 %v11358_v5, %v4781_v4 }
 0xab3   :  { %v4950_v32 = vadd.f32 %v4949_v28, %v4777_v23  ;;  %v4951_v34 = vpop.f32.mrb[78].mxu1  ;;  %v11360_v35 = vpop.f32.mrb[82].mxu0 }
 0xab4   :  { %v4953_v37 = vpop.f32.mrb[79].mxu1  ;;  %v9886_v40 = vpop.f32.mrb[83].mxu0  ;;  %v9243_v33 = vpack.c.bf16 %v4948_v29, %v4948_v29  ;;  %v4952_v48 = vadd.f32 %v4951_v34, %v4773_v26  ;;  %v11405_v10 = vpack.c.bf16 %v4991_v38, %v4991_v38  ;;  %v4994_v12 = vadd.f32 %v11360_v35, %v4781_v4 }
 0xab5   :  { %v9245_v41 = vpack.c.bf16 %v4950_v32, %v4950_v32  ;;  %v4954_v44 = vadd.f32 %v4953_v37, %v4777_v23 }
 0xab6   :  { %v9244_v50 = vpack.c.bf16 %v4952_v48, %v4952_v48  ;;  %v11413_v15 = vpack.c.bf16 %v4994_v12, %v4994_v12  ;;  %v5519_v55 = vsel %vm1385_vm4, %v11405_v10, 0 }
 0xab7   :  { %v9246_v46 = vpack.c.bf16 %v4954_v44, %v4954_v44  ;;  %5022 = vrot.lane.b32.xlu1 %v9245_v41, %s10528_s0  ;;  %v5055_v47 = vsel %vm916_vm3, %v9245_v41, 0 }
 0xab8   :  { %9888 = vmatpush3.bf16.xpose.msra.mxu1 %v5055_v47  ;;  %v5565_v17 = vsel %vm1385_vm4, %v11413_v15, 0 }
 0xab9   :  { %5024 = vrot.lane.b32.xlu0 %v9246_v46, %s10528_s0  ;;  %v5101_v49 = vsel %vm916_vm3, %v9246_v46, 0  ;;  %9899 = vmatprep.subr.bf16.mxu1 %v10525_v0 }
 0xaba   :  { %9894 = vmatpush3.bf16.xpose.msra.mxu0 %v5101_v49 }
 0xabb   :  { %5005 = vrot.lane.b32.xlu1 %v9243_v33, %s10528_s0  ;;  %9905 = vmatprep.subr.bf16.mxu0 %v10525_v0 }
 0xabd   :  { %5026 = vrot.lane.b32.xlu0 %v9245_v41, %s10529_s5 }
 0xabf   :  { %5007 = vrot.lane.b32.xlu1 %v9244_v50, %s10528_s0  ;;  %9890 = vmatmul.mubr.msk.bf16.vlgmr.msra.gmra.mrb[80].mxu1 %vm916_vm3, %v9243_v33 }
 0xac0   :  { %9901 = vmatprep.mubr.msk.bf16.mxu1 %vm10526_vm1, %v10525_v0 }
 0xac1   :  { %9896 = vmatmul.mubr.msk.bf16.vlgmr.msra.gmra.mrb[84].mxu0 %vm916_vm3, %v9244_v50  ;;  %5009 = vrot.lane.b32.xlu0 %v9243_v33, %s10529_s5 }
 0xac2   :  { %9907 = vmatprep.mubr.msk.bf16.mxu0 %vm10526_vm1, %v10525_v0 }
 0xac3   :  { %5028 = vrot.lane.b32.xlu1 %v9246_v46, %s10529_s5 }
 0xac5   :  { %5030 = vrot.lane.b32.xlu0 %v9245_v41, %s10530_s9 }
 0xac7   :  { %5011 = vrot.lane.b32.xlu1 %v9244_v50, %s10529_s5 }
 0xac9   :  { %5013 = vrot.lane.b32.xlu0 %v9243_v33, %s10530_s9 }
 0xacb   :  { %5032 = vrot.lane.b32.xlu1 %v9246_v46, %s10530_s9 }
 0xacf   :  { %5015 = vrot.lane.b32.xlu1 %v9244_v50, %s10530_s9 }
 0xb29   :  { %v5023_v51 = vpop.permute.xlu1 %5022 }
 0xb2a   :  { %v5147_v52 = vsel %vm916_vm3, %v5023_v51, 0 }
 0xb2b   :  { %v5025_v60 = vpop.permute.xlu0 %5024  ;;  %9900 = vmatpush3.bf16.xpose.msra.mxu1 %v5147_v52 }
 0xb2c   :  { %v5193_v61 = vsel %vm916_vm3, %v5025_v60, 0  ;;  %9911 = vmatprep.subr.bf16.mxu1 %v10525_v0 }
 0xb2d   :  { %9906 = vmatpush3.bf16.xpose.msra.mxu0 %v5193_v61  ;;  %v5006_v57 = vpop.permute.xlu1 %5005 }
 0xb2e   :  { %9917 = vmatprep.subr.bf16.mxu0 %v10525_v0 }
 0xb2f   :  { %v5027_v8 = vpop.permute.xlu0 %5026 }
 0xb30   :  { %v5239_v2 = vsel %vm916_vm3, %v5027_v8, 0 }
 0xb31   :  { %v5008_v1 = vpop.permute.xlu1 %5007 }
 0xb32   :  { %9902 = vmatmul.mubr.msk.bf16.vlgmr.msra.gmra.mrb[84].mxu1 %vm916_vm3, %v5006_v57 }
 0xb33   :  { %v5010_v42 = vpop.permute.xlu0 %5009  ;;  %9912 = vmatpush3.bf16.xpose.msra.mxu1 %v5239_v2  ;;  %9913 = vmatprep.mubr.msk.bf16.mxu1 %vm10526_vm1, %v10525_v0 }
 0xb34   :  { %9908 = vmatmul.mubr.msk.bf16.vlgmr.msra.gmra.mrb[88].mxu0 %vm916_vm3, %v5008_v1  ;;  %9923 = vmatprep.subr.bf16.mxu1 %v10525_v0 }
 0xb35   :  { %v5029_v3 = vpop.permute.xlu1 %5028  ;;  %9919 = vmatprep.mubr.msk.bf16.mxu0 %vm10526_vm1, %v10525_v0 }
 0xb36   :  { %v5285_v6 = vsel %vm916_vm3, %v5029_v3, 0 }
 0xb37   :  { %v5031_v7 = vpop.permute.xlu0 %5030  ;;  %9918 = vmatpush3.bf16.xpose.msra.mxu0 %v5285_v6 }
 0xb38   :  { %9929 = vmatprep.subr.bf16.mxu0 %v10525_v0  ;;  %v5331_v36 = vsel %vm916_vm3, %v5031_v7, 0 }
 0xb39   :  { %v5012_v9 = vpop.permute.xlu1 %5011 }
 0xb3a   :  { %9914 = vmatmul.mubr.msk.bf16.vlgmr.msra.gmra.mrb[88].mxu1 %vm916_vm3, %v5010_v42 }
 0xb3b   :  { %9924 = vmatpush3.bf16.xpose.msra.mxu1 %v5331_v36  ;;  %9925 = vmatprep.mubr.msk.bf16.mxu1 %vm10526_vm1, %v10525_v0  ;;  %v5014_v14 = vpop.permute.xlu0 %5013 }
 0xb3c   :  { %9935 = vmatprep.subr.bf16.mxu1 %v10525_v0 }
 0xb3d   :  { %v5033_v39 = vpop.permute.xlu1 %5032 }
 0xb3e   :  { %v5377_v13 = vsel %vm916_vm3, %v5033_v39, 0  ;;  %9920 = vmatmul.mubr.msk.bf16.vlgmr.msra.gmra.mrb[92].mxu0 %vm916_vm3, %v5012_v9 }
 0xb3f   :  { %9930 = vmatpush3.bf16.xpose.msra.mxu0 %v5377_v13  ;;  %9931 = vmatprep.mubr.msk.bf16.mxu0 %vm10526_vm1, %v10525_v0 }
 0xb40   :  { %9941 = vmatprep.subr.bf16.mxu0 %v10525_v0 }
 0xb41   :  { %v5016_v16 = vpop.permute.xlu1 %5015 }
 0xb42   :  { %9926 = vmatmul.mubr.msk.bf16.vlgmr.msra.gmra.mrb[92].mxu1 %vm916_vm3, %v5014_v14 }
 0xb43   :  { %9936 = vmatpush3.bf16.msra.mxu1 %v5519_v55  ;;  %9937 = vmatprep.mubr.msk.bf16.mxu1 %vm10526_vm1, %v10525_v0 }
 0xb44   :  { %9947 = vmatprep.subr.bf16.mxu1 %v10525_v0 }
 0xb46   :  { %9932 = vmatmul.mubr.msk.bf16.vlgmr.msra.gmra.mrb[96].mxu0 %vm916_vm3, %v5016_v16 }
 0xb47   :  { %9942 = vmatpush3.bf16.msra.mxu0 %v5565_v17  ;;  %9943 = vmatprep.mubr.msk.bf16.mxu0 %vm10526_vm1, %v10525_v0 }
 0xb48   :  { %9953 = vmatprep.subr.bf16.mxu0 %v10525_v0 }
 0xb92   :  { %v5091_v18 = vpop.f32.mrb[80].mxu1 }
 0xb93   :  { %v9891_v19 = vpop.f32.mrb[81].mxu1  ;;  %v5419_v20 = vsel %vm1285_vm5, %v5091_v18, -inf }
 0xb94   :  { %v5137_v22 = vpop.f32.mrb[84].mxu0  ;;  %5420 = vmax.xlane.f32.xlu0 %v5419_v20  ;;  %v5094_v25 = vpop.f32.mrb[82].mxu1 }
 0xb95   :  { %v9892_v62 = vpop.f32.mrb[83].mxu1  ;;  %v9897_v21 = vpop.f32.mrb[85].mxu0  ;;  %v5422_v23 = vsel %vm1285_vm5, %v5137_v22, -inf }
 0xb96   :  { %v5140_v26 = vpop.f32.mrb[86].mxu0  ;;  %5423 = vmax.xlane.f32.xlu1 %v5422_v23 }
 0xb97   :  { %v9898_v27 = vpop.f32.mrb[87].mxu0 }
 0xc05   :  { %v5183_v5 = vpop.f32.mrb[84].mxu1 }
 0xc06   :  { %v9903_v28 = vpop.f32.mrb[85].mxu1  ;;  %v5425_v31 = vsel %vm1285_vm5, %v5183_v5, -inf }
 0xc07   :  { %v5229_v32 = vpop.f32.mrb[88].mxu0  ;;  %5426 = vmax.xlane.f32.xlu0 %v5425_v31  ;;  %v5186_v34 = vpop.f32.mrb[86].mxu1 }
 0xc08   :  { %v9904_v35 = vpop.f32.mrb[87].mxu1  ;;  %v9909_v37 = vpop.f32.mrb[89].mxu0  ;;  %v5428_v41 = vsel %vm1285_vm5, %v5229_v32, -inf }
 0xc09   :  { %v5232_v40 = vpop.f32.mrb[90].mxu0 }
 0xc0a   :  { %v9910_v29 = vpop.f32.mrb[91].mxu0 }
 0xc0b   :  { %5429 = vmax.xlane.f32.xlu0 %v5428_v41 }
 0xc0d   :  { %v11431_v44 = vpop.f32.mrb[88].mxu1 }
 0xc0e   :  { %v9915_v46 = vpop.f32.mrb[89].mxu1  ;;  %v5431_v47 = vsel %vm1285_vm5, %v11431_v44, -inf }
 0xc0f   :  { %5432 = vmax.xlane.f32.xlu1 %v5431_v47  ;;  %v5278_v33 = vpop.f32.mrb[90].mxu1 }
 0xc10   :  { %v9916_v48 = vpop.f32.mrb[91].mxu1 }
 0xc11   :  { %v5321_v49 = vpop.f32.mrb[92].mxu0 }
 0xc12   :  { %v9921_v50 = vpop.f32.mrb[93].mxu0  ;;  %v5434_v51 = vsel %vm1285_vm5, %v5321_v49, -inf }
 0xc13   :  { %v5324_v52 = vpop.f32.mrb[94].mxu0  ;;  %5435 = vmax.xlane.f32.xlu0 %v5434_v51 }
 0xc14   :  { %v9922_v60 = vpop.f32.mrb[95].mxu0 }
 0xc15   :  { %v5367_v61 = vpop.f32.mrb[92].mxu1 }
 0xc16   :  { %v9927_v57 = vpop.f32.mrb[93].mxu1  ;;  %v5437_v8 = vsel %vm1285_vm5, %v5367_v61, -inf }
 0xc17   :  { %5438 = vmax.xlane.f32.xlu1 %v5437_v8  ;;  %v5370_v1 = vpop.f32.mrb[94].mxu1 }
 0xc18   :  { %v9928_v2 = vpop.f32.mrb[95].mxu1 }
 0xc19   :  { %v5413_v42 = vpop.f32.mrb[96].mxu0 }
 0xc1a   :  { %v9933_v3 = vpop.f32.mrb[97].mxu0  ;;  %v5440_v4 = vsel %vm1285_vm5, %v5413_v42, -inf }
 0xc1b   :  { %v5416_v6 = vpop.f32.mrb[98].mxu0  ;;  %5441 = vmax.xlane.f32.xlu0 %v5440_v4 }
 0xc1c   :  { %v9934_v7 = vpop.f32.mrb[99].mxu0 }
 0xc21   :  { %v5421_v12 = vpop.xlane.xlu0 %5420 }
 0xc22   :  { %v5443_v14 = vsub.f32 %v5091_v18, %v5421_v12 }
 0xc23   :  { %v5424_v9 = vpop.xlane.xlu1 %5423 }
 0xc24   :  { %v5444_v38 = vsub.f32 %v5137_v22, %v5424_v9  ;;  %v5451_v55 = vmul.f32 1.442695, %v5443_v14 }
 0xc26   :  { %v5453_v36 = vmul.f32 1.442695, %v5444_v38 }
 0xc28   :  { %10428 = vpow2.f32 %v5453_v36  ;;  %5039 = vrot.lane.b32.xlu1 %v11405_v10, %s10528_s0 }
 0xc29   :  { %10430 = vpow2.f32 %v5451_v55 }
 0xc32   :  { %v10429_v39 = vpop.eup %10428 }
 0xc33   :  { %v5470_v13 = vsel %vm1285_vm5, %v10429_v39, 0.0  ;;  %v10431_v16 = vpop.eup %10430 }
 0xc34   :  { %5471 = vadd.xlane.f32.xlu0 %v5470_v13  ;;  %v5467_v17 = vsel %vm1285_vm5, %v10431_v16, 0.0 }
 0xc4c   :  { %5468 = vadd.xlane.f32.xlu1 %v5467_v17 }
 0xc94   :  { %v5427_v19 = vpop.xlane.xlu0 %5426 }
 0xc95   :  { %v5445_v20 = vsub.f32 %v5183_v5, %v5427_v19 }
 0xc97   :  { %v5455_v22 = vmul.f32 1.442695, %v5445_v20 }
 0xc98   :  { %v5430_v25 = vpop.xlane.xlu0 %5429 }
 0xc99   :  { %10432 = vpow2.f32 %v5455_v22  ;;  %v5446_v62 = vsub.f32 %v5229_v32, %v5430_v25 }
 0xc9b   :  { %v5457_v21 = vmul.f32 1.442695, %v5446_v62 }
 0xc9c   :  { %v5433_v32 = vpop.xlane.xlu1 %5432 }
 0xc9d   :  { %10434 = vpow2.f32 %v5457_v21  ;;  %v5447_v34 = vsub.f32 %v11431_v44, %v5433_v32 }
 0xc9f   :  { %v5459_v40 = vmul.f32 1.442695, %v5447_v34 }
 0xca0   :  { %v5436_v5 = vpop.xlane.xlu0 %5435 }
 0xca1   :  { %v5448_v35 = vsub.f32 %v5321_v49, %v5436_v5 }
 0xca3   :  { %v11442_v23 = vpop.eup %10432  ;;  %v5461_v46 = vmul.f32 1.442695, %v5448_v35 }
 0xca4   :  { %v5473_v26 = vsel %vm1285_vm5, %v11442_v23, 0.0  ;;  %v5439_v37 = vpop.xlane.xlu1 %5438 }
 0xca5   :  { %5474 = vadd.xlane.f32.xlu1 %v5473_v26  ;;  %v5449_v29 = vsub.f32 %v5367_v61, %v5439_v37 }
 0xca7   :  { %v11446_v18 = vpop.eup %10434  ;;  %v5463_v48 = vmul.f32 1.442695, %v5449_v29 }
 0xca8   :  { %v5476_v27 = vsel %vm1285_vm5, %v11446_v18, 0.0  ;;  %v5442_v28 = vpop.xlane.xlu0 %5441  ;;  %v5040_v44 = vpop.permute.xlu1 %5039 }
 0xca9   :  { %5477 = vadd.xlane.f32.xlu0 %v5476_v27  ;;  %v5450_v47 = vsub.f32 %v5413_v42, %v5442_v28  ;;  %v5611_v7 = vsel %vm1385_vm4, %v5040_v44, 0 }
 0xcab   :  { %v5465_v51 = vmul.f32 1.442695, %v5450_v47  ;;  %v10252_v47 = vld [vmem:[%s11899_s25] sm:$0xff]  }
 0xcb6   :  { %5043 = vrot.lane.b32.xlu1 %v11405_v10, %s10529_s5 }
 0xcba   :  { %5045 = vrot.lane.b32.xlu1 %v11413_v15, %s10529_s5 }
 0xcbf   :  { %5041 = vrot.lane.b32.xlu0 %v11413_v15, %s10528_s0 }
 0xcc1   :  { %v5472_v31 = vpop.xlane.xlu0 %5471 }
 0xcc2   :  { %10436 = vrcp.f32 %v5472_v31 }
 0xcc3   :  { %10438 = vpow2.f32 %v5459_v40 }
 0xcc4   :  { %10440 = vpow2.f32 %v5461_v46 }
 0xcc5   :  { %10442 = vpow2.f32 %v5463_v48  ;;  %v10253_v48 = vld [vmem:[%s11899_s25 + $0x8] sm:$0xff]  }
 0xcc6   :  { %10444 = vpow2.f32 %v5465_v51  ;;  %v10255_v51 = vld [vmem:[%s11899_s25 + $0x18] sm:$0xff]  }
 0xccc   :  { %v10437_v41 = vpop.eup %10436 }
 0xccd   :  { %v5500_v33 = vmul.f32 %v10437_v41, %v10429_v39  ;;  %v10439_v49 = vpop.eup %10438 }
 0xcce   :  { %v10441_v60 = vpop.eup %10440  ;;  %v5479_v8 = vsel %vm1285_vm5, %v10439_v49, 0.0 }
 0xccf   :  { %v5508_v50 = vpack.c.bf16 %v5500_v33, %v5500_v33  ;;  %v11460_v61 = vpop.eup %10442  ;;  %v5482_v57 = vsel %vm1285_vm5, %v10441_v60, 0.0 }
 0xcd0   :  { %v11464_v1 = vpop.eup %10444  ;;  %v5485_v42 = vsel %vm1285_vm5, %v11460_v61, 0.0 }
 0xcd1   :  { %9944 = vmatmul.mubr.msk.bf16.vlgmr.msra.gmra.mrb[100].mxu0 %vm1285_vm5, %v5508_v50  ;;  %v5488_v2 = vsel %vm1285_vm5, %v11464_v1, 0.0  ;;  %v10254_v50 = vld [vmem:[%s11899_s25 + $0x10] sm:$0xff]  }
 0xcd2   :  { %9955 = vmatprep.mubr.msk.bf16.mxu0 %vm10526_vm1, %v10525_v0 }
 0xcd9   :  { %v5469_v52 = vpop.xlane.xlu1 %5468 }
 0xcda   :  { %10446 = vrcp.f32 %v5469_v52 }
 0xcde   :  { %5483 = vadd.xlane.f32.xlu0 %v5482_v57  ;;  %5480 = vadd.xlane.f32.xlu1 %v5479_v8  ;;  %v10256_v57 = vld [vmem:[%s11899_s25 + $0x20] sm:$0xff]  }
 0xce2   :  { %5489 = vadd.xlane.f32.xlu0 %v5488_v2  ;;  %5486 = vadd.xlane.f32.xlu1 %v5485_v42 }
 0xce4   :  { %v10447_v3 = vpop.eup %10446 }
 0xce5   :  { %v5499_v4 = vmul.f32 %v10447_v3, %v10431_v16  ;;  %v10257_v3 = vld [vmem:[%s11899_s25 + $0x28] sm:$0xff]  }
 0xce7   :  { %v5507_v6 = vpack.c.bf16 %v5499_v4, %v5499_v4 }
 0xce9   :  { %9938 = vmatmul.mubr.msk.bf16.vlgmr.msra.gmra.mrb[96].mxu1 %vm1285_vm5, %v5507_v6 }
 0xcea   :  { %9948 = vmatpush3.bf16.msra.mxu1 %v5611_v7  ;;  %9949 = vmatprep.mubr.msk.bf16.mxu1 %vm10526_vm1, %v10525_v0 }
 0xceb   :  { %9959 = vmatprep.subr.bf16.mxu1 %v10525_v0 }
 0xcf3   :  { %5049 = vrot.lane.b32.xlu1 %v11413_v15, %s10530_s9 }
 0xcf8   :  { %5047 = vrot.lane.b32.xlu0 %v11405_v10, %s10530_s9 }
 0xd32   :  { %v5475_v9 = vpop.xlane.xlu1 %5474 }
 0xd33   :  { %10448 = vrcp.f32 %v5475_v9 }
 0xd36   :  { %v5478_v38 = vpop.xlane.xlu0 %5477  ;;  %v5044_v13 = vpop.permute.xlu1 %5043 }
 0xd37   :  { %10450 = vrcp.f32 %v5478_v38  ;;  %v5703_v10 = vsel %vm1385_vm4, %v5044_v13, 0 }
 0xd3a   :  { %v5042_v36 = vpop.permute.xlu0 %5041  ;;  %v5046_v17 = vpop.permute.xlu1 %5045 }
 0xd3b   :  { %v5657_v39 = vsel %vm1385_vm4, %v5042_v36, 0  ;;  %v5749_v20 = vsel %vm1385_vm4, %v5046_v17, 0  ;;  %v10258_v36 = vld [vmem:[%s11899_s25 + $0x30] sm:$0xff]  }
 0xd3c   :  { %9954 = vmatpush3.bf16.msra.mxu0 %v5657_v39 }
 0xd3d   :  { %v10449_v12 = vpop.eup %10448  ;;  %9965 = vmatprep.subr.bf16.mxu0 %v10525_v0 }
 0xd3e   :  { %v5501_v14 = vmul.f32 %v10449_v12, %v11442_v23 }
 0xd40   :  { %v5509_v55 = vpack.c.bf16 %v5501_v14, %v5501_v14 }
 0xd41   :  { %v10451_v16 = vpop.eup %10450 }
 0xd42   :  { %v5502_v15 = vmul.f32 %v10451_v16, %v11446_v18  ;;  %9950 = vmatmul.mubr.msk.bf16.vlgmr.msra.gmra.mrb[100].mxu1 %vm1285_vm5, %v5509_v55  ;;  %v10259_v55 = vld [vmem:[%s11899_s25 + $0x38] sm:$0xff]  }
 0xd43   :  { %9960 = vmatpush3.bf16.msra.mxu1 %v5703_v10  ;;  %9961 = vmatprep.mubr.msk.bf16.mxu1 %vm10526_vm1, %v10525_v0 }
 0xd44   :  { %v5510_v19 = vpack.c.bf16 %v5502_v15, %v5502_v15  ;;  %9971 = vmatprep.subr.bf16.mxu1 %v10525_v0 }
 0xd46   :  { %9956 = vmatmul.mubr.msk.bf16.vlgmr.msra.gmra.mrb[104].mxu0 %vm1285_vm5, %v5510_v19 }
 0xd47   :  { %9966 = vmatpush3.bf16.msra.mxu0 %v5749_v20  ;;  %9967 = vmatprep.mubr.msk.bf16.mxu0 %vm10526_vm1, %v10525_v0 }
 0xd48   :  { %9977 = vmatprep.subr.bf16.mxu0 %v10525_v0 }
 0xd6b   :  { %v5484_v22 = vpop.xlane.xlu0 %5483  ;;  %v5481_v25 = vpop.xlane.xlu1 %5480 }
 0xd6c   :  { %10452 = vrcp.f32 %v5484_v22 }
 0xd6d   :  { %10454 = vrcp.f32 %v5481_v25 }
 0xd6f   :  { %v5490_v62 = vpop.xlane.xlu0 %5489  ;;  %v5487_v21 = vpop.xlane.xlu1 %5486 }
 0xd70   :  { %10456 = vrcp.f32 %v5490_v62 }
 0xd71   :  { %10458 = vrcp.f32 %v5487_v21 }
 0xd73   :  { %v5050_v5 = vpop.permute.xlu1 %5049  ;;  %v5048_v28 = vpop.permute.xlu0 %5047 }
 0xd74   :  { %v5841_v37 = vsel %vm1385_vm4, %v5050_v5, 0  ;;  %v5795_v40 = vsel %vm1385_vm4, %v5048_v28, 0 }
 0xd76   :  { %v10453_v23 = vpop.eup %10452 }
 0xd77   :  { %v10455_v26 = vpop.eup %10454  ;;  %v5504_v18 = vmul.f32 %v10453_v23, %v10441_v60 }
 0xd78   :  { %v5503_v27 = vmul.f32 %v10455_v26, %v10439_v49 }
 0xd79   :  { %v5512_v31 = vpack.c.bf16 %v5504_v18, %v5504_v18 }
 0xd7a   :  { %v10457_v32 = vpop.eup %10456  ;;  %v5511_v34 = vpack.c.bf16 %v5503_v27, %v5503_v27 }
 0xd7b   :  { %v10459_v35 = vpop.eup %10458  ;;  %9968 = vmatmul.mubr.msk.bf16.vlgmr.msra.gmra.mrb[108].mxu0 %vm1285_vm5, %v5512_v31  ;;  %v5506_v29 = vmul.f32 %v10457_v32, %v11464_v1 }
 0xd7c   :  { %9962 = vmatmul.mubr.msk.bf16.vlgmr.msra.gmra.mrb[104].mxu1 %vm1285_vm5, %v5511_v34  ;;  %9978 = vmatpush3.bf16.msra.mxu0 %v5841_v37  ;;  %v5505_v41 = vmul.f32 %v10459_v35, %v11460_v61 }
 0xd7d   :  { %9972 = vmatpush3.bf16.msra.mxu1 %v5795_v40  ;;  %9973 = vmatprep.mubr.msk.bf16.mxu1 %vm10526_vm1, %v10525_v0  ;;  %v5514_v46 = vpack.c.bf16 %v5506_v29, %v5506_v29  ;;  %v8957_v40 = vld [vmem:[%s11900_s29] ss:$0 sm:$0xff] }
 0xd7e   :  { %9979 = vmatprep.mubr.msk.bf16.mxu0 %vm10526_vm1, %v10525_v0  ;;  %9983 = vmatprep.subr.bf16.mxu1 %v10525_v0  ;;  %v5513_v33 = vpack.c.bf16 %v5505_v41, %v5505_v41 }
 0xd7f   :  { %9991 = vmatprep.subr.bf16.mxu0 %v10525_v0 }
 0xd83   :  { %9980 = vmatmul.mubr.msk.bf16.vlgmr.msra.gmra.mrb[112].mxu0 %vm1285_vm5, %v5514_v46 }
 0xd84   :  { %9974 = vmatmul.mubr.msk.bf16.vlgmr.msra.gmra.mrb[108].mxu1 %vm1285_vm5, %v5513_v33  ;;  %9995 = vmatprep.mubr.msk.bf16.mxu0 %vm10526_vm1, %v10525_v0 }
 0xd85   :  { %9984 = vmatpush3.bf16.msra.mxu1 %v10252_v47  ;;  %9987 = vmatprep.mubr.msk.bf16.mxu1 %vm10526_vm1, %v10525_v0 }
 0xd86   :  { %9985 = vmatprep.subr.bf16.mxu1 %v10525_v0  ;;  %9992 = vmatpush3.bf16.msra.mxu0 %v10254_v50 }
 0xd87   :  { %9993 = vmatprep.subr.bf16.mxu0 %v10525_v0 }
 0xd89   :  { %9986 = vmatpush3.bf16.msra.mxu1 %v10253_v48 }
 0xd8a   :  { %9999 = vmatprep.subr.bf16.mxu1 %v10525_v0  ;;  %9994 = vmatpush3.bf16.msra.mxu0 %v10255_v51 }
 0xd8b   :  { %10007 = vmatprep.subr.bf16.mxu0 %v10525_v0 }
 0xda4   :  { %v5601_v44 = vpop.f32.mrb[100].mxu0 }
 0xda5   :  { %v9945_v49 = vpop.f32.mrb[101].mxu0 }
 0xda6   :  { %v5604_v52 = vpop.f32.mrb[102].mxu0 }
 0xda7   :  { %v9946_v60 = vpop.f32.mrb[103].mxu0 }
 0xdbc   :  { %v5555_v61 = vpop.f32.mrb[96].mxu1 }
 0xdbd   :  { %v9249_v8 = vpack.c.bf16 %v5601_v44, %v5555_v61  ;;  %v9939_v1 = vpop.f32.mrb[97].mxu1 }
 0xdbe   :  { %v5558_v2 = vpop.f32.mrb[98].mxu1 }
 0xdbf   :  { %v9940_v42 = vpop.f32.mrb[99].mxu1  ;;  %9988 = vmatmul.mubr.msk.bf16.vlgmr.msra.gmra.mrb[112].mxu1 %vm916_vm3, %v9249_v8 }
 0xdc0   :  { %10000 = vmatpush3.bf16.msra.mxu1 %v10256_v57  ;;  %10003 = vmatprep.mubr.msk.bf16.mxu1 %vm10526_vm1, %v10525_v0 }
 0xdc1   :  { %10001 = vmatprep.subr.bf16.mxu1 %v10525_v0 }
 0xdc4   :  { %10002 = vmatpush3.bf16.msra.mxu1 %v10257_v3 }
 0xe15   :  { %v5647_v4 = vpop.f32.mrb[100].mxu1 }
 0xe16   :  { %v9951_v6 = vpop.f32.mrb[101].mxu1 }
 0xe17   :  { %v5650_v7 = vpop.f32.mrb[102].mxu1 }
 0xe18   :  { %v9952_v9 = vpop.f32.mrb[103].mxu1 }
 0xe19   :  { %v5693_v38 = vpop.f32.mrb[104].mxu0 }
 0xe1a   :  { %v9250_v39 = vpack.c.bf16 %v5693_v38, %v5647_v4  ;;  %v9957_v12 = vpop.f32.mrb[105].mxu0 }
 0xe1b   :  { %v5696_v13 = vpop.f32.mrb[106].mxu0  ;;  %v4388_v12 = vld [vmem:[%s11901_s3 + $0x48] sm:$0xff] }
 0xe1c   :  { %v9958_v14 = vpop.f32.mrb[107].mxu0  ;;  %9996 = vmatmul.mubr.msk.bf16.vlgmr.msra.gmra.mrb[116].mxu0 %vm916_vm3, %v9250_v39 }
 0xe1d   :  { %10008 = vmatpush3.bf16.msra.mxu0 %v10258_v36  ;;  %10011 = vmatprep.mubr.msk.bf16.mxu0 %vm10526_vm1, %v10525_v0  ;;  %v4387_v36 = vld [vmem:[%s11901_s3 + $0x40] sm:$0xff] }
 0xe1e   :  { %10009 = vmatprep.subr.bf16.mxu0 %v10525_v0 }
 0xe21   :  { %10010 = vmatpush3.bf16.msra.mxu0 %v10259_v55 }
 0xe4e   :  { %v5785_v16 = vpop.f32.mrb[108].mxu0 }
 0xe4f   :  { %v5739_v15 = vpop.f32.mrb[104].mxu1  ;;  %v9969_v10 = vpop.f32.mrb[109].mxu0 }
 0xe50   :  { %v9251_v17 = vpack.c.bf16 %v5785_v16, %v5739_v15  ;;  %v9963_v19 = vpop.f32.mrb[105].mxu1  ;;  %v5788_v20 = vpop.f32.mrb[110].mxu0  ;;  %v4395_v16 = vld [vmem:[%s11901_s3 + $0x80] sm:$0xff]  ;;  %v4396_v10 = vld [vmem:[%s11901_s3 + $0x88] sm:$0xff] }
 0xe51   :  { %v5742_v22 = vpop.f32.mrb[106].mxu1  ;;  %v9970_v25 = vpop.f32.mrb[111].mxu0  ;;  %v4403_v15 = vld [vmem:[%s11901_s3 + $0xc0] sm:$0xff] }
 0xe52   :  { %v9964_v62 = vpop.f32.mrb[107].mxu1  ;;  %10004 = vmatmul.mubr.msk.bf16.vlgmr.msra.gmra.mrb[116].mxu1 %vm916_vm3, %v9251_v17  ;;  %v4404_v17 = vld [vmem:[%s11901_s3 + $0xc8] sm:$0xff]  ;;  %v8988_v19 = vcombine.low %v4395_v16, %v4403_v15  ;;  %v8989_v20 = vcombine.high %v4395_v16, %v4403_v15 }
 0xe53   :  { %6950 = vmatprep.mubr.bf16.mxu1 %v10527_v30  ;;  %v8990_v22 = vcombine.low %v4396_v10, %v4404_v17  ;;  %v8991_v25 = vcombine.high %v4396_v10, %v4404_v17  ;;  %v4411_v62 = vld [vmem:[%s11901_s3 + $0x100] sm:$0xff]  ;;  %v4381_v17 = vld [vmem:[%s11901_s3 + $0x10] sm:$0xff] }
 0xe56   :  { %v5877_v21 = vpop.f32.mrb[112].mxu0 }
 0xe57   :  { %v5831_v23 = vpop.f32.mrb[108].mxu1  ;;  %v9981_v26 = vpop.f32.mrb[113].mxu0 }
 0xe58   :  { %v9252_v18 = vpack.c.bf16 %v5877_v21, %v5831_v23  ;;  %v9975_v0 = vpop.f32.mrb[109].mxu1  ;;  %v5880_v27 = vpop.f32.mrb[114].mxu0  ;;  %v4419_v21 = vld [vmem:[%s11901_s3 + $0x140] sm:$0xff]  ;;  %v4412_v23 = vld [vmem:[%s11901_s3 + $0x108] sm:$0xff] }
 0xe59   :  { %v5834_v5 = vpop.f32.mrb[110].mxu1  ;;  %v9982_v28 = vpop.f32.mrb[115].mxu0  ;;  %v9005_v26 = vcombine.high %v4411_v62, %v4419_v21  ;;  %v9004_v0 = vcombine.low %v4411_v62, %v4419_v21  ;;  %v4390_v62 = vld [vmem:[%s11901_s3 + $0x58] sm:$0xff] }
 0xe5a   :  { %v9976_v31 = vpop.f32.mrb[111].mxu1  ;;  %10012 = vmatmul.mubr.msk.bf16.vlgmr.msra.gmra.mrb[120].mxu0 %vm916_vm3, %v9252_v18  ;;  %v4420_v18 = vld [vmem:[%s11901_s3 + $0x148] sm:$0xff]  ;;  %v4427_v28 = vld [vmem:[%s11901_s3 + $0x180] sm:$0xff] }
 0xe5b   :  { %6993 = vmatprep.mubr.bf16.mxu0 %v10527_v30  ;;  %v9006_v27 = vcombine.low %v4412_v23, %v4420_v18  ;;  %v9007_v5 = vcombine.high %v4412_v23, %v4420_v18  ;;  %v4435_v31 = vld [vmem:[%s11901_s3 + $0x1c0] sm:$0xff] }
 0xe92   :  { %v5945_v32 = vpop.f32.mrb[112].mxu1 }
 0xe93   :  { %v9989_v34 = vpop.f32.mrb[113].mxu1  ;;  %v5958_v29 = vadd.f32 %v8957_v40, %v5945_v32  ;;  %v4428_v32 = vld [vmem:[%s11901_s3 + $0x188] sm:$0xff] }
 0xe94   :  { %v5948_v35 = vpop.f32.mrb[114].mxu1  ;;  %v9021_v34 = vcombine.high %v4427_v28, %v4435_v31 }
 0xe95   :  { %v9990_v37 = vpop.f32.mrb[115].mxu1  ;;  %v5959_v46 = vadd.f32 %v8957_v40, %v5948_v35  ;;  %v4436_v35 = vld [vmem:[%s11901_s3 + $0x1c8] sm:$0xff] }
 0xe96   :  { %v9020_v37 = vcombine.low %v4427_v28, %v4435_v31  ;;  %v9022_v40 = vcombine.low %v4428_v32, %v4436_v35 }
 0xeef   :  { %v6014_v41 = vpop.f32.mrb[116].mxu0 }
 0xef0   :  { %v6021_v47 = vadd.f32 %v6014_v41, %v5958_v29  ;;  %v9997_v33 = vpop.f32.mrb[117].mxu0  ;;  %v9023_v29 = vcombine.high %v4428_v32, %v4436_v35  ;;  %v4443_v41 = vld [vmem:[%s11901_s3 + $0x200] sm:$0xff] }
 0xef1   :  { %v6017_v48 = vpop.f32.mrb[118].mxu0 }
 0xef2   :  { %v6022_v50 = vadd.f32 %v6017_v48, %v5959_v46  ;;  %v9998_v51 = vpop.f32.mrb[119].mxu0  ;;  %v4451_v46 = vld [vmem:[%s11901_s3 + $0x240] sm:$0xff]  ;;  %v4452_v48 = vld [vmem:[%s11901_s3 + $0x248] sm:$0xff] }
 0xef3   :  { %v9037_v33 = vcombine.high %v4443_v41, %v4451_v46 }
 0xf25   :  { %v6077_v44 = vpop.f32.mrb[116].mxu1 }
 0xf26   :  { %v6084_v49 = vadd.f32 %v6077_v44, %v6021_v47  ;;  %v10005_v52 = vpop.f32.mrb[117].mxu1  ;;  %v4444_v47 = vld [vmem:[%s11901_s3 + $0x208] sm:$0xff] }
 0xf27   :  { %v6080_v60 = vpop.f32.mrb[118].mxu1  ;;  %v9038_v51 = vcombine.low %v4444_v47, %v4452_v48  ;;  %v9039_v44 = vcombine.high %v4444_v47, %v4452_v48  ;;  %v4467_v52 = vld [vmem:[%s11901_s3 + $0x2c0] sm:$0xff] }
 0xf28   :  { %v6085_v61 = vadd.f32 %v6080_v60, %v6022_v50  ;;  %v10006_v57 = vpop.f32.mrb[119].mxu1  ;;  %v9036_v50 = vcombine.low %v4443_v41, %v4451_v46  ;;  %v4460_v60 = vld [vmem:[%s11901_s3 + $0x288] sm:$0xff] }
 0xf29   :  { %v4468_v57 = vld [vmem:[%s11901_s3 + $0x2c8] sm:$0xff] }
 0xf2d   :  { %v6140_v8 = vpop.f32.mrb[120].mxu0 }
 0xf2e   :  { %v6147_v1 = vadd.f32 %v6140_v8, %v6084_v49  ;;  %v10013_v2 = vpop.f32.mrb[121].mxu0  ;;  %v4459_v49 = vld [vmem:[%s11901_s3 + $0x280] sm:$0xff] }
 0xf2f   :  { %v6143_v42 = vpop.f32.mrb[122].mxu0  ;;  %v9052_v8 = vcombine.low %v4459_v49, %v4467_v52  ;;  %v9055_v2 = vcombine.high %v4460_v60, %v4468_v57 }
 0xf30   :  { %v11537_v3 = vadd.f32 %v6147_v1, %v11345_v24  ;;  %v6148_v4 = vadd.f32 %v6143_v42, %v6085_v61  ;;  %v10014_v6 = vpop.f32.mrb[123].mxu0  ;;  %v4379_v24 = vld [vmem:[%s11901_s3] sm:$0xff]  ;;  %v9053_v61 = vcombine.high %v4459_v49, %v4467_v52  ;;  %v9054_v1 = vcombine.low %v4460_v60, %v4468_v57 }
 0xf31   :  { %v8973_v39 = vcombine.high %v4379_v24, %v4387_v36  ;;  %v8972_v13 = vcombine.low %v4379_v24, %v4387_v36  ;;  %v4475_v42 = vld [vmem:[%s11901_s3 + $0x300] sm:$0xff]  ;;  %v4476_v6 = vld [vmem:[%s11901_s3 + $0x308] sm:$0xff] }
 0xf32   :  { %v11540_v7 = vadd.f32 %v6148_v4, %v11347_v63  ;;  %6151 = vadd.xlane.f32.xlu0 %v11537_v3  ;;  %v6157_v9 = vmul.f32 %v11537_v3, %v11537_v3  ;;  %v4380_v63 = vld [vmem:[%s11901_s3 + $0x8] sm:$0xff]  ;;  %v4483_v4 = vld [vmem:[%s11901_s3 + $0x340] sm:$0xff] }
 0xf33   :  { %v8974_v14 = vcombine.low %v4380_v63, %v4388_v12  ;;  %v8975_v55 = vcombine.high %v4380_v63, %v4388_v12  ;;  %6918 = vmatprep.subr.bf16.mxu1 %v8973_v39  ;;  %v9068_v24 = vcombine.low %v4475_v42, %v4483_v4  ;;  %v4491_v39 = vld [vmem:[%s11901_s3 + $0x380] sm:$0xff] }
 0xf34   :  { %6153 = vadd.xlane.f32.xlu1 %v11540_v7  ;;  %v6158_v38 = vmul.f32 %v11540_v7, %v11540_v7  ;;  %6919 = vmatpush1.bf16.msra.mxu1 %v8972_v13  ;;  %v4499_v12 = vld [vmem:[%s11901_s3 + $0x3c0] sm:$0xff]  ;;  %v4492_v13 = vld [vmem:[%s11901_s3 + $0x388] sm:$0xff] }
 0xf35   :  { %6961 = vmatprep.subr.bf16.mxu0 %v8975_v55  ;;  %6920 = vmatprep.subr.bf16.mxu1 %v8989_v20  ;;  %v4500_v55 = vld [vmem:[%s11901_s3 + $0x3c8] sm:$0xff]  ;;  %v9084_v16 = vcombine.low %v4491_v39, %v4499_v12  ;;  %v4382_v20 = vld [vmem:[%s11901_s3 + $0x18] sm:$0xff] }
 0xf36   :  { %6159 = vadd.xlane.f32.xlu0 %v6157_v9  ;;  %6962 = vmatpush1.bf16.msra.mxu0 %v8974_v14  ;;  %v9069_v9 = vcombine.high %v4475_v42, %v4483_v4  ;;  %v9085_v14 = vcombine.high %v4491_v39, %v4499_v12  ;;  %v9086_v15 = vcombine.low %v4492_v13, %v4500_v55  ;;  %v4406_v42 = vld [vmem:[%s11901_s3 + $0xd8] sm:$0xff] }
 0xf37   :  { %6963 = vmatprep.subr.bf16.mxu0 %v8991_v25  ;;  %v9087_v10 = vcombine.high %v4492_v13, %v4500_v55  ;;  %v8978_v21 = vcombine.low %v4382_v20, %v4390_v62  ;;  %v8979_v23 = vcombine.high %v4382_v20, %v4390_v62  ;;  %v4429_v55 = vld [vmem:[%s11901_s3 + $0x190] sm:$0xff] }
 0xf38   :  { %6921 = vmatpush1.bf16.msra.mxu1 %v8988_v19  ;;  %v4389_v19 = vld [vmem:[%s11901_s3 + $0x50] sm:$0xff] }
 0xf39   :  { %6922 = vmatprep.subr.bf16.mxu1 %v9005_v26  ;;  %v8977_v25 = vcombine.high %v4381_v17, %v4389_v19  ;;  %v4453_v62 = vld [vmem:[%s11901_s3 + $0x250] sm:$0xff] }
 0xf3a   :  { %6161 = vadd.xlane.f32.xlu0 %v6158_v38  ;;  %6964 = vmatpush1.bf16.msra.mxu0 %v8990_v22  ;;  %v4484_v38 = vld [vmem:[%s11901_s3 + $0x348] sm:$0xff]  ;;  %v8976_v22 = vcombine.low %v4381_v17, %v4389_v19 }
 0xf3b   :  { %6965 = vmatprep.subr.bf16.mxu0 %v9007_v5  ;;  %v9070_v36 = vcombine.low %v4476_v6, %v4484_v38  ;;  %v9071_v63 = vcombine.high %v4476_v6, %v4484_v38  ;;  %v4413_v38 = vld [vmem:[%s11901_s3 + $0x110] sm:$0xff] }
 0xf3c   :  { %6923 = vmatpush1.bf16.msra.mxu1 %v9004_v0 }
 0xf3d   :  { %6924 = vmatprep.subr.bf16.mxu1 %v9021_v34 }
 0xf3e   :  { %6966 = vmatpush1.bf16.msra.mxu0 %v9006_v27 }
 0xf3f   :  { %6967 = vmatprep.subr.bf16.mxu0 %v9023_v29 }
 0xf40   :  { %6925 = vmatpush1.bf16.msra.mxu1 %v9020_v37 }
 0xf41   :  { %6926 = vmatprep.subr.bf16.mxu1 %v9037_v33 }
 0xf42   :  { %6968 = vmatpush1.bf16.msra.mxu0 %v9022_v40 }
 0xf43   :  { %6969 = vmatprep.subr.bf16.mxu0 %v9039_v44 }
 0xf44   :  { %6927 = vmatpush1.bf16.msra.mxu1 %v9036_v50 }
 0xf45   :  { %6928 = vmatprep.subr.bf16.mxu1 %v9053_v61  ;;  %v8971_v61 = vld [vmem:[%s11903_s14] ss:$0 sm:$0xff] }
 0xf46   :  { %6970 = vmatpush1.bf16.msra.mxu0 %v9038_v51  ;;  %v8970_v51 = vld [vmem:[%s11902_s8] ss:$0 sm:$0xff] }
 0xf47   :  { %6971 = vmatprep.subr.bf16.mxu0 %v9055_v2  ;;  %v4398_v2 = vld [vmem:[%s11901_s3 + $0x98] sm:$0xff] }
 0xf48   :  { %6929 = vmatpush1.bf16.msra.mxu1 %v9052_v8  ;;  %v4397_v8 = vld [vmem:[%s11901_s3 + $0x90] sm:$0xff]  ;;  %v8994_v12 = vcombine.low %v4398_v2, %v4406_v42 }
 0xf49   :  { %6930 = vmatprep.subr.bf16.mxu1 %v9069_v9  ;;  %v8995_v9 = vcombine.high %v4398_v2, %v4406_v42  ;;  %v4383_v2 = vld [vmem:[%s11901_s3 + $0x20] sm:$0xff] }
 0xf4a   :  { %6972 = vmatpush1.bf16.msra.mxu0 %v9054_v1  ;;  %v4405_v1 = vld [vmem:[%s11901_s3 + $0xd0] sm:$0xff]  ;;  %v4391_v42 = vld [vmem:[%s11901_s3 + $0x60] sm:$0xff] }
 0xf4b   :  { %6973 = vmatprep.subr.bf16.mxu0 %v9071_v63  ;;  %v4422_v63 = vld [vmem:[%s11901_s3 + $0x158] sm:$0xff]  ;;  %v8992_v39 = vcombine.low %v4397_v8, %v4405_v1 }
 0xf4c   :  { %6931 = vmatpush1.bf16.msra.mxu1 %v9068_v24  ;;  %v4421_v24 = vld [vmem:[%s11901_s3 + $0x150] sm:$0xff] }
 0xf4d   :  { %6932 = vmatprep.subr.bf16.mxu1 %v9085_v14  ;;  %v9009_v13 = vcombine.high %v4413_v38, %v4421_v24  ;;  %v9008_v17 = vcombine.low %v4413_v38, %v4421_v24 }
 0xf4e   :  { %6974 = vmatpush1.bf16.msra.mxu0 %v9070_v36  ;;  %v4414_v36 = vld [vmem:[%s11901_s3 + $0x118] sm:$0xff] }
 0xf4f   :  { %6975 = vmatprep.subr.bf16.mxu0 %v9087_v10  ;;  %v9011_v14 = vcombine.high %v4414_v36, %v4422_v63  ;;  %v4438_v10 = vld [vmem:[%s11901_s3 + $0x1d8] sm:$0xff]  ;;  %v9010_v19 = vcombine.low %v4414_v36, %v4422_v63  ;;  %v8981_v36 = vcombine.high %v4383_v2, %v4391_v42 }
 0xf50   :  { %6933 = vmatpush1.bf16.msra.mxu1 %v9084_v16  ;;  %v4437_v16 = vld [vmem:[%s11901_s3 + $0x1d0] sm:$0xff] }
 0xf51   :  { %7004 = vmatprep.subr.bf16.mxu1 %v8977_v25  ;;  %v9025_v20 = vcombine.high %v4429_v55, %v4437_v16  ;;  %v4445_v25 = vld [vmem:[%s11901_s3 + $0x210] sm:$0xff] }
 0xf52   :  { %6976 = vmatpush1.bf16.msra.mxu0 %v9086_v15  ;;  %v4430_v15 = vld [vmem:[%s11901_s3 + $0x198] sm:$0xff] }
 0xf53   :  { %7047 = vmatprep.subr.bf16.mxu0 %v8979_v23  ;;  %v4454_v23 = vld [vmem:[%s11901_s3 + $0x258] sm:$0xff] }
 0xfbf   :  { %v6152_v26 = vpop.xlane.xlu0 %6151 }
 0xfc0   :  { %v6155_v18 = vmul.f32 0.0078125, %v6152_v26  ;;  %v9024_v26 = vcombine.low %v4429_v55, %v4437_v16  ;;  %v8980_v55 = vcombine.low %v4383_v2, %v4391_v42 }
 0xfc1   :  { %v6154_v0 = vpop.xlane.xlu1 %6153 }
 0xfc2   :  { %v6165_v5 = vmul.f32 %v6155_v18, %v6155_v18  ;;  %v6156_v28 = vmul.f32 0.0078125, %v6154_v0  ;;  %v6171_v33 = vsub.f32 %v11537_v3, %v6155_v18  ;;  %v9026_v18 = vcombine.low %v4430_v15, %v4438_v10 }
 0xfc3   :  { %v6160_v27 = vpop.xlane.xlu0 %6159  ;;  %v9041_v0 = vcombine.high %v4445_v25, %v4453_v62 }
 0xfc4   :  { %v6163_v31 = vmul.f32 0.0078125, %v6160_v27  ;;  %v6166_v35 = vmul.f32 %v6156_v28, %v6156_v28  ;;  %v6172_v44 = vsub.f32 %v11540_v7, %v6156_v28  ;;  %v8993_v7 = vcombine.high %v4397_v8, %v4405_v1  ;;  %v4469_v28 = vld [vmem:[%s11901_s3 + $0x2d0] sm:$0xff] }
 0xfc6   :  { %v6167_v32 = vsub.f32 %v6163_v31, %v6165_v5  ;;  %v4461_v5 = vld [vmem:[%s11901_s3 + $0x290] sm:$0xff]  ;;  %v4462_v31 = vld [vmem:[%s11901_s3 + $0x298] sm:$0xff] }
 0xfc7   :  { %v6162_v34 = vpop.xlane.xlu0 %6161 }
 0xfc8   :  { %v6169_v37 = vmax.f32 %v6167_v32, 0.0  ;;  %v6164_v40 = vmul.f32 0.0078125, %v6162_v34  ;;  %v4470_v32 = vld [vmem:[%s11901_s3 + $0x2d8] sm:$0xff]  ;;  %v9040_v34 = vcombine.low %v4445_v25, %v4453_v62 }
 0xfca   :  { %v6173_v29 = vadd.f32 1e-05, %v6169_v37  ;;  %v6168_v41 = vsub.f32 %v6164_v40, %v6166_v35  ;;  %v9057_v37 = vcombine.high %v4461_v5, %v4469_v28  ;;  %v9059_v40 = vcombine.high %v4462_v31, %v4470_v32 }
 0xfcc   :  { %10460 = vrsqrt.f32 %v6173_v29  ;;  %v6170_v46 = vmax.f32 %v6168_v41, 0.0  ;;  %v4477_v29 = vld [vmem:[%s11901_s3 + $0x310] sm:$0xff] }
 0xfcd   :  { %v4485_v41 = vld [vmem:[%s11901_s3 + $0x350] sm:$0xff] }
 0xfce   :  { %v6174_v47 = vadd.f32 1e-05, %v6170_v46  ;;  %v4478_v46 = vld [vmem:[%s11901_s3 + $0x318] sm:$0xff] }
 0xfd0   :  { %10462 = vrsqrt.f32 %v6174_v47  ;;  %v4486_v47 = vld [vmem:[%s11901_s3 + $0x358] sm:$0xff] }
 0xfd6   :  { %v10461_v48 = vpop.eup %10460 }
 0xfd7   :  { %v6177_v50 = vmul.f32 %v10461_v48, %v6171_v33  ;;  %v9056_v33 = vcombine.low %v4461_v5, %v4469_v28  ;;  %v9058_v48 = vcombine.low %v4462_v31, %v4470_v32 }
 0xfd9   :  { %v6185_v52 = vmul.f32 %v8970_v51, %v6177_v50  ;;  %v9073_v50 = vcombine.high %v4477_v29, %v4485_v41 }
 0xfda   :  { %v10463_v49 = vpop.eup %10462 }
 0xfdb   :  { %v6178_v60 = vmul.f32 %v10463_v49, %v6172_v44  ;;  %v11592_v4 = vadd.f32 %v8971_v61, %v6185_v52  ;;  %v4493_v44 = vld [vmem:[%s11901_s3 + $0x390] sm:$0xff]  ;;  %v4494_v52 = vld [vmem:[%s11901_s3 + $0x398] sm:$0xff] }
 0xfdc   :  { %v4501_v49 = vld [vmem:[%s11901_s3 + $0x3d0] sm:$0xff] }
 0xfdd   :  { %v6186_v57 = vmul.f32 %v8970_v51, %v6178_v60  ;;  %v9075_v51 = vcombine.high %v4478_v46, %v4486_v47  ;;  %v4502_v60 = vld [vmem:[%s11901_s3 + $0x3d8] sm:$0xff]  ;;  %v9089_v8 = vcombine.high %v4493_v44, %v4501_v49  ;;  %v9088_v38 = vcombine.low %v4493_v44, %v4501_v49 }
 0xfde   :  { %v9091_v1 = vcombine.high %v4494_v52, %v4502_v60  ;;  %v9090_v24 = vcombine.low %v4494_v52, %v4502_v60 }
 0xfdf   :  { %v11594_v3 = vadd.f32 %v8971_v61, %v6186_v57  ;;  %v9072_v61 = vcombine.low %v4477_v29, %v4485_v41  ;;  %v9074_v57 = vcombine.low %v4478_v46, %v4486_v47 }
 0xfe1   :  { %v11598_v6 = vpack.c.bf16 %v11594_v3, %v11592_v4 }
 0xfe3   :  { %6951 = vmatmul.mubr.bf16.vlgmr.msra.gmra.mrb[120].mxu1 %v11598_v6  ;;  %6994 = vmatmul.mubr.bf16.vlgmr.msra.gmra.mrb[124].mxu0 %v11598_v6 }
 0xfe4   :  { %7005 = vmatpush1.bf16.msra.mxu1 %v8976_v22  ;;  %7048 = vmatpush1.bf16.msra.mxu0 %v8978_v21  ;;  %v9027_v22 = vcombine.high %v4430_v15, %v4438_v10  ;;  %v4446_v21 = vld [vmem:[%s11901_s3 + $0x218] sm:$0xff] }
 0xfe5   :  { %7006 = vmatprep.subr.bf16.mxu1 %v8993_v7  ;;  %7049 = vmatprep.subr.bf16.mxu0 %v8995_v9  ;;  %v9043_v27 = vcombine.high %v4446_v21, %v4454_v23  ;;  %v9042_v35 = vcombine.low %v4446_v21, %v4454_v23  ;;  %v4384_v7 = vld [vmem:[%s11901_s3 + $0x28] sm:$0xff] }
 0xfe6   :  { %7036 = vmatprep.mubr.bf16.mxu1 %v10527_v30  ;;  %7079 = vmatprep.mubr.bf16.mxu0 %v10527_v30  ;;  %v4392_v9 = vld [vmem:[%s11901_s3 + $0x68] sm:$0xff] }
 0xfe7   :  { %v8983_v63 = vcombine.high %v4384_v7, %v4392_v9  ;;  %v8982_v16 = vcombine.low %v4384_v7, %v4392_v9 }
 0xfe8   :  { %7007 = vmatpush1.bf16.msra.mxu1 %v8992_v39  ;;  %7050 = vmatpush1.bf16.msra.mxu0 %v8994_v12  ;;  %v4399_v39 = vld [vmem:[%s11901_s3 + $0xa0] sm:$0xff] }
 0xfe9   :  { %7008 = vmatprep.subr.bf16.mxu1 %v9009_v13  ;;  %7051 = vmatprep.subr.bf16.mxu0 %v9011_v14  ;;  %v4407_v12 = vld [vmem:[%s11901_s3 + $0xe0] sm:$0xff]  ;;  %v4400_v13 = vld [vmem:[%s11901_s3 + $0xa8] sm:$0xff] }
 0xfea   :  { %v4408_v14 = vld [vmem:[%s11901_s3 + $0xe8] sm:$0xff]  ;;  %v8997_v15 = vcombine.high %v4399_v39, %v4407_v12  ;;  %v8996_v25 = vcombine.low %v4399_v39, %v4407_v12 }
 0xfeb   :  { %v8999_v10 = vcombine.high %v4400_v13, %v4408_v14  ;;  %v8998_v62 = vcombine.low %v4400_v13, %v4408_v14 }
 0xfec   :  { %7009 = vmatpush1.bf16.msra.mxu1 %v9008_v17  ;;  %7052 = vmatpush1.bf16.msra.mxu0 %v9010_v19  ;;  %v4415_v17 = vld [vmem:[%s11901_s3 + $0x120] sm:$0xff] }
 0xfed   :  { %7010 = vmatprep.subr.bf16.mxu1 %v9025_v20  ;;  %7053 = vmatprep.subr.bf16.mxu0 %v9027_v22  ;;  %v4423_v19 = vld [vmem:[%s11901_s3 + $0x160] sm:$0xff]  ;;  %v4416_v20 = vld [vmem:[%s11901_s3 + $0x128] sm:$0xff] }
 0xfee   :  { %v4424_v22 = vld [vmem:[%s11901_s3 + $0x168] sm:$0xff]  ;;  %v9013_v21 = vcombine.high %v4415_v17, %v4423_v19  ;;  %v9012_v5 = vcombine.low %v4415_v17, %v4423_v19 }
 0xfef   :  { %v9015_v23 = vcombine.high %v4416_v20, %v4424_v22  ;;  %v9014_v28 = vcombine.low %v4416_v20, %v4424_v22 }
 0xff0   :  { %7011 = vmatpush1.bf16.msra.mxu1 %v9024_v26  ;;  %7054 = vmatpush1.bf16.msra.mxu0 %v9026_v18  ;;  %v4431_v26 = vld [vmem:[%s11901_s3 + $0x1a0] sm:$0xff] }
 0xff1   :  { %7012 = vmatprep.subr.bf16.mxu1 %v9041_v0  ;;  %7055 = vmatprep.subr.bf16.mxu0 %v9043_v27  ;;  %v4439_v18 = vld [vmem:[%s11901_s3 + $0x1e0] sm:$0xff]  ;;  %v4432_v0 = vld [vmem:[%s11901_s3 + $0x1a8] sm:$0xff] }
 0xff2   :  { %v4440_v27 = vld [vmem:[%s11901_s3 + $0x1e8] sm:$0xff]  ;;  %v9029_v31 = vcombine.high %v4431_v26, %v4439_v18  ;;  %v9028_v29 = vcombine.low %v4431_v26, %v4439_v18 }
 0xff3   :  { %v9031_v32 = vcombine.high %v4432_v0, %v4440_v27  ;;  %v9030_v41 = vcombine.low %v4432_v0, %v4440_v27 }
 0xff4   :  { %7013 = vmatpush1.bf16.msra.mxu1 %v9040_v34  ;;  %7056 = vmatpush1.bf16.msra.mxu0 %v9042_v35  ;;  %v4447_v34 = vld [vmem:[%s11901_s3 + $0x220] sm:$0xff] }
 0xff5   :  { %7014 = vmatprep.subr.bf16.mxu1 %v9057_v37  ;;  %7057 = vmatprep.subr.bf16.mxu0 %v9059_v40  ;;  %v4455_v35 = vld [vmem:[%s11901_s3 + $0x260] sm:$0xff]  ;;  %v4448_v37 = vld [vmem:[%s11901_s3 + $0x228] sm:$0xff] }
 0xff6   :  { %v4456_v40 = vld [vmem:[%s11901_s3 + $0x268] sm:$0xff]  ;;  %v9045_v46 = vcombine.high %v4447_v34, %v4455_v35  ;;  %v9044_v44 = vcombine.low %v4447_v34, %v4455_v35 }
 0xff7   :  { %v9047_v47 = vcombine.high %v4448_v37, %v4456_v40  ;;  %v9046_v49 = vcombine.low %v4448_v37, %v4456_v40 }
 0xff8   :  { %7015 = vmatpush1.bf16.msra.mxu1 %v9056_v33  ;;  %7058 = vmatpush1.bf16.msra.mxu0 %v9058_v48  ;;  %v4463_v33 = vld [vmem:[%s11901_s3 + $0x2a0] sm:$0xff] }
 0xff9   :  { %7016 = vmatprep.subr.bf16.mxu1 %v9073_v50  ;;  %7059 = vmatprep.subr.bf16.mxu0 %v9075_v51  ;;  %v4471_v48 = vld [vmem:[%s11901_s3 + $0x2e0] sm:$0xff]  ;;  %v4464_v50 = vld [vmem:[%s11901_s3 + $0x2a8] sm:$0xff] }
 0xffa   :  { %v4472_v51 = vld [vmem:[%s11901_s3 + $0x2e8] sm:$0xff]  ;;  %v9061_v52 = vcombine.high %v4463_v33, %v4471_v48  ;;  %v9060_v2 = vcombine.low %v4463_v33, %v4471_v48 }
 0xffb   :  { %v9063_v60 = vcombine.high %v4464_v50, %v4472_v51  ;;  %v9062_v42 = vcombine.low %v4464_v50, %v4472_v51 }
 0xffc   :  { %7017 = vmatpush1.bf16.msra.mxu1 %v9072_v61  ;;  %7060 = vmatpush1.bf16.msra.mxu0 %v9074_v57  ;;  %v4479_v61 = vld [vmem:[%s11901_s3 + $0x320] sm:$0xff] }
 0xffd   :  { %7018 = vmatprep.subr.bf16.mxu1 %v9089_v8  ;;  %7061 = vmatprep.subr.bf16.mxu0 %v9091_v1  ;;  %v4487_v57 = vld [vmem:[%s11901_s3 + $0x360] sm:$0xff]  ;;  %v4480_v8 = vld [vmem:[%s11901_s3 + $0x328] sm:$0xff] }
 0xffe   :  { %v4488_v1 = vld [vmem:[%s11901_s3 + $0x368] sm:$0xff]  ;;  %v9077_v7 = vcombine.high %v4479_v61, %v4487_v57  ;;  %v9076_v39 = vcombine.low %v4479_v61, %v4487_v57 }
 0xfff   :  { %v9079_v9 = vcombine.high %v4480_v8, %v4488_v1  ;;  %v9078_v12 = vcombine.low %v4480_v8, %v4488_v1  ;;  %v4465_v1 = vld [vmem:[%s11901_s3 + $0x2b0] sm:$0xff] }
0x1000   :  { %7019 = vmatpush1.bf16.msra.mxu1 %v9088_v38  ;;  %7062 = vmatpush1.bf16.msra.mxu0 %v9090_v24  ;;  %v4495_v38 = vld [vmem:[%s11901_s3 + $0x3a0] sm:$0xff] }
0x1001   :  { %7090 = vmatprep.subr.bf16.mxu1 %v8981_v36  ;;  %7133 = vmatprep.subr.bf16.mxu0 %v8983_v63  ;;  %v4503_v24 = vld [vmem:[%s11901_s3 + $0x3e0] sm:$0xff]  ;;  %v4496_v36 = vld [vmem:[%s11901_s3 + $0x3a8] sm:$0xff] }
0x1002   :  { %v4504_v63 = vld [vmem:[%s11901_s3 + $0x3e8] sm:$0xff]  ;;  %v9093_v13 = vcombine.high %v4495_v38, %v4503_v24  ;;  %v9092_v17 = vcombine.low %v4495_v38, %v4503_v24 }
0x1003   :  { %7037 = vmatmul.mubr.bf16.vlgmr.msra.gmra.mrb[124].mxu1 %v11598_v6  ;;  %7080 = vmatmul.mubr.bf16.vlgmr.msra.gmra.mrb[128].mxu0 %v11598_v6  ;;  %v9095_v14 = vcombine.high %v4496_v36, %v4504_v63  ;;  %v9094_v19 = vcombine.low %v4496_v36, %v4504_v63  ;;  %v4481_v63 = vld [vmem:[%s11901_s3 + $0x330] sm:$0xff] }
0x1004   :  { %7091 = vmatpush1.bf16.msra.mxu1 %v8980_v55  ;;  %7134 = vmatpush1.bf16.msra.mxu0 %v8982_v16  ;;  %v4385_v55 = vld [vmem:[%s11901_s3 + $0x30] sm:$0xff] }
0x1005   :  { %7092 = vmatprep.subr.bf16.mxu1 %v8997_v15  ;;  %7135 = vmatprep.subr.bf16.mxu0 %v8999_v10  ;;  %v4393_v16 = vld [vmem:[%s11901_s3 + $0x70] sm:$0xff]  ;;  %v4386_v15 = vld [vmem:[%s11901_s3 + $0x38] sm:$0xff] }
0x1006   :  { %7122 = vmatprep.mubr.bf16.mxu1 %v10527_v30  ;;  %7165 = vmatprep.mubr.bf16.mxu0 %v10527_v30  ;;  %v4394_v10 = vld [vmem:[%s11901_s3 + $0x78] sm:$0xff]  ;;  %v8985_v20 = vcombine.high %v4385_v55, %v4393_v16  ;;  %v8984_v26 = vcombine.low %v4385_v55, %v4393_v16 }
0x1007   :  { %v8987_v22 = vcombine.high %v4386_v15, %v4394_v10  ;;  %v8986_v18 = vcombine.low %v4386_v15, %v4394_v10  ;;  %v4497_v10 = vld [vmem:[%s11901_s3 + $0x3b0] sm:$0xff] }
0x1008   :  { %7093 = vmatpush1.bf16.msra.mxu1 %v8996_v25  ;;  %7136 = vmatpush1.bf16.msra.mxu0 %v8998_v62  ;;  %v4401_v25 = vld [vmem:[%s11901_s3 + $0xb0] sm:$0xff] }
0x1009   :  { %7094 = vmatprep.subr.bf16.mxu1 %v9013_v21  ;;  %7137 = vmatprep.subr.bf16.mxu0 %v9015_v23  ;;  %v4409_v62 = vld [vmem:[%s11901_s3 + $0xf0] sm:$0xff]  ;;  %v4402_v21 = vld [vmem:[%s11901_s3 + $0xb8] sm:$0xff] }
0x100a   :  { %v4410_v23 = vld [vmem:[%s11901_s3 + $0xf8] sm:$0xff]  ;;  %v9001_v0 = vcombine.high %v4401_v25, %v4409_v62  ;;  %v9000_v34 = vcombine.low %v4401_v25, %v4409_v62 }
0x100b   :  { %v9003_v27 = vcombine.high %v4402_v21, %v4410_v23  ;;  %v9002_v35 = vcombine.low %v4402_v21, %v4410_v23 }
0x100c   :  { %7095 = vmatpush1.bf16.msra.mxu1 %v9012_v5  ;;  %7138 = vmatpush1.bf16.msra.mxu0 %v9014_v28  ;;  %v4417_v5 = vld [vmem:[%s11901_s3 + $0x130] sm:$0xff] }
0x100d   :  { %7096 = vmatprep.subr.bf16.mxu1 %v9029_v31  ;;  %7139 = vmatprep.subr.bf16.mxu0 %v9031_v32  ;;  %v4425_v28 = vld [vmem:[%s11901_s3 + $0x170] sm:$0xff]  ;;  %v4418_v31 = vld [vmem:[%s11901_s3 + $0x138] sm:$0xff] }
0x100e   :  { %v4426_v32 = vld [vmem:[%s11901_s3 + $0x178] sm:$0xff]  ;;  %v9017_v37 = vcombine.high %v4417_v5, %v4425_v28  ;;  %v9016_v33 = vcombine.low %v4417_v5, %v4425_v28  ;;  %v10263_v5 = vld [vmem:[%s11904_s19 + $0x80] sm:$0xff]   ;;  %v10264_v28 = vld [vmem:[%s11904_s19 + $0x48] sm:$0xff]  }
0x100f   :  { %v9019_v40 = vcombine.high %v4418_v31, %v4426_v32  ;;  %v9018_v48 = vcombine.low %v4418_v31, %v4426_v32  ;;  %v10265_v31 = vld [vmem:[%s11904_s19 + $0xc8] sm:$0xff]  }
0x1010   :  { %7097 = vmatpush1.bf16.msra.mxu1 %v9028_v29  ;;  %7140 = vmatpush1.bf16.msra.mxu0 %v9030_v41  ;;  %v4433_v29 = vld [vmem:[%s11901_s3 + $0x1b0] sm:$0xff]  ;;  %v10266_v32 = vld [vmem:[%s11904_s19 + $0x8] sm:$0xff]  }
0x1011   :  { %7098 = vmatprep.subr.bf16.mxu1 %v9045_v46  ;;  %7141 = vmatprep.subr.bf16.mxu0 %v9047_v47  ;;  %v4441_v41 = vld [vmem:[%s11901_s3 + $0x1f0] sm:$0xff]  ;;  %v4434_v46 = vld [vmem:[%s11901_s3 + $0x1b8] sm:$0xff] }
0x1012   :  { %v4442_v47 = vld [vmem:[%s11901_s3 + $0x1f8] sm:$0xff]  ;;  %v9033_v50 = vcombine.high %v4433_v29, %v4441_v41  ;;  %v9032_v61 = vcombine.low %v4433_v29, %v4441_v41  ;;  %v10271_v29 = vld [vmem:[%s11904_s19 + $0x90] sm:$0xff]  }
0x1013   :  { %v9035_v51 = vcombine.high %v4434_v46, %v4442_v47  ;;  %v10273_v41 = vld [vmem:[%s11904_s19 + $0xd8] sm:$0xff]  }
0x1014   :  { %7099 = vmatpush1.bf16.msra.mxu1 %v9044_v44  ;;  %7142 = vmatpush1.bf16.msra.mxu0 %v9046_v49  ;;  %v4449_v44 = vld [vmem:[%s11901_s3 + $0x230] sm:$0xff] }
0x1015   :  { %7100 = vmatprep.subr.bf16.mxu1 %v9061_v52  ;;  %7143 = vmatprep.subr.bf16.mxu0 %v9063_v60  ;;  %v4457_v49 = vld [vmem:[%s11901_s3 + $0x270] sm:$0xff]  ;;  %v4450_v52 = vld [vmem:[%s11901_s3 + $0x238] sm:$0xff] }
0x1016   :  { %v4458_v60 = vld [vmem:[%s11901_s3 + $0x278] sm:$0xff]  ;;  %v9049_v57 = vcombine.high %v4449_v44, %v4457_v49 }
0x1017   :  { %v9051_v8 = vcombine.high %v4450_v52, %v4458_v60  ;;  %v9050_v38 = vcombine.low %v4450_v52, %v4458_v60  ;;  %v10282_v52 = vld [vmem:[%s11904_s19 + $0x28] sm:$0xff]  }
0x1018   :  { %7101 = vmatpush1.bf16.msra.mxu1 %v9060_v2  ;;  %7144 = vmatpush1.bf16.msra.mxu0 %v9062_v42  ;;  %v4473_v2 = vld [vmem:[%s11901_s3 + $0x2f0] sm:$0xff]  ;;  %v4466_v42 = vld [vmem:[%s11901_s3 + $0x2b8] sm:$0xff]  ;;  %v10283_v60 = vld [vmem:[%s11904_s19 + $0xa8] sm:$0xff]  }
0x1019   :  { %7102 = vmatprep.subr.bf16.mxu1 %v9077_v7  ;;  %7145 = vmatprep.subr.bf16.mxu0 %v9079_v9  ;;  %v4474_v7 = vld [vmem:[%s11901_s3 + $0x2f8] sm:$0xff]  ;;  %v9048_v9 = vcombine.low %v4449_v44, %v4457_v49  ;;  %v9065_v24 = vcombine.high %v4465_v1, %v4473_v2  ;;  %v10280_v44 = vld [vmem:[%s11904_s19 + $0x68] sm:$0xff]  }
0x101a   :  { %v9067_v36 = vcombine.high %v4466_v42, %v4474_v7  ;;  %v9066_v55 = vcombine.low %v4466_v42, %v4474_v7  ;;  %v10281_v49 = vld [vmem:[%s11904_s19 + $0xe8] sm:$0xff]   ;;  %v10290_v42 = vld [vmem:[%s11904_s19 + $0x38] sm:$0xff]  }
0x101b   :  { %v10291_v7 = vld [vmem:[%s11904_s19 + $0xb8] sm:$0xff]  }
0x101c   :  { %7103 = vmatpush1.bf16.msra.mxu1 %v9076_v39  ;;  %7146 = vmatpush1.bf16.msra.mxu0 %v9078_v12  ;;  %v4489_v39 = vld [vmem:[%s11901_s3 + $0x370] sm:$0xff]  ;;  %v4482_v12 = vld [vmem:[%s11901_s3 + $0x338] sm:$0xff] }
0x101d   :  { %7104 = vmatprep.subr.bf16.mxu1 %v9093_v13  ;;  %7147 = vmatprep.subr.bf16.mxu0 %v9095_v14  ;;  %v4490_v13 = vld [vmem:[%s11901_s3 + $0x378] sm:$0xff]  ;;  %v9064_v14 = vcombine.low %v4465_v1, %v4473_v2  ;;  %v9081_v16 = vcombine.high %v4481_v63, %v4489_v39 }
0x101e   :  { %v9083_v15 = vcombine.high %v4482_v12, %v4490_v13  ;;  %v9082_v25 = vcombine.low %v4482_v12, %v4490_v13  ;;  %v10288_v1 = vld [vmem:[%s11904_s19 + $0x78] sm:$0xff]  }
0x101f   :  { %v10289_v2 = vld [vmem:[%s11904_s19 + $0xf8] sm:$0xff]  }
0x1020   :  { %7105 = vmatpush1.bf16.msra.mxu1 %v9092_v17  ;;  %7148 = vmatpush1.bf16.msra.mxu0 %v9094_v19  ;;  %v4505_v17 = vld [vmem:[%s11901_s3 + $0x3f0] sm:$0xff]  ;;  %v4498_v19 = vld [vmem:[%s11901_s3 + $0x3b8] sm:$0xff] }
0x1021   :  { %7176 = vmatprep.subr.bf16.mxu1 %v8985_v20  ;;  %7219 = vmatprep.subr.bf16.mxu0 %v8987_v22  ;;  %v4506_v20 = vld [vmem:[%s11901_s3 + $0x3f8] sm:$0xff]  ;;  %v9080_v22 = vcombine.low %v4481_v63, %v4489_v39  ;;  %v9097_v62 = vcombine.high %v4497_v10, %v4505_v17  ;;  %v9096_v23 = vcombine.low %v4497_v10, %v4505_v17 }
0x1022   :  { %v9099_v21 = vcombine.high %v4498_v19, %v4506_v20 }
0x1023   :  { %7123 = vmatmul.mubr.bf16.vlgmr.msra.gmra.mrb[128].mxu1 %v11598_v6  ;;  %7166 = vmatmul.mubr.bf16.vlgmr.msra.gmra.mrb[132].mxu0 %v11598_v6 }
0x1024   :  { %7177 = vmatpush1.bf16.msra.mxu1 %v8984_v26  ;;  %7220 = vmatpush1.bf16.msra.mxu0 %v8986_v18  ;;  %v9098_v26 = vcombine.low %v4498_v19, %v4506_v20  ;;  %v10260_v18 = vld [vmem:[%s11904_s19 + $0x40] sm:$0xff]  }
0x1025   :  { %7178 = vmatprep.subr.bf16.mxu1 %v9001_v0  ;;  %7221 = vmatprep.subr.bf16.mxu0 %v9003_v27  ;;  %v10261_v0 = vld [vmem:[%s11904_s19 + $0xc0] sm:$0xff]  }
0x1026   :  { %7208 = vmatprep.mubr.bf16.mxu1 %v10527_v30  ;;  %7251 = vmatprep.mubr.bf16.mxu0 %v10527_v30  ;;  %v9034_v30 = vcombine.low %v4434_v46, %v4442_v47  ;;  %v10262_v27 = vld [vmem:[%s11904_s19] sm:$0xff]   ;;  %v10274_v46 = vld [vmem:[%s11904_s19 + $0x18] sm:$0xff]  }
0x1027   :  { %v10275_v47 = vld [vmem:[%s11904_s19 + $0x98] sm:$0xff]  }
0x1028   :  { %7179 = vmatpush1.bf16.msra.mxu1 %v9000_v34  ;;  %7222 = vmatpush1.bf16.msra.mxu0 %v9002_v35  ;;  %v10267_v34 = vld [vmem:[%s11904_s19 + $0x88] sm:$0xff]   ;;  %v10268_v35 = vld [vmem:[%s11904_s19 + $0x50] sm:$0xff]  }
0x1029   :  { %7180 = vmatprep.subr.bf16.mxu1 %v9017_v37  ;;  %7223 = vmatprep.subr.bf16.mxu0 %v9019_v40  ;;  %v10269_v37 = vld [vmem:[%s11904_s19 + $0xd0] sm:$0xff]  }
0x102a   :  { %v10270_v40 = vld [vmem:[%s11904_s19 + $0x10] sm:$0xff]  }
0x102c   :  { %7181 = vmatpush1.bf16.msra.mxu1 %v9016_v33  ;;  %7224 = vmatpush1.bf16.msra.mxu0 %v9018_v48  ;;  %v10276_v33 = vld [vmem:[%s11904_s19 + $0x60] sm:$0xff]  }
0x102d   :  { %7182 = vmatprep.subr.bf16.mxu1 %v9033_v50  ;;  %7225 = vmatprep.subr.bf16.mxu0 %v9035_v51  ;;  %v10277_v48 = vld [vmem:[%s11904_s19 + $0xe0] sm:$0xff]  }
0x102e   :  { %v10278_v50 = vld [vmem:[%s11904_s19 + $0x20] sm:$0xff]  }
0x102f   :  { %v10279_v51 = vld [vmem:[%s11904_s19 + $0xa0] sm:$0xff]  }
0x1030   :  { %7183 = vmatpush1.bf16.msra.mxu1 %v9032_v61  ;;  %7226 = vmatpush1.bf16.msra.mxu0 %v9034_v30  ;;  %v10284_v61 = vld [vmem:[%s11904_s19 + $0x70] sm:$0xff]  }
0x1031   :  { %7184 = vmatprep.subr.bf16.mxu1 %v9049_v57  ;;  %7227 = vmatprep.subr.bf16.mxu0 %v9051_v8  ;;  %v10285_v30 = vld [vmem:[%s11904_s19 + $0xf0] sm:$0xff]  }
0x1032   :  { %v10286_v57 = vld [vmem:[%s11904_s19 + $0x30] sm:$0xff]  }
0x1033   :  { %v10287_v8 = vld [vmem:[%s11904_s19 + $0xb0] sm:$0xff]  }
0x1034   :  { %7185 = vmatpush1.bf16.msra.mxu1 %v9048_v9  ;;  %7228 = vmatpush1.bf16.msra.mxu0 %v9050_v38  ;;  %v10292_v9 = vld [vmem:[%s11904_s19 + $0x140] sm:$0xff]  }
0x1035   :  { %7186 = vmatprep.subr.bf16.mxu1 %v9065_v24  ;;  %7229 = vmatprep.subr.bf16.mxu0 %v9067_v36  ;;  %v10293_v38 = vld [vmem:[%s11904_s19 + $0x1c0] sm:$0xff]  }
0x1036   :  { %v11737_v24 = vld [vmem:[%s11905_s24] sm:$0xff] }
0x1037   :  { %v6201_v36 = vrot.slane %v11737_v24, %v10748_v43  ;;  %v6209_v63 = vrot.slane %v11737_v24, %v10791_v11  ;;  %v6205_v39 = vrot.slane %v11737_v24, %v10754_v45  ;;  %v6213_v12 = vrot.slane %v11737_v24, %v11148_v56 }
0x1038   :  { %7187 = vmatpush1.bf16.msra.mxu1 %v9064_v14  ;;  %7230 = vmatpush1.bf16.msra.mxu0 %v9066_v55 }
0x1039   :  { %7188 = vmatprep.subr.bf16.mxu1 %v9081_v16  ;;  %7231 = vmatprep.subr.bf16.mxu0 %v9083_v15 }
0x103c   :  { %7189 = vmatpush1.bf16.msra.mxu1 %v9080_v22  ;;  %7232 = vmatpush1.bf16.msra.mxu0 %v9082_v25 }
0x103d   :  { %7190 = vmatprep.subr.bf16.mxu1 %v9097_v62  ;;  %7233 = vmatprep.subr.bf16.mxu0 %v9099_v21 }
0x1040   :  { %7191 = vmatpush1.bf16.msra.mxu1 %v9096_v23  ;;  %7234 = vmatpush1.bf16.msra.mxu0 %v9098_v26 }
0x1041   :  { %9537 = vmatprep.subr.bf16.mxu1 %v10260_v18  ;;  %9559 = vmatprep.subr.bf16.mxu0 %v10261_v0 }
0x1043   :  { %7209 = vmatmul.mubr.bf16.vlgmr.msra.gmra.mrb[132].mxu1 %v11598_v6  ;;  %7252 = vmatmul.mubr.bf16.vlgmr.msra.gmra.mrb[136].mxu0 %v11598_v6  ;;  %v10272_v6 = vld [vmem:[%s11904_s19 + $0x58] sm:$0xff]  }
0x1044   :  { %9538 = vmatpush3.bf16.msra.mxu1 %v10262_v27  ;;  %9560 = vmatpush3.bf16.msra.mxu0 %v10263_v5 }
0x1045   :  { %9539 = vmatprep.subr.bf16.mxu1 %v10264_v28  ;;  %9561 = vmatprep.subr.bf16.mxu0 %v10265_v31 }
0x1048   :  { %9540 = vmatpush3.bf16.msra.mxu1 %v10266_v32  ;;  %9562 = vmatpush3.bf16.msra.mxu0 %v10267_v34 }
0x1049   :  { %9541 = vmatprep.subr.bf16.mxu1 %v10268_v35  ;;  %9563 = vmatprep.subr.bf16.mxu0 %v10269_v37 }
0x104c   :  { %9542 = vmatpush3.bf16.msra.mxu1 %v10270_v40  ;;  %9564 = vmatpush3.bf16.msra.mxu0 %v10271_v29 }
0x104d   :  { %9543 = vmatprep.subr.bf16.mxu1 %v10272_v6  ;;  %9565 = vmatprep.subr.bf16.mxu0 %v10273_v41  ;;  %v10294_v41 = vld [vmem:[%s11904_s19 + $0x100] sm:$0xff]  }
0x1050   :  { %9544 = vmatpush3.bf16.msra.mxu1 %v10274_v46  ;;  %9566 = vmatpush3.bf16.msra.mxu0 %v10275_v47  ;;  %v10295_v46 = vld [vmem:[%s11904_s19 + $0x180] sm:$0xff]   ;;  %v10296_v47 = vld [vmem:[%s11904_s19 + $0x148] sm:$0xff]  }
0x1051   :  { %9545 = vmatprep.subr.bf16.mxu1 %v10276_v33  ;;  %9567 = vmatprep.subr.bf16.mxu0 %v10277_v48  ;;  %v10297_v33 = vld [vmem:[%s11904_s19 + $0x1c8] sm:$0xff]  }
0x1052   :  { %v10298_v48 = vld [vmem:[%s11904_s19 + $0x108] sm:$0xff]  }
0x1054   :  { %9546 = vmatpush3.bf16.msra.mxu1 %v10278_v50  ;;  %9568 = vmatpush3.bf16.msra.mxu0 %v10279_v51  ;;  %v10299_v50 = vld [vmem:[%s11904_s19 + $0x188] sm:$0xff]   ;;  %v10300_v51 = vld [vmem:[%s11904_s19 + $0x150] sm:$0xff]  }
0x1055   :  { %9547 = vmatprep.subr.bf16.mxu1 %v10280_v44  ;;  %9569 = vmatprep.subr.bf16.mxu0 %v10281_v49  ;;  %v10301_v44 = vld [vmem:[%s11904_s19 + $0x1d0] sm:$0xff]  }
0x1056   :  { %v10302_v49 = vld [vmem:[%s11904_s19 + $0x110] sm:$0xff]  }
0x1058   :  { %9548 = vmatpush3.bf16.msra.mxu1 %v10282_v52  ;;  %9570 = vmatpush3.bf16.msra.mxu0 %v10283_v60  ;;  %v10303_v52 = vld [vmem:[%s11904_s19 + $0x190] sm:$0xff]   ;;  %v10304_v60 = vld [vmem:[%s11904_s19 + $0x158] sm:$0xff]  }
0x1059   :  { %9549 = vmatprep.subr.bf16.mxu1 %v10284_v61  ;;  %9571 = vmatprep.subr.bf16.mxu0 %v10285_v30  ;;  %v10305_v61 = vld [vmem:[%s11904_s19 + $0x1d8] sm:$0xff]  }
0x105a   :  { %v10306_v30 = vld [vmem:[%s11904_s19 + $0x118] sm:$0xff]  }
0x105c   :  { %9550 = vmatpush3.bf16.msra.mxu1 %v10286_v57  ;;  %9572 = vmatpush3.bf16.msra.mxu0 %v10287_v8  ;;  %v10307_v57 = vld [vmem:[%s11904_s19 + $0x198] sm:$0xff]   ;;  %v10308_v8 = vld [vmem:[%s11904_s19 + $0x160] sm:$0xff]  }
0x105d   :  { %9551 = vmatprep.subr.bf16.mxu1 %v10288_v1  ;;  %9573 = vmatprep.subr.bf16.mxu0 %v10289_v2  ;;  %v10309_v1 = vld [vmem:[%s11904_s19 + $0x1e0] sm:$0xff]  }
0x105e   :  { %v10310_v2 = vld [vmem:[%s11904_s19 + $0x120] sm:$0xff]  }
0x1060   :  { %9552 = vmatpush3.bf16.msra.mxu1 %v10290_v42  ;;  %9574 = vmatpush3.bf16.msra.mxu0 %v10291_v7  ;;  %v10311_v42 = vld [vmem:[%s11904_s19 + $0x1a0] sm:$0xff]   ;;  %v10312_v7 = vld [vmem:[%s11904_s19 + $0x168] sm:$0xff]  }
0x1061   :  { %9581 = vmatprep.subr.bf16.mxu1 %v10292_v9  ;;  %9603 = vmatprep.subr.bf16.mxu0 %v10293_v38  ;;  %v10313_v9 = vld [vmem:[%s11904_s19 + $0x1e8] sm:$0xff]  }
0x1062   :  { %v10314_v38 = vld [vmem:[%s11904_s19 + $0x128] sm:$0xff]  }
0x10b6   :  { %v6952_v13 = vpop.f32.mrb[120].mxu1  ;;  %v6995_v14 = vpop.f32.mrb[124].mxu0 }
0x10b7   :  { %v6953_v55 = vadd.f32 %v6952_v13, %v6201_v36  ;;  %v6996_v16 = vadd.f32 %v6995_v14, %v6209_v63  ;;  %v6954_v15 = vpop.f32.mrb[121].mxu1  ;;  %v6997_v10 = vpop.f32.mrb[125].mxu0  ;;  %v10317_v13 = vld [vmem:[%s11904_s19 + $0x1f0] sm:$0xff]   ;;  %v6221_v14 = vrot.slane %v11737_v24, %v11185_v58 }
0x10b8   :  { %v6955_v17 = vadd.f32 %v6954_v15, %v6205_v39  ;;  %v6998_v19 = vadd.f32 %v6997_v10, %v6213_v12  ;;  %v6956_v20 = vpop.f32.mrb[122].mxu1  ;;  %v6999_v22 = vpop.f32.mrb[126].mxu0  ;;  %v10318_v10 = vld [vmem:[%s11904_s19 + $0x130] sm:$0xff]  }
0x10b9   :  { %v6957_v25 = vadd.f32 %v6956_v20, %v6201_v36  ;;  %v7000_v62 = vadd.f32 %v6999_v22, %v6209_v63  ;;  %v6958_v21 = vpop.f32.mrb[123].mxu1  ;;  %v7001_v23 = vpop.f32.mrb[127].mxu0  ;;  %v7262_v0 = vmax.f32 %v6953_v55, 0.0  ;;  %v7264_v27 = vmax.f32 %v6996_v16, 0.0  ;;  %v10315_v36 = vld [vmem:[%s11904_s19 + $0x1a8] sm:$0xff]  }
0x10ba   :  { %v6959_v26 = vadd.f32 %v6958_v21, %v6205_v39  ;;  %v7002_v18 = vadd.f32 %v7001_v23, %v6213_v12  ;;  %v7263_v31 = vmax.f32 %v6955_v17, 0.0  ;;  %v7265_v32 = vmax.f32 %v6998_v19, 0.0  ;;  %v10316_v12 = vld [vmem:[%s11904_s19 + $0x170] sm:$0xff]   ;;  %v10321_v21 = vld [vmem:[%s11904_s19 + $0x1f8] sm:$0xff]  }
0x10bb   :  { %v7278_v5 = vmax.f32 %v6957_v25, 0.0  ;;  %v7280_v28 = vmax.f32 %v7000_v62, 0.0  ;;  %v6217_v63 = vrot.slane %v11737_v24, %v11179_v53  ;;  %v6225_v39 = vrot.slane %v11737_v24, %v11182_v54  ;;  %v10319_v17 = vld [vmem:[%s11904_s19 + $0x1b0] sm:$0xff]   ;;  %v10320_v62 = vld [vmem:[%s11904_s19 + $0x178] sm:$0xff]  }
0x10bc   :  { %v7279_v34 = vmax.f32 %v6959_v26, 0.0  ;;  %v7281_v35 = vmax.f32 %v7002_v18, 0.0  ;;  %v6229_v55 = vrot.slane %v11737_v24, %v11188_v59 }
0x10bd   :  { %v7294_v37 = vpack.c.bf16 %v7278_v5, %v7262_v0  ;;  %v7296_v40 = vpack.c.bf16 %v7280_v28, %v7264_v27 }
0x10be   :  { %v7295_v29 = vpack.c.bf16 %v7279_v34, %v7263_v31  ;;  %v7297_v6 = vpack.c.bf16 %v7281_v35, %v7265_v32  ;;  %v10322_v34 = vld [vmem:[%s11904_s19 + $0x138] sm:$0xff]  }
0x10bf   :  { %v10323_v35 = vld [vmem:[%s11904_s19 + $0x1b8] sm:$0xff]  }
0x10c0   :  { %8116 = vmatprep.mubr.bf16.mxu1 %v7295_v29  ;;  %8157 = vmatprep.mubr.bf16.mxu0 %v7297_v6 }
0x10c1   :  { %8117 = vmatmul.mubr.bf16.vlgmr.msra.gmra.mrb[136].mxu1 %v7294_v37  ;;  %8158 = vmatmul.mubr.bf16.vlgmr.msra.gmra.mrb[140].mxu0 %v7296_v40 }
0x10c2   :  { %9582 = vmatpush3.bf16.msra.mxu1 %v10294_v41  ;;  %9604 = vmatpush3.bf16.msra.mxu0 %v10295_v46  ;;  %v10324_v41 = vld [vmem:[%s11904_s19 + $0x240] sm:$0xff]  }
0x10c3   :  { %9583 = vmatprep.subr.bf16.mxu1 %v10296_v47  ;;  %9605 = vmatprep.subr.bf16.mxu0 %v10297_v33  ;;  %v10325_v46 = vld [vmem:[%s11904_s19 + $0x2c0] sm:$0xff]  }
0x10c6   :  { %9584 = vmatpush3.bf16.msra.mxu1 %v10298_v48  ;;  %9606 = vmatpush3.bf16.msra.mxu0 %v10299_v50 }
0x10c7   :  { %9585 = vmatprep.subr.bf16.mxu1 %v10300_v51  ;;  %9607 = vmatprep.subr.bf16.mxu0 %v10301_v44 }
0x10ca   :  { %9586 = vmatpush3.bf16.msra.mxu1 %v10302_v49  ;;  %9608 = vmatpush3.bf16.msra.mxu0 %v10303_v52 }
0x10cb   :  { %9587 = vmatprep.subr.bf16.mxu1 %v10304_v60  ;;  %9609 = vmatprep.subr.bf16.mxu0 %v10305_v61  ;;  %v10326_v60 = vld [vmem:[%s11904_s19 + $0x200] sm:$0xff]  }
0x10cc   :  { %v10327_v61 = vld [vmem:[%s11904_s19 + $0x280] sm:$0xff]  }
0x10ce   :  { %9588 = vmatpush3.bf16.msra.mxu1 %v10306_v30  ;;  %9610 = vmatpush3.bf16.msra.mxu0 %v10307_v57  ;;  %v10328_v30 = vld [vmem:[%s11904_s19 + $0x248] sm:$0xff]  }
0x10cf   :  { %9589 = vmatprep.subr.bf16.mxu1 %v10308_v8  ;;  %9611 = vmatprep.subr.bf16.mxu0 %v10309_v1  ;;  %v10329_v57 = vld [vmem:[%s11904_s19 + $0x2c8] sm:$0xff]  }
0x10d0   :  { %v10330_v8 = vld [vmem:[%s11904_s19 + $0x208] sm:$0xff]  }
0x10d1   :  { %v10331_v1 = vld [vmem:[%s11904_s19 + $0x288] sm:$0xff]  }
0x10d2   :  { %9590 = vmatpush3.bf16.msra.mxu1 %v10310_v2  ;;  %9612 = vmatpush3.bf16.msra.mxu0 %v10311_v42  ;;  %v10332_v2 = vld [vmem:[%s11904_s19 + $0x250] sm:$0xff]  }
0x10d3   :  { %9591 = vmatprep.subr.bf16.mxu1 %v10312_v7  ;;  %9613 = vmatprep.subr.bf16.mxu0 %v10313_v9  ;;  %v10333_v42 = vld [vmem:[%s11904_s19 + $0x2d0] sm:$0xff]  }
0x10d4   :  { %v10334_v7 = vld [vmem:[%s11904_s19 + $0x210] sm:$0xff]  }
0x10d5   :  { %v10335_v9 = vld [vmem:[%s11904_s19 + $0x290] sm:$0xff]  }
0x10d6   :  { %v7038_v16 = vpop.f32.mrb[124].mxu1  ;;  %v7081_v15 = vpop.f32.mrb[128].mxu0  ;;  %9592 = vmatpush3.bf16.msra.mxu1 %v10314_v38  ;;  %9614 = vmatpush3.bf16.msra.mxu0 %v10315_v36  ;;  %v10336_v38 = vld [vmem:[%s11904_s19 + $0x258] sm:$0xff]  }
0x10d7   :  { %v7039_v19 = vadd.f32 %v7038_v16, %v6217_v63  ;;  %v7082_v20 = vadd.f32 %v7081_v15, %v6225_v39  ;;  %v7040_v22 = vpop.f32.mrb[125].mxu1  ;;  %v7083_v25 = vpop.f32.mrb[129].mxu0  ;;  %9593 = vmatprep.subr.bf16.mxu1 %v10316_v12  ;;  %9615 = vmatprep.subr.bf16.mxu0 %v10317_v13  ;;  %v10337_v36 = vld [vmem:[%s11904_s19 + $0x2d8] sm:$0xff]   ;;  %v10340_v12 = vld [vmem:[%s11904_s19 + $0x260] sm:$0xff]   ;;  %v10344_v16 = vld [vmem:[%s11904_s19 + $0x268] sm:$0xff]  }
0x10d8   :  { %v7041_v23 = vadd.f32 %v7040_v22, %v6221_v14  ;;  %v7084_v26 = vadd.f32 %v7083_v25, %v6229_v55  ;;  %v7042_v18 = vpop.f32.mrb[126].mxu1  ;;  %v7085_v24 = vpop.f32.mrb[130].mxu0  ;;  %v10341_v13 = vld [vmem:[%s11904_s19 + $0x2e0] sm:$0xff]   ;;  %v10345_v15 = vld [vmem:[%s11904_s19 + $0x2e8] sm:$0xff]   ;;  %v10348_v25 = vld [vmem:[%s11904_s19 + $0x270] sm:$0xff]  }
0x10d9   :  { %v7043_v0 = vadd.f32 %v7042_v18, %v6217_v63  ;;  %v7086_v27 = vadd.f32 %v7085_v24, %v6225_v39  ;;  %v7044_v5 = vpop.f32.mrb[127].mxu1  ;;  %v7087_v28 = vpop.f32.mrb[131].mxu0  ;;  %v7266_v37 = vmax.f32 %v7039_v19, 0.0  ;;  %v7268_v40 = vmax.f32 %v7082_v20, 0.0  ;;  %v10338_v63 = vld [vmem:[%s11904_s19 + $0x218] sm:$0xff]   ;;  %v10347_v19 = vld [vmem:[%s11904_s19 + $0x2a8] sm:$0xff]  }
0x10da   :  { %v7045_v31 = vadd.f32 %v7044_v5, %v6221_v14  ;;  %v7088_v32 = vadd.f32 %v7087_v28, %v6229_v55  ;;  %9594 = vmatpush3.bf16.msra.mxu1 %v10318_v10  ;;  %9616 = vmatpush3.bf16.msra.mxu0 %v10319_v17  ;;  %v7267_v47 = vmax.f32 %v7041_v23, 0.0  ;;  %v7269_v33 = vmax.f32 %v7084_v26, 0.0  ;;  %v10339_v39 = vld [vmem:[%s11904_s19 + $0x298] sm:$0xff]   ;;  %v10342_v14 = vld [vmem:[%s11904_s19 + $0x220] sm:$0xff]   ;;  %v11808_v10 = vld [vmem:[%s11905_s24 + $0x8] sm:$0xff] }
0x10db   :  { %v7282_v29 = vmax.f32 %v7043_v0, 0.0  ;;  %v7284_v6 = vmax.f32 %v7086_v27, 0.0  ;;  %9595 = vmatprep.subr.bf16.mxu1 %v10320_v62  ;;  %9617 = vmatprep.subr.bf16.mxu0 %v10321_v21  ;;  %v10343_v55 = vld [vmem:[%s11904_s19 + $0x2a0] sm:$0xff]   ;;  %v10346_v17 = vld [vmem:[%s11904_s19 + $0x228] sm:$0xff]   ;;  %v6233_v20 = vrot.slane %v11808_v10, %v10748_v43  ;;  %v6241_v22 = vrot.slane %v11808_v10, %v10791_v11  ;;  %v10349_v62 = vld [vmem:[%s11904_s19 + $0x2f0] sm:$0xff]  }
0x10dc   :  { %v7283_v48 = vmax.f32 %v7045_v31, 0.0  ;;  %v7285_v50 = vmax.f32 %v7088_v32, 0.0  ;;  %v6237_v21 = vrot.slane %v11808_v10, %v10754_v45  ;;  %v6245_v23 = vrot.slane %v11808_v10, %v11148_v56  ;;  %v10350_v24 = vld [vmem:[%s11904_s19 + $0x230] sm:$0xff]   ;;  %v10352_v28 = vld [vmem:[%s11904_s19 + $0x278] sm:$0xff]  }
0x10dd   :  { %v7298_v51 = vpack.c.bf16 %v7282_v29, %v7266_v37  ;;  %v7300_v44 = vpack.c.bf16 %v7284_v6, %v7268_v40  ;;  %v10351_v0 = vld [vmem:[%s11904_s19 + $0x2b0] sm:$0xff]   ;;  %v10353_v31 = vld [vmem:[%s11904_s19 + $0x2f8] sm:$0xff]  }
0x10de   :  { %v7299_v49 = vpack.c.bf16 %v7283_v48, %v7267_v47  ;;  %v7301_v52 = vpack.c.bf16 %v7285_v50, %v7269_v33  ;;  %9596 = vmatpush3.bf16.msra.mxu1 %v10322_v34  ;;  %9618 = vmatpush3.bf16.msra.mxu0 %v10323_v35  ;;  %v10355_v47 = vld [vmem:[%s11904_s19 + $0x2b8] sm:$0xff]  }
0x10df   :  { %9625 = vmatprep.subr.bf16.mxu1 %v10324_v41  ;;  %9647 = vmatprep.subr.bf16.mxu0 %v10325_v46  ;;  %v10354_v46 = vld [vmem:[%s11904_s19 + $0x238] sm:$0xff]  }
0x10e0   :  { %8198 = vmatprep.mubr.bf16.mxu1 %v7299_v49  ;;  %8239 = vmatprep.mubr.bf16.mxu0 %v7301_v52  ;;  %v10357_v49 = vld [vmem:[%s11904_s19 + $0x3c0] sm:$0xff]  }
0x10e1   :  { %8199 = vmatmul.mubr.bf16.vlgmr.msra.gmra.mrb[140].mxu1 %v7298_v51  ;;  %8240 = vmatmul.mubr.bf16.vlgmr.msra.gmra.mrb[144].mxu0 %v7300_v44  ;;  %v10356_v44 = vld [vmem:[%s11904_s19 + $0x340] sm:$0xff]  }
0x10e2   :  { %9626 = vmatpush3.bf16.msra.mxu1 %v10326_v60  ;;  %9648 = vmatpush3.bf16.msra.mxu0 %v10327_v61 }
0x10e3   :  { %9627 = vmatprep.subr.bf16.mxu1 %v10328_v30  ;;  %9649 = vmatprep.subr.bf16.mxu0 %v10329_v57 }
0x10e6   :  { %9628 = vmatpush3.bf16.msra.mxu1 %v10330_v8  ;;  %9650 = vmatpush3.bf16.msra.mxu0 %v10331_v1 }
0x10e7   :  { %9629 = vmatprep.subr.bf16.mxu1 %v10332_v2  ;;  %9651 = vmatprep.subr.bf16.mxu0 %v10333_v42  ;;  %v10358_v42 = vld [vmem:[%s11904_s19 + $0x300] sm:$0xff]  }
0x10ea   :  { %9630 = vmatpush3.bf16.msra.mxu1 %v10334_v7  ;;  %9652 = vmatpush3.bf16.msra.mxu0 %v10335_v9  ;;  %v10359_v7 = vld [vmem:[%s11904_s19 + $0x380] sm:$0xff]   ;;  %v10360_v9 = vld [vmem:[%s11904_s19 + $0x348] sm:$0xff]  }
0x10eb   :  { %9631 = vmatprep.subr.bf16.mxu1 %v10336_v38  ;;  %9653 = vmatprep.subr.bf16.mxu0 %v10337_v36  ;;  %v10361_v38 = vld [vmem:[%s11904_s19 + $0x3c8] sm:$0xff]  }
0x10ec   :  { %v10362_v36 = vld [vmem:[%s11904_s19 + $0x308] sm:$0xff]  }
0x10ee   :  { %9632 = vmatpush3.bf16.msra.mxu1 %v10338_v63  ;;  %9654 = vmatpush3.bf16.msra.mxu0 %v10339_v39  ;;  %v10363_v63 = vld [vmem:[%s11904_s19 + $0x388] sm:$0xff]   ;;  %v10364_v39 = vld [vmem:[%s11904_s19 + $0x350] sm:$0xff]  }
0x10ef   :  { %9633 = vmatprep.subr.bf16.mxu1 %v10340_v12  ;;  %9655 = vmatprep.subr.bf16.mxu0 %v10341_v13  ;;  %v10365_v12 = vld [vmem:[%s11904_s19 + $0x3d0] sm:$0xff]  }
0x10f0   :  { %v10366_v13 = vld [vmem:[%s11904_s19 + $0x310] sm:$0xff]  }
0x10f2   :  { %9634 = vmatpush3.bf16.msra.mxu1 %v10342_v14  ;;  %9656 = vmatpush3.bf16.msra.mxu0 %v10343_v55  ;;  %v10367_v14 = vld [vmem:[%s11904_s19 + $0x390] sm:$0xff]   ;;  %v10368_v55 = vld [vmem:[%s11904_s19 + $0x358] sm:$0xff]  }
0x10f3   :  { %9635 = vmatprep.subr.bf16.mxu1 %v10344_v16  ;;  %9657 = vmatprep.subr.bf16.mxu0 %v10345_v15  ;;  %v10369_v16 = vld [vmem:[%s11904_s19 + $0x3d8] sm:$0xff]  }
0x10f4   :  { %v10370_v15 = vld [vmem:[%s11904_s19 + $0x318] sm:$0xff]  }
0x10f6   :  { %v7124_v26 = vpop.f32.mrb[128].mxu1  ;;  %v7167_v18 = vpop.f32.mrb[132].mxu0  ;;  %9636 = vmatpush3.bf16.msra.mxu1 %v10346_v17  ;;  %9658 = vmatpush3.bf16.msra.mxu0 %v10347_v19  ;;  %v10371_v17 = vld [vmem:[%s11904_s19 + $0x398] sm:$0xff]   ;;  %v10372_v19 = vld [vmem:[%s11904_s19 + $0x360] sm:$0xff]  }
0x10f7   :  { %v7125_v43 = vadd.f32 %v7124_v26, %v6233_v20  ;;  %v7168_v27 = vadd.f32 %v7167_v18, %v6241_v22  ;;  %v7126_v5 = vpop.f32.mrb[129].mxu1  ;;  %v7169_v11 = vpop.f32.mrb[133].mxu0  ;;  %9637 = vmatprep.subr.bf16.mxu1 %v10348_v25  ;;  %9659 = vmatprep.subr.bf16.mxu0 %v10349_v62  ;;  %v10375_v25 = vld [vmem:[%s11904_s19 + $0x3a0] sm:$0xff]   ;;  %v10376_v62 = vld [vmem:[%s11904_s19 + $0x368] sm:$0xff]   ;;  %v6249_v18 = vrot.slane %v11808_v10, %v11179_v53 }
0x10f8   :  { %v7127_v45 = vadd.f32 %v7126_v5, %v6237_v21  ;;  %v7170_v32 = vadd.f32 %v7169_v11, %v6245_v23  ;;  %v7128_v34 = vpop.f32.mrb[130].mxu1  ;;  %v7171_v56 = vpop.f32.mrb[134].mxu0  ;;  %v10379_v26 = vld [vmem:[%s11904_s19 + $0x3a8] sm:$0xff]   ;;  %v6261_v5 = vrot.slane %v11808_v10, %v11188_v59 }
0x10f9   :  { %v7129_v35 = vadd.f32 %v7128_v34, %v6233_v20  ;;  %v7172_v37 = vadd.f32 %v7171_v56, %v6241_v22  ;;  %v7130_v40 = vpop.f32.mrb[131].mxu1  ;;  %v7173_v29 = vpop.f32.mrb[135].mxu0  ;;  %v7270_v33 = vmax.f32 %v7125_v43, 0.0  ;;  %v7272_v48 = vmax.f32 %v7168_v27, 0.0  ;;  %v10373_v20 = vld [vmem:[%s11904_s19 + $0x3e0] sm:$0xff]   ;;  %v10381_v43 = vld [vmem:[%s11904_s19 + $0x3f0] sm:$0xff]  }
0x10fa   :  { %v7131_v6 = vadd.f32 %v7130_v40, %v6237_v21  ;;  %v7174_v41 = vadd.f32 %v7173_v29, %v6245_v23  ;;  %9638 = vmatpush3.bf16.msra.mxu1 %v10350_v24  ;;  %9660 = vmatpush3.bf16.msra.mxu0 %v10351_v0  ;;  %v7271_v52 = vmax.f32 %v7127_v45, 0.0  ;;  %v7273_v60 = vmax.f32 %v7170_v32, 0.0  ;;  %v10374_v22 = vld [vmem:[%s11904_s19 + $0x320] sm:$0xff]   ;;  %v10377_v21 = vld [vmem:[%s11904_s19 + $0x3e8] sm:$0xff]   ;;  %v10380_v0 = vld [vmem:[%s11904_s19 + $0x370] sm:$0xff]  }
0x10fb   :  { %v7286_v50 = vmax.f32 %v7129_v35, 0.0  ;;  %v7288_v51 = vmax.f32 %v7172_v37, 0.0  ;;  %9639 = vmatprep.subr.bf16.mxu1 %v10352_v28  ;;  %9661 = vmatprep.subr.bf16.mxu0 %v10353_v31  ;;  %v10378_v23 = vld [vmem:[%s11904_s19 + $0x328] sm:$0xff]   ;;  %v6257_v24 = vrot.slane %v11808_v10, %v11182_v54  ;;  %v6253_v27 = vrot.slane %v11808_v10, %v11185_v58  ;;  %v10382_v31 = vld [vmem:[%s11904_s19 + $0x330] sm:$0xff]   ;;  %v10384_v56 = vld [vmem:[%s11904_s19 + $0x378] sm:$0xff]  }
0x10fc   :  { %v7287_v61 = vmax.f32 %v7131_v6, 0.0  ;;  %v7289_v30 = vmax.f32 %v7174_v41, 0.0  ;;  %v10383_v45 = vld [vmem:[%s11904_s19 + $0x3b0] sm:$0xff]   ;;  %v10385_v35 = vld [vmem:[%s11904_s19 + $0x3f8] sm:$0xff]  }
0x10fd   :  { %v7302_v57 = vpack.c.bf16 %v7286_v50, %v7270_v33  ;;  %v7304_v8 = vpack.c.bf16 %v7288_v51, %v7272_v48  ;;  %v10386_v33 = vld [vmem:[%s11904_s19 + $0x338] sm:$0xff]  }
0x10fe   :  { %v7303_v1 = vpack.c.bf16 %v7287_v61, %v7271_v52  ;;  %v7305_v2 = vpack.c.bf16 %v7289_v30, %v7273_v60  ;;  %9640 = vmatpush3.bf16.msra.mxu1 %v10354_v46  ;;  %9662 = vmatpush3.bf16.msra.mxu0 %v10355_v47  ;;  %v10387_v48 = vld [vmem:[%s11904_s19 + $0x3b8] sm:$0xff]  }
0x10ff   :  { %9669 = vmatprep.subr.bf16.mxu1 %v10356_v44  ;;  %9691 = vmatprep.subr.bf16.mxu0 %v10357_v49 }
0x1100   :  { %8280 = vmatprep.mubr.bf16.mxu1 %v7303_v1  ;;  %8321 = vmatprep.mubr.bf16.mxu0 %v7305_v2 }
0x1101   :  { %8281 = vmatmul.mubr.bf16.vlgmr.msra.gmra.mrb[144].mxu1 %v7302_v57  ;;  %8322 = vmatmul.mubr.bf16.vlgmr.msra.gmra.mrb[148].mxu0 %v7304_v8 }
0x1102   :  { %9670 = vmatpush3.bf16.msra.mxu1 %v10358_v42  ;;  %9692 = vmatpush3.bf16.msra.mxu0 %v10359_v7 }
0x1103   :  { %9671 = vmatprep.subr.bf16.mxu1 %v10360_v9  ;;  %9693 = vmatprep.subr.bf16.mxu0 %v10361_v38  ;;  %v9100_v9 = vld [vmem:[%s11906_s30] ss:$0 sm:$0xff] }
0x1106   :  { %9672 = vmatpush3.bf16.msra.mxu1 %v10362_v36  ;;  %9694 = vmatpush3.bf16.msra.mxu0 %v10363_v63 }
0x1107   :  { %9673 = vmatprep.subr.bf16.mxu1 %v10364_v39  ;;  %9695 = vmatprep.subr.bf16.mxu0 %v10365_v12 }
0x110a   :  { %9674 = vmatpush3.bf16.msra.mxu1 %v10366_v13  ;;  %9696 = vmatpush3.bf16.msra.mxu0 %v10367_v14 }
0x110b   :  { %9675 = vmatprep.subr.bf16.mxu1 %v10368_v55  ;;  %9697 = vmatprep.subr.bf16.mxu0 %v10369_v16 }
0x110e   :  { %9676 = vmatpush3.bf16.msra.mxu1 %v10370_v15  ;;  %9698 = vmatpush3.bf16.msra.mxu0 %v10371_v17 }
0x110f   :  { %9677 = vmatprep.subr.bf16.mxu1 %v10372_v19  ;;  %9699 = vmatprep.subr.bf16.mxu0 %v10373_v20 }
0x1112   :  { %9678 = vmatpush3.bf16.msra.mxu1 %v10374_v22  ;;  %9700 = vmatpush3.bf16.msra.mxu0 %v10375_v25 }
0x1113   :  { %9679 = vmatprep.subr.bf16.mxu1 %v10376_v62  ;;  %9701 = vmatprep.subr.bf16.mxu0 %v10377_v21 }
0x1116   :  { %v7210_v11 = vpop.f32.mrb[132].mxu1  ;;  %v7253_v28 = vpop.f32.mrb[136].mxu0  ;;  %9680 = vmatpush3.bf16.msra.mxu1 %v10378_v23  ;;  %9702 = vmatpush3.bf16.msra.mxu0 %v10379_v26 }
0x1117   :  { %v7211_v53 = vadd.f32 %v7210_v11, %v6249_v18  ;;  %v7254_v32 = vadd.f32 %v7253_v28, %v6257_v24  ;;  %v7212_v34 = vpop.f32.mrb[133].mxu1  ;;  %v7255_v54 = vpop.f32.mrb[137].mxu0  ;;  %9681 = vmatprep.subr.bf16.mxu1 %v10380_v0  ;;  %9703 = vmatprep.subr.bf16.mxu0 %v10381_v43 }
0x1118   :  { %v7213_v58 = vadd.f32 %v7212_v34, %v6253_v27  ;;  %v7256_v37 = vadd.f32 %v7255_v54, %v6261_v5  ;;  %v7214_v40 = vpop.f32.mrb[134].mxu1  ;;  %v7257_v59 = vpop.f32.mrb[138].mxu0 }
0x1119   :  { %v7215_v10 = vadd.f32 %v7214_v40, %v6249_v18  ;;  %v7258_v29 = vadd.f32 %v7257_v59, %v6257_v24  ;;  %v7216_v6 = vpop.f32.mrb[135].mxu1  ;;  %v7259_v41 = vpop.f32.mrb[139].mxu0  ;;  %v7274_v50 = vmax.f32 %v7211_v53, 0.0  ;;  %v7276_v51 = vmax.f32 %v7254_v32, 0.0 }
0x111a   :  { %v7217_v46 = vadd.f32 %v7216_v6, %v6253_v27  ;;  %v7260_v47 = vadd.f32 %v7259_v41, %v6261_v5  ;;  %9682 = vmatpush3.bf16.msra.mxu1 %v10382_v31  ;;  %9704 = vmatpush3.bf16.msra.mxu0 %v10383_v45  ;;  %v7275_v52 = vmax.f32 %v7213_v58, 0.0  ;;  %v7277_v60 = vmax.f32 %v7256_v37, 0.0 }
0x111b   :  { %v7290_v44 = vmax.f32 %v7215_v10, 0.0  ;;  %v7292_v49 = vmax.f32 %v7258_v29, 0.0  ;;  %9683 = vmatprep.subr.bf16.mxu1 %v10384_v56  ;;  %9705 = vmatprep.subr.bf16.mxu0 %v10385_v35 }
0x111c   :  { %v7291_v61 = vmax.f32 %v7217_v46, 0.0  ;;  %v7293_v30 = vmax.f32 %v7260_v47, 0.0 }
0x111d   :  { %v7306_v57 = vpack.c.bf16 %v7290_v44, %v7274_v50  ;;  %v7308_v8 = vpack.c.bf16 %v7292_v49, %v7276_v51 }
0x111e   :  { %v7307_v1 = vpack.c.bf16 %v7291_v61, %v7275_v52  ;;  %v7309_v2 = vpack.c.bf16 %v7293_v30, %v7277_v60  ;;  %9684 = vmatpush3.bf16.msra.mxu1 %v10386_v33  ;;  %9706 = vmatpush3.bf16.msra.mxu0 %v10387_v48 }
0x1120   :  { %8362 = vmatprep.mubr.bf16.mxu1 %v7307_v1  ;;  %8403 = vmatprep.mubr.bf16.mxu0 %v7309_v2 }
0x1121   :  { %8363 = vmatmul.mubr.bf16.vlgmr.msra.gmra.mrb[148].mxu1 %v7306_v57  ;;  %8404 = vmatmul.mubr.bf16.vlgmr.msra.gmra.mrb[152].mxu0 %v7308_v8 }
0x1194   :  { %v9553_v42 = vpop.f32.mrb[136].mxu1  ;;  %v9575_v7 = vpop.f32.mrb[140].mxu0 }
0x1195   :  { %v9554_v38 = vpop.f32.mrb[137].mxu1  ;;  %v9576_v36 = vpop.f32.mrb[141].mxu0 }
0x1196   :  { %v9555_v63 = vadd.f32 %v9554_v38, %v9553_v42  ;;  %v9577_v39 = vadd.f32 %v9576_v36, %v9575_v7  ;;  %v9556_v12 = vpop.f32.mrb[138].mxu1  ;;  %v9578_v13 = vpop.f32.mrb[142].mxu0 }
0x1197   :  { %v9557_v14 = vpop.f32.mrb[139].mxu1  ;;  %v9579_v55 = vpop.f32.mrb[143].mxu0 }
0x1198   :  { %v8119_v16 = vadd.f32 %v9555_v63, %v9100_v9  ;;  %v9558_v15 = vadd.f32 %v9557_v14, %v9556_v12  ;;  %v9580_v17 = vadd.f32 %v9579_v55, %v9578_v13 }
0x119a   :  { %v8160_v19 = vadd.f32 %v9577_v39, %v8119_v16  ;;  %v8122_v20 = vadd.f32 %v9558_v15, %v9100_v9 }
0x119c   :  { %v8163_v22 = vadd.f32 %v9580_v17, %v8122_v20 }
0x11b4   :  { %v9597_v25 = vpop.f32.mrb[140].mxu1  ;;  %v9619_v62 = vpop.f32.mrb[144].mxu0 }
0x11b5   :  { %v9598_v21 = vpop.f32.mrb[141].mxu1  ;;  %v9620_v23 = vpop.f32.mrb[145].mxu0 }
0x11b6   :  { %v9599_v26 = vadd.f32 %v9598_v21, %v9597_v25  ;;  %v9621_v18 = vadd.f32 %v9620_v23, %v9619_v62  ;;  %v9600_v24 = vpop.f32.mrb[142].mxu1  ;;  %v9622_v0 = vpop.f32.mrb[146].mxu0 }
0x11b7   :  { %v9601_v43 = vpop.f32.mrb[143].mxu1  ;;  %v9623_v27 = vpop.f32.mrb[147].mxu0 }
0x11b8   :  { %v8201_v5 = vadd.f32 %v9599_v26, %v8160_v19  ;;  %v9602_v11 = vadd.f32 %v9601_v43, %v9600_v24  ;;  %v9624_v28 = vadd.f32 %v9623_v27, %v9622_v0  ;;  %v9229_v24 = vld [vmem:[%s11907_s20] ss:$0 sm:$0xff] }
0x11b9   :  { %v9230_v43 = vld [vmem:[%s10670_s12] ss:$0 sm:$0xff]  ;;  %s10531_s12 = smov [#allocation2]  }
0x11ba   :  { %v8242_v31 = vadd.f32 %v9621_v18, %v8201_v5  ;;  %v8204_v45 = vadd.f32 %v9602_v11, %v8163_v22  ;;  %s8543_s7 = sshll.u32 %s10531_s12, 4  ;;  %s8544_s7 = int_to_ptr.vmem [resolvable:$true] %s8543_s7 }
0x11bb   :  { %s10472_s10 = scalar_lea.vmem %s8544_s7, 32  ;;  %p10477_p1 = scmp.lt.s32.totalorder %s8544_s7, %s8544_s7 }
0x11bc   :  { %v8245_v53 = vadd.f32 %v9624_v28, %v8204_v45  ;;  %p10473_p0 = scmp.ne.s32.totalorder %s8544_s7, %s10472_s10  ;;  %p10478_p2 = scmp.lt.s32.totalorder %s10472_s10, %s10472_s10 }
0x11be   :  { %p10479_p3 = por %p10478_p2, %p10477_p1 }
0x11c0   :  { %p10480_p4 = pnand %p10479_p3, %p10473_p0 }
0x11d4   :  { %v9641_v32 = vpop.f32.mrb[144].mxu1  ;;  %v9663_v34 = vpop.f32.mrb[148].mxu0 }
0x11d5   :  { %v9642_v54 = vpop.f32.mrb[145].mxu1  ;;  %v9664_v56 = vpop.f32.mrb[149].mxu0 }
0x11d6   :  { %v9643_v35 = vadd.f32 %v9642_v54, %v9641_v32  ;;  %v9665_v58 = vadd.f32 %v9664_v56, %v9663_v34  ;;  %v9644_v37 = vpop.f32.mrb[146].mxu1  ;;  %v9666_v40 = vpop.f32.mrb[150].mxu0 }
0x11d7   :  { %v9645_v59 = vpop.f32.mrb[147].mxu1  ;;  %v9667_v10 = vpop.f32.mrb[151].mxu0 }
0x11d8   :  { %v8283_v29 = vadd.f32 %v9643_v35, %v8242_v31  ;;  %v9646_v6 = vadd.f32 %v9645_v59, %v9644_v37  ;;  %v9668_v41 = vadd.f32 %v9667_v10, %v9666_v40 }
0x11da   :  { %v8324_v46 = vadd.f32 %v9665_v58, %v8283_v29  ;;  %v8286_v47 = vadd.f32 %v9646_v6, %v8245_v53 }
0x11dc   :  { %v8327_v33 = vadd.f32 %v9668_v41, %v8286_v47 }
0x11f4   :  { %v9685_v48 = vpop.f32.mrb[148].mxu1  ;;  %v9707_v50 = vpop.f32.mrb[152].mxu0 }
0x11f5   :  { %v9686_v51 = vpop.f32.mrb[149].mxu1  ;;  %v9708_v44 = vpop.f32.mrb[153].mxu0 }
0x11f6   :  { %v9687_v49 = vadd.f32 %v9686_v51, %v9685_v48  ;;  %v9709_v52 = vadd.f32 %v9708_v44, %v9707_v50  ;;  %v9688_v60 = vpop.f32.mrb[150].mxu1  ;;  %v9710_v61 = vpop.f32.mrb[154].mxu0 }
0x11f7   :  { %v9689_v30 = vpop.f32.mrb[151].mxu1  ;;  %v9711_v57 = vpop.f32.mrb[155].mxu0 }
0x11f8   :  { %v8365_v8 = vadd.f32 %v9687_v49, %v8324_v46  ;;  %v9690_v1 = vadd.f32 %v9689_v30, %v9688_v60  ;;  %v9712_v2 = vadd.f32 %v9711_v57, %v9710_v61 }
0x11fa   :  { %v8406_v42 = vadd.f32 %v9709_v52, %v8365_v8  ;;  %v8368_v7 = vadd.f32 %v9690_v1, %v8327_v33 }
0x11fc   :  { %v8409_v9 = vadd.f32 %v9712_v2, %v8368_v7  ;;  %v8412_v63 = vadd.f32 %v8406_v42, %v11592_v4  ;;  %v9231_v2 = vld [vmem:[%s10675_s6] ss:$0 sm:$0xff] }
0x11fe   :  { %v8413_v38 = vadd.f32 %v8409_v9, %v11594_v3  ;;  %v8420_v39 = vmul.f32 %v8412_v63, %v8412_v63 }
0x1200   :  { %8416 = vadd.xlane.f32.xlu1 %v8413_v38  ;;  %v8421_v36 = vmul.f32 %v8413_v38, %v8413_v38 }
0x1202   :  { %8424 = vadd.xlane.f32.xlu0 %v8421_v36 }
0x1204   :  { %8414 = vadd.xlane.f32.xlu1 %v8412_v63 }
0x1206   :  { %8422 = vadd.xlane.f32.xlu0 %v8420_v39 }
0x128d   :  { %v8417_v12 = vpop.xlane.xlu1 %8416 }
0x128e   :  { %v8419_v13 = vmul.f32 0.0078125, %v8417_v12 }
0x128f   :  { %v8425_v14 = vpop.xlane.xlu0 %8424 }
0x1290   :  { %v8429_v55 = vmul.f32 %v8419_v13, %v8419_v13  ;;  %v8427_v16 = vmul.f32 0.0078125, %v8425_v14  ;;  %v8435_v26 = vsub.f32 %v8413_v38, %v8419_v13  ;;  %v9232_v38 = vld [vmem:[%s10680_s27] ss:$0 sm:$0xff] }
0x1291   :  { %v8415_v15 = vpop.xlane.xlu1 %8414 }
0x1292   :  { %v8431_v17 = vsub.f32 %v8427_v16, %v8429_v55  ;;  %v8418_v19 = vmul.f32 0.0078125, %v8415_v15 }
0x1293   :  { %v8423_v20 = vpop.xlane.xlu0 %8422 }
0x1294   :  { %v8433_v3 = vmax.f32 %v8431_v17, 0.0  ;;  %v8428_v22 = vmul.f32 %v8418_v19, %v8418_v19  ;;  %v8426_v25 = vmul.f32 0.0078125, %v8423_v20  ;;  %v8434_v27 = vsub.f32 %v8412_v63, %v8418_v19 }
0x1296   :  { %v8437_v62 = vadd.f32 1e-05, %v8433_v3  ;;  %v8430_v4 = vsub.f32 %v8426_v25, %v8428_v22 }
0x1298   :  { %10464 = vrsqrt.f32 %v8437_v62  ;;  %v8432_v21 = vmax.f32 %v8430_v4, 0.0 }
0x129a   :  { %v8436_v23 = vadd.f32 1e-05, %v8432_v21 }
0x129c   :  { %10466 = vrsqrt.f32 %v8436_v23 }
0x12a2   :  { %v10465_v18 = vpop.eup %10464 }
0x12a3   :  { %v8441_v0 = vmul.f32 %v10465_v18, %v8435_v26 }
0x12a5   :  { %v8449_v5 = vmul.f32 %v9229_v24, %v8441_v0 }
0x12a6   :  { %v10467_v11 = vpop.eup %10466 }
0x12a7   :  { %v8457_v28 = vadd.f32 %v9230_v43, %v8449_v5  ;;  %v8440_v31 = vmul.f32 %v10467_v11, %v8434_v27 }
0x12a9   :  { %v8462_v45 = vrot.slane %v8457_v28, 7  ;;  %v8476_v53 = vmul.f32 %v8457_v28, %v8457_v28  ;;  %v8448_v32 = vmul.f32 %v9229_v24, %v8440_v31 }
0x12ab   :  { %v8470_v34 = vsel %vm8469_vm6, %v8462_v45, 0.0  ;;  %v8479_v54 = vrot.slane %v8476_v53, 7  ;;  %v8456_v56 = vadd.f32 %v9230_v43, %v8448_v32 }
0x12ac   :  { %8471 = vadd.xlane.f32.xlu1 %v8470_v34 }
0x12ad   :  { %v8485_v35 = vsel %vm8469_vm6, %v8479_v54, 0.0  ;;  %v8475_v58 = vmul.f32 %v8456_v56, %v8456_v56  ;;  %v8466_v37 = vsel %vm8465_vm7, %v8456_v56, 0.0 }
0x12ae   :  { %8486 = vadd.xlane.f32.xlu0 %v8485_v35 }
0x12af   :  { %v8482_v40 = vsel %vm8465_vm7, %v8475_v58, 0.0 }
0x12b0   :  { %8467 = vadd.xlane.f32.xlu1 %v8466_v37 }
0x12b2   :  { %8483 = vadd.xlane.f32.xlu0 %v8482_v40 }
0x1339   :  { %v8472_v59 = vpop.xlane.xlu1 %8471 }
0x133a   :  { %v8474_v10 = vmul.f32 0.0078125, %v8472_v59 }
0x133b   :  { %v8487_v29 = vpop.xlane.xlu0 %8486 }
0x133c   :  { %v8491_v6 = vmul.f32 %v8474_v10, %v8474_v10  ;;  %v8489_v41 = vmul.f32 0.0078125, %v8487_v29  ;;  %v8498_v30 = vrot.slane %v8474_v10, 1 }
0x133d   :  { %v8468_v46 = vpop.xlane.xlu1 %8467 }
0x133e   :  { %v8493_v47 = vsub.f32 %v8489_v41, %v8491_v6  ;;  %v8473_v33 = vmul.f32 0.0078125, %v8468_v46  ;;  %v8502_v8 = vsub.f32 %v8457_v28, %v8498_v30 }
0x133f   :  { %v8484_v48 = vpop.xlane.xlu0 %8483 }
0x1340   :  { %v8495_v50 = vmax.f32 %v8493_v47, 0.0  ;;  %v8490_v51 = vmul.f32 %v8473_v33, %v8473_v33  ;;  %v8488_v44 = vmul.f32 0.0078125, %v8484_v48  ;;  %v8501_v42 = vsub.f32 %v8456_v56, %v8473_v33 }
0x1342   :  { %v8504_v49 = vadd.f32 1e-05, %v8495_v50  ;;  %v8492_v52 = vsub.f32 %v8488_v44, %v8490_v51 }
0x1344   :  { %10468 = vrsqrt.f32 %v8504_v49  ;;  %v8494_v60 = vmax.f32 %v8492_v52, 0.0 }
0x1346   :  { %v8503_v61 = vadd.f32 1e-05, %v8494_v60 }
0x1348   :  { %10470 = vrsqrt.f32 %v8503_v61 }
0x134e   :  { %v10469_v57 = vpop.eup %10468 }
0x134f   :  { %v8509_v1 = vrot.slane %v10469_v57, 1 }
0x1351   :  { %v8513_v7 = vmul.f32 %v8509_v1, %v8502_v8 }
0x1352   :  { %v10471_v9 = vpop.eup %10470 }
0x1353   :  { %v8512_v36 = vmul.f32 %v10471_v9, %v8501_v42  ;;  %v8521_v63 = vmul.f32 %v9231_v2, %v8513_v7 }
0x1355   :  { %v8520_v39 = vmul.f32 %v9231_v2, %v8512_v36  ;;  %v8529_v12 = vadd.f32 %v9232_v38, %v8521_v63 }
0x1357   :  { %v8528_v13 = vadd.f32 %v9232_v38, %v8520_v39  ;;  %v8532_v14 = vrot.slane %v8529_v12, 7 }
0x1359   :  { %8535 = vst [vmem:[#allocation2 - $0x7] sm:$0x80] %v8528_v13  ;;  %8536 = vst [vmem:[#allocation2 + $0x1] sm:$0x1] %v8532_v14 }
0x135a   :  { %10483 = shalt.err (!%p10480_p4)
}
0x135b   :  { %s10484_s6 = scalar_lea.hbm %s10685_s4, 32 }
0x135c   :  { %p10485_p5 = scmp.ne.s32.totalorder %s10685_s4, %s10484_s6  ;;  %p10488_p6 = scmp.lt.u32.totalorder %s10484_s6, %s10685_s4 }
0x135e   :  { %p10490_p7 = pnand %p10488_p6, %p10485_p5 }
0x1360   :  { %10493 = shalt.err (!%p10490_p7)
}
0x1361   :  { %8546 = dma.vmem_to_hbm [thread:$0]  %s8544_s7, 32, %s10685_s4, [#allocation3]  }
0x1362   :  { %10494 = dma.done.wait [#allocation3], 32  }
0x1363   :  { %10495 = vsyncadd [#allocation3], 4294967264 }
0x1364   :  { %8550 = vsyncpa [#allocation3], 1 }

</bundles_post_ra>
